<compile_context>
chip_gen: v5e
topology: v5e:2x2
jax: 0.10.0
libtpu: 0.0.40
codegen_flags: <defaults>
</compile_context>

<pallas_src>
import functools

import jax
import jax.numpy as jnp
from jax.experimental import pallas as pl
from jax.experimental.pallas import tpu as pltpu


def _round_up(x, m):
    return ((x + m - 1) // m) * m


def _vmem_limit_bytes():
    """Generation-aware scoped-VMEM request (3/4 of physical capacity)."""
    cap = 64 * 1024 * 1024                       # conservative fallback (v7x per-TC)
    try:
        info = pltpu.get_tpu_info()
        cap = int(getattr(info, "vmem_capacity_bytes", cap))
    except Exception:
        pass
    return (cap * 3) // 4


def _choose_tile_l(tile_l, L, B, C, HB, x_bytes, w_bytes, budget):
    """Largest HB-aligned L-tile <= tile_l whose working set fits the budget."""
    TL = max(HB, _round_up(min(tile_l, _round_up(L, HB)), HB))

    def est(tl):
        win = tl + HB
        return (2 * B * C * win * x_bytes        # double-buffered input blocks
                + 2 * B * C * tl * x_bytes       # double-buffered output block
                + w_bytes                        # resident weights + biases
                + 10 * B * C * win * 4)          # in-kernel f32/bf16 temporaries

    while TL > HB and est(TL) > budget:
        TL = max(HB, ((TL // 2) // HB) * HB)

    # Keep >= 2 grid steps when the sequence allows it: v7x megacore sharding of
    # the "parallel" axis, plus DMA/compute overlap on all generations.
    half = max(HB, _round_up(pl.cdiv(L, 2), HB))
    if half < TL:
        TL = half
    return TL


# -----------------------------------------------------------------------------
# Fused kernel: a full ResBlock (all dilation layers) on one L-tile.
# -----------------------------------------------------------------------------
def _make_resblock_kernel(B, C, K, dilations, L, TL, HB, H, alpha, out_scale,
                          compute_dtype):
    W = TL + HB                      # constant working width (lane-aligned)
    BW = B * W

    def shift(a, off):
        """result[:, t] = a[:, t + off], zero-filled at the slab edges."""
        if off == 0:
            return a
        rows = a.shape[0]
        pad = jnp.zeros((rows, abs(off)), a.dtype)
        if off > 0:
            return jnp.concatenate([a[:, off:], pad], axis=1)
        return jnp.concatenate([pad, a[:, :off]], axis=1)

    def kernel(xm_ref, xh_ref, w_ref, b_ref, o_ref):
        i = pl.program_id(0)

        # Assemble the (C, B*W) window slab: per batch, [main tile | halo tail].
        x = jnp.concatenate(
            [jnp.concatenate([xm_ref[b], xh_ref[b]], axis=1) for b in range(B)],
            axis=1).astype(jnp.float32)

        # 0/1 mask of in-sequence global positions (implements the convs' zero
        # padding at the sequence boundaries), replicated per batch window.
        jw = jax.lax.broadcasted_iota(jnp.int32, (1, W), 1)
        g = i * TL - H + jw
        valid_w = jnp.logical_and(g >= 0, g < L).astype(jnp.float32)
        valid = jnp.concatenate([valid_w] * B, axis=1)          # (1, B*W)

        for l, d in enumerate(dilations):
            p1 = d * (K - 1) // 2
            p2 = (K - 1) // 2

            # conv1 (dilated): pre-activation LeakyReLU in f32, bf16 MXU taps.
            a1 = jnp.where(x >= 0.0, x, alpha * x).astype(compute_dtype)
            acc = jnp.zeros((C, BW), jnp.float32)
            for k in range(K):
                wk = w_ref[(2 * l) * K + k]                      # (C, C)
                acc = acc + jnp.dot(wk, shift(a1, k * d - p1),
                                    preferred_element_type=jnp.float32)
            h = acc + b_ref[2 * l]

            # conv2 (dilation 1) on lrelu(h); h is zeroed outside [0, L) so the
            # implicit zero padding of the activated intermediate is honoured.
            a2 = (jnp.where(h >= 0.0, h, alpha * h) * valid).astype(compute_dtype)
            acc = jnp.zeros((C, BW), jnp.float32)
            for k in range(K):
                wk = w_ref[(2 * l + 1) * K + k]
                acc = acc + jnp.dot(wk, shift(a2, k - p2),
                                    preferred_element_type=jnp.float32)
            y = acc + b_ref[2 * l + 1]

            # Residual; keep zero outside [0, L) for the next layer's padding.
            x = (x + y) * valid

        if out_scale != 1.0:
            x = x * out_scale                    # folded MRF 1/len(blocks) scale
        for b in range(B):
            o_ref[b] = x[:, b * W + H:b * W + H + TL].astype(o_ref.dtype)

    return kernel


def fused_resblock(x, w_all, b_all, *, kernel_size, dilations, tile_l=2048,
                   compute_dtype=jnp.bfloat16, alpha=0.1, out_scale=1.0,
                   vmem_limit_bytes=None):
    """out = out_scale * ResBlock(x), all dilation layers fused in one kernel."""
    B, C, L = x.shape
    K = int(kernel_size)
    dils = tuple(int(d) for d in dilations)
    D = len(dils)
    H = sum(d * (K - 1) // 2 + (K - 1) // 2 for d in dils)   # cumulative halo
    HB = 128 * pl.cdiv(max(2 * H, 1), 128)                   # lane-aligned halo blk

    limit = _vmem_limit_bytes() if vmem_limit_bytes is None else int(vmem_limit_bytes)
    w_bytes = (int(w_all.size) * jnp.dtype(compute_dtype).itemsize
               + int(b_all.size) * 4)
    TL = _choose_tile_l(tile_l, L, B, C, HB, x.dtype.itemsize, w_bytes,
                        int(limit * 0.8))
    ntiles = pl.cdiv(L, TL)
    l_pad = ntiles * TL + HB
    # Single pad per ResBlock (left halo + right tail); boundaries elsewhere are
    # handled by the in-kernel validity mask.
    xpad = jnp.pad(x, ((0, 0), (0, 0), (H, l_pad - H - L)))

    # (D, 2, K, C, C) -> (D*2*K, C, C); taps indexed as (2*l + stage)*K + k.
    w_flat = w_all.reshape(D * 2 * K, C, C).astype(compute_dtype)
    b_flat = b_all.reshape(D * 2, C, 1).astype(jnp.float32)

    kernel = _make_resblock_kernel(B, C, K, dils, L, TL, HB, H, alpha,
                                   float(out_scale), compute_dtype)
    hblk = TL // HB
    out = pl.pallas_call(
        kernel,
        out_shape=jax.ShapeDtypeStruct((B, C, ntiles * TL), x.dtype),
        grid=(ntiles,),
        in_specs=[
            pl.BlockSpec((B, C, TL), lambda i: (0, 0, i)),                 # main tile
            pl.BlockSpec((B, C, HB), lambda i: (0, 0, (i + 1) * hblk)),    # halo tail
            pl.BlockSpec((D * 2 * K, C, C), lambda i: (0, 0, 0)),          # weights
            pl.BlockSpec((D * 2, C, 1), lambda i: (0, 0, 0)),              # biases
        ],
        out_specs=pl.BlockSpec((B, C, TL), lambda i: (0, 0, i)),
        compiler_params=pltpu.CompilerParams(
            dimension_semantics=("parallel",),
            vmem_limit_bytes=int(limit)),
    )(xpad, xpad, w_flat, b_flat)

    return out if ntiles * TL == L else out[:, :, :L]


# -----------------------------------------------------------------------------
# Parameter init (deterministic, PyTorch Conv1d-style uniform bounds).
# -----------------------------------------------------------------------------
def init_mrf_params(key, n_channels, blocks_kernels, blocks_dilations):
    """Returns (configs, params).

    configs: static tuple of (kernel_size, dilations) per block (hashable).
    params : list of (w_all, b_all) per block;
             w_all: (D, 2, K, Cout, Cin)  (PyTorch (Cout, Cin, K) transposed),
             b_all: (D, 2, C).
    NOTE: zip() truncates to the shorter list, exactly like the PyTorch module.
    """
    configs, params = [], []
    for k_size, dilations in zip(blocks_kernels, blocks_dilations):
        k_size = int(k_size)
        dils = tuple(int(d) for d in dilations)
        configs.append((k_size, dils))
        bound = 1.0 / float(n_channels * k_size) ** 0.5
        D = len(dils)
        key, kw, kb = jax.random.split(key, 3)
        w_all = jax.random.uniform(kw, (D, 2, k_size, n_channels, n_channels),
                                   minval=-bound, maxval=bound, dtype=jnp.float32)
        b_all = jax.random.uniform(kb, (D, 2, n_channels),
                                   minval=-bound, maxval=bound, dtype=jnp.float32)
        params.append((w_all, b_all))
    return tuple(configs), params


# -----------------------------------------------------------------------------
# Forward pass: one fused Pallas kernel per ResBlock; cross-block sum in JAX
# (the 1/len(blocks) scale is folded into each block's kernel).
# -----------------------------------------------------------------------------
@functools.partial(jax.jit,
                   static_argnames=("configs", "tile_l", "compute_dtype"))
def mrf_forward(x, params, *, configs, tile_l=2048, compute_dtype=jnp.bfloat16):
    if not configs:
        return jnp.zeros_like(x)
    scale = 1.0 / float(len(configs))
    result = None
    for (ksize, dilations), (w_all, b_all) in zip(configs, params):
        out = fused_resblock(x, w_all, b_all, kernel_size=ksize,
                             dilations=dilations, tile_l=tile_l,
                             compute_dtype=compute_dtype, out_scale=scale)
        result = out if result is None else result + out
    return result


# -----------------------------------------------------------------------------
# Pure-JAX reference (XLA conv) with the same bf16 operand rounding points.
# -----------------------------------------------------------------------------
def _ref_preact_conv(x, w, b, dilation, alpha, compute_dtype):
    a = jnp.where(x >= 0, x, alpha * x)
    K = w.shape[0]
    pad = dilation * (K - 1) // 2
    w_oik = jnp.transpose(w, (1, 2, 0))               # (Cout, Cin, K)
    y = jax.lax.conv_general_dilated(
        a.astype(compute_dtype), w_oik.astype(compute_dtype),
        window_strides=(1,), padding=[(pad, pad)], rhs_dilation=(dilation,),
        dimension_numbers=("NCH", "OIH", "NCH"),
        preferred_element_type=jnp.float32)
    return y + b.reshape(1, -1, 1)


def mrf_reference(x, params, configs, alpha=0.1, compute_dtype=jnp.bfloat16):
    result = jnp.zeros_like(x)
    for (_k, dilations), (w_all, b_all) in zip(configs, params):
        xb = x
        for l, d in enumerate(dilations):
            h = _ref_preact_conv(xb, w_all[l, 0], b_all[l, 0], d, alpha, compute_dtype)
            h = _ref_preact_conv(h, w_all[l, 1], b_all[l, 1], 1, alpha, compute_dtype)
            xb = xb + h
        result = result + xb
    return result / len(configs)


if __name__ == "__main__":
    key = jax.random.PRNGKey(0)
    B, C, L = 2, 8, 1024                      # small (batch, channels, time)
    kx, kp = jax.random.split(key)
    x = jax.random.normal(kx, (B, C, L), dtype=jnp.float32)

    # Module defaults: blocks_kernels=[3, 7, 11], blocks_dilations=[[1,3,5]*3]
    # (zip -> a single ResBlock with kernel 3 and nine dilations).
    blocks_kernels = [3, 7, 11]
    blocks_dilations = [[1, 3, 5] * 3]
    configs, params = init_mrf_params(kp, C, blocks_kernels, blocks_dilations)

    out = mrf_forward(x, params, configs=configs)
    out = jax.block_until_ready(out)
    assert out.shape == x.shape and out.dtype == x.dtype

    # Correctness cross-check against the XLA conv reference.
    ref = jax.block_until_ready(mrf_reference(x, params, configs))
    err = float(jnp.max(jnp.abs(out - ref)))
    scale = float(jnp.max(jnp.abs(ref)))
    assert err <= 1e-2 * max(scale, 1.0), f"max abs err {err} vs ref scale {scale}"

    print("KERNEL_OK")
</pallas_src>

<mosaic_0001>
module attributes {stable_mosaic.version = 11 : i64} {
  func.func @kernel(%arg0: i32, %arg1: memref<2x8x512xf32, #tpu.memory_space<vmem>>, %arg2: memref<2x8x128xf32, #tpu.memory_space<vmem>>, %arg3: memref<54x8x8xbf16, #tpu.memory_space<vmem>>, %arg4: memref<18x8x1xf32, #tpu.memory_space<vmem>>, %arg5: memref<2x8x512xf32, #tpu.memory_space<vmem>>) attributes {dimension_semantics = [#tpu.dimension_semantics<parallel>], iteration_bounds = array<i64: 2>, scalar_prefetch = 0 : i64, scratch_operands = 0 : i64, tpu.core_type = #tpu.core_type<tc>, window_params = [{transform_indices = @transform_0, window_bounds = array<i64: 2, 8, 512>}, {transform_indices = @transform_1, window_bounds = array<i64: 2, 8, 128>}, {pipeline_mode = #tpu.pipeline_mode<synchronous>, transform_indices = @transform_2, window_bounds = array<i64: 54, 8, 8>}, {pipeline_mode = #tpu.pipeline_mode<synchronous>, transform_indices = @transform_3, window_bounds = array<i64: 18, 8, 1>}, {transform_indices = @transform_4, window_bounds = array<i64: 2, 8, 512>}]} {
    %c0 = arith.constant 0 : index
    %c0_0 = arith.constant 0 : index
    %c0_1 = arith.constant 0 : index
    %0 = vector.load %arg1[%c0, %c0_0, %c0_1] : memref<2x8x512xf32, #tpu.memory_space<vmem>>, vector<1x8x512xf32>
    %1 = vector.shape_cast %0 : vector<1x8x512xf32> to vector<8x512xf32>
    %c0_2 = arith.constant 0 : index
    %c0_3 = arith.constant 0 : index
    %c0_4 = arith.constant 0 : index
    %2 = vector.load %arg2[%c0_2, %c0_3, %c0_4] : memref<2x8x128xf32, #tpu.memory_space<vmem>>, vector<1x8x128xf32>
    %3 = vector.shape_cast %2 : vector<1x8x128xf32> to vector<8x128xf32>
    %4 = tpu.concatenate %1, %3 in 1 : vector<8x512xf32>, vector<8x128xf32> -> vector<8x640xf32>
    %c1 = arith.constant 1 : index
    %c0_5 = arith.constant 0 : index
    %c0_6 = arith.constant 0 : index
    %5 = vector.load %arg1[%c1, %c0_5, %c0_6] : memref<2x8x512xf32, #tpu.memory_space<vmem>>, vector<1x8x512xf32>
    %6 = vector.shape_cast %5 : vector<1x8x512xf32> to vector<8x512xf32>
    %c1_7 = arith.constant 1 : index
    %c0_8 = arith.constant 0 : index
    %c0_9 = arith.constant 0 : index
    %7 = vector.load %arg2[%c1_7, %c0_8, %c0_9] : memref<2x8x128xf32, #tpu.memory_space<vmem>>, vector<1x8x128xf32>
    %8 = vector.shape_cast %7 : vector<1x8x128xf32> to vector<8x128xf32>
    %9 = tpu.concatenate %6, %8 in 1 : vector<8x512xf32>, vector<8x128xf32> -> vector<8x640xf32>
    %10 = tpu.concatenate %4, %9 in 1 : vector<8x640xf32>, vector<8x640xf32> -> vector<8x1280xf32>
    %11 = tpu.iota {dimensions = array<i32: 1>} : vector<1x640xi32>
    %c512_i32 = arith.constant 512 : i32
    %12 = arith.muli %arg0, %c512_i32 : i32
    %c36_i32 = arith.constant 36 : i32
    %13 = arith.subi %12, %c36_i32 : i32
    %14 = vector.broadcast %13 : i32 to vector<1x640xi32>
    %15 = arith.addi %14, %11 : vector<1x640xi32>
    %c0_i32 = arith.constant 0 : i32
    %16 = vector.broadcast %c0_i32 : i32 to vector<1x640xi32>
    %17 = arith.cmpi sge, %15, %16 : vector<1x640xi32>
    %c1024_i32 = arith.constant 1024 : i32
    %18 = vector.broadcast %c1024_i32 : i32 to vector<1x640xi32>
    %19 = arith.cmpi slt, %15, %18 : vector<1x640xi32>
    %20 = arith.andi %17, %19 : vector<1x640xi1>
    %21 = arith.extui %20 : vector<1x640xi1> to vector<1x640xi32>
    %22 = arith.sitofp %21 : vector<1x640xi32> to vector<1x640xf32>
    %23 = tpu.concatenate %22, %22 in 1 : vector<1x640xf32>, vector<1x640xf32> -> vector<1x1280xf32>
    %cst = arith.constant 0.000000e+00 : f32
    %24 = vector.broadcast %cst : f32 to vector<8x1280xf32>
    %25 = arith.cmpf oge, %10, %24 : vector<8x1280xf32>
    %cst_10 = arith.constant 1.000000e-01 : f32
    %26 = vector.broadcast %cst_10 : f32 to vector<8x1280xf32>
    %27 = arith.mulf %26, %10 : vector<8x1280xf32>
    %28 = arith.select %25, %10, %27 : vector<8x1280xi1>, vector<8x1280xf32>
    %29 = arith.truncf %28 : vector<8x1280xf32> to vector<8x1280xbf16>
    %cst_11 = arith.constant 0.000000e+00 : f32
    %30 = vector.broadcast %cst_11 : f32 to vector<8x1280xf32>
    %c0_12 = arith.constant 0 : index
    %c0_13 = arith.constant 0 : index
    %c0_14 = arith.constant 0 : index
    %31 = vector.load %arg3[%c0_12, %c0_13, %c0_14] : memref<54x8x8xbf16, #tpu.memory_space<vmem>>, vector<1x8x8xbf16>
    %32 = vector.shape_cast %31 : vector<1x8x8xbf16> to vector<8x8xbf16>
    %cst_15 = arith.constant 0.000000e+00 : bf16
    %33 = vector.broadcast %cst_15 : bf16 to vector<8x1xbf16>
    %34 = vector.extract_strided_slice %29 {offsets = [0, 0], sizes = [8, 1279], strides = [1, 1]} : vector<8x1280xbf16> to vector<8x1279xbf16>
    %35 = tpu.concatenate %33, %34 in 1 : vector<8x1xbf16>, vector<8x1279xbf16> -> vector<8x1280xbf16>
    %cst_16 = arith.constant dense<0.000000e+00> : vector<8x1280xf32>
    %36 = tpu.matmul %32, %35, %cst_16 {dimension_numbers = #tpu.dot_dimension_numbers<[1], [0], [0], [1], [0, 0, 1, 1], [], []>} : vector<8x8xbf16>, vector<8x1280xbf16>, vector<8x1280xf32> -> vector<8x1280xf32>
    %37 = arith.addf %30, %36 : vector<8x1280xf32>
    %c1_17 = arith.constant 1 : index
    %c0_18 = arith.constant 0 : index
    %c0_19 = arith.constant 0 : index
    %38 = vector.load %arg3[%c1_17, %c0_18, %c0_19] : memref<54x8x8xbf16, #tpu.memory_space<vmem>>, vector<1x8x8xbf16>
    %39 = vector.shape_cast %38 : vector<1x8x8xbf16> to vector<8x8xbf16>
    %cst_20 = arith.constant dense<0.000000e+00> : vector<8x1280xf32>
    %40 = tpu.matmul %39, %29, %cst_20 {dimension_numbers = #tpu.dot_dimension_numbers<[1], [0], [0], [1], [0, 0, 1, 1], [], []>} : vector<8x8xbf16>, vector<8x1280xbf16>, vector<8x1280xf32> -> vector<8x1280xf32>
    %41 = arith.addf %37, %40 : vector<8x1280xf32>
    %c2 = arith.constant 2 : index
    %c0_21 = arith.constant 0 : index
    %c0_22 = arith.constant 0 : index
    %42 = vector.load %arg3[%c2, %c0_21, %c0_22] : memref<54x8x8xbf16, #tpu.memory_space<vmem>>, vector<1x8x8xbf16>
    %43 = vector.shape_cast %42 : vector<1x8x8xbf16> to vector<8x8xbf16>
    %cst_23 = arith.constant 0.000000e+00 : bf16
    %44 = vector.broadcast %cst_23 : bf16 to vector<8x1xbf16>
    %45 = vector.extract_strided_slice %29 {offsets = [0, 1], sizes = [8, 1279], strides = [1, 1]} : vector<8x1280xbf16> to vector<8x1279xbf16>
    %46 = tpu.concatenate %45, %44 in 1 : vector<8x1279xbf16>, vector<8x1xbf16> -> vector<8x1280xbf16>
    %cst_24 = arith.constant dense<0.000000e+00> : vector<8x1280xf32>
    %47 = tpu.matmul %43, %46, %cst_24 {dimension_numbers = #tpu.dot_dimension_numbers<[1], [0], [0], [1], [0, 0, 1, 1], [], []>} : vector<8x8xbf16>, vector<8x1280xbf16>, vector<8x1280xf32> -> vector<8x1280xf32>
    %48 = arith.addf %41, %47 : vector<8x1280xf32>
    %c0_25 = arith.constant 0 : index
    %c0_26 = arith.constant 0 : index
    %c0_27 = arith.constant 0 : index
    %49 = vector.load %arg4[%c0_25, %c0_26, %c0_27] : memref<18x8x1xf32, #tpu.memory_space<vmem>>, vector<1x8x1xf32>
    %50 = vector.shape_cast %49 : vector<1x8x1xf32> to vector<8x1xf32>
    %51 = vector.broadcast %50 : vector<8x1xf32> to vector<8x1280xf32>
    %52 = arith.addf %48, %51 : vector<8x1280xf32>
    %cst_28 = arith.constant 0.000000e+00 : f32
    %53 = vector.broadcast %cst_28 : f32 to vector<8x1280xf32>
    %54 = arith.cmpf oge, %52, %53 : vector<8x1280xf32>
    %cst_29 = arith.constant 1.000000e-01 : f32
    %55 = vector.broadcast %cst_29 : f32 to vector<8x1280xf32>
    %56 = arith.mulf %55, %52 : vector<8x1280xf32>
    %57 = arith.select %54, %52, %56 : vector<8x1280xi1>, vector<8x1280xf32>
    %58 = vector.broadcast %23 : vector<1x1280xf32> to vector<8x1280xf32>
    %59 = arith.mulf %57, %58 : vector<8x1280xf32>
    %60 = arith.truncf %59 : vector<8x1280xf32> to vector<8x1280xbf16>
    %cst_30 = arith.constant 0.000000e+00 : f32
    %61 = vector.broadcast %cst_30 : f32 to vector<8x1280xf32>
    %c3 = arith.constant 3 : index
    %c0_31 = arith.constant 0 : index
    %c0_32 = arith.constant 0 : index
    %62 = vector.load %arg3[%c3, %c0_31, %c0_32] : memref<54x8x8xbf16, #tpu.memory_space<vmem>>, vector<1x8x8xbf16>
    %63 = vector.shape_cast %62 : vector<1x8x8xbf16> to vector<8x8xbf16>
    %cst_33 = arith.constant 0.000000e+00 : bf16
    %64 = vector.broadcast %cst_33 : bf16 to vector<8x1xbf16>
    %65 = vector.extract_strided_slice %60 {offsets = [0, 0], sizes = [8, 1279], strides = [1, 1]} : vector<8x1280xbf16> to vector<8x1279xbf16>
    %66 = tpu.concatenate %64, %65 in 1 : vector<8x1xbf16>, vector<8x1279xbf16> -> vector<8x1280xbf16>
    %cst_34 = arith.constant dense<0.000000e+00> : vector<8x1280xf32>
    %67 = tpu.matmul %63, %66, %cst_34 {dimension_numbers = #tpu.dot_dimension_numbers<[1], [0], [0], [1], [0, 0, 1, 1], [], []>} : vector<8x8xbf16>, vector<8x1280xbf16>, vector<8x1280xf32> -> vector<8x1280xf32>
    %68 = arith.addf %61, %67 : vector<8x1280xf32>
    %c4 = arith.constant 4 : index
    %c0_35 = arith.constant 0 : index
    %c0_36 = arith.constant 0 : index
    %69 = vector.load %arg3[%c4, %c0_35, %c0_36] : memref<54x8x8xbf16, #tpu.memory_space<vmem>>, vector<1x8x8xbf16>
    %70 = vector.shape_cast %69 : vector<1x8x8xbf16> to vector<8x8xbf16>
    %cst_37 = arith.constant dense<0.000000e+00> : vector<8x1280xf32>
    %71 = tpu.matmul %70, %60, %cst_37 {dimension_numbers = #tpu.dot_dimension_numbers<[1], [0], [0], [1], [0, 0, 1, 1], [], []>} : vector<8x8xbf16>, vector<8x1280xbf16>, vector<8x1280xf32> -> vector<8x1280xf32>
    %72 = arith.addf %68, %71 : vector<8x1280xf32>
    %c5 = arith.constant 5 : index
    %c0_38 = arith.constant 0 : index
    %c0_39 = arith.constant 0 : index
    %73 = vector.load %arg3[%c5, %c0_38, %c0_39] : memref<54x8x8xbf16, #tpu.memory_space<vmem>>, vector<1x8x8xbf16>
    %74 = vector.shape_cast %73 : vector<1x8x8xbf16> to vector<8x8xbf16>
    %cst_40 = arith.constant 0.000000e+00 : bf16
    %75 = vector.broadcast %cst_40 : bf16 to vector<8x1xbf16>
    %76 = vector.extract_strided_slice %60 {offsets = [0, 1], sizes = [8, 1279], strides = [1, 1]} : vector<8x1280xbf16> to vector<8x1279xbf16>
    %77 = tpu.concatenate %76, %75 in 1 : vector<8x1279xbf16>, vector<8x1xbf16> -> vector<8x1280xbf16>
    %cst_41 = arith.constant dense<0.000000e+00> : vector<8x1280xf32>
    %78 = tpu.matmul %74, %77, %cst_41 {dimension_numbers = #tpu.dot_dimension_numbers<[1], [0], [0], [1], [0, 0, 1, 1], [], []>} : vector<8x8xbf16>, vector<8x1280xbf16>, vector<8x1280xf32> -> vector<8x1280xf32>
    %79 = arith.addf %72, %78 : vector<8x1280xf32>
    %c1_42 = arith.constant 1 : index
    %c0_43 = arith.constant 0 : index
    %c0_44 = arith.constant 0 : index
    %80 = vector.load %arg4[%c1_42, %c0_43, %c0_44] : memref<18x8x1xf32, #tpu.memory_space<vmem>>, vector<1x8x1xf32>
    %81 = vector.shape_cast %80 : vector<1x8x1xf32> to vector<8x1xf32>
    %82 = vector.broadcast %81 : vector<8x1xf32> to vector<8x1280xf32>
    %83 = arith.addf %79, %82 : vector<8x1280xf32>
    %84 = arith.addf %10, %83 : vector<8x1280xf32>
    %85 = vector.broadcast %23 : vector<1x1280xf32> to vector<8x1280xf32>
    %86 = arith.mulf %84, %85 : vector<8x1280xf32>
    %cst_45 = arith.constant 0.000000e+00 : f32
    %87 = vector.broadcast %cst_45 : f32 to vector<8x1280xf32>
    %88 = arith.cmpf oge, %86, %87 : vector<8x1280xf32>
    %cst_46 = arith.constant 1.000000e-01 : f32
    %89 = vector.broadcast %cst_46 : f32 to vector<8x1280xf32>
    %90 = arith.mulf %89, %86 : vector<8x1280xf32>
    %91 = arith.select %88, %86, %90 : vector<8x1280xi1>, vector<8x1280xf32>
    %92 = arith.truncf %91 : vector<8x1280xf32> to vector<8x1280xbf16>
    %cst_47 = arith.constant 0.000000e+00 : f32
    %93 = vector.broadcast %cst_47 : f32 to vector<8x1280xf32>
    %c6 = arith.constant 6 : index
    %c0_48 = arith.constant 0 : index
    %c0_49 = arith.constant 0 : index
    %94 = vector.load %arg3[%c6, %c0_48, %c0_49] : memref<54x8x8xbf16, #tpu.memory_space<vmem>>, vector<1x8x8xbf16>
    %95 = vector.shape_cast %94 : vector<1x8x8xbf16> to vector<8x8xbf16>
    %cst_50 = arith.constant 0.000000e+00 : bf16
    %96 = vector.broadcast %cst_50 : bf16 to vector<8x3xbf16>
    %97 = vector.extract_strided_slice %92 {offsets = [0, 0], sizes = [8, 1277], strides = [1, 1]} : vector<8x1280xbf16> to vector<8x1277xbf16>
    %98 = tpu.concatenate %96, %97 in 1 : vector<8x3xbf16>, vector<8x1277xbf16> -> vector<8x1280xbf16>
    %cst_51 = arith.constant dense<0.000000e+00> : vector<8x1280xf32>
    %99 = tpu.matmul %95, %98, %cst_51 {dimension_numbers = #tpu.dot_dimension_numbers<[1], [0], [0], [1], [0, 0, 1, 1], [], []>} : vector<8x8xbf16>, vector<8x1280xbf16>, vector<8x1280xf32> -> vector<8x1280xf32>
    %100 = arith.addf %93, %99 : vector<8x1280xf32>
    %c7 = arith.constant 7 : index
    %c0_52 = arith.constant 0 : index
    %c0_53 = arith.constant 0 : index
    %101 = vector.load %arg3[%c7, %c0_52, %c0_53] : memref<54x8x8xbf16, #tpu.memory_space<vmem>>, vector<1x8x8xbf16>
    %102 = vector.shape_cast %101 : vector<1x8x8xbf16> to vector<8x8xbf16>
    %cst_54 = arith.constant dense<0.000000e+00> : vector<8x1280xf32>
    %103 = tpu.matmul %102, %92, %cst_54 {dimension_numbers = #tpu.dot_dimension_numbers<[1], [0], [0], [1], [0, 0, 1, 1], [], []>} : vector<8x8xbf16>, vector<8x1280xbf16>, vector<8x1280xf32> -> vector<8x1280xf32>
    %104 = arith.addf %100, %103 : vector<8x1280xf32>
    %c8 = arith.constant 8 : index
    %c0_55 = arith.constant 0 : index
    %c0_56 = arith.constant 0 : index
    %105 = vector.load %arg3[%c8, %c0_55, %c0_56] : memref<54x8x8xbf16, #tpu.memory_space<vmem>>, vector<1x8x8xbf16>
    %106 = vector.shape_cast %105 : vector<1x8x8xbf16> to vector<8x8xbf16>
    %cst_57 = arith.constant 0.000000e+00 : bf16
    %107 = vector.broadcast %cst_57 : bf16 to vector<8x3xbf16>
    %108 = vector.extract_strided_slice %92 {offsets = [0, 3], sizes = [8, 1277], strides = [1, 1]} : vector<8x1280xbf16> to vector<8x1277xbf16>
    %109 = tpu.concatenate %108, %107 in 1 : vector<8x1277xbf16>, vector<8x3xbf16> -> vector<8x1280xbf16>
    %cst_58 = arith.constant dense<0.000000e+00> : vector<8x1280xf32>
    %110 = tpu.matmul %106, %109, %cst_58 {dimension_numbers = #tpu.dot_dimension_numbers<[1], [0], [0], [1], [0, 0, 1, 1], [], []>} : vector<8x8xbf16>, vector<8x1280xbf16>, vector<8x1280xf32> -> vector<8x1280xf32>
    %111 = arith.addf %104, %110 : vector<8x1280xf32>
    %c2_59 = arith.constant 2 : index
    %c0_60 = arith.constant 0 : index
    %c0_61 = arith.constant 0 : index
    %112 = vector.load %arg4[%c2_59, %c0_60, %c0_61] : memref<18x8x1xf32, #tpu.memory_space<vmem>>, vector<1x8x1xf32>
    %113 = vector.shape_cast %112 : vector<1x8x1xf32> to vector<8x1xf32>
    %114 = vector.broadcast %113 : vector<8x1xf32> to vector<8x1280xf32>
    %115 = arith.addf %111, %114 : vector<8x1280xf32>
    %cst_62 = arith.constant 0.000000e+00 : f32
    %116 = vector.broadcast %cst_62 : f32 to vector<8x1280xf32>
    %117 = arith.cmpf oge, %115, %116 : vector<8x1280xf32>
    %cst_63 = arith.constant 1.000000e-01 : f32
    %118 = vector.broadcast %cst_63 : f32 to vector<8x1280xf32>
    %119 = arith.mulf %118, %115 : vector<8x1280xf32>
    %120 = arith.select %117, %115, %119 : vector<8x1280xi1>, vector<8x1280xf32>
    %121 = vector.broadcast %23 : vector<1x1280xf32> to vector<8x1280xf32>
    %122 = arith.mulf %120, %121 : vector<8x1280xf32>
    %123 = arith.truncf %122 : vector<8x1280xf32> to vector<8x1280xbf16>
    %cst_64 = arith.constant 0.000000e+00 : f32
    %124 = vector.broadcast %cst_64 : f32 to vector<8x1280xf32>
    %c9 = arith.constant 9 : index
    %c0_65 = arith.constant 0 : index
    %c0_66 = arith.constant 0 : index
    %125 = vector.load %arg3[%c9, %c0_65, %c0_66] : memref<54x8x8xbf16, #tpu.memory_space<vmem>>, vector<1x8x8xbf16>
    %126 = vector.shape_cast %125 : vector<1x8x8xbf16> to vector<8x8xbf16>
    %cst_67 = arith.constant 0.000000e+00 : bf16
    %127 = vector.broadcast %cst_67 : bf16 to vector<8x1xbf16>
    %128 = vector.extract_strided_slice %123 {offsets = [0, 0], sizes = [8, 1279], strides = [1, 1]} : vector<8x1280xbf16> to vector<8x1279xbf16>
    %129 = tpu.concatenate %127, %128 in 1 : vector<8x1xbf16>, vector<8x1279xbf16> -> vector<8x1280xbf16>
    %cst_68 = arith.constant dense<0.000000e+00> : vector<8x1280xf32>
    %130 = tpu.matmul %126, %129, %cst_68 {dimension_numbers = #tpu.dot_dimension_numbers<[1], [0], [0], [1], [0, 0, 1, 1], [], []>} : vector<8x8xbf16>, vector<8x1280xbf16>, vector<8x1280xf32> -> vector<8x1280xf32>
    %131 = arith.addf %124, %130 : vector<8x1280xf32>
    %c10 = arith.constant 10 : index
    %c0_69 = arith.constant 0 : index
    %c0_70 = arith.constant 0 : index
    %132 = vector.load %arg3[%c10, %c0_69, %c0_70] : memref<54x8x8xbf16, #tpu.memory_space<vmem>>, vector<1x8x8xbf16>
    %133 = vector.shape_cast %132 : vector<1x8x8xbf16> to vector<8x8xbf16>
    %cst_71 = arith.constant dense<0.000000e+00> : vector<8x1280xf32>
    %134 = tpu.matmul %133, %123, %cst_71 {dimension_numbers = #tpu.dot_dimension_numbers<[1], [0], [0], [1], [0, 0, 1, 1], [], []>} : vector<8x8xbf16>, vector<8x1280xbf16>, vector<8x1280xf32> -> vector<8x1280xf32>
    %135 = arith.addf %131, %134 : vector<8x1280xf32>
    %c11 = arith.constant 11 : index
    %c0_72 = arith.constant 0 : index
    %c0_73 = arith.constant 0 : index
    %136 = vector.load %arg3[%c11, %c0_72, %c0_73] : memref<54x8x8xbf16, #tpu.memory_space<vmem>>, vector<1x8x8xbf16>
    %137 = vector.shape_cast %136 : vector<1x8x8xbf16> to vector<8x8xbf16>
    %cst_74 = arith.constant 0.000000e+00 : bf16
    %138 = vector.broadcast %cst_74 : bf16 to vector<8x1xbf16>
    %139 = vector.extract_strided_slice %123 {offsets = [0, 1], sizes = [8, 1279], strides = [1, 1]} : vector<8x1280xbf16> to vector<8x1279xbf16>
    %140 = tpu.concatenate %139, %138 in 1 : vector<8x1279xbf16>, vector<8x1xbf16> -> vector<8x1280xbf16>
    %cst_75 = arith.constant dense<0.000000e+00> : vector<8x1280xf32>
    %141 = tpu.matmul %137, %140, %cst_75 {dimension_numbers = #tpu.dot_dimension_numbers<[1], [0], [0], [1], [0, 0, 1, 1], [], []>} : vector<8x8xbf16>, vector<8x1280xbf16>, vector<8x1280xf32> -> vector<8x1280xf32>
    %142 = arith.addf %135, %141 : vector<8x1280xf32>
    %c3_76 = arith.constant 3 : index
    %c0_77 = arith.constant 0 : index
    %c0_78 = arith.constant 0 : index
    %143 = vector.load %arg4[%c3_76, %c0_77, %c0_78] : memref<18x8x1xf32, #tpu.memory_space<vmem>>, vector<1x8x1xf32>
    %144 = vector.shape_cast %143 : vector<1x8x1xf32> to vector<8x1xf32>
    %145 = vector.broadcast %144 : vector<8x1xf32> to vector<8x1280xf32>
    %146 = arith.addf %142, %145 : vector<8x1280xf32>
    %147 = arith.addf %86, %146 : vector<8x1280xf32>
    %148 = vector.broadcast %23 : vector<1x1280xf32> to vector<8x1280xf32>
    %149 = arith.mulf %147, %148 : vector<8x1280xf32>
    %cst_79 = arith.constant 0.000000e+00 : f32
    %150 = vector.broadcast %cst_79 : f32 to vector<8x1280xf32>
    %151 = arith.cmpf oge, %149, %150 : vector<8x1280xf32>
    %cst_80 = arith.constant 1.000000e-01 : f32
    %152 = vector.broadcast %cst_80 : f32 to vector<8x1280xf32>
    %153 = arith.mulf %152, %149 : vector<8x1280xf32>
    %154 = arith.select %151, %149, %153 : vector<8x1280xi1>, vector<8x1280xf32>
    %155 = arith.truncf %154 : vector<8x1280xf32> to vector<8x1280xbf16>
    %cst_81 = arith.constant 0.000000e+00 : f32
    %156 = vector.broadcast %cst_81 : f32 to vector<8x1280xf32>
    %c12 = arith.constant 12 : index
    %c0_82 = arith.constant 0 : index
    %c0_83 = arith.constant 0 : index
    %157 = vector.load %arg3[%c12, %c0_82, %c0_83] : memref<54x8x8xbf16, #tpu.memory_space<vmem>>, vector<1x8x8xbf16>
    %158 = vector.shape_cast %157 : vector<1x8x8xbf16> to vector<8x8xbf16>
    %cst_84 = arith.constant 0.000000e+00 : bf16
    %159 = vector.broadcast %cst_84 : bf16 to vector<8x5xbf16>
    %160 = vector.extract_strided_slice %155 {offsets = [0, 0], sizes = [8, 1275], strides = [1, 1]} : vector<8x1280xbf16> to vector<8x1275xbf16>
    %161 = tpu.concatenate %159, %160 in 1 : vector<8x5xbf16>, vector<8x1275xbf16> -> vector<8x1280xbf16>
    %cst_85 = arith.constant dense<0.000000e+00> : vector<8x1280xf32>
    %162 = tpu.matmul %158, %161, %cst_85 {dimension_numbers = #tpu.dot_dimension_numbers<[1], [0], [0], [1], [0, 0, 1, 1], [], []>} : vector<8x8xbf16>, vector<8x1280xbf16>, vector<8x1280xf32> -> vector<8x1280xf32>
    %163 = arith.addf %156, %162 : vector<8x1280xf32>
    %c13 = arith.constant 13 : index
    %c0_86 = arith.constant 0 : index
    %c0_87 = arith.constant 0 : index
    %164 = vector.load %arg3[%c13, %c0_86, %c0_87] : memref<54x8x8xbf16, #tpu.memory_space<vmem>>, vector<1x8x8xbf16>
    %165 = vector.shape_cast %164 : vector<1x8x8xbf16> to vector<8x8xbf16>
    %cst_88 = arith.constant dense<0.000000e+00> : vector<8x1280xf32>
    %166 = tpu.matmul %165, %155, %cst_88 {dimension_numbers = #tpu.dot_dimension_numbers<[1], [0], [0], [1], [0, 0, 1, 1], [], []>} : vector<8x8xbf16>, vector<8x1280xbf16>, vector<8x1280xf32> -> vector<8x1280xf32>
    %167 = arith.addf %163, %166 : vector<8x1280xf32>
    %c14 = arith.constant 14 : index
    %c0_89 = arith.constant 0 : index
    %c0_90 = arith.constant 0 : index
    %168 = vector.load %arg3[%c14, %c0_89, %c0_90] : memref<54x8x8xbf16, #tpu.memory_space<vmem>>, vector<1x8x8xbf16>
    %169 = vector.shape_cast %168 : vector<1x8x8xbf16> to vector<8x8xbf16>
    %cst_91 = arith.constant 0.000000e+00 : bf16
    %170 = vector.broadcast %cst_91 : bf16 to vector<8x5xbf16>
    %171 = vector.extract_strided_slice %155 {offsets = [0, 5], sizes = [8, 1275], strides = [1, 1]} : vector<8x1280xbf16> to vector<8x1275xbf16>
    %172 = tpu.concatenate %171, %170 in 1 : vector<8x1275xbf16>, vector<8x5xbf16> -> vector<8x1280xbf16>
    %cst_92 = arith.constant dense<0.000000e+00> : vector<8x1280xf32>
    %173 = tpu.matmul %169, %172, %cst_92 {dimension_numbers = #tpu.dot_dimension_numbers<[1], [0], [0], [1], [0, 0, 1, 1], [], []>} : vector<8x8xbf16>, vector<8x1280xbf16>, vector<8x1280xf32> -> vector<8x1280xf32>
    %174 = arith.addf %167, %173 : vector<8x1280xf32>
    %c4_93 = arith.constant 4 : index
    %c0_94 = arith.constant 0 : index
    %c0_95 = arith.constant 0 : index
    %175 = vector.load %arg4[%c4_93, %c0_94, %c0_95] : memref<18x8x1xf32, #tpu.memory_space<vmem>>, vector<1x8x1xf32>
    %176 = vector.shape_cast %175 : vector<1x8x1xf32> to vector<8x1xf32>
    %177 = vector.broadcast %176 : vector<8x1xf32> to vector<8x1280xf32>
    %178 = arith.addf %174, %177 : vector<8x1280xf32>
    %cst_96 = arith.constant 0.000000e+00 : f32
    %179 = vector.broadcast %cst_96 : f32 to vector<8x1280xf32>
    %180 = arith.cmpf oge, %178, %179 : vector<8x1280xf32>
    %cst_97 = arith.constant 1.000000e-01 : f32
    %181 = vector.broadcast %cst_97 : f32 to vector<8x1280xf32>
    %182 = arith.mulf %181, %178 : vector<8x1280xf32>
    %183 = arith.select %180, %178, %182 : vector<8x1280xi1>, vector<8x1280xf32>
    %184 = vector.broadcast %23 : vector<1x1280xf32> to vector<8x1280xf32>
    %185 = arith.mulf %183, %184 : vector<8x1280xf32>
    %186 = arith.truncf %185 : vector<8x1280xf32> to vector<8x1280xbf16>
    %cst_98 = arith.constant 0.000000e+00 : f32
    %187 = vector.broadcast %cst_98 : f32 to vector<8x1280xf32>
    %c15 = arith.constant 15 : index
    %c0_99 = arith.constant 0 : index
    %c0_100 = arith.constant 0 : index
    %188 = vector.load %arg3[%c15, %c0_99, %c0_100] : memref<54x8x8xbf16, #tpu.memory_space<vmem>>, vector<1x8x8xbf16>
    %189 = vector.shape_cast %188 : vector<1x8x8xbf16> to vector<8x8xbf16>
    %cst_101 = arith.constant 0.000000e+00 : bf16
    %190 = vector.broadcast %cst_101 : bf16 to vector<8x1xbf16>
    %191 = vector.extract_strided_slice %186 {offsets = [0, 0], sizes = [8, 1279], strides = [1, 1]} : vector<8x1280xbf16> to vector<8x1279xbf16>
    %192 = tpu.concatenate %190, %191 in 1 : vector<8x1xbf16>, vector<8x1279xbf16> -> vector<8x1280xbf16>
    %cst_102 = arith.constant dense<0.000000e+00> : vector<8x1280xf32>
    %193 = tpu.matmul %189, %192, %cst_102 {dimension_numbers = #tpu.dot_dimension_numbers<[1], [0], [0], [1], [0, 0, 1, 1], [], []>} : vector<8x8xbf16>, vector<8x1280xbf16>, vector<8x1280xf32> -> vector<8x1280xf32>
    %194 = arith.addf %187, %193 : vector<8x1280xf32>
    %c16 = arith.constant 16 : index
    %c0_103 = arith.constant 0 : index
    %c0_104 = arith.constant 0 : index
    %195 = vector.load %arg3[%c16, %c0_103, %c0_104] : memref<54x8x8xbf16, #tpu.memory_space<vmem>>, vector<1x8x8xbf16>
    %196 = vector.shape_cast %195 : vector<1x8x8xbf16> to vector<8x8xbf16>
    %cst_105 = arith.constant dense<0.000000e+00> : vector<8x1280xf32>
    %197 = tpu.matmul %196, %186, %cst_105 {dimension_numbers = #tpu.dot_dimension_numbers<[1], [0], [0], [1], [0, 0, 1, 1], [], []>} : vector<8x8xbf16>, vector<8x1280xbf16>, vector<8x1280xf32> -> vector<8x1280xf32>
    %198 = arith.addf %194, %197 : vector<8x1280xf32>
    %c17 = arith.constant 17 : index
    %c0_106 = arith.constant 0 : index
    %c0_107 = arith.constant 0 : index
    %199 = vector.load %arg3[%c17, %c0_106, %c0_107] : memref<54x8x8xbf16, #tpu.memory_space<vmem>>, vector<1x8x8xbf16>
    %200 = vector.shape_cast %199 : vector<1x8x8xbf16> to vector<8x8xbf16>
    %cst_108 = arith.constant 0.000000e+00 : bf16
    %201 = vector.broadcast %cst_108 : bf16 to vector<8x1xbf16>
    %202 = vector.extract_strided_slice %186 {offsets = [0, 1], sizes = [8, 1279], strides = [1, 1]} : vector<8x1280xbf16> to vector<8x1279xbf16>
    %203 = tpu.concatenate %202, %201 in 1 : vector<8x1279xbf16>, vector<8x1xbf16> -> vector<8x1280xbf16>
    %cst_109 = arith.constant dense<0.000000e+00> : vector<8x1280xf32>
    %204 = tpu.matmul %200, %203, %cst_109 {dimension_numbers = #tpu.dot_dimension_numbers<[1], [0], [0], [1], [0, 0, 1, 1], [], []>} : vector<8x8xbf16>, vector<8x1280xbf16>, vector<8x1280xf32> -> vector<8x1280xf32>
    %205 = arith.addf %198, %204 : vector<8x1280xf32>
    %c5_110 = arith.constant 5 : index
    %c0_111 = arith.constant 0 : index
    %c0_112 = arith.constant 0 : index
    %206 = vector.load %arg4[%c5_110, %c0_111, %c0_112] : memref<18x8x1xf32, #tpu.memory_space<vmem>>, vector<1x8x1xf32>
    %207 = vector.shape_cast %206 : vector<1x8x1xf32> to vector<8x1xf32>
    %208 = vector.broadcast %207 : vector<8x1xf32> to vector<8x1280xf32>
    %209 = arith.addf %205, %208 : vector<8x1280xf32>
    %210 = arith.addf %149, %209 : vector<8x1280xf32>
    %211 = vector.broadcast %23 : vector<1x1280xf32> to vector<8x1280xf32>
    %212 = arith.mulf %210, %211 : vector<8x1280xf32>
    %cst_113 = arith.constant 0.000000e+00 : f32
    %213 = vector.broadcast %cst_113 : f32 to vector<8x1280xf32>
    %214 = arith.cmpf oge, %212, %213 : vector<8x1280xf32>
    %cst_114 = arith.constant 1.000000e-01 : f32
    %215 = vector.broadcast %cst_114 : f32 to vector<8x1280xf32>
    %216 = arith.mulf %215, %212 : vector<8x1280xf32>
    %217 = arith.select %214, %212, %216 : vector<8x1280xi1>, vector<8x1280xf32>
    %218 = arith.truncf %217 : vector<8x1280xf32> to vector<8x1280xbf16>
    %cst_115 = arith.constant 0.000000e+00 : f32
    %219 = vector.broadcast %cst_115 : f32 to vector<8x1280xf32>
    %c18 = arith.constant 18 : index
    %c0_116 = arith.constant 0 : index
    %c0_117 = arith.constant 0 : index
    %220 = vector.load %arg3[%c18, %c0_116, %c0_117] : memref<54x8x8xbf16, #tpu.memory_space<vmem>>, vector<1x8x8xbf16>
    %221 = vector.shape_cast %220 : vector<1x8x8xbf16> to vector<8x8xbf16>
    %cst_118 = arith.constant 0.000000e+00 : bf16
    %222 = vector.broadcast %cst_118 : bf16 to vector<8x1xbf16>
    %223 = vector.extract_strided_slice %218 {offsets = [0, 0], sizes = [8, 1279], strides = [1, 1]} : vector<8x1280xbf16> to vector<8x1279xbf16>
    %224 = tpu.concatenate %222, %223 in 1 : vector<8x1xbf16>, vector<8x1279xbf16> -> vector<8x1280xbf16>
    %cst_119 = arith.constant dense<0.000000e+00> : vector<8x1280xf32>
    %225 = tpu.matmul %221, %224, %cst_119 {dimension_numbers = #tpu.dot_dimension_numbers<[1], [0], [0], [1], [0, 0, 1, 1], [], []>} : vector<8x8xbf16>, vector<8x1280xbf16>, vector<8x1280xf32> -> vector<8x1280xf32>
    %226 = arith.addf %219, %225 : vector<8x1280xf32>
    %c19 = arith.constant 19 : index
    %c0_120 = arith.constant 0 : index
    %c0_121 = arith.constant 0 : index
    %227 = vector.load %arg3[%c19, %c0_120, %c0_121] : memref<54x8x8xbf16, #tpu.memory_space<vmem>>, vector<1x8x8xbf16>
    %228 = vector.shape_cast %227 : vector<1x8x8xbf16> to vector<8x8xbf16>
    %cst_122 = arith.constant dense<0.000000e+00> : vector<8x1280xf32>
    %229 = tpu.matmul %228, %218, %cst_122 {dimension_numbers = #tpu.dot_dimension_numbers<[1], [0], [0], [1], [0, 0, 1, 1], [], []>} : vector<8x8xbf16>, vector<8x1280xbf16>, vector<8x1280xf32> -> vector<8x1280xf32>
    %230 = arith.addf %226, %229 : vector<8x1280xf32>
    %c20 = arith.constant 20 : index
    %c0_123 = arith.constant 0 : index
    %c0_124 = arith.constant 0 : index
    %231 = vector.load %arg3[%c20, %c0_123, %c0_124] : memref<54x8x8xbf16, #tpu.memory_space<vmem>>, vector<1x8x8xbf16>
    %232 = vector.shape_cast %231 : vector<1x8x8xbf16> to vector<8x8xbf16>
    %cst_125 = arith.constant 0.000000e+00 : bf16
    %233 = vector.broadcast %cst_125 : bf16 to vector<8x1xbf16>
    %234 = vector.extract_strided_slice %218 {offsets = [0, 1], sizes = [8, 1279], strides = [1, 1]} : vector<8x1280xbf16> to vector<8x1279xbf16>
    %235 = tpu.concatenate %234, %233 in 1 : vector<8x1279xbf16>, vector<8x1xbf16> -> vector<8x1280xbf16>
    %cst_126 = arith.constant dense<0.000000e+00> : vector<8x1280xf32>
    %236 = tpu.matmul %232, %235, %cst_126 {dimension_numbers = #tpu.dot_dimension_numbers<[1], [0], [0], [1], [0, 0, 1, 1], [], []>} : vector<8x8xbf16>, vector<8x1280xbf16>, vector<8x1280xf32> -> vector<8x1280xf32>
    %237 = arith.addf %230, %236 : vector<8x1280xf32>
    %c6_127 = arith.constant 6 : index
    %c0_128 = arith.constant 0 : index
    %c0_129 = arith.constant 0 : index
    %238 = vector.load %arg4[%c6_127, %c0_128, %c0_129] : memref<18x8x1xf32, #tpu.memory_space<vmem>>, vector<1x8x1xf32>
    %239 = vector.shape_cast %238 : vector<1x8x1xf32> to vector<8x1xf32>
    %240 = vector.broadcast %239 : vector<8x1xf32> to vector<8x1280xf32>
    %241 = arith.addf %237, %240 : vector<8x1280xf32>
    %cst_130 = arith.constant 0.000000e+00 : f32
    %242 = vector.broadcast %cst_130 : f32 to vector<8x1280xf32>
    %243 = arith.cmpf oge, %241, %242 : vector<8x1280xf32>
    %cst_131 = arith.constant 1.000000e-01 : f32
    %244 = vector.broadcast %cst_131 : f32 to vector<8x1280xf32>
    %245 = arith.mulf %244, %241 : vector<8x1280xf32>
    %246 = arith.select %243, %241, %245 : vector<8x1280xi1>, vector<8x1280xf32>
    %247 = vector.broadcast %23 : vector<1x1280xf32> to vector<8x1280xf32>
    %248 = arith.mulf %246, %247 : vector<8x1280xf32>
    %249 = arith.truncf %248 : vector<8x1280xf32> to vector<8x1280xbf16>
    %cst_132 = arith.constant 0.000000e+00 : f32
    %250 = vector.broadcast %cst_132 : f32 to vector<8x1280xf32>
    %c21 = arith.constant 21 : index
    %c0_133 = arith.constant 0 : index
    %c0_134 = arith.constant 0 : index
    %251 = vector.load %arg3[%c21, %c0_133, %c0_134] : memref<54x8x8xbf16, #tpu.memory_space<vmem>>, vector<1x8x8xbf16>
    %252 = vector.shape_cast %251 : vector<1x8x8xbf16> to vector<8x8xbf16>
    %cst_135 = arith.constant 0.000000e+00 : bf16
    %253 = vector.broadcast %cst_135 : bf16 to vector<8x1xbf16>
    %254 = vector.extract_strided_slice %249 {offsets = [0, 0], sizes = [8, 1279], strides = [1, 1]} : vector<8x1280xbf16> to vector<8x1279xbf16>
    %255 = tpu.concatenate %253, %254 in 1 : vector<8x1xbf16>, vector<8x1279xbf16> -> vector<8x1280xbf16>
    %cst_136 = arith.constant dense<0.000000e+00> : vector<8x1280xf32>
    %256 = tpu.matmul %252, %255, %cst_136 {dimension_numbers = #tpu.dot_dimension_numbers<[1], [0], [0], [1], [0, 0, 1, 1], [], []>} : vector<8x8xbf16>, vector<8x1280xbf16>, vector<8x1280xf32> -> vector<8x1280xf32>
    %257 = arith.addf %250, %256 : vector<8x1280xf32>
    %c22 = arith.constant 22 : index
    %c0_137 = arith.constant 0 : index
    %c0_138 = arith.constant 0 : index
    %258 = vector.load %arg3[%c22, %c0_137, %c0_138] : memref<54x8x8xbf16, #tpu.memory_space<vmem>>, vector<1x8x8xbf16>
    %259 = vector.shape_cast %258 : vector<1x8x8xbf16> to vector<8x8xbf16>
    %cst_139 = arith.constant dense<0.000000e+00> : vector<8x1280xf32>
    %260 = tpu.matmul %259, %249, %cst_139 {dimension_numbers = #tpu.dot_dimension_numbers<[1], [0], [0], [1], [0, 0, 1, 1], [], []>} : vector<8x8xbf16>, vector<8x1280xbf16>, vector<8x1280xf32> -> vector<8x1280xf32>
    %261 = arith.addf %257, %260 : vector<8x1280xf32>
    %c23 = arith.constant 23 : index
    %c0_140 = arith.constant 0 : index
    %c0_141 = arith.constant 0 : index
    %262 = vector.load %arg3[%c23, %c0_140, %c0_141] : memref<54x8x8xbf16, #tpu.memory_space<vmem>>, vector<1x8x8xbf16>
    %263 = vector.shape_cast %262 : vector<1x8x8xbf16> to vector<8x8xbf16>
    %cst_142 = arith.constant 0.000000e+00 : bf16
    %264 = vector.broadcast %cst_142 : bf16 to vector<8x1xbf16>
    %265 = vector.extract_strided_slice %249 {offsets = [0, 1], sizes = [8, 1279], strides = [1, 1]} : vector<8x1280xbf16> to vector<8x1279xbf16>
    %266 = tpu.concatenate %265, %264 in 1 : vector<8x1279xbf16>, vector<8x1xbf16> -> vector<8x1280xbf16>
    %cst_143 = arith.constant dense<0.000000e+00> : vector<8x1280xf32>
    %267 = tpu.matmul %263, %266, %cst_143 {dimension_numbers = #tpu.dot_dimension_numbers<[1], [0], [0], [1], [0, 0, 1, 1], [], []>} : vector<8x8xbf16>, vector<8x1280xbf16>, vector<8x1280xf32> -> vector<8x1280xf32>
    %268 = arith.addf %261, %267 : vector<8x1280xf32>
    %c7_144 = arith.constant 7 : index
    %c0_145 = arith.constant 0 : index
    %c0_146 = arith.constant 0 : index
    %269 = vector.load %arg4[%c7_144, %c0_145, %c0_146] : memref<18x8x1xf32, #tpu.memory_space<vmem>>, vector<1x8x1xf32>
    %270 = vector.shape_cast %269 : vector<1x8x1xf32> to vector<8x1xf32>
    %271 = vector.broadcast %270 : vector<8x1xf32> to vector<8x1280xf32>
    %272 = arith.addf %268, %271 : vector<8x1280xf32>
    %273 = arith.addf %212, %272 : vector<8x1280xf32>
    %274 = vector.broadcast %23 : vector<1x1280xf32> to vector<8x1280xf32>
    %275 = arith.mulf %273, %274 : vector<8x1280xf32>
    %cst_147 = arith.constant 0.000000e+00 : f32
    %276 = vector.broadcast %cst_147 : f32 to vector<8x1280xf32>
    %277 = arith.cmpf oge, %275, %276 : vector<8x1280xf32>
    %cst_148 = arith.constant 1.000000e-01 : f32
    %278 = vector.broadcast %cst_148 : f32 to vector<8x1280xf32>
    %279 = arith.mulf %278, %275 : vector<8x1280xf32>
    %280 = arith.select %277, %275, %279 : vector<8x1280xi1>, vector<8x1280xf32>
    %281 = arith.truncf %280 : vector<8x1280xf32> to vector<8x1280xbf16>
    %cst_149 = arith.constant 0.000000e+00 : f32
    %282 = vector.broadcast %cst_149 : f32 to vector<8x1280xf32>
    %c24 = arith.constant 24 : index
    %c0_150 = arith.constant 0 : index
    %c0_151 = arith.constant 0 : index
    %283 = vector.load %arg3[%c24, %c0_150, %c0_151] : memref<54x8x8xbf16, #tpu.memory_space<vmem>>, vector<1x8x8xbf16>
    %284 = vector.shape_cast %283 : vector<1x8x8xbf16> to vector<8x8xbf16>
    %cst_152 = arith.constant 0.000000e+00 : bf16
    %285 = vector.broadcast %cst_152 : bf16 to vector<8x3xbf16>
    %286 = vector.extract_strided_slice %281 {offsets = [0, 0], sizes = [8, 1277], strides = [1, 1]} : vector<8x1280xbf16> to vector<8x1277xbf16>
    %287 = tpu.concatenate %285, %286 in 1 : vector<8x3xbf16>, vector<8x1277xbf16> -> vector<8x1280xbf16>
    %cst_153 = arith.constant dense<0.000000e+00> : vector<8x1280xf32>
    %288 = tpu.matmul %284, %287, %cst_153 {dimension_numbers = #tpu.dot_dimension_numbers<[1], [0], [0], [1], [0, 0, 1, 1], [], []>} : vector<8x8xbf16>, vector<8x1280xbf16>, vector<8x1280xf32> -> vector<8x1280xf32>
    %289 = arith.addf %282, %288 : vector<8x1280xf32>
    %c25 = arith.constant 25 : index
    %c0_154 = arith.constant 0 : index
    %c0_155 = arith.constant 0 : index
    %290 = vector.load %arg3[%c25, %c0_154, %c0_155] : memref<54x8x8xbf16, #tpu.memory_space<vmem>>, vector<1x8x8xbf16>
    %291 = vector.shape_cast %290 : vector<1x8x8xbf16> to vector<8x8xbf16>
    %cst_156 = arith.constant dense<0.000000e+00> : vector<8x1280xf32>
    %292 = tpu.matmul %291, %281, %cst_156 {dimension_numbers = #tpu.dot_dimension_numbers<[1], [0], [0], [1], [0, 0, 1, 1], [], []>} : vector<8x8xbf16>, vector<8x1280xbf16>, vector<8x1280xf32> -> vector<8x1280xf32>
    %293 = arith.addf %289, %292 : vector<8x1280xf32>
    %c26 = arith.constant 26 : index
    %c0_157 = arith.constant 0 : index
    %c0_158 = arith.constant 0 : index
    %294 = vector.load %arg3[%c26, %c0_157, %c0_158] : memref<54x8x8xbf16, #tpu.memory_space<vmem>>, vector<1x8x8xbf16>
    %295 = vector.shape_cast %294 : vector<1x8x8xbf16> to vector<8x8xbf16>
    %cst_159 = arith.constant 0.000000e+00 : bf16
    %296 = vector.broadcast %cst_159 : bf16 to vector<8x3xbf16>
    %297 = vector.extract_strided_slice %281 {offsets = [0, 3], sizes = [8, 1277], strides = [1, 1]} : vector<8x1280xbf16> to vector<8x1277xbf16>
    %298 = tpu.concatenate %297, %296 in 1 : vector<8x1277xbf16>, vector<8x3xbf16> -> vector<8x1280xbf16>
    %cst_160 = arith.constant dense<0.000000e+00> : vector<8x1280xf32>
    %299 = tpu.matmul %295, %298, %cst_160 {dimension_numbers = #tpu.dot_dimension_numbers<[1], [0], [0], [1], [0, 0, 1, 1], [], []>} : vector<8x8xbf16>, vector<8x1280xbf16>, vector<8x1280xf32> -> vector<8x1280xf32>
    %300 = arith.addf %293, %299 : vector<8x1280xf32>
    %c8_161 = arith.constant 8 : index
    %c0_162 = arith.constant 0 : index
    %c0_163 = arith.constant 0 : index
    %301 = vector.load %arg4[%c8_161, %c0_162, %c0_163] : memref<18x8x1xf32, #tpu.memory_space<vmem>>, vector<1x8x1xf32>
    %302 = vector.shape_cast %301 : vector<1x8x1xf32> to vector<8x1xf32>
    %303 = vector.broadcast %302 : vector<8x1xf32> to vector<8x1280xf32>
    %304 = arith.addf %300, %303 : vector<8x1280xf32>
    %cst_164 = arith.constant 0.000000e+00 : f32
    %305 = vector.broadcast %cst_164 : f32 to vector<8x1280xf32>
    %306 = arith.cmpf oge, %304, %305 : vector<8x1280xf32>
    %cst_165 = arith.constant 1.000000e-01 : f32
    %307 = vector.broadcast %cst_165 : f32 to vector<8x1280xf32>
    %308 = arith.mulf %307, %304 : vector<8x1280xf32>
    %309 = arith.select %306, %304, %308 : vector<8x1280xi1>, vector<8x1280xf32>
    %310 = vector.broadcast %23 : vector<1x1280xf32> to vector<8x1280xf32>
    %311 = arith.mulf %309, %310 : vector<8x1280xf32>
    %312 = arith.truncf %311 : vector<8x1280xf32> to vector<8x1280xbf16>
    %cst_166 = arith.constant 0.000000e+00 : f32
    %313 = vector.broadcast %cst_166 : f32 to vector<8x1280xf32>
    %c27 = arith.constant 27 : index
    %c0_167 = arith.constant 0 : index
    %c0_168 = arith.constant 0 : index
    %314 = vector.load %arg3[%c27, %c0_167, %c0_168] : memref<54x8x8xbf16, #tpu.memory_space<vmem>>, vector<1x8x8xbf16>
    %315 = vector.shape_cast %314 : vector<1x8x8xbf16> to vector<8x8xbf16>
    %cst_169 = arith.constant 0.000000e+00 : bf16
    %316 = vector.broadcast %cst_169 : bf16 to vector<8x1xbf16>
    %317 = vector.extract_strided_slice %312 {offsets = [0, 0], sizes = [8, 1279], strides = [1, 1]} : vector<8x1280xbf16> to vector<8x1279xbf16>
    %318 = tpu.concatenate %316, %317 in 1 : vector<8x1xbf16>, vector<8x1279xbf16> -> vector<8x1280xbf16>
    %cst_170 = arith.constant dense<0.000000e+00> : vector<8x1280xf32>
    %319 = tpu.matmul %315, %318, %cst_170 {dimension_numbers = #tpu.dot_dimension_numbers<[1], [0], [0], [1], [0, 0, 1, 1], [], []>} : vector<8x8xbf16>, vector<8x1280xbf16>, vector<8x1280xf32> -> vector<8x1280xf32>
    %320 = arith.addf %313, %319 : vector<8x1280xf32>
    %c28 = arith.constant 28 : index
    %c0_171 = arith.constant 0 : index
    %c0_172 = arith.constant 0 : index
    %321 = vector.load %arg3[%c28, %c0_171, %c0_172] : memref<54x8x8xbf16, #tpu.memory_space<vmem>>, vector<1x8x8xbf16>
    %322 = vector.shape_cast %321 : vector<1x8x8xbf16> to vector<8x8xbf16>
    %cst_173 = arith.constant dense<0.000000e+00> : vector<8x1280xf32>
    %323 = tpu.matmul %322, %312, %cst_173 {dimension_numbers = #tpu.dot_dimension_numbers<[1], [0], [0], [1], [0, 0, 1, 1], [], []>} : vector<8x8xbf16>, vector<8x1280xbf16>, vector<8x1280xf32> -> vector<8x1280xf32>
    %324 = arith.addf %320, %323 : vector<8x1280xf32>
    %c29 = arith.constant 29 : index
    %c0_174 = arith.constant 0 : index
    %c0_175 = arith.constant 0 : index
    %325 = vector.load %arg3[%c29, %c0_174, %c0_175] : memref<54x8x8xbf16, #tpu.memory_space<vmem>>, vector<1x8x8xbf16>
    %326 = vector.shape_cast %325 : vector<1x8x8xbf16> to vector<8x8xbf16>
    %cst_176 = arith.constant 0.000000e+00 : bf16
    %327 = vector.broadcast %cst_176 : bf16 to vector<8x1xbf16>
    %328 = vector.extract_strided_slice %312 {offsets = [0, 1], sizes = [8, 1279], strides = [1, 1]} : vector<8x1280xbf16> to vector<8x1279xbf16>
    %329 = tpu.concatenate %328, %327 in 1 : vector<8x1279xbf16>, vector<8x1xbf16> -> vector<8x1280xbf16>
    %cst_177 = arith.constant dense<0.000000e+00> : vector<8x1280xf32>
    %330 = tpu.matmul %326, %329, %cst_177 {dimension_numbers = #tpu.dot_dimension_numbers<[1], [0], [0], [1], [0, 0, 1, 1], [], []>} : vector<8x8xbf16>, vector<8x1280xbf16>, vector<8x1280xf32> -> vector<8x1280xf32>
    %331 = arith.addf %324, %330 : vector<8x1280xf32>
    %c9_178 = arith.constant 9 : index
    %c0_179 = arith.constant 0 : index
    %c0_180 = arith.constant 0 : index
    %332 = vector.load %arg4[%c9_178, %c0_179, %c0_180] : memref<18x8x1xf32, #tpu.memory_space<vmem>>, vector<1x8x1xf32>
    %333 = vector.shape_cast %332 : vector<1x8x1xf32> to vector<8x1xf32>
    %334 = vector.broadcast %333 : vector<8x1xf32> to vector<8x1280xf32>
    %335 = arith.addf %331, %334 : vector<8x1280xf32>
    %336 = arith.addf %275, %335 : vector<8x1280xf32>
    %337 = vector.broadcast %23 : vector<1x1280xf32> to vector<8x1280xf32>
    %338 = arith.mulf %336, %337 : vector<8x1280xf32>
    %cst_181 = arith.constant 0.000000e+00 : f32
    %339 = vector.broadcast %cst_181 : f32 to vector<8x1280xf32>
    %340 = arith.cmpf oge, %338, %339 : vector<8x1280xf32>
    %cst_182 = arith.constant 1.000000e-01 : f32
    %341 = vector.broadcast %cst_182 : f32 to vector<8x1280xf32>
    %342 = arith.mulf %341, %338 : vector<8x1280xf32>
    %343 = arith.select %340, %338, %342 : vector<8x1280xi1>, vector<8x1280xf32>
    %344 = arith.truncf %343 : vector<8x1280xf32> to vector<8x1280xbf16>
    %cst_183 = arith.constant 0.000000e+00 : f32
    %345 = vector.broadcast %cst_183 : f32 to vector<8x1280xf32>
    %c30 = arith.constant 30 : index
    %c0_184 = arith.constant 0 : index
    %c0_185 = arith.constant 0 : index
    %346 = vector.load %arg3[%c30, %c0_184, %c0_185] : memref<54x8x8xbf16, #tpu.memory_space<vmem>>, vector<1x8x8xbf16>
    %347 = vector.shape_cast %346 : vector<1x8x8xbf16> to vector<8x8xbf16>
    %cst_186 = arith.constant 0.000000e+00 : bf16
    %348 = vector.broadcast %cst_186 : bf16 to vector<8x5xbf16>
    %349 = vector.extract_strided_slice %344 {offsets = [0, 0], sizes = [8, 1275], strides = [1, 1]} : vector<8x1280xbf16> to vector<8x1275xbf16>
    %350 = tpu.concatenate %348, %349 in 1 : vector<8x5xbf16>, vector<8x1275xbf16> -> vector<8x1280xbf16>
    %cst_187 = arith.constant dense<0.000000e+00> : vector<8x1280xf32>
    %351 = tpu.matmul %347, %350, %cst_187 {dimension_numbers = #tpu.dot_dimension_numbers<[1], [0], [0], [1], [0, 0, 1, 1], [], []>} : vector<8x8xbf16>, vector<8x1280xbf16>, vector<8x1280xf32> -> vector<8x1280xf32>
    %352 = arith.addf %345, %351 : vector<8x1280xf32>
    %c31 = arith.constant 31 : index
    %c0_188 = arith.constant 0 : index
    %c0_189 = arith.constant 0 : index
    %353 = vector.load %arg3[%c31, %c0_188, %c0_189] : memref<54x8x8xbf16, #tpu.memory_space<vmem>>, vector<1x8x8xbf16>
    %354 = vector.shape_cast %353 : vector<1x8x8xbf16> to vector<8x8xbf16>
    %cst_190 = arith.constant dense<0.000000e+00> : vector<8x1280xf32>
    %355 = tpu.matmul %354, %344, %cst_190 {dimension_numbers = #tpu.dot_dimension_numbers<[1], [0], [0], [1], [0, 0, 1, 1], [], []>} : vector<8x8xbf16>, vector<8x1280xbf16>, vector<8x1280xf32> -> vector<8x1280xf32>
    %356 = arith.addf %352, %355 : vector<8x1280xf32>
    %c32 = arith.constant 32 : index
    %c0_191 = arith.constant 0 : index
    %c0_192 = arith.constant 0 : index
    %357 = vector.load %arg3[%c32, %c0_191, %c0_192] : memref<54x8x8xbf16, #tpu.memory_space<vmem>>, vector<1x8x8xbf16>
    %358 = vector.shape_cast %357 : vector<1x8x8xbf16> to vector<8x8xbf16>
    %cst_193 = arith.constant 0.000000e+00 : bf16
    %359 = vector.broadcast %cst_193 : bf16 to vector<8x5xbf16>
    %360 = vector.extract_strided_slice %344 {offsets = [0, 5], sizes = [8, 1275], strides = [1, 1]} : vector<8x1280xbf16> to vector<8x1275xbf16>
    %361 = tpu.concatenate %360, %359 in 1 : vector<8x1275xbf16>, vector<8x5xbf16> -> vector<8x1280xbf16>
    %cst_194 = arith.constant dense<0.000000e+00> : vector<8x1280xf32>
    %362 = tpu.matmul %358, %361, %cst_194 {dimension_numbers = #tpu.dot_dimension_numbers<[1], [0], [0], [1], [0, 0, 1, 1], [], []>} : vector<8x8xbf16>, vector<8x1280xbf16>, vector<8x1280xf32> -> vector<8x1280xf32>
    %363 = arith.addf %356, %362 : vector<8x1280xf32>
    %c10_195 = arith.constant 10 : index
    %c0_196 = arith.constant 0 : index
    %c0_197 = arith.constant 0 : index
    %364 = vector.load %arg4[%c10_195, %c0_196, %c0_197] : memref<18x8x1xf32, #tpu.memory_space<vmem>>, vector<1x8x1xf32>
    %365 = vector.shape_cast %364 : vector<1x8x1xf32> to vector<8x1xf32>
    %366 = vector.broadcast %365 : vector<8x1xf32> to vector<8x1280xf32>
    %367 = arith.addf %363, %366 : vector<8x1280xf32>
    %cst_198 = arith.constant 0.000000e+00 : f32
    %368 = vector.broadcast %cst_198 : f32 to vector<8x1280xf32>
    %369 = arith.cmpf oge, %367, %368 : vector<8x1280xf32>
    %cst_199 = arith.constant 1.000000e-01 : f32
    %370 = vector.broadcast %cst_199 : f32 to vector<8x1280xf32>
    %371 = arith.mulf %370, %367 : vector<8x1280xf32>
    %372 = arith.select %369, %367, %371 : vector<8x1280xi1>, vector<8x1280xf32>
    %373 = vector.broadcast %23 : vector<1x1280xf32> to vector<8x1280xf32>
    %374 = arith.mulf %372, %373 : vector<8x1280xf32>
    %375 = arith.truncf %374 : vector<8x1280xf32> to vector<8x1280xbf16>
    %cst_200 = arith.constant 0.000000e+00 : f32
    %376 = vector.broadcast %cst_200 : f32 to vector<8x1280xf32>
    %c33 = arith.constant 33 : index
    %c0_201 = arith.constant 0 : index
    %c0_202 = arith.constant 0 : index
    %377 = vector.load %arg3[%c33, %c0_201, %c0_202] : memref<54x8x8xbf16, #tpu.memory_space<vmem>>, vector<1x8x8xbf16>
    %378 = vector.shape_cast %377 : vector<1x8x8xbf16> to vector<8x8xbf16>
    %cst_203 = arith.constant 0.000000e+00 : bf16
    %379 = vector.broadcast %cst_203 : bf16 to vector<8x1xbf16>
    %380 = vector.extract_strided_slice %375 {offsets = [0, 0], sizes = [8, 1279], strides = [1, 1]} : vector<8x1280xbf16> to vector<8x1279xbf16>
    %381 = tpu.concatenate %379, %380 in 1 : vector<8x1xbf16>, vector<8x1279xbf16> -> vector<8x1280xbf16>
    %cst_204 = arith.constant dense<0.000000e+00> : vector<8x1280xf32>
    %382 = tpu.matmul %378, %381, %cst_204 {dimension_numbers = #tpu.dot_dimension_numbers<[1], [0], [0], [1], [0, 0, 1, 1], [], []>} : vector<8x8xbf16>, vector<8x1280xbf16>, vector<8x1280xf32> -> vector<8x1280xf32>
    %383 = arith.addf %376, %382 : vector<8x1280xf32>
    %c34 = arith.constant 34 : index
    %c0_205 = arith.constant 0 : index
    %c0_206 = arith.constant 0 : index
    %384 = vector.load %arg3[%c34, %c0_205, %c0_206] : memref<54x8x8xbf16, #tpu.memory_space<vmem>>, vector<1x8x8xbf16>
    %385 = vector.shape_cast %384 : vector<1x8x8xbf16> to vector<8x8xbf16>
    %cst_207 = arith.constant dense<0.000000e+00> : vector<8x1280xf32>
    %386 = tpu.matmul %385, %375, %cst_207 {dimension_numbers = #tpu.dot_dimension_numbers<[1], [0], [0], [1], [0, 0, 1, 1], [], []>} : vector<8x8xbf16>, vector<8x1280xbf16>, vector<8x1280xf32> -> vector<8x1280xf32>
    %387 = arith.addf %383, %386 : vector<8x1280xf32>
    %c35 = arith.constant 35 : index
    %c0_208 = arith.constant 0 : index
    %c0_209 = arith.constant 0 : index
    %388 = vector.load %arg3[%c35, %c0_208, %c0_209] : memref<54x8x8xbf16, #tpu.memory_space<vmem>>, vector<1x8x8xbf16>
    %389 = vector.shape_cast %388 : vector<1x8x8xbf16> to vector<8x8xbf16>
    %cst_210 = arith.constant 0.000000e+00 : bf16
    %390 = vector.broadcast %cst_210 : bf16 to vector<8x1xbf16>
    %391 = vector.extract_strided_slice %375 {offsets = [0, 1], sizes = [8, 1279], strides = [1, 1]} : vector<8x1280xbf16> to vector<8x1279xbf16>
    %392 = tpu.concatenate %391, %390 in 1 : vector<8x1279xbf16>, vector<8x1xbf16> -> vector<8x1280xbf16>
    %cst_211 = arith.constant dense<0.000000e+00> : vector<8x1280xf32>
    %393 = tpu.matmul %389, %392, %cst_211 {dimension_numbers = #tpu.dot_dimension_numbers<[1], [0], [0], [1], [0, 0, 1, 1], [], []>} : vector<8x8xbf16>, vector<8x1280xbf16>, vector<8x1280xf32> -> vector<8x1280xf32>
    %394 = arith.addf %387, %393 : vector<8x1280xf32>
    %c11_212 = arith.constant 11 : index
    %c0_213 = arith.constant 0 : index
    %c0_214 = arith.constant 0 : index
    %395 = vector.load %arg4[%c11_212, %c0_213, %c0_214] : memref<18x8x1xf32, #tpu.memory_space<vmem>>, vector<1x8x1xf32>
    %396 = vector.shape_cast %395 : vector<1x8x1xf32> to vector<8x1xf32>
    %397 = vector.broadcast %396 : vector<8x1xf32> to vector<8x1280xf32>
    %398 = arith.addf %394, %397 : vector<8x1280xf32>
    %399 = arith.addf %338, %398 : vector<8x1280xf32>
    %400 = vector.broadcast %23 : vector<1x1280xf32> to vector<8x1280xf32>
    %401 = arith.mulf %399, %400 : vector<8x1280xf32>
    %cst_215 = arith.constant 0.000000e+00 : f32
    %402 = vector.broadcast %cst_215 : f32 to vector<8x1280xf32>
    %403 = arith.cmpf oge, %401, %402 : vector<8x1280xf32>
    %cst_216 = arith.constant 1.000000e-01 : f32
    %404 = vector.broadcast %cst_216 : f32 to vector<8x1280xf32>
    %405 = arith.mulf %404, %401 : vector<8x1280xf32>
    %406 = arith.select %403, %401, %405 : vector<8x1280xi1>, vector<8x1280xf32>
    %407 = arith.truncf %406 : vector<8x1280xf32> to vector<8x1280xbf16>
    %cst_217 = arith.constant 0.000000e+00 : f32
    %408 = vector.broadcast %cst_217 : f32 to vector<8x1280xf32>
    %c36 = arith.constant 36 : index
    %c0_218 = arith.constant 0 : index
    %c0_219 = arith.constant 0 : index
    %409 = vector.load %arg3[%c36, %c0_218, %c0_219] : memref<54x8x8xbf16, #tpu.memory_space<vmem>>, vector<1x8x8xbf16>
    %410 = vector.shape_cast %409 : vector<1x8x8xbf16> to vector<8x8xbf16>
    %cst_220 = arith.constant 0.000000e+00 : bf16
    %411 = vector.broadcast %cst_220 : bf16 to vector<8x1xbf16>
    %412 = vector.extract_strided_slice %407 {offsets = [0, 0], sizes = [8, 1279], strides = [1, 1]} : vector<8x1280xbf16> to vector<8x1279xbf16>
    %413 = tpu.concatenate %411, %412 in 1 : vector<8x1xbf16>, vector<8x1279xbf16> -> vector<8x1280xbf16>
    %cst_221 = arith.constant dense<0.000000e+00> : vector<8x1280xf32>
    %414 = tpu.matmul %410, %413, %cst_221 {dimension_numbers = #tpu.dot_dimension_numbers<[1], [0], [0], [1], [0, 0, 1, 1], [], []>} : vector<8x8xbf16>, vector<8x1280xbf16>, vector<8x1280xf32> -> vector<8x1280xf32>
    %415 = arith.addf %408, %414 : vector<8x1280xf32>
    %c37 = arith.constant 37 : index
    %c0_222 = arith.constant 0 : index
    %c0_223 = arith.constant 0 : index
    %416 = vector.load %arg3[%c37, %c0_222, %c0_223] : memref<54x8x8xbf16, #tpu.memory_space<vmem>>, vector<1x8x8xbf16>
    %417 = vector.shape_cast %416 : vector<1x8x8xbf16> to vector<8x8xbf16>
    %cst_224 = arith.constant dense<0.000000e+00> : vector<8x1280xf32>
    %418 = tpu.matmul %417, %407, %cst_224 {dimension_numbers = #tpu.dot_dimension_numbers<[1], [0], [0], [1], [0, 0, 1, 1], [], []>} : vector<8x8xbf16>, vector<8x1280xbf16>, vector<8x1280xf32> -> vector<8x1280xf32>
    %419 = arith.addf %415, %418 : vector<8x1280xf32>
    %c38 = arith.constant 38 : index
    %c0_225 = arith.constant 0 : index
    %c0_226 = arith.constant 0 : index
    %420 = vector.load %arg3[%c38, %c0_225, %c0_226] : memref<54x8x8xbf16, #tpu.memory_space<vmem>>, vector<1x8x8xbf16>
    %421 = vector.shape_cast %420 : vector<1x8x8xbf16> to vector<8x8xbf16>
    %cst_227 = arith.constant 0.000000e+00 : bf16
    %422 = vector.broadcast %cst_227 : bf16 to vector<8x1xbf16>
    %423 = vector.extract_strided_slice %407 {offsets = [0, 1], sizes = [8, 1279], strides = [1, 1]} : vector<8x1280xbf16> to vector<8x1279xbf16>
    %424 = tpu.concatenate %423, %422 in 1 : vector<8x1279xbf16>, vector<8x1xbf16> -> vector<8x1280xbf16>
    %cst_228 = arith.constant dense<0.000000e+00> : vector<8x1280xf32>
    %425 = tpu.matmul %421, %424, %cst_228 {dimension_numbers = #tpu.dot_dimension_numbers<[1], [0], [0], [1], [0, 0, 1, 1], [], []>} : vector<8x8xbf16>, vector<8x1280xbf16>, vector<8x1280xf32> -> vector<8x1280xf32>
    %426 = arith.addf %419, %425 : vector<8x1280xf32>
    %c12_229 = arith.constant 12 : index
    %c0_230 = arith.constant 0 : index
    %c0_231 = arith.constant 0 : index
    %427 = vector.load %arg4[%c12_229, %c0_230, %c0_231] : memref<18x8x1xf32, #tpu.memory_space<vmem>>, vector<1x8x1xf32>
    %428 = vector.shape_cast %427 : vector<1x8x1xf32> to vector<8x1xf32>
    %429 = vector.broadcast %428 : vector<8x1xf32> to vector<8x1280xf32>
    %430 = arith.addf %426, %429 : vector<8x1280xf32>
    %cst_232 = arith.constant 0.000000e+00 : f32
    %431 = vector.broadcast %cst_232 : f32 to vector<8x1280xf32>
    %432 = arith.cmpf oge, %430, %431 : vector<8x1280xf32>
    %cst_233 = arith.constant 1.000000e-01 : f32
    %433 = vector.broadcast %cst_233 : f32 to vector<8x1280xf32>
    %434 = arith.mulf %433, %430 : vector<8x1280xf32>
    %435 = arith.select %432, %430, %434 : vector<8x1280xi1>, vector<8x1280xf32>
    %436 = vector.broadcast %23 : vector<1x1280xf32> to vector<8x1280xf32>
    %437 = arith.mulf %435, %436 : vector<8x1280xf32>
    %438 = arith.truncf %437 : vector<8x1280xf32> to vector<8x1280xbf16>
    %cst_234 = arith.constant 0.000000e+00 : f32
    %439 = vector.broadcast %cst_234 : f32 to vector<8x1280xf32>
    %c39 = arith.constant 39 : index
    %c0_235 = arith.constant 0 : index
    %c0_236 = arith.constant 0 : index
    %440 = vector.load %arg3[%c39, %c0_235, %c0_236] : memref<54x8x8xbf16, #tpu.memory_space<vmem>>, vector<1x8x8xbf16>
    %441 = vector.shape_cast %440 : vector<1x8x8xbf16> to vector<8x8xbf16>
    %cst_237 = arith.constant 0.000000e+00 : bf16
    %442 = vector.broadcast %cst_237 : bf16 to vector<8x1xbf16>
    %443 = vector.extract_strided_slice %438 {offsets = [0, 0], sizes = [8, 1279], strides = [1, 1]} : vector<8x1280xbf16> to vector<8x1279xbf16>
    %444 = tpu.concatenate %442, %443 in 1 : vector<8x1xbf16>, vector<8x1279xbf16> -> vector<8x1280xbf16>
    %cst_238 = arith.constant dense<0.000000e+00> : vector<8x1280xf32>
    %445 = tpu.matmul %441, %444, %cst_238 {dimension_numbers = #tpu.dot_dimension_numbers<[1], [0], [0], [1], [0, 0, 1, 1], [], []>} : vector<8x8xbf16>, vector<8x1280xbf16>, vector<8x1280xf32> -> vector<8x1280xf32>
    %446 = arith.addf %439, %445 : vector<8x1280xf32>
    %c40 = arith.constant 40 : index
    %c0_239 = arith.constant 0 : index
    %c0_240 = arith.constant 0 : index
    %447 = vector.load %arg3[%c40, %c0_239, %c0_240] : memref<54x8x8xbf16, #tpu.memory_space<vmem>>, vector<1x8x8xbf16>
    %448 = vector.shape_cast %447 : vector<1x8x8xbf16> to vector<8x8xbf16>
    %cst_241 = arith.constant dense<0.000000e+00> : vector<8x1280xf32>
    %449 = tpu.matmul %448, %438, %cst_241 {dimension_numbers = #tpu.dot_dimension_numbers<[1], [0], [0], [1], [0, 0, 1, 1], [], []>} : vector<8x8xbf16>, vector<8x1280xbf16>, vector<8x1280xf32> -> vector<8x1280xf32>
    %450 = arith.addf %446, %449 : vector<8x1280xf32>
    %c41 = arith.constant 41 : index
    %c0_242 = arith.constant 0 : index
    %c0_243 = arith.constant 0 : index
    %451 = vector.load %arg3[%c41, %c0_242, %c0_243] : memref<54x8x8xbf16, #tpu.memory_space<vmem>>, vector<1x8x8xbf16>
    %452 = vector.shape_cast %451 : vector<1x8x8xbf16> to vector<8x8xbf16>
    %cst_244 = arith.constant 0.000000e+00 : bf16
    %453 = vector.broadcast %cst_244 : bf16 to vector<8x1xbf16>
    %454 = vector.extract_strided_slice %438 {offsets = [0, 1], sizes = [8, 1279], strides = [1, 1]} : vector<8x1280xbf16> to vector<8x1279xbf16>
    %455 = tpu.concatenate %454, %453 in 1 : vector<8x1279xbf16>, vector<8x1xbf16> -> vector<8x1280xbf16>
    %cst_245 = arith.constant dense<0.000000e+00> : vector<8x1280xf32>
    %456 = tpu.matmul %452, %455, %cst_245 {dimension_numbers = #tpu.dot_dimension_numbers<[1], [0], [0], [1], [0, 0, 1, 1], [], []>} : vector<8x8xbf16>, vector<8x1280xbf16>, vector<8x1280xf32> -> vector<8x1280xf32>
    %457 = arith.addf %450, %456 : vector<8x1280xf32>
    %c13_246 = arith.constant 13 : index
    %c0_247 = arith.constant 0 : index
    %c0_248 = arith.constant 0 : index
    %458 = vector.load %arg4[%c13_246, %c0_247, %c0_248] : memref<18x8x1xf32, #tpu.memory_space<vmem>>, vector<1x8x1xf32>
    %459 = vector.shape_cast %458 : vector<1x8x1xf32> to vector<8x1xf32>
    %460 = vector.broadcast %459 : vector<8x1xf32> to vector<8x1280xf32>
    %461 = arith.addf %457, %460 : vector<8x1280xf32>
    %462 = arith.addf %401, %461 : vector<8x1280xf32>
    %463 = vector.broadcast %23 : vector<1x1280xf32> to vector<8x1280xf32>
    %464 = arith.mulf %462, %463 : vector<8x1280xf32>
    %cst_249 = arith.constant 0.000000e+00 : f32
    %465 = vector.broadcast %cst_249 : f32 to vector<8x1280xf32>
    %466 = arith.cmpf oge, %464, %465 : vector<8x1280xf32>
    %cst_250 = arith.constant 1.000000e-01 : f32
    %467 = vector.broadcast %cst_250 : f32 to vector<8x1280xf32>
    %468 = arith.mulf %467, %464 : vector<8x1280xf32>
    %469 = arith.select %466, %464, %468 : vector<8x1280xi1>, vector<8x1280xf32>
    %470 = arith.truncf %469 : vector<8x1280xf32> to vector<8x1280xbf16>
    %cst_251 = arith.constant 0.000000e+00 : f32
    %471 = vector.broadcast %cst_251 : f32 to vector<8x1280xf32>
    %c42 = arith.constant 42 : index
    %c0_252 = arith.constant 0 : index
    %c0_253 = arith.constant 0 : index
    %472 = vector.load %arg3[%c42, %c0_252, %c0_253] : memref<54x8x8xbf16, #tpu.memory_space<vmem>>, vector<1x8x8xbf16>
    %473 = vector.shape_cast %472 : vector<1x8x8xbf16> to vector<8x8xbf16>
    %cst_254 = arith.constant 0.000000e+00 : bf16
    %474 = vector.broadcast %cst_254 : bf16 to vector<8x3xbf16>
    %475 = vector.extract_strided_slice %470 {offsets = [0, 0], sizes = [8, 1277], strides = [1, 1]} : vector<8x1280xbf16> to vector<8x1277xbf16>
    %476 = tpu.concatenate %474, %475 in 1 : vector<8x3xbf16>, vector<8x1277xbf16> -> vector<8x1280xbf16>
    %cst_255 = arith.constant dense<0.000000e+00> : vector<8x1280xf32>
    %477 = tpu.matmul %473, %476, %cst_255 {dimension_numbers = #tpu.dot_dimension_numbers<[1], [0], [0], [1], [0, 0, 1, 1], [], []>} : vector<8x8xbf16>, vector<8x1280xbf16>, vector<8x1280xf32> -> vector<8x1280xf32>
    %478 = arith.addf %471, %477 : vector<8x1280xf32>
    %c43 = arith.constant 43 : index
    %c0_256 = arith.constant 0 : index
    %c0_257 = arith.constant 0 : index
    %479 = vector.load %arg3[%c43, %c0_256, %c0_257] : memref<54x8x8xbf16, #tpu.memory_space<vmem>>, vector<1x8x8xbf16>
    %480 = vector.shape_cast %479 : vector<1x8x8xbf16> to vector<8x8xbf16>
    %cst_258 = arith.constant dense<0.000000e+00> : vector<8x1280xf32>
    %481 = tpu.matmul %480, %470, %cst_258 {dimension_numbers = #tpu.dot_dimension_numbers<[1], [0], [0], [1], [0, 0, 1, 1], [], []>} : vector<8x8xbf16>, vector<8x1280xbf16>, vector<8x1280xf32> -> vector<8x1280xf32>
    %482 = arith.addf %478, %481 : vector<8x1280xf32>
    %c44 = arith.constant 44 : index
    %c0_259 = arith.constant 0 : index
    %c0_260 = arith.constant 0 : index
    %483 = vector.load %arg3[%c44, %c0_259, %c0_260] : memref<54x8x8xbf16, #tpu.memory_space<vmem>>, vector<1x8x8xbf16>
    %484 = vector.shape_cast %483 : vector<1x8x8xbf16> to vector<8x8xbf16>
    %cst_261 = arith.constant 0.000000e+00 : bf16
    %485 = vector.broadcast %cst_261 : bf16 to vector<8x3xbf16>
    %486 = vector.extract_strided_slice %470 {offsets = [0, 3], sizes = [8, 1277], strides = [1, 1]} : vector<8x1280xbf16> to vector<8x1277xbf16>
    %487 = tpu.concatenate %486, %485 in 1 : vector<8x1277xbf16>, vector<8x3xbf16> -> vector<8x1280xbf16>
    %cst_262 = arith.constant dense<0.000000e+00> : vector<8x1280xf32>
    %488 = tpu.matmul %484, %487, %cst_262 {dimension_numbers = #tpu.dot_dimension_numbers<[1], [0], [0], [1], [0, 0, 1, 1], [], []>} : vector<8x8xbf16>, vector<8x1280xbf16>, vector<8x1280xf32> -> vector<8x1280xf32>
    %489 = arith.addf %482, %488 : vector<8x1280xf32>
    %c14_263 = arith.constant 14 : index
    %c0_264 = arith.constant 0 : index
    %c0_265 = arith.constant 0 : index
    %490 = vector.load %arg4[%c14_263, %c0_264, %c0_265] : memref<18x8x1xf32, #tpu.memory_space<vmem>>, vector<1x8x1xf32>
    %491 = vector.shape_cast %490 : vector<1x8x1xf32> to vector<8x1xf32>
    %492 = vector.broadcast %491 : vector<8x1xf32> to vector<8x1280xf32>
    %493 = arith.addf %489, %492 : vector<8x1280xf32>
    %cst_266 = arith.constant 0.000000e+00 : f32
    %494 = vector.broadcast %cst_266 : f32 to vector<8x1280xf32>
    %495 = arith.cmpf oge, %493, %494 : vector<8x1280xf32>
    %cst_267 = arith.constant 1.000000e-01 : f32
    %496 = vector.broadcast %cst_267 : f32 to vector<8x1280xf32>
    %497 = arith.mulf %496, %493 : vector<8x1280xf32>
    %498 = arith.select %495, %493, %497 : vector<8x1280xi1>, vector<8x1280xf32>
    %499 = vector.broadcast %23 : vector<1x1280xf32> to vector<8x1280xf32>
    %500 = arith.mulf %498, %499 : vector<8x1280xf32>
    %501 = arith.truncf %500 : vector<8x1280xf32> to vector<8x1280xbf16>
    %cst_268 = arith.constant 0.000000e+00 : f32
    %502 = vector.broadcast %cst_268 : f32 to vector<8x1280xf32>
    %c45 = arith.constant 45 : index
    %c0_269 = arith.constant 0 : index
    %c0_270 = arith.constant 0 : index
    %503 = vector.load %arg3[%c45, %c0_269, %c0_270] : memref<54x8x8xbf16, #tpu.memory_space<vmem>>, vector<1x8x8xbf16>
    %504 = vector.shape_cast %503 : vector<1x8x8xbf16> to vector<8x8xbf16>
    %cst_271 = arith.constant 0.000000e+00 : bf16
    %505 = vector.broadcast %cst_271 : bf16 to vector<8x1xbf16>
    %506 = vector.extract_strided_slice %501 {offsets = [0, 0], sizes = [8, 1279], strides = [1, 1]} : vector<8x1280xbf16> to vector<8x1279xbf16>
    %507 = tpu.concatenate %505, %506 in 1 : vector<8x1xbf16>, vector<8x1279xbf16> -> vector<8x1280xbf16>
    %cst_272 = arith.constant dense<0.000000e+00> : vector<8x1280xf32>
    %508 = tpu.matmul %504, %507, %cst_272 {dimension_numbers = #tpu.dot_dimension_numbers<[1], [0], [0], [1], [0, 0, 1, 1], [], []>} : vector<8x8xbf16>, vector<8x1280xbf16>, vector<8x1280xf32> -> vector<8x1280xf32>
    %509 = arith.addf %502, %508 : vector<8x1280xf32>
    %c46 = arith.constant 46 : index
    %c0_273 = arith.constant 0 : index
    %c0_274 = arith.constant 0 : index
    %510 = vector.load %arg3[%c46, %c0_273, %c0_274] : memref<54x8x8xbf16, #tpu.memory_space<vmem>>, vector<1x8x8xbf16>
    %511 = vector.shape_cast %510 : vector<1x8x8xbf16> to vector<8x8xbf16>
    %cst_275 = arith.constant dense<0.000000e+00> : vector<8x1280xf32>
    %512 = tpu.matmul %511, %501, %cst_275 {dimension_numbers = #tpu.dot_dimension_numbers<[1], [0], [0], [1], [0, 0, 1, 1], [], []>} : vector<8x8xbf16>, vector<8x1280xbf16>, vector<8x1280xf32> -> vector<8x1280xf32>
    %513 = arith.addf %509, %512 : vector<8x1280xf32>
    %c47 = arith.constant 47 : index
    %c0_276 = arith.constant 0 : index
    %c0_277 = arith.constant 0 : index
    %514 = vector.load %arg3[%c47, %c0_276, %c0_277] : memref<54x8x8xbf16, #tpu.memory_space<vmem>>, vector<1x8x8xbf16>
    %515 = vector.shape_cast %514 : vector<1x8x8xbf16> to vector<8x8xbf16>
    %cst_278 = arith.constant 0.000000e+00 : bf16
    %516 = vector.broadcast %cst_278 : bf16 to vector<8x1xbf16>
    %517 = vector.extract_strided_slice %501 {offsets = [0, 1], sizes = [8, 1279], strides = [1, 1]} : vector<8x1280xbf16> to vector<8x1279xbf16>
    %518 = tpu.concatenate %517, %516 in 1 : vector<8x1279xbf16>, vector<8x1xbf16> -> vector<8x1280xbf16>
    %cst_279 = arith.constant dense<0.000000e+00> : vector<8x1280xf32>
    %519 = tpu.matmul %515, %518, %cst_279 {dimension_numbers = #tpu.dot_dimension_numbers<[1], [0], [0], [1], [0, 0, 1, 1], [], []>} : vector<8x8xbf16>, vector<8x1280xbf16>, vector<8x1280xf32> -> vector<8x1280xf32>
    %520 = arith.addf %513, %519 : vector<8x1280xf32>
    %c15_280 = arith.constant 15 : index
    %c0_281 = arith.constant 0 : index
    %c0_282 = arith.constant 0 : index
    %521 = vector.load %arg4[%c15_280, %c0_281, %c0_282] : memref<18x8x1xf32, #tpu.memory_space<vmem>>, vector<1x8x1xf32>
    %522 = vector.shape_cast %521 : vector<1x8x1xf32> to vector<8x1xf32>
    %523 = vector.broadcast %522 : vector<8x1xf32> to vector<8x1280xf32>
    %524 = arith.addf %520, %523 : vector<8x1280xf32>
    %525 = arith.addf %464, %524 : vector<8x1280xf32>
    %526 = vector.broadcast %23 : vector<1x1280xf32> to vector<8x1280xf32>
    %527 = arith.mulf %525, %526 : vector<8x1280xf32>
    %cst_283 = arith.constant 0.000000e+00 : f32
    %528 = vector.broadcast %cst_283 : f32 to vector<8x1280xf32>
    %529 = arith.cmpf oge, %527, %528 : vector<8x1280xf32>
    %cst_284 = arith.constant 1.000000e-01 : f32
    %530 = vector.broadcast %cst_284 : f32 to vector<8x1280xf32>
    %531 = arith.mulf %530, %527 : vector<8x1280xf32>
    %532 = arith.select %529, %527, %531 : vector<8x1280xi1>, vector<8x1280xf32>
    %533 = arith.truncf %532 : vector<8x1280xf32> to vector<8x1280xbf16>
    %cst_285 = arith.constant 0.000000e+00 : f32
    %534 = vector.broadcast %cst_285 : f32 to vector<8x1280xf32>
    %c48 = arith.constant 48 : index
    %c0_286 = arith.constant 0 : index
    %c0_287 = arith.constant 0 : index
    %535 = vector.load %arg3[%c48, %c0_286, %c0_287] : memref<54x8x8xbf16, #tpu.memory_space<vmem>>, vector<1x8x8xbf16>
    %536 = vector.shape_cast %535 : vector<1x8x8xbf16> to vector<8x8xbf16>
    %cst_288 = arith.constant 0.000000e+00 : bf16
    %537 = vector.broadcast %cst_288 : bf16 to vector<8x5xbf16>
    %538 = vector.extract_strided_slice %533 {offsets = [0, 0], sizes = [8, 1275], strides = [1, 1]} : vector<8x1280xbf16> to vector<8x1275xbf16>
    %539 = tpu.concatenate %537, %538 in 1 : vector<8x5xbf16>, vector<8x1275xbf16> -> vector<8x1280xbf16>
    %cst_289 = arith.constant dense<0.000000e+00> : vector<8x1280xf32>
    %540 = tpu.matmul %536, %539, %cst_289 {dimension_numbers = #tpu.dot_dimension_numbers<[1], [0], [0], [1], [0, 0, 1, 1], [], []>} : vector<8x8xbf16>, vector<8x1280xbf16>, vector<8x1280xf32> -> vector<8x1280xf32>
    %541 = arith.addf %534, %540 : vector<8x1280xf32>
    %c49 = arith.constant 49 : index
    %c0_290 = arith.constant 0 : index
    %c0_291 = arith.constant 0 : index
    %542 = vector.load %arg3[%c49, %c0_290, %c0_291] : memref<54x8x8xbf16, #tpu.memory_space<vmem>>, vector<1x8x8xbf16>
    %543 = vector.shape_cast %542 : vector<1x8x8xbf16> to vector<8x8xbf16>
    %cst_292 = arith.constant dense<0.000000e+00> : vector<8x1280xf32>
    %544 = tpu.matmul %543, %533, %cst_292 {dimension_numbers = #tpu.dot_dimension_numbers<[1], [0], [0], [1], [0, 0, 1, 1], [], []>} : vector<8x8xbf16>, vector<8x1280xbf16>, vector<8x1280xf32> -> vector<8x1280xf32>
    %545 = arith.addf %541, %544 : vector<8x1280xf32>
    %c50 = arith.constant 50 : index
    %c0_293 = arith.constant 0 : index
    %c0_294 = arith.constant 0 : index
    %546 = vector.load %arg3[%c50, %c0_293, %c0_294] : memref<54x8x8xbf16, #tpu.memory_space<vmem>>, vector<1x8x8xbf16>
    %547 = vector.shape_cast %546 : vector<1x8x8xbf16> to vector<8x8xbf16>
    %cst_295 = arith.constant 0.000000e+00 : bf16
    %548 = vector.broadcast %cst_295 : bf16 to vector<8x5xbf16>
    %549 = vector.extract_strided_slice %533 {offsets = [0, 5], sizes = [8, 1275], strides = [1, 1]} : vector<8x1280xbf16> to vector<8x1275xbf16>
    %550 = tpu.concatenate %549, %548 in 1 : vector<8x1275xbf16>, vector<8x5xbf16> -> vector<8x1280xbf16>
    %cst_296 = arith.constant dense<0.000000e+00> : vector<8x1280xf32>
    %551 = tpu.matmul %547, %550, %cst_296 {dimension_numbers = #tpu.dot_dimension_numbers<[1], [0], [0], [1], [0, 0, 1, 1], [], []>} : vector<8x8xbf16>, vector<8x1280xbf16>, vector<8x1280xf32> -> vector<8x1280xf32>
    %552 = arith.addf %545, %551 : vector<8x1280xf32>
    %c16_297 = arith.constant 16 : index
    %c0_298 = arith.constant 0 : index
    %c0_299 = arith.constant 0 : index
    %553 = vector.load %arg4[%c16_297, %c0_298, %c0_299] : memref<18x8x1xf32, #tpu.memory_space<vmem>>, vector<1x8x1xf32>
    %554 = vector.shape_cast %553 : vector<1x8x1xf32> to vector<8x1xf32>
    %555 = vector.broadcast %554 : vector<8x1xf32> to vector<8x1280xf32>
    %556 = arith.addf %552, %555 : vector<8x1280xf32>
    %cst_300 = arith.constant 0.000000e+00 : f32
    %557 = vector.broadcast %cst_300 : f32 to vector<8x1280xf32>
    %558 = arith.cmpf oge, %556, %557 : vector<8x1280xf32>
    %cst_301 = arith.constant 1.000000e-01 : f32
    %559 = vector.broadcast %cst_301 : f32 to vector<8x1280xf32>
    %560 = arith.mulf %559, %556 : vector<8x1280xf32>
    %561 = arith.select %558, %556, %560 : vector<8x1280xi1>, vector<8x1280xf32>
    %562 = vector.broadcast %23 : vector<1x1280xf32> to vector<8x1280xf32>
    %563 = arith.mulf %561, %562 : vector<8x1280xf32>
    %564 = arith.truncf %563 : vector<8x1280xf32> to vector<8x1280xbf16>
    %cst_302 = arith.constant 0.000000e+00 : f32
    %565 = vector.broadcast %cst_302 : f32 to vector<8x1280xf32>
    %c51 = arith.constant 51 : index
    %c0_303 = arith.constant 0 : index
    %c0_304 = arith.constant 0 : index
    %566 = vector.load %arg3[%c51, %c0_303, %c0_304] : memref<54x8x8xbf16, #tpu.memory_space<vmem>>, vector<1x8x8xbf16>
    %567 = vector.shape_cast %566 : vector<1x8x8xbf16> to vector<8x8xbf16>
    %cst_305 = arith.constant 0.000000e+00 : bf16
    %568 = vector.broadcast %cst_305 : bf16 to vector<8x1xbf16>
    %569 = vector.extract_strided_slice %564 {offsets = [0, 0], sizes = [8, 1279], strides = [1, 1]} : vector<8x1280xbf16> to vector<8x1279xbf16>
    %570 = tpu.concatenate %568, %569 in 1 : vector<8x1xbf16>, vector<8x1279xbf16> -> vector<8x1280xbf16>
    %cst_306 = arith.constant dense<0.000000e+00> : vector<8x1280xf32>
    %571 = tpu.matmul %567, %570, %cst_306 {dimension_numbers = #tpu.dot_dimension_numbers<[1], [0], [0], [1], [0, 0, 1, 1], [], []>} : vector<8x8xbf16>, vector<8x1280xbf16>, vector<8x1280xf32> -> vector<8x1280xf32>
    %572 = arith.addf %565, %571 : vector<8x1280xf32>
    %c52 = arith.constant 52 : index
    %c0_307 = arith.constant 0 : index
    %c0_308 = arith.constant 0 : index
    %573 = vector.load %arg3[%c52, %c0_307, %c0_308] : memref<54x8x8xbf16, #tpu.memory_space<vmem>>, vector<1x8x8xbf16>
    %574 = vector.shape_cast %573 : vector<1x8x8xbf16> to vector<8x8xbf16>
    %cst_309 = arith.constant dense<0.000000e+00> : vector<8x1280xf32>
    %575 = tpu.matmul %574, %564, %cst_309 {dimension_numbers = #tpu.dot_dimension_numbers<[1], [0], [0], [1], [0, 0, 1, 1], [], []>} : vector<8x8xbf16>, vector<8x1280xbf16>, vector<8x1280xf32> -> vector<8x1280xf32>
    %576 = arith.addf %572, %575 : vector<8x1280xf32>
    %c53 = arith.constant 53 : index
    %c0_310 = arith.constant 0 : index
    %c0_311 = arith.constant 0 : index
    %577 = vector.load %arg3[%c53, %c0_310, %c0_311] : memref<54x8x8xbf16, #tpu.memory_space<vmem>>, vector<1x8x8xbf16>
    %578 = vector.shape_cast %577 : vector<1x8x8xbf16> to vector<8x8xbf16>
    %cst_312 = arith.constant 0.000000e+00 : bf16
    %579 = vector.broadcast %cst_312 : bf16 to vector<8x1xbf16>
    %580 = vector.extract_strided_slice %564 {offsets = [0, 1], sizes = [8, 1279], strides = [1, 1]} : vector<8x1280xbf16> to vector<8x1279xbf16>
    %581 = tpu.concatenate %580, %579 in 1 : vector<8x1279xbf16>, vector<8x1xbf16> -> vector<8x1280xbf16>
    %cst_313 = arith.constant dense<0.000000e+00> : vector<8x1280xf32>
    %582 = tpu.matmul %578, %581, %cst_313 {dimension_numbers = #tpu.dot_dimension_numbers<[1], [0], [0], [1], [0, 0, 1, 1], [], []>} : vector<8x8xbf16>, vector<8x1280xbf16>, vector<8x1280xf32> -> vector<8x1280xf32>
    %583 = arith.addf %576, %582 : vector<8x1280xf32>
    %c17_314 = arith.constant 17 : index
    %c0_315 = arith.constant 0 : index
    %c0_316 = arith.constant 0 : index
    %584 = vector.load %arg4[%c17_314, %c0_315, %c0_316] : memref<18x8x1xf32, #tpu.memory_space<vmem>>, vector<1x8x1xf32>
    %585 = vector.shape_cast %584 : vector<1x8x1xf32> to vector<8x1xf32>
    %586 = vector.broadcast %585 : vector<8x1xf32> to vector<8x1280xf32>
    %587 = arith.addf %583, %586 : vector<8x1280xf32>
    %588 = arith.addf %527, %587 : vector<8x1280xf32>
    %589 = vector.broadcast %23 : vector<1x1280xf32> to vector<8x1280xf32>
    %590 = arith.mulf %588, %589 : vector<8x1280xf32>
    %591 = vector.extract_strided_slice %590 {offsets = [0, 36], sizes = [8, 512], strides = [1, 1]} : vector<8x1280xf32> to vector<8x512xf32>
    %c0_317 = arith.constant 0 : index
    %c0_318 = arith.constant 0 : index
    %c0_319 = arith.constant 0 : index
    %592 = vector.load %arg5[%c0_317, %c0_318, %c0_319] : memref<2x8x512xf32, #tpu.memory_space<vmem>>, vector<1x8x512xf32>
    %593 = vector.shape_cast %592 : vector<1x8x512xf32> to vector<8x512xf32>
    %594 = vector.shape_cast %591 : vector<8x512xf32> to vector<1x8x512xf32>
    tpu.vector_store %arg5[%c0_317, %c0_318, %c0_319], %594 {strides = array<i32>} : memref<2x8x512xf32, #tpu.memory_space<vmem>>, vector<1x8x512xf32>,
    %595 = vector.extract_strided_slice %590 {offsets = [0, 676], sizes = [8, 512], strides = [1, 1]} : vector<8x1280xf32> to vector<8x512xf32>
    %c1_320 = arith.constant 1 : index
    %c0_321 = arith.constant 0 : index
    %c0_322 = arith.constant 0 : index
    %596 = vector.load %arg5[%c1_320, %c0_321, %c0_322] : memref<2x8x512xf32, #tpu.memory_space<vmem>>, vector<1x8x512xf32>
    %597 = vector.shape_cast %596 : vector<1x8x512xf32> to vector<8x512xf32>
    %598 = vector.shape_cast %595 : vector<8x512xf32> to vector<1x8x512xf32>
    tpu.vector_store %arg5[%c1_320, %c0_321, %c0_322], %598 {strides = array<i32>} : memref<2x8x512xf32, #tpu.memory_space<vmem>>, vector<1x8x512xf32>,
    return
  }
  func.func @transform_0(%arg0: i32) -> (i32, i32, i32) {
    %c0_i32 = arith.constant 0 : i32
    %c0_i32_0 = arith.constant 0 : i32
    %c0_i32_1 = arith.constant 0 : i32
    return %c0_i32, %c0_i32_0, %arg0 : i32, i32, i32
  }
  func.func @transform_1(%arg0: i32) -> (i32, i32, i32) {
    %c1_i32 = arith.constant 1 : i32
    %0 = arith.addi %arg0, %c1_i32 : i32
    %c4_i32 = arith.constant 4 : i32
    %1 = arith.muli %0, %c4_i32 : i32
    %c0_i32 = arith.constant 0 : i32
    %c0_i32_0 = arith.constant 0 : i32
    %c0_i32_1 = arith.constant 0 : i32
    return %c0_i32, %c0_i32_0, %1 : i32, i32, i32
  }
  func.func @transform_2(%arg0: i32) -> (i32, i32, i32) {
    %c0_i32 = arith.constant 0 : i32
    %c0_i32_0 = arith.constant 0 : i32
    %c0_i32_1 = arith.constant 0 : i32
    %c0_i32_2 = arith.constant 0 : i32
    return %c0_i32, %c0_i32_0, %c0_i32_1 : i32, i32, i32
  }
  func.func @transform_3(%arg0: i32) -> (i32, i32, i32) {
    %c0_i32 = arith.constant 0 : i32
    %c0_i32_0 = arith.constant 0 : i32
    %c0_i32_1 = arith.constant 0 : i32
    %c0_i32_2 = arith.constant 0 : i32
    return %c0_i32, %c0_i32_0, %c0_i32_1 : i32, i32, i32
  }
  func.func @transform_4(%arg0: i32) -> (i32, i32, i32) {
    %c0_i32 = arith.constant 0 : i32
    %c0_i32_0 = arith.constant 0 : i32
    %c0_i32_1 = arith.constant 0 : i32
    return %c0_i32, %c0_i32_0, %arg0 : i32, i32, i32
  }
}

</mosaic_0001>

<bundles_post_ra>
// kernel: mrf_forward.1
= control target key start
LH: loop header
LB: loop body
LE: loop exit
PB: predicated region body
PF: predicated region fallthrough
CT: control target
= control target key end

     0   :  { %s18461_s0 = inlined_call_operand.vmem [shape: f32[2,8,1152], index: 0, kind: input, shape index: {}, may-alias: {0,1}]   ;;  %s18462_s1 = inlined_call_operand.vmem [shape: f32[2,8,1152], index: 1, kind: input, shape index: {}, may-alias: {0,1}]   ;;  %s18463_s2 = inlined_call_operand.vmem [shape: bf16[54,8,8], index: 2, kind: input, shape index: {}]   ;;  %s18464_s3 = inlined_call_operand.vmem [shape: f32[18,8,1], index: 3, kind: input, shape index: {}]   ;;  %s18465_s4 = inlined_call_operand.hbm [shape: f32[2,8,1024], index: 4, kind: output, shape index: {}]  }
   0x1   :  { %18470 = sst [smem:[#allocation12_spill]] %s18461_s0 }
   0x2   :  { %9 = vsyncpa [#allocation5], 0 }
   0x3   :  { %11 = vsyncpa [#allocation5 + $0x1], 0  ;;  %s13830_s15 = smov 0   ;;  %s13832_s16 = smov 0  }
   0x4   :  { %s13834_s17 = smov 0   ;;  %s13836_s18 = smov 0  }
   0x5   :  { %s13838_s19 = smov 0   ;;  %s13840_s20 = smov 0  }
   0x6 LB: > { %18471 = sst [smem:[#allocation7_spill]] %s13721_s19  ;;  %s13861_s21 = sadd.s32 4294967295, %s13725_s20   ;;  %s13725_s20 = sphi %s13840_s20, %s18492_s20   ;;  %s13721_s19 = sphi %s13838_s19, %s18495_s19   ;;  %s13717_s18 = sphi %s13836_s18, %s18499_s18   ;;  %s13713_s17 = sphi %s13834_s17, %s18498_s17   ;;  %s13709_s16 = sphi %s13832_s16, %s18497_s16   ;;  %s13705_s15 = sphi %s13830_s15, %s18496_s15  }
   0x7   : > { %s12689_s22 = sadd.s32 4294967294, %s13725_s20   ;;  %s13865_s23 = sadd.s32 1, %s13725_s20  }
   0x8   : > { %18472 = sst [smem:[#allocation8_spill]] %s13865_s23  ;;  %s24_s24 = sadd.s32 1, %s13721_s19 }
   0x9   : > { %s21_s25 = ssub.s32 %s13725_s20, %s13865_s23  ;;  %p31_p0 = scmp.ne.s32.totalorder %s13721_s19, %s13717_s18 }
   0xa   : > { %p22_p1 = scmp.eq.s32.totalorder %s21_s25, 0  ;;  %p32_p2 = scmp.eq.s32.totalorder %s13725_s20, 0 }
   0xb   : > { %s13362_s26 = sshll.u32 %s13725_s20, 2  ;;  %s54_s27 = sadd.s32 1, %s13713_s17 }
   0xc   : > { %s13876_s28 = scalar_select %p22_p1, %s13721_s19, %s24_s24  }
   0xd   : > { %p13881_p3 = por %p32_p2, %p31_p0  ;;  %s13363_s30 = sadd.s32 4, %s13362_s26 }
   0xe   : > { %18473 = sst [smem:[#allocation9_spill]] %s13876_s28  ;;  %s13365_s5 = sadd.s32 4, %s13363_s30 }
   0xf   : > { %p61_p4 = scmp.ne.s32.totalorder %s13713_s17, %s13709_s16  ;;  %s51_s6 = ssub.s32 %s13363_s30, %s13365_s5 }
  0x10   : > { %p133_p5 = scmp.eq.s32.totalorder %s13861_s21, 1  ;;  %p52_p6 = scmp.eq.s32.totalorder %s51_s6, 0 }
  0x11   : > { %p13888_p7 = por %p61_p4, %p32_p2  ;;  %p138_p9 = scmp.ne.s32.totalorder %s13717_s18, %s13705_s15 }
  0x12   : > { %p13895_p8 = por %p133_p5, %p31_p0  ;;  %p139_p10 = scmp.eq.s32.totalorder %s12689_s22, 1 }
  0x13   : > { %s13902_s9 = scalar_select %p52_p6, %s13713_s17, %s54_s27  }
  0x14   : > { %p13904_p11 = por %p139_p10, %p138_p9  ;;  %p12693_p12 = scmp.ge.s32.totalorder %s13725_s20, 2 }
  0x15   : > { %18477 = sst [smem:[#allocation10_spill]] %s13902_s9 }
  0x16   : > { %s18478_s10 = scalar_select %p13904_p11, 1, 0 }
  0x17   : > { %161 = sbr.rel (%p12693_p12) target bundleno = 165 (0xa5), region = 24 }
  0x18   : > { %18479 = sst [smem:[#allocation11_spill]] %s18478_s10 }
  0x1c   : > { %164 = sbr.rel (!%p13881_p3) target bundleno = 159 (0x9f), region = 28  ;;  %s166_s11 = sand.u32 (%p13881_p3), 1, %s13721_s19  }
  0x1d   : > { %s170_s12 = ssub.s32 (%p13881_p3), 9, %s13362_s26  ;;  %s12694_s13 = sshll.u32 (%p13881_p3), %s166_s11, 6 }
  0x1e   : > { %p171_p13 = scmp.lt.s32.totalorder (%p13881_p3), %s170_s12, 4  ;;  %s13366_s14 = sshll.u32 (%p13881_p3), %s13725_s20, 5 }
  0x1f   : > { %s18480_s0 = sld [smem:[#allocation12_spill]] (%p13881_p3)  ;;  %s13922_s5 = scalar_lea.vmem (%p13881_p3), [#allocation2], %s12694_s13  }
  0x21   : > { %s18501_s12 = smov (!%p171_p13, %s170_s12), 4 }
  0x22   : > { %s12696_s27 = sshll.u32 %s18501_s12, 4  ;;  %s13920_s30 = sshll.u32 %s18501_s12, 3 }
  0x23   : > { %p12700_p0 = scmp.eq.s32.totalorder %s12696_s27, 0 }
  0x24   : > { %p181_p1 = scmp.lt.u32.totalorder (!%p12700_p0), %s13920_s30, 8 }
  0x25   : > { %s13918_s25 = scalar_lea.vmem %s18480_s0, %s13366_s14   ;;  %180 = sbr.rel (%p12700_p0) target bundleno = 159 (0x9f), region = 32 }
  0x2a   : > { %184 = sbr.rel (%p181_p1) target bundleno = 149 (0x95), region = 36  ;;  %s13926_s26 = sand.u32 (!%p181_p1), 7, %s13920_s30  }
  0x2b   : > { %p203_p2 = scmp.eq.s32.totalorder (!%p181_p1), %s13926_s26, 0  ;;  %p12701_p3 = scmp.ne.s32.totalorder (!%p181_p1), %s13926_s26, 0 }
  0x2f   : > { %206 = sbr.rel (%p12701_p3) target bundleno = 95 (0x5f), region = 51  ;;  %s207_s29 = sshrl.u32 (!%p12701_p3), %s13920_s30, 3 }
  0x30   : > { %s13933_s6 = sshrl.u32 (!%p12701_p3), %s207_s29, 4 }
  0x31   : > { %p12702_p4 = scmp.le.s32.totalorder (!%p12701_p3), %s13933_s6, 0 }
  0x34   : > { %12611 = sbr.rel (%p12702_p4) target bundleno = 78 (0x4e), region = 273  ;;  %s18481_s11 = smov (!%p12702_p4), %s13922_s5 }
  0x35   : > { %s18482_s12 = smov (!%p12702_p4), %s13918_s25  ;;  %s13942_s13 = smov (!%p12702_p4), 0  }
  0x36   : > { %s13944_s14 = smov (!%p12702_p4), 0  }
  0x39 LB: >> { %v236_v0 = vld [vmem:[%s13733_s12 + $0x48] sm:$0xff]  ;;  %v238_v1 = vld [vmem:[%s13733_s12 + $0x50] sm:$0xff]  ;;  %v218_v2 = vld [vmem:[%s13733_s12] sm:$0xff]  ;;  %s282_s22 = sadd.s32 1, %s13737_s13  ;;  %s212_s14 = sadd.s32 1, %s13741_s14   ;;  %s13741_s14 = sphi %s13944_s14, %s212_s14   ;;  %s13737_s13 = sphi %s13942_s13, %s18485_s13   ;;  %s13733_s12 = sphi %s18482_s12, %s18484_s12   ;;  %s13729_s11 = sphi %s18481_s11, %s18483_s11  }
  0x3a   : >> { %251 = vst [vmem:[%s13729_s11 + $0x20] sm:$0xff] %v236_v0  ;;  %v220_v3 = vld [vmem:[%s13733_s12 + $0x8] sm:$0xff]  ;;  %v222_v4 = vld [vmem:[%s13733_s12 + $0x10] sm:$0xff]  ;;  %v224_v5 = vld [vmem:[%s13733_s12 + $0x18] sm:$0xff]  ;;  %p283_p5 = scmp.ge.s32.totalorder %s282_s22, %s13933_s6  ;;  %p211_p6 = scmp.ge.s32.totalorder %s212_s14, %s13933_s6 }
  0x3b   : >> { %253 = vst [vmem:[%s13729_s11 + $0x28] sm:$0xff] %v238_v1  ;;  %v240_v6 = vld [vmem:[%s13733_s12 + $0x58] sm:$0xff]  ;;  %v242_v7 = vld [vmem:[%s13733_s12 + $0x60] sm:$0xff]  ;;  %v244_v8 = vld [vmem:[%s13733_s12 + $0x68] sm:$0xff] }
  0x3c   : >> { %219 = vst [vmem:[%s13729_s11] sm:$0xff] %v218_v2  ;;  %s18503_s22 = smov (%p283_p5, %s282_s22), 0  ;;  %v246_v9 = vld [vmem:[%s13733_s12 + $0x70] sm:$0xff]  ;;  %v248_v10 = vld [vmem:[%s13733_s12 + $0x78] sm:$0xff]  ;;  %v264_v11 = vld [vmem:[%s13733_s12 + $0x80] sm:$0xff] }
  0x3d   : >> { %221 = vst [vmem:[%s13729_s11 + $0x8] sm:$0xff] %v220_v3  ;;  %s12703_s24 = sshll.u32 %s18503_s22, 7  ;;  %v266_v12 = vld [vmem:[%s13733_s12 + $0x88] sm:$0xff]  ;;  %v268_v13 = vld [vmem:[%s13733_s12 + $0x90] sm:$0xff]  ;;  %v270_v14 = vld [vmem:[%s13733_s12 + $0x98] sm:$0xff] }
  0x3e   : >> { %223 = vst [vmem:[%s13729_s11 + $0x10] sm:$0xff] %v222_v4  ;;  %s287_s27 = scalar_lea.vmem %s13918_s25, %s12703_s24   ;;  %s288_s13 = scalar_lea.vmem %s13922_s5, %s12703_s24 [#allocation2]   ;;  %v272_v15 = vld [vmem:[%s13733_s12 + $0xa0] sm:$0xff]  ;;  %v274_v16 = vld [vmem:[%s13733_s12 + $0xa8] sm:$0xff]  ;;  %v276_v17 = vld [vmem:[%s13733_s12 + $0xb0] sm:$0xff] }
  0x3f   : >> { %225 = vst [vmem:[%s13729_s11 + $0x18] sm:$0xff] %v224_v5  ;;  %v278_v18 = vld [vmem:[%s13733_s12 + $0xb8] sm:$0xff]  ;;  %v280_v19 = vld [vmem:[%s13733_s12 + $0xc0] sm:$0xff]  ;;  %s18484_s12 = smov %s287_s27 }
  0x40   : >> { %255 = vst [vmem:[%s13729_s11 + $0x30] sm:$0xff] %v240_v6 }
  0x41   : >> { %257 = vst [vmem:[%s13729_s11 + $0x38] sm:$0xff] %v242_v7 }
  0x42   : >> { %259 = vst [vmem:[%s13729_s11 + $0x40] sm:$0xff] %v244_v8 }
  0x43   : >> { %261 = vst [vmem:[%s13729_s11 + $0x48] sm:$0xff] %v246_v9 }
  0x44   : >> { %263 = vst [vmem:[%s13729_s11 + $0x50] sm:$0xff] %v248_v10 }
  0x45   : >> { %265 = vst [vmem:[%s13729_s11 + $0x58] sm:$0xff] %v264_v11 }
  0x46   : >> { %267 = vst [vmem:[%s13729_s11 + $0x60] sm:$0xff] %v266_v12 }
  0x47   : >> { %269 = vst [vmem:[%s13729_s11 + $0x68] sm:$0xff] %v268_v13 }
  0x48   : >> { %271 = vst [vmem:[%s13729_s11 + $0x70] sm:$0xff] %v270_v14 }
  0x49   : >> { %273 = vst [vmem:[%s13729_s11 + $0x78] sm:$0xff] %v272_v15  ;;  %214 = sbr.rel (!%p211_p6) target bundleno = 57 (0x39), region = 279 }
  0x4a   : >> { %275 = vst [vmem:[%s13729_s11 + $0x80] sm:$0xff] %v274_v16 }
  0x4b   : >> { %277 = vst [vmem:[%s13729_s11 + $0x88] sm:$0xff] %v276_v17 }
  0x4c   : >> { %279 = vst [vmem:[%s13729_s11 + $0x90] sm:$0xff] %v278_v18 }
  0x4d   : >> { %281 = vst [vmem:[%s13729_s11 + $0x98] sm:$0xff] %v280_v19  ;;  %s18483_s11 = smov %s288_s13  ;;  %s18485_s13 = smov %s18503_s22 }
  0x4e PF: > { %s14015_s24 = sand.u32 15, %s207_s29   ;;  %s13367_s0 = sshll.u32 %s13933_s6, 7 }
  0x4f   : > { %s14019_s28 = scalar_lea.vmem %s13918_s25, %s13367_s0   ;;  %s295_s19 = scalar_lea.vmem %s13922_s5, %s13367_s0 [#allocation2]  }
  0x50   : > { %p12708_p9 = scmp.le.s32.totalorder %s14015_s24, 0 }
  0x51   : > { %s13743_s27 = smov (!%p12708_p9), %s295_s19   ;;  %s13747_s22 = smov (!%p12708_p9), %s14019_s28  }
  0x52   : > { %12625 = sbr.rel (%p12708_p9) target bundleno = 95 (0x5f), region = 284  ;;  %s13751_s14 = smov (!%p12708_p9), 0  }
  0x53   : > { %s13755_s9 = smov (!%p12708_p9), 0  }
  0x57 LB: >> { %v305_v20 = vld [vmem:[%s13749_s22] sm:$0xff]  ;;  %v307_v21 = vld [vmem:[%s13749_s22 + $0x48] sm:$0xff]  ;;  %s309_s29 = sadd.s32 1, %s13753_s14  ;;  %s299_s9 = sadd.s32 1, %s13757_s9   ;;  %s13757_s9 = sphi %s13755_s9, %s299_s9   ;;  %s13753_s14 = sphi %s13751_s14, %s13752_s14   ;;  %s13749_s22 = sphi %s13747_s22, %s314_s22   ;;  %s13745_s27 = sphi %s13743_s27, %s315_s27  }
  0x58   : >> { %306 = vst [vmem:[%s13745_s27] sm:$0xff] %v305_v20  ;;  %p310_p10 = scmp.ge.s32.totalorder %s309_s29, %s14015_s24  ;;  %p298_p13 = scmp.ge.s32.totalorder %s299_s9, %s14015_s24 }
  0x59   : >> { %308 = vst [vmem:[%s13745_s27 + $0x20] sm:$0xff] %v307_v21 }
  0x5a   : >> { %s18505_s29 = smov (%p310_p10, %s309_s29), 0  ;;  %301 = sbr.rel (!%p298_p13) target bundleno = 87 (0x57), region = 290 }
  0x5b   : >> { %s12709_s0 = sshll.u32 %s18505_s29, 3  ;;  %s13752_s14 = smov %s18505_s29  }
  0x5c   : >> { %s314_s22 = scalar_lea.vmem %s14019_s28, %s12709_s0   ;;  %s315_s27 = scalar_lea.vmem %s295_s19, %s12709_s0 [#allocation2]  }
  0x5f PF: > { %318 = sbr.rel (%p203_p2) target bundleno = 149 (0x95), region = 69  ;;  %s320_s6 = ssub.s32 (!%p203_p2), %s13920_s30, %s13926_s26 }
  0x60   : > { %s324_s11 = sshrl.u32 (!%p203_p2), %s13920_s30, 3  ;;  %s14033_s12 = scalar_lea.vmem (!%p203_p2), %s13918_s25, %s320_s6 }
  0x61   : > { %s14036_s13 = scalar_lea.vmem (!%p203_p2), %s13922_s5, %s320_s6 [#allocation2]  ;;  %s14040_s9 = sshrl.u32 (!%p203_p2), %s324_s11, 4 }
  0x62   : > { %p12711_p0 = scmp.le.s32.totalorder (!%p203_p2), %s14040_s9, 0 }
  0x64   : > { %12639 = sbr.rel (%p12711_p0) target bundleno = 126 (0x7e), region = 295  ;;  %s18486_s19 = smov (!%p12711_p0), %s13922_s5 }
  0x65   : > { %s18487_s28 = smov (!%p12711_p0), %s13918_s25  ;;  %s14049_s24 = smov (!%p12711_p0), 0  }
  0x66   : > { %s14051_s27 = smov (!%p12711_p0), 0  }
  0x69 LB: >> { %v353_v22 = vld [vmem:[%s13765_s28 + $0x48] sm:$0xff]  ;;  %v355_v23 = vld [vmem:[%s13765_s28 + $0x50] sm:$0xff]  ;;  %v335_v24 = vld [vmem:[%s13765_s28] sm:$0xff]  ;;  %s399_s22 = sadd.s32 1, %s13769_s24  ;;  %s329_s27 = sadd.s32 1, %s13773_s27   ;;  %s13773_s27 = sphi %s14051_s27, %s329_s27   ;;  %s13769_s24 = sphi %s14049_s24, %s18490_s24   ;;  %s13765_s28 = sphi %s18487_s28, %s18489_s28   ;;  %s13761_s19 = sphi %s18486_s19, %s18488_s19  }
  0x6a   : >> { %368 = vst [vmem:[%s13761_s19 + $0x20] sm:$0xff] %v353_v22  ;;  %v337_v25 = vld [vmem:[%s13765_s28 + $0x8] sm:$0xff]  ;;  %v339_v26 = vld [vmem:[%s13765_s28 + $0x10] sm:$0xff]  ;;  %v341_v27 = vld [vmem:[%s13765_s28 + $0x18] sm:$0xff]  ;;  %p400_p1 = scmp.ge.s32.totalorder %s399_s22, %s14040_s9  ;;  %p328_p2 = scmp.ge.s32.totalorder %s329_s27, %s14040_s9 }
  0x6b   : >> { %370 = vst [vmem:[%s13761_s19 + $0x28] sm:$0xff] %v355_v23  ;;  %v357_v28 = vld [vmem:[%s13765_s28 + $0x58] sm:$0xff]  ;;  %v359_v29 = vld [vmem:[%s13765_s28 + $0x60] sm:$0xff]  ;;  %v361_v30 = vld [vmem:[%s13765_s28 + $0x68] sm:$0xff] }
  0x6c   : >> { %336 = vst [vmem:[%s13761_s19] sm:$0xff] %v335_v24  ;;  %s18507_s22 = smov (%p400_p1, %s399_s22), 0  ;;  %v363_v31 = vld [vmem:[%s13765_s28 + $0x70] sm:$0xff]  ;;  %v365_v32 = vld [vmem:[%s13765_s28 + $0x78] sm:$0xff]  ;;  %v381_v33 = vld [vmem:[%s13765_s28 + $0x80] sm:$0xff] }
  0x6d   : >> { %338 = vst [vmem:[%s13761_s19 + $0x8] sm:$0xff] %v337_v25  ;;  %s12712_s14 = sshll.u32 %s18507_s22, 7  ;;  %v383_v34 = vld [vmem:[%s13765_s28 + $0x88] sm:$0xff]  ;;  %v385_v35 = vld [vmem:[%s13765_s28 + $0x90] sm:$0xff]  ;;  %v387_v36 = vld [vmem:[%s13765_s28 + $0x98] sm:$0xff]  ;;  %s18490_s24 = smov %s18507_s22 }
  0x6e   : >> { %340 = vst [vmem:[%s13761_s19 + $0x10] sm:$0xff] %v339_v26  ;;  %s404_s29 = scalar_lea.vmem %s13918_s25, %s12712_s14   ;;  %s405_s0 = scalar_lea.vmem %s13922_s5, %s12712_s14 [#allocation2]   ;;  %v389_v37 = vld [vmem:[%s13765_s28 + $0xa0] sm:$0xff]  ;;  %v391_v38 = vld [vmem:[%s13765_s28 + $0xa8] sm:$0xff]  ;;  %v393_v39 = vld [vmem:[%s13765_s28 + $0xb0] sm:$0xff] }
  0x6f   : >> { %342 = vst [vmem:[%s13761_s19 + $0x18] sm:$0xff] %v341_v27  ;;  %v395_v40 = vld [vmem:[%s13765_s28 + $0xb8] sm:$0xff]  ;;  %v397_v41 = vld [vmem:[%s13765_s28 + $0xc0] sm:$0xff]  ;;  %s18489_s28 = smov %s404_s29 }
  0x70   : >> { %372 = vst [vmem:[%s13761_s19 + $0x30] sm:$0xff] %v357_v28 }
  0x71   : >> { %374 = vst [vmem:[%s13761_s19 + $0x38] sm:$0xff] %v359_v29 }
  0x72   : >> { %376 = vst [vmem:[%s13761_s19 + $0x40] sm:$0xff] %v361_v30 }
  0x73   : >> { %378 = vst [vmem:[%s13761_s19 + $0x48] sm:$0xff] %v363_v31 }
  0x74   : >> { %380 = vst [vmem:[%s13761_s19 + $0x50] sm:$0xff] %v365_v32 }
  0x75   : >> { %382 = vst [vmem:[%s13761_s19 + $0x58] sm:$0xff] %v381_v33 }
  0x76   : >> { %384 = vst [vmem:[%s13761_s19 + $0x60] sm:$0xff] %v383_v34 }
  0x77   : >> { %386 = vst [vmem:[%s13761_s19 + $0x68] sm:$0xff] %v385_v35 }
  0x78   : >> { %388 = vst [vmem:[%s13761_s19 + $0x70] sm:$0xff] %v387_v36 }
  0x79   : >> { %390 = vst [vmem:[%s13761_s19 + $0x78] sm:$0xff] %v389_v37  ;;  %331 = sbr.rel (!%p328_p2) target bundleno = 105 (0x69), region = 301 }
  0x7a   : >> { %392 = vst [vmem:[%s13761_s19 + $0x80] sm:$0xff] %v391_v38 }
  0x7b   : >> { %394 = vst [vmem:[%s13761_s19 + $0x88] sm:$0xff] %v393_v39 }
  0x7c   : >> { %396 = vst [vmem:[%s13761_s19 + $0x90] sm:$0xff] %v395_v40 }
  0x7d   : >> { %398 = vst [vmem:[%s13761_s19 + $0x98] sm:$0xff] %v397_v41  ;;  %s18488_s19 = smov %s405_s0 }
  0x7e PF: > { %s14122_s6 = sand.u32 15, %s324_s11   ;;  %s13369_s14 = sshll.u32 %s14040_s9, 7 }
  0x7f   : > { %s14126_s23 = scalar_lea.vmem %s13918_s25, %s13369_s14   ;;  %s412_s10 = scalar_lea.vmem %s13922_s5, %s13369_s14 [#allocation2]  }
  0x80   : > { %p12717_p3 = scmp.le.s32.totalorder %s14122_s6, 0 }
  0x81   : > { %s13775_s29 = smov (!%p12717_p3), %s412_s10   ;;  %s13779_s22 = smov (!%p12717_p3), %s14126_s23  }
  0x82   : > { %12653 = sbr.rel (%p12717_p3) target bundleno = 143 (0x8f), region = 306  ;;  %s13783_s27 = smov (!%p12717_p3), 0  }
  0x83   : > { %s13787_s0 = smov (!%p12717_p3), 0  }
  0x87 LB: >> { %v422_v42 = vld [vmem:[%s13781_s22] sm:$0xff]  ;;  %v424_v43 = vld [vmem:[%s13781_s22 + $0x48] sm:$0xff]  ;;  %s426_s11 = sadd.s32 1, %s13785_s27  ;;  %s416_s0 = sadd.s32 1, %s13789_s0   ;;  %s13789_s0 = sphi %s13787_s0, %s416_s0   ;;  %s13785_s27 = sphi %s13783_s27, %s13784_s27   ;;  %s13781_s22 = sphi %s13779_s22, %s431_s22   ;;  %s13777_s29 = sphi %s13775_s29, %s432_s29  }
  0x88   : >> { %423 = vst [vmem:[%s13777_s29] sm:$0xff] %v422_v42  ;;  %p427_p4 = scmp.ge.s32.totalorder %s426_s11, %s14122_s6  ;;  %p415_p5 = scmp.ge.s32.totalorder %s416_s0, %s14122_s6 }
  0x89   : >> { %425 = vst [vmem:[%s13777_s29 + $0x20] sm:$0xff] %v424_v43 }
  0x8a   : >> { %s18509_s11 = smov (%p427_p4, %s426_s11), 0  ;;  %418 = sbr.rel (!%p415_p5) target bundleno = 135 (0x87), region = 312 }
  0x8b   : >> { %s12718_s9 = sshll.u32 %s18509_s11, 3  ;;  %s13784_s27 = smov %s18509_s11  }
  0x8c   : >> { %s431_s22 = scalar_lea.vmem %s14126_s23, %s12718_s9   ;;  %s432_s29 = scalar_lea.vmem %s412_s10, %s12718_s9 [#allocation2]  }
  0x8f PF: > { %s13791_s19 = smov 1  }
  0x90   : > { %s433_s28 = sshll.u32 %s13791_s19, %s13926_s26 }
  0x91   : > { %s12720_s24 = sadd.s32 4294967295, %s433_s28 }
  0x92   : > { %v443_v44 = vld [vmem:[%s14033_s12] sm:%s12720_s24]  ;;  %v445_v45 = vld [vmem:[%s14033_s12 + $0x48] sm:%s12720_s24] }
  0x93   : > { %444 = vst [vmem:[%s14036_s13] sm:%s12720_s24] %v443_v44 }
  0x94   : > { %446 = vst [vmem:[%s14036_s13 + $0x20] sm:%s12720_s24] %v445_v45 }
  0x95 PF: > { %p12721_p6 = scmp.ge.u32.totalorder %s13920_s30, 8 }
  0x96   : > { %s13792_s14 = smov (!%p12721_p6), 1  }
  0x97   : > { %187 = sbr.rel (%p12721_p6) target bundleno = 159 (0x9f), region = 40  ;;  %s188_s23 = sshll.u32 (!%p12721_p6), %s13792_s14, %s13920_s30 }
  0x98   : > { %s12722_s10 = sadd.s32 (!%p12721_p6), 4294967295, %s188_s23 }
  0x9c   : > { %v198_v46 = vld [vmem:[%s13918_s25] sm:%s12722_s10]  ;;  %v200_v47 = vld [vmem:[%s13918_s25 + $0x48] sm:%s12722_s10] }
  0x9d   : > { %199 = vst [vmem:[%s13922_s5] sm:%s12722_s10] %v198_v46 }
  0x9e   : > { %201 = vst [vmem:[%s13922_s5 + $0x20] sm:%s12722_s10] %v200_v47 }
  0x9f PF: > { %450 = sbr.rel (!%p13888_p7) target bundleno = 165 (0xa5), region = 94  ;;  %s452_s26 = sand.u32 (%p13888_p7), 1, %s13713_s17  }
  0xa0   : > { %s12724_s12 = sshll.u32 (%p13888_p7), %s13725_s20, 5  ;;  %s12723_s13 = sshll.u32 (%p13888_p7), %s452_s26, 4 }
  0xa1   : > { %s12573_s30 = scalar_lea.vmem (%p13888_p7), %s18462_s1, %s12724_s12  ;;  %s454_s25 = scalar_lea.vmem (%p13888_p7), [#allocation3], %s12723_s13 }
  0xa2   : > { %v12725_v48 = vld [vmem:[%s12573_s30 + $0x20] sm:$0xff] (%p13888_p7)  ;;  %v12726_v49 = vld [vmem:[%s12573_s30 + $0x68] sm:$0xff] (%p13888_p7) }
  0xa3   : > { %490 = vst [vmem:[%s454_s25] sm:$0xff] (%p13888_p7), %v12725_v48 }
  0xa4   : > { %492 = vst [vmem:[%s454_s25 + $0x8] sm:$0xff] %v12726_v49 }
  0xa5 PF: > { %p12727_p9 = scmp.ge.s32.totalorder %s13725_s20, 1  ;;  %p497_p7 = scmp.lt.s32.totalorder %s13725_s20, 3 }
  0xa7   : > { %p498_p10 = pnand %p12727_p9, %p497_p7 }
  0xa8   : > { %s504_s7 = sand.u32 (!%p498_p10), 1, %s13717_s18   ;;  %s511_s22 = sand.u32 (!%p498_p10), 1, %s13709_s16  }
  0xa9   : > { %501 = sbr.rel (%p498_p10) target bundleno = 5895 (0x1707), region = 132  ;;  %s14157_s5 = sshll.u32 (!%p498_p10), %s504_s7, 6 }
  0xaa   : > { %s14161_s27 = scalar_lea.vmem (!%p498_p10), [#allocation2], %s14157_s5  ;;  %s12729_s0 = sshll.u32 (!%p498_p10), %s511_s22, 4 }
  0xab   : > { %s14170_s16 = scalar_lea.vmem (!%p498_p10), [#allocation3], %s12729_s0  ;;  %s13793_s11 = smov (!%p498_p10), 1  }
  0xac   : > { %s13794_s28 = smov (!%p498_p10), 127   ;;  %s12736_s13 = sshll.u32 (!%p498_p10), %s13861_s21, 9 }
  0xad   : > { %s12737_s6 = sadd.s32 (!%p498_p10), 4294967260, %s12736_s13  ;;  %s13797_s14 = smov (!%p498_p10), 3  }
  0xae   : > { %v551_v50 = vld [vmem:[%s14161_s27 + $0x10] sm:$0xff]  ;;  %v552_v51 = vld [vmem:[%s14161_s27 + $0x18] sm:$0xff]  ;;  %v549_v52 = vld [vmem:[%s14161_s27] sm:$0xff]  ;;  %vm701_vm10 = vcmask 1043456   ;;  %vm697_vm11 = vcmask 64512   ;;  %vm681_vm12 = vcmask 7168  }
  0xaf   : > { %vm602_vm0 = vcmp.ge.f32.partialorder %v551_v50, 0.0  ;;  %vm603_vm1 = vcmp.ge.f32.partialorder %v552_v51, 0.0  ;;  %v612_v53 = vmul.f32 0.1, %v551_v50  ;;  %v613_v54 = vmul.f32 0.1, %v552_v51 }
  0xb0   : > { %v550_v55 = vld [vmem:[%s14161_s27 + $0x8] sm:$0xff]  ;;  %vm600_vm2 = vcmp.ge.f32.partialorder %v549_v52, 0.0  ;;  %v610_v56 = vmul.f32 0.1, %v549_v52  ;;  %v12731_v61 = vld [vmem:[%s14161_s27 + $0x20] sm:$0xff]  ;;  %v12733_v0 = vld [vmem:[%s14161_s27 + $0x30] sm:$0xff] }
  0xb1   : > { %v12732_v57 = vld [vmem:[%s14161_s27 + $0x28] sm:$0xff]  ;;  %v622_v58 = vsel %vm602_vm0, %v551_v50, %v612_v53  ;;  %v623_v59 = vsel %vm603_vm1, %v552_v51, %v613_v54  ;;  %vm601_vm3 = vcmp.ge.f32.partialorder %v550_v55, 0.0  ;;  %v611_v60 = vmul.f32 0.1, %v550_v55  ;;  %v553_v1 = vld [vmem:[%s14170_s16] sm:$0xff]  ;;  %v12734_v20 = vld [vmem:[%s14161_s27 + $0x38] sm:$0xff] }
  0xb2   : > { %v631_v62 = vpack.c.bf16 %v623_v59, %v622_v58  ;;  %v620_v63 = vsel %vm600_vm2, %v549_v52, %v610_v56  ;;  %v616_v3 = vmul.f32 0.1, %v12732_v57  ;;  %vm604_vm4 = vcmp.ge.f32.partialorder %v553_v1, 0.0  ;;  %v12735_v21 = vld [vmem:[%s14170_s16 + $0x8] sm:$0xff]  ;;  %v12743_v44 = vld [vmem:[%s18463_s2 + $0x4] sm:$0xf] }
  0xb3   : > { %v621_v2 = vsel %vm601_vm3, %v550_v55, %v611_v60  ;;  %vm605_vm5 = vcmp.ge.f32.partialorder %v12731_v61, 0.0  ;;  %v617_v6 = vmul.f32 0.1, %v12733_v0  ;;  %v614_v7 = vmul.f32 0.1, %v553_v1  ;;  %s13799_s10 = smov 5  }
  0xb4   : > { %v643_v4 = vunpack.c.l.b16 %v631_v62  ;;  %v630_v5 = vpack.c.bf16 %v621_v2, %v620_v63  ;;  %v615_v8 = vmul.f32 0.1, %v12731_v61  ;;  %vm606_vm6 = vcmp.ge.f32.partialorder %v12732_v57, 0.0  ;;  %v14228_v58 = vld [vmem:[%s18463_s2] sm:$0xf]  ;;  %s13800_s12 = smov 123  }
  0xb5   : > { %vm607_vm7 = vcmp.ge.f32.partialorder %v12733_v0, 0.0  ;;  %v624_v11 = vsel %vm604_vm4, %v553_v1, %v614_v7  ;;  %v644_v14 = vunpack.c.h.b16 %v631_v62  ;;  %v626_v16 = vsel %vm606_vm6, %v12732_v57, %v616_v3  ;;  %s539_s26 = scalar_lea.vmem [#allocation4], %s14157_s5  ;;  %s13371_s13 = sshll.u32 %s13861_s21, 5 }
  0xb6   : > { %v14173_v9 = vpack.c.b16 %v643_v4, %v643_v4  ;;  %v641_v10 = vunpack.c.l.b16 %v630_v5  ;;  %v625_v12 = vsel %vm605_vm5, %v12731_v61, %v615_v8  ;;  %v627_v17 = vsel %vm607_vm7, %v12733_v0, %v617_v6  ;;  %s12501_s21 = scalar_lea.sflag [#allocation5], %s504_s7  ;;  %s13603_s22 = scalar_lea.hbm %s18465_s4, 128 }
  0xb7   : > { %v632_v15 = vpack.c.bf16 %v625_v12, %v624_v11  ;;  %v642_v18 = vunpack.c.h.b16 %v630_v5  ;;  %v654_v22 = vpack.c.b16 %v644_v14, %v644_v14  ;;  %v633_v23 = vpack.c.bf16 %v627_v17, %v626_v16 }
  0xb8   : > { %665 = vrot.lane.b32.xlu1 %v14173_v9, %s13793_s11  ;;  %v651_v13 = vpack.c.b16 %v641_v10, %v641_v10  ;;  %v618_v25 = vmul.f32 0.1, %v12734_v20  ;;  %v619_v26 = vmul.f32 0.1, %v12735_v21  ;;  %vm608_vm8 = vcmp.ge.f32.partialorder %v12734_v20, 0.0 }
  0xb9   : > { %v645_v19 = vunpack.c.l.b16 %v632_v15  ;;  %v652_v27 = vpack.c.b16 %v642_v18, %v642_v18  ;;  %vm609_vm9 = vcmp.ge.f32.partialorder %v12735_v21, 0.0  ;;  %v646_v28 = vunpack.c.h.b16 %v632_v15 }
  0xba   : > { %661 = vrot.lane.b32.xlu0 %v651_v13, %s13793_s11  ;;  %v648_v29 = vunpack.c.h.b16 %v633_v23  ;;  %v628_v30 = vsel %vm608_vm8, %v12734_v20, %v618_v25  ;;  %v629_v31 = vsel %vm609_vm9, %v12735_v21, %v619_v26  ;;  %v647_v32 = vunpack.c.l.b16 %v633_v23 }
  0xbb   : > { %v655_v24 = vpack.c.b16 %v645_v19, %v645_v19  ;;  %v656_v33 = vpack.c.b16 %v646_v28, %v646_v28  ;;  %v634_v35 = vpack.c.bf16 %v629_v31, %v628_v30  ;;  %v703_v40 = vsel %vm701_vm10, %v651_v13, 0 }
  0xbc   : > { %v658_v34 = vpack.c.b16 %v648_v29, %v648_v29  ;;  %v657_v36 = vpack.c.b16 %v647_v32, %v647_v32  ;;  %v706_v41 = vsel %vm701_vm10, %v652_v27, 0  ;;  %v709_v42 = vsel %vm701_vm10, %v14173_v9, 0  ;;  %739 = vmatpush.bf16.msra.mxu0 %v703_v40 }
  0xbd   : > { %669 = vrot.lane.b32.xlu2 %v655_v24, %s13793_s11  ;;  %v649_v37 = vunpack.c.l.b16 %v634_v35  ;;  %v650_v38 = vunpack.c.h.b16 %v634_v35  ;;  %v712_v43 = vsel %vm701_vm10, %v654_v22, 0  ;;  %752 = vmatpush.bf16.msra.mxu1 %v706_v41  ;;  %v715_v45 = vsel %vm701_vm10, %v655_v24, 0 }
  0xbe   : > { %765 = vmatpush.bf16.msra.mxu2 %v709_v42  ;;  %778 = vmatpush.bf16.msra.mxu3 %v712_v43  ;;  %v718_v47 = vsel %vm701_vm10, %v656_v33, 0  ;;  %v721_v48 = vsel %vm701_vm10, %v657_v36, 0  ;;  %v724_v49 = vsel %vm701_vm10, %v658_v34, 0  ;;  %vm1046_vm13 = vcmask 1039360   ;;  %v1231_v43 = vld [vmem:[%s18464_s3] sm:$0xff] }
  0xbf   : > { %v659_v39 = vpack.c.b16 %v649_v37, %v649_v37  ;;  %v660_v46 = vpack.c.b16 %v650_v38, %v650_v38  ;;  %12744 = vmatmul.msk.bf16.vlgmr.msra.gmra.mxu0 %vm697_vm11, %v12743_v44  ;;  %v12764_v37 = vld [vmem:[%s18463_s2 + $0x8] sm:$0xf] }
  0xc0   : > { %667 = vrot.lane.b32.xlu1 %v654_v22, %s13793_s11  ;;  %791 = vmatpush.bf16.msrb.mxu0 %v715_v45 }
  0xc1   : > { %12745 = vmatmul.msk.bf16.vlgmr.msra.gmra.mxu1 %vm697_vm11, %v12743_v44  ;;  %12746 = vmatmul.msk.bf16.vlgmr.msra.gmra.mxu2 %vm697_vm11, %v12743_v44  ;;  %v727_v50 = vsel %vm701_vm10, %v659_v39, 0  ;;  %v730_v51 = vsel %vm701_vm10, %v660_v46, 0 }
  0xc2   : > { %663 = vrot.lane.b32.xlu0 %v652_v27, %s13793_s11  ;;  %12747 = vmatmul.msk.bf16.vlgmr.msra.gmra.mxu3 %vm697_vm11, %v12743_v44 }
  0xc3   : > { %804 = vmatpush.bf16.msrb.mxu1 %v718_v47  ;;  %817 = vmatpush.bf16.msrb.mxu2 %v721_v48 }
  0xc4   : > { %830 = vmatpush.bf16.msrb.mxu3 %v724_v49  ;;  %843 = vmatpush.bf16.msra.mxu0 %v727_v50 }
  0xc5   : > { %671 = vrot.lane.b32.xlu2 %v656_v33, %s13793_s11 }
  0xc7   : > { %856 = vmatpush.bf16.msra.mxu1 %v730_v51 }
  0xc8   : > { %675 = vrot.lane.b32.xlu1 %v658_v34, %s13793_s11 }
  0xca   : > { %673 = vrot.lane.b32.xlu0 %v657_v36, %s13793_s11 }
  0xcd   : > { %677 = vrot.lane.b32.xlu2 %v659_v39, %s13793_s11 }
  0xcf   : > { %12748 = vmatmul.msk.bf16.vlgmr.msrb.gmra.mxu0 %vm697_vm11, %v12743_v44 }
  0xd0   : > { %1026 = vrot.lane.b32.xlu1 %v651_v13, %s13794_s28 }
  0xd1   : > { %12749 = vmatmul.msk.bf16.vlgmr.msrb.gmra.mxu1 %vm697_vm11, %v12743_v44  ;;  %12750 = vmatmul.msk.bf16.vlgmr.msrb.gmra.mxu2 %vm697_vm11, %v12743_v44 }
  0xd2   : > { %679 = vrot.lane.b32.xlu0 %v660_v46, %s13793_s11  ;;  %12751 = vmatmul.msk.bf16.vlgmr.msrb.gmra.mxu3 %vm697_vm11, %v12743_v44 }
  0xd5   : > { %1028 = vrot.lane.b32.xlu2 %v652_v27, %s13794_s28 }
  0xd8   : > { %1032 = vrot.lane.b32.xlu1 %v654_v22, %s13794_s28 }
  0xda   : > { %1030 = vrot.lane.b32.xlu0 %v14173_v9, %s13794_s28 }
  0xdd   : > { %1034 = vrot.lane.b32.xlu2 %v655_v24, %s13794_s28 }
  0xdf   : > { %12752 = vmatmul.msk.bf16.vlgmr.msra.gmra.mxu0 %vm697_vm11, %v12743_v44 }
  0xe0   : > { %1038 = vrot.lane.b32.xlu1 %v657_v36, %s13794_s28 }
  0xe1   : > { %12753 = vmatmul.msk.bf16.vlgmr.msra.gmra.mxu1 %vm697_vm11, %v12743_v44 }
  0xe2   : > { %1036 = vrot.lane.b32.xlu0 %v656_v33, %s13794_s28 }
  0xe5   : > { %1040 = vrot.lane.b32.xlu2 %v658_v34, %s13794_s28 }
  0xe8   : > { %1044 = vrot.lane.b32.xlu1 %v660_v46, %s13794_s28  ;;  %v13795_v46 = vmov 0  }
  0xe9   : > { %13571 = vset.pattern.permute.xlu2 %v13795_v46  ;;  %13572 = vset.pattern.permute.xlu0 %v13795_v46 }
  0xea   : > { %1042 = vrot.lane.b32.xlu0 %v659_v39, %s13794_s28 }
  0xed   : > { %1234 = vperm.xlu2 %13571, %v1231_v43  }
 0x117   : > { %v670_v52 = vpop.permute.xlu2 %669 }
 0x11f   : > { %v672_v55 = vpop.permute.xlu2 %671 }
 0x120   : > { %v686_v60 = vsel %vm681_vm12, %v670_v52, %v672_v55 }
 0x121   : > { %v880_v5 = vsel %vm701_vm10, %v686_v60, 0 }
 0x127   : > { %v678_v2 = vpop.permute.xlu2 %677 }
 0x12a   : > { %v666_v53 = vpop.permute.xlu1 %665 }
 0x12c   : > { %v662_v54 = vpop.permute.xlu0 %661 }
 0x12d   : > { %v694_v56 = vsel %vm681_vm12, 0, %v662_v54 }
 0x12e   : > { %v865_v57 = vsel %vm701_vm10, %v694_v56, 0 }
 0x12f   : > { %901 = vmatpush.bf16.msra.mxu2 %v865_v57  ;;  %v1029_v16 = vpop.permute.xlu2 %1028 }
 0x132   : > { %12754 = vmatmul.msk.bf16.vlgmr.msra.gmra.mxu2 %vm697_vm11, %v14228_v58  ;;  %v668_v59 = vpop.permute.xlu1 %667 }
 0x133   : > { %v684_v61 = vsel %vm681_vm12, %v666_v53, %v668_v59  ;;  %v685_v62 = vsel %vm681_vm12, %v668_v59, %v670_v52 }
 0x134   : > { %v664_v63 = vpop.permute.xlu0 %663  ;;  %v874_v0 = vsel %vm701_vm10, %v684_v61, 0  ;;  %v877_v1 = vsel %vm701_vm10, %v685_v62, 0 }
 0x135   : > { %v682_v3 = vsel %vm681_vm12, %v662_v54, %v664_v63  ;;  %v683_v4 = vsel %vm681_vm12, %v664_v63, %v666_v53  ;;  %940 = vmatpush.bf16.msrb.mxu1 %v874_v0  ;;  %953 = vmatpush.bf16.msrb.mxu2 %v877_v1 }
 0x136   : > { %v868_v6 = vsel %vm701_vm10, %v682_v3, 0  ;;  %v871_v7 = vsel %vm701_vm10, %v683_v4, 0 }
 0x137   : > { %914 = vmatpush.bf16.msra.mxu3 %v868_v6  ;;  %927 = vmatpush.bf16.msrb.mxu0 %v871_v7  ;;  %v1035_v23 = vpop.permute.xlu2 %1034 }
 0x138   : > { %12757 = vmatmul.msk.bf16.vlgmr.msrb.gmra.mxu1 %vm697_vm11, %v14228_v58 }
 0x13a   : > { %12755 = vmatmul.msk.bf16.vlgmr.msra.gmra.mxu3 %vm697_vm11, %v14228_v58  ;;  %12756 = vmatmul.msk.bf16.vlgmr.msrb.gmra.mxu0 %vm697_vm11, %v14228_v58  ;;  %v676_v8 = vpop.permute.xlu1 %675 }
 0x13b   : > { %966 = vmatpush.bf16.msrb.mxu3 %v880_v5  ;;  %v689_v9 = vsel %vm681_vm12, %v676_v8, %v678_v2 }
 0x13c   : > { %v674_v10 = vpop.permute.xlu0 %673  ;;  %v889_v11 = vsel %vm701_vm10, %v689_v9, 0  ;;  %v14290_v44 = vpop.f32.mrf.mxu0 }
 0x13d   : > { %v687_v12 = vsel %vm681_vm12, %v672_v55, %v674_v10  ;;  %v688_v13 = vsel %vm681_vm12, %v674_v10, %v676_v8  ;;  %1005 = vmatpush.bf16.msra.mxu2 %v889_v11 }
 0x13e   : > { %v883_v14 = vsel %vm701_vm10, %v687_v12, 0  ;;  %v886_v15 = vsel %vm701_vm10, %v688_v13, 0  ;;  %v14293_v47 = vpop.f32.mrf.mxu1 }
 0x13f   : > { %979 = vmatpush.bf16.msra.mxu0 %v883_v14  ;;  %992 = vmatpush.bf16.msra.mxu1 %v886_v15  ;;  %v1041_v32 = vpop.permute.xlu2 %1040  ;;  %v561_v15 = vlaneseq }
 0x142   : > { %12758 = vmatmul.msk.bf16.vlgmr.msrb.gmra.mxu2 %vm697_vm11, %v14228_v58  ;;  %v1027_v17 = vpop.permute.xlu1 %1026 }
 0x143   : > { %v1047_v18 = vsel %vm1046_vm13, %v1027_v17, %v1029_v16 }
 0x144   : > { %v680_v19 = vpop.permute.xlu0 %679  ;;  %v1063_v20 = vsel %vm701_vm10, %v1047_v18, 0  ;;  %v14295_v48 = vpop.f32.mrf.mxu2  ;;  %v562_v18 = vand.u32 127, %v561_v15 }
 0x145   : > { %v690_v21 = vsel %vm681_vm12, %v678_v2, %v680_v19  ;;  %1098 = vmatpush.bf16.msrb.mxu0 %v1063_v20  ;;  %v14298_v51 = vpop.f32.mrf.mxu3  ;;  %v743_v56 = vpop.f32.mrf.mxu0 }
 0x146   : > { %v892_v22 = vsel %vm701_vm10, %v690_v21, 0  ;;  %v756_v57 = vpop.f32.mrf.mxu1  ;;  %v563_v21 = vadd.s32 128, %v562_v18 }
 0x147   : > { %1018 = vmatpush.bf16.msra.mxu3 %v892_v22  ;;  %v569_v22 = vstv %s12737_s6 }
 0x148   : > { %12761 = vmatmul.msk.bf16.vlgmr.msra.gmra.mxu1 %vm697_vm11, %v14228_v58 }
 0x14a   : > { %12759 = vmatmul.msk.bf16.vlgmr.msrb.gmra.mxu3 %vm697_vm11, %v14228_v58  ;;  %12760 = vmatmul.msk.bf16.vlgmr.msra.gmra.mxu0 %vm697_vm11, %v14228_v58  ;;  %v1033_v24 = vpop.permute.xlu1 %1032 }
 0x14b   : > { %v1050_v25 = vsel %vm1046_vm13, %v1033_v24, %v1035_v23 }
 0x14c   : > { %v1031_v26 = vpop.permute.xlu0 %1030  ;;  %v1072_v27 = vsel %vm701_vm10, %v1050_v25, 0  ;;  %v571_v25 = vadd.s32 %v569_v22, %v563_v21 }
 0x14d   : > { %v1048_v28 = vsel %vm1046_vm13, %v1029_v16, %v1031_v26  ;;  %v1049_v29 = vsel %vm1046_vm13, %v1031_v26, %v1033_v24  ;;  %1137 = vmatpush.bf16.msrb.mxu3 %v1072_v27  ;;  %v782_v59 = vpop.f32.mrf.mxu3  ;;  %v14308_v60 = vpop.f32.mrf.mxu0  ;;  %v570_v27 = vadd.s32 %v569_v22, %v562_v18 }
 0x14e   : > { %v1066_v30 = vsel %vm701_vm10, %v1048_v28, 0  ;;  %v1069_v31 = vsel %vm701_vm10, %v1049_v29, 0  ;;  %v14310_v61 = vpop.f32.mrf.mxu1  ;;  %vm576_vm14 = vcmp.ge.s32.totalorder %v571_v25, 0  ;;  %vm581_vm15 = vcmp.lt.s32.totalorder %v571_v25, 1024 }
 0x14f   : > { %1111 = vmatpush.bf16.msrb.mxu1 %v1066_v30  ;;  %1124 = vmatpush.bf16.msrb.mxu2 %v1069_v31  ;;  %vm575_vm0 = vcmp.ge.s32.totalorder %v570_v27, 0  ;;  %vm580_vm1 = vcmp.lt.s32.totalorder %v570_v27, 1024  ;;  %vm586_vm2 = vmand %vm576_vm14, %vm581_vm15 }
 0x150   : > { %vm585_vm3 = vmand %vm575_vm0, %vm580_vm1 }
 0x152   : > { %12762 = vmatmul.msk.bf16.vlgmr.msra.gmra.mxu2 %vm697_vm11, %v14228_v58  ;;  %v1039_v33 = vpop.permute.xlu1 %1038 }
 0x153   : > { %v1053_v34 = vsel %vm1046_vm13, %v1039_v33, %v1041_v32 }
 0x154   : > { %v1037_v35 = vpop.permute.xlu0 %1036  ;;  %v1081_v36 = vsel %vm701_vm10, %v1053_v34, 0  ;;  %v14337_v34 = vpop.permute.xlu2 %1234 }
 0x155   : > { %v1051_v38 = vsel %vm1046_vm13, %v1035_v23, %v1037_v35  ;;  %v1052_v39 = vsel %vm1046_vm13, %v1037_v35, %v1039_v33  ;;  %1176 = vmatpush.bf16.msra.mxu2 %v1081_v36  ;;  %v14314_v63 = vpop.f32.mrf.mxu3  ;;  %v795_v0 = vpop.f32.mrf.mxu0 }
 0x156   : > { %v1075_v40 = vsel %vm701_vm10, %v1051_v38, 0  ;;  %v1078_v41 = vsel %vm701_vm10, %v1052_v39, 0  ;;  %v808_v1 = vpop.f32.mrf.mxu1 }
 0x157   : > { %1150 = vmatpush.bf16.msra.mxu0 %v1075_v40  ;;  %1163 = vmatpush.bf16.msra.mxu1 %v1078_v41 }
 0x158   : > { %12766 = vmatmul.msk.bf16.vlgmr.msrb.gmra.mxu1 %vm697_vm11, %v12764_v37 }
 0x15a   : > { %12763 = vmatmul.msk.bf16.vlgmr.msra.gmra.mxu3 %vm697_vm11, %v14228_v58  ;;  %12765 = vmatmul.msk.bf16.vlgmr.msrb.gmra.mxu0 %vm697_vm11, %v12764_v37  ;;  %v1045_v42 = vpop.permute.xlu1 %1044  ;;  %v769_v58 = vpop.f32.mrf.mxu2 }
 0x15b   : > { %v1058_v45 = vsel %vm1046_vm13, %v1045_v42, 0  ;;  %v565_v58 = vadd.s32 384, %v562_v18 }
 0x15c   : > { %v1043_v49 = vpop.permute.xlu0 %1042  ;;  %v1089_v50 = vsel %vm701_vm10, %v1058_v45, 0  ;;  %v566_v45 = vadd.s32 512, %v562_v18 }
 0x15d   : > { %v1054_v52 = vsel %vm1046_vm13, %v1041_v32, %v1043_v49  ;;  %v1055_v53 = vsel %vm1046_vm13, %v1043_v49, %v1045_v42  ;;  %1215 = vmatpush.bf16.msrb.mxu1 %v1089_v50  ;;  %v834_v3 = vpop.f32.mrf.mxu3  ;;  %v14320_v4 = vpop.f32.mrf.mxu0 }
 0x15e   : > { %v1084_v54 = vsel %vm701_vm10, %v1054_v52, 0  ;;  %v1087_v55 = vsel %vm701_vm10, %v1055_v53, 0  ;;  %v14322_v5 = vpop.f32.mrf.mxu1  ;;  %v564_v52 = vadd.s32 256, %v562_v18  ;;  %v574_v57 = vadd.s32 %v569_v22, %v566_v45 }
 0x15f   : > { %1189 = vmatpush.bf16.msra.mxu3 %v1084_v54  ;;  %1202 = vmatpush.bf16.msrb.mxu0 %v1087_v55  ;;  %v573_v3 = vadd.s32 %v569_v22, %v565_v58 }
 0x160   : > { %vm579_vm6 = vcmp.ge.s32.totalorder %v574_v57, 0  ;;  %vm584_vm7 = vcmp.lt.s32.totalorder %v574_v57, 1024 }
 0x161   : > { %vm589_vm8 = vmand %vm579_vm6, %vm584_vm7  ;;  %vm578_vm15 = vcmp.ge.s32.totalorder %v573_v3, 0  ;;  %vm583_vm0 = vcmp.lt.s32.totalorder %v573_v3, 1024 }
 0x162   : > { %12767 = vmatmul.msk.bf16.vlgmr.msrb.gmra.mxu2 %vm697_vm11, %v12764_v37  ;;  %v14312_v62 = vpop.f32.mrf.mxu2 }
 0x165   : > { %v847_v6 = vpop.f32.mrf.mxu0 }
 0x166   : > { %v860_v7 = vpop.f32.mrf.mxu1 }
 0x168   : > { %12770 = vmatmul.msk.bf16.vlgmr.msra.gmra.mxu1 %vm697_vm11, %v12764_v37 }
 0x16a   : > { %12768 = vmatmul.msk.bf16.vlgmr.msrb.gmra.mxu3 %vm697_vm11, %v12764_v37  ;;  %12769 = vmatmul.msk.bf16.vlgmr.msra.gmra.mxu0 %vm697_vm11, %v12764_v37  ;;  %v821_v2 = vpop.f32.mrf.mxu2 }
 0x16b   : > { %v572_v2 = vadd.s32 %v569_v22, %v564_v52 }
 0x16d   : > { %vm577_vm9 = vcmp.ge.s32.totalorder %v572_v2, 0  ;;  %vm582_vm14 = vcmp.lt.s32.totalorder %v572_v2, 1024 }
 0x16e   : > { %vm587_vm1 = vmand %vm577_vm9, %vm582_vm14 }
 0x172   : > { %12771 = vmatmul.msk.bf16.vlgmr.msra.gmra.mxu2 %vm697_vm11, %v12764_v37 }
 0x178   : > { %12774 = vmatmul.msk.bf16.vlgmr.msrb.gmra.mxu1 %vm697_vm11, %v12764_v37 }
 0x17a   : > { %12772 = vmatmul.msk.bf16.vlgmr.msra.gmra.mxu3 %vm697_vm11, %v12764_v37  ;;  %12773 = vmatmul.msk.bf16.vlgmr.msrb.gmra.mxu0 %vm697_vm11, %v12764_v37  ;;  %v13796_v37 = vmov 0.0  }
 0x17b   : > { %v12739_v38 = vsel %vm586_vm2, 1.0, %v13796_v37  ;;  %v12738_v40 = vsel %vm585_vm3, 1.0, %v13796_v37  ;;  %vm588_vm2 = vmand %vm578_vm15, %vm583_vm0 }
 0x17c   : > { %v14343_v43 = vperm.slane %v12739_v38, 0  ;;  %v14345_v46 = vperm.slane %v12738_v40, 0 }
 0x1b5   : > { %v903_v8 = vpop.f32.mrf.mxu2  ;;  %v14324_v9 = vpop.f32.mrf.mxu1 }
 0x1b6   : > { %v904_v32 = vadd.f32 %v903_v8, %v14290_v44 }
 0x1b7   : > { %v14326_v10 = vpop.f32.mrf.mxu0 }
 0x1b8   : > { %v930_v8 = vadd.f32 %v14326_v10, %v14295_v48  ;;  %v12742_v10 = vsel %vm589_vm8, 1.0, %v13796_v37 }
 0x1bd   : > { %v905_v11 = vpop.f32.mrf.mxu2  ;;  %v916_v12 = vpop.f32.mrf.mxu3 }
 0x1be   : > { %v944_v13 = vpop.f32.mrf.mxu1  ;;  %v917_v29 = vadd.f32 %v916_v12, %v14293_v47 }
 0x1bf   : > { %v931_v14 = vpop.f32.mrf.mxu0 }
 0x1c5   : > { %v918_v16 = vpop.f32.mrf.mxu3  ;;  %v955_v17 = vpop.f32.mrf.mxu2 }
 0x1c6   : > { %v14329_v19 = vpop.f32.mrf.mxu1  ;;  %v956_v11 = vadd.f32 %v955_v17, %v14308_v60 }
 0x1c7   : > { %v14331_v20 = vpop.f32.mrf.mxu0 }
 0x1cd   : > { %v957_v23 = vpop.f32.mrf.mxu2  ;;  %v968_v24 = vpop.f32.mrf.mxu3 }
 0x1ce   : > { %v996_v26 = vpop.f32.mrf.mxu1  ;;  %v969_v12 = vadd.f32 %v968_v24, %v14310_v61  ;;  %v14371_v23 = vld [vmem:[%s18463_s2 + $0x10] sm:$0xf] }
 0x1cf   : > { %v983_v28 = vpop.f32.mrf.mxu0 }
 0x1d0   : > { %v14379_v28 = vperm.slane %v12742_v10, 0 }
 0x1d5   : > { %v970_v30 = vpop.f32.mrf.mxu3  ;;  %v14334_v31 = vpop.f32.mrf.mxu2 }
 0x1d6   : > { %v1113_v33 = vpop.f32.mrf.mxu1 }
 0x1d7   : > { %v1100_v35 = vpop.f32.mrf.mxu0  ;;  %v1222_v36 = vadd.f32 %v1113_v33, %v917_v29  ;;  %v943_v29 = vadd.f32 %v14324_v9, %v14298_v51 }
 0x1d8   : > { %v1221_v39 = vadd.f32 %v1100_v35, %v904_v32  ;;  %v12740_v32 = vsel %vm587_vm1, 1.0, %v13796_v37 }
 0x1d9   : > { %v1238_v41 = vadd.f32 %v14337_v34, %v1222_v36  ;;  %v12741_v36 = vsel %vm588_vm2, 1.0, %v13796_v37  ;;  %v14392_v9 = vperm.slane %v12740_v32, 0 }
 0x1da   : > { %v1237_v42 = vadd.f32 %v14337_v34, %v1221_v39 }
 0x1db   : > { %vm1248_vm4 = vcmp.ge.f32.partialorder %v1238_v41, 0.0  ;;  %v1258_v44 = vmul.f32 0.1, %v1238_v41 }
 0x1dc   : > { %vm1247_vm5 = vcmp.ge.f32.partialorder %v1237_v42, 0.0  ;;  %v1257_v47 = vmul.f32 0.1, %v1237_v42 }
 0x1dd   : > { %v1009_v49 = vpop.f32.mrf.mxu2  ;;  %v14347_v50 = vpop.f32.mrf.mxu3  ;;  %v1268_v53 = vsel %vm1248_vm4, %v1238_v41, %v1258_v44 }
 0x1de   : > { %v1115_v54 = vpop.f32.mrf.mxu1  ;;  %v1267_v55 = vsel %vm1247_vm5, %v1237_v42, %v1257_v47  ;;  %v1283_v56 = vmul.f32 %v14343_v43, %v1268_v53  ;;  %v14394_v49 = vperm.slane %v12741_v36, 0  ;;  %v1021_v57 = vadd.f32 %v14347_v50, %v14322_v5 }
 0x1df   : > { %v1102_v59 = vpop.f32.mrf.mxu0  ;;  %v1282_v0 = vmul.f32 %v14345_v46, %v1267_v55 }
 0x1e1   : > { %v1292_v1 = vpack.c.bf16 %v1283_v56, %v1282_v0  ;;  %v982_v56 = vadd.f32 %v14331_v20, %v14312_v62 }
 0x1e3   : > { %v1305_v6 = vunpack.c.h.b16 %v1292_v1  ;;  %v1304_v7 = vunpack.c.l.b16 %v1292_v1 }
 0x1e5   : > { %v1022_v13 = vpop.f32.mrf.mxu3  ;;  %v1126_v14 = vpop.f32.mrf.mxu2  ;;  %v14355_v15 = vpack.c.b16 %v1305_v6, %v1305_v6  ;;  %v14357_v16 = vpack.c.b16 %v1304_v7, %v1304_v7  ;;  %v1008_v7 = vadd.f32 %v14334_v31, %v14320_v4 }
 0x1e6   : > { %v1223_v18 = vadd.f32 %v1126_v14, %v930_v8  ;;  %v1165_v21 = vpop.f32.mrf.mxu1 }
 0x1e7   : > { %v1226_v22 = vadd.f32 %v1165_v21, %v969_v12  ;;  %1326 = vrot.lane.b32.xlu1 %v14355_v15, %s13793_s11  ;;  %1324 = vrot.lane.b32.xlu0 %v14357_v16, %s13793_s11  ;;  %v1152_v48 = vpop.f32.mrf.mxu0  ;;  %v1361_v60 = vsel %vm701_vm10, %v14357_v16, 0  ;;  %v1364_v61 = vsel %vm701_vm10, %v14355_v15, 0 }
 0x1e8   : > { %v1225_v17 = vadd.f32 %v1152_v48, %v956_v11  ;;  %1397 = vmatpush.bf16.msrb.mxu2 %v1361_v60  ;;  %1410 = vmatpush.bf16.msrb.mxu3 %v1364_v61  ;;  %v1239_v25 = vadd.f32 %v14337_v34, %v1223_v18  ;;  %v995_v61 = vadd.f32 %v14329_v19, %v14314_v63 }
 0x1e9   : > { %v1242_v24 = vadd.f32 %v14337_v34, %v1226_v22 }
 0x1ea   : > { %v1241_v26 = vadd.f32 %v14337_v34, %v1225_v17  ;;  %v1259_v39 = vmul.f32 0.1, %v1239_v25  ;;  %vm1249_vm5 = vcmp.ge.f32.partialorder %v1239_v25, 0.0 }
 0x1eb   : > { %vm1252_vm3 = vcmp.ge.f32.partialorder %v1242_v24, 0.0  ;;  %v1262_v27 = vmul.f32 0.1, %v1242_v24  ;;  %12777 = vmatmul.msk.bf16.vlgmr.msrb.gmra.mxu2 %vm697_vm11, %v14371_v23  ;;  %12778 = vmatmul.msk.bf16.vlgmr.msrb.gmra.mxu3 %vm697_vm11, %v14371_v23 }
 0x1ec   : > { %vm1251_vm4 = vcmp.ge.f32.partialorder %v1241_v26, 0.0  ;;  %v1261_v30 = vmul.f32 0.1, %v1241_v26  ;;  %v1269_v53 = vsel %vm1249_vm5, %v1239_v25, %v1259_v39 }
 0x1ed   : > { %v1272_v33 = vsel %vm1252_vm3, %v1242_v24, %v1262_v27  ;;  %v1128_v35 = vpop.f32.mrf.mxu2  ;;  %v1139_v38 = vpop.f32.mrf.mxu3  ;;  %v1284_v59 = vmul.f32 %v14392_v9, %v1269_v53 }
 0x1ee   : > { %v1287_v40 = vmul.f32 %v14345_v46, %v1272_v33  ;;  %v1271_v41 = vsel %vm1251_vm4, %v1241_v26, %v1261_v30  ;;  %v1224_v42 = vadd.f32 %v1139_v38, %v943_v29  ;;  %v1167_v45 = vpop.f32.mrf.mxu1 }
 0x1ef   : > { %v1286_v44 = vmul.f32 %v14379_v28, %v1271_v41  ;;  %v1154_v47 = vpop.f32.mrf.mxu0 }
 0x1f0   : > { %v1240_v51 = vadd.f32 %v14337_v34, %v1224_v42 }
 0x1f1   : > { %v1294_v52 = vpack.c.bf16 %v1287_v40, %v1286_v44 }
 0x1f2   : > { %vm1250_vm6 = vcmp.ge.f32.partialorder %v1240_v51, 0.0  ;;  %v1260_v37 = vmul.f32 0.1, %v1240_v51 }
 0x1f3   : > { %v1308_v54 = vunpack.c.l.b16 %v1294_v52  ;;  %v1309_v55 = vunpack.c.h.b16 %v1294_v52 }
 0x1f4   : > { %v1270_v58 = vsel %vm1250_vm6, %v1240_v51, %v1260_v37 }
 0x1f5   : > { %v1285_v0 = vmul.f32 %v14394_v49, %v1270_v58  ;;  %v1141_v1 = vpop.f32.mrf.mxu3  ;;  %v1178_v2 = vpop.f32.mrf.mxu2  ;;  %v14402_v3 = vpack.c.b16 %v1308_v54, %v1308_v54  ;;  %v14404_v6 = vpack.c.b16 %v1309_v55, %v1309_v55 }
 0x1f6   : > { %v1227_v8 = vadd.f32 %v1178_v2, %v982_v56  ;;  %v1217_v11 = vpop.f32.mrf.mxu1 }
 0x1f7   : > { %v1230_v62 = vadd.f32 %v1217_v11, %v1021_v57  ;;  %1332 = vrot.lane.b32.xlu1 %v14402_v3, %s13793_s11  ;;  %v1204_v5 = vpop.f32.mrf.mxu0  ;;  %v1373_v20 = vsel %vm701_vm10, %v14402_v3, 0  ;;  %v1376_v50 = vsel %vm701_vm10, %v14404_v6, 0  ;;  %v1293_v12 = vpack.c.bf16 %v1285_v0, %v1284_v59 }
 0x1f8   : > { %v1229_v13 = vadd.f32 %v1204_v5, %v1008_v7  ;;  %1449 = vmatpush.bf16.msra.mxu2 %v1373_v20  ;;  %1462 = vmatpush.bf16.msra.mxu3 %v1376_v50  ;;  %v1243_v18 = vadd.f32 %v14337_v34, %v1227_v8 }
 0x1f9   : > { %v1246_v14 = vadd.f32 %v14337_v34, %v1230_v62  ;;  %v1307_v4 = vunpack.c.h.b16 %v1293_v12  ;;  %v1306_v31 = vunpack.c.l.b16 %v1293_v12  ;;  %v12775_v62 = vld [vmem:[%s18463_s2 + $0xc] sm:$0xf] }
 0x1fa   : > { %v1245_v21 = vadd.f32 %v14337_v34, %v1229_v13  ;;  %v1263_v29 = vmul.f32 0.1, %v1243_v18  ;;  %vm1253_vm9 = vcmp.ge.f32.partialorder %v1243_v18, 0.0 }
 0x1fb   : > { %vm1256_vm7 = vcmp.ge.f32.partialorder %v1246_v14, 0.0  ;;  %v1266_v22 = vmul.f32 0.1, %v1246_v14  ;;  %v1317_v48 = vpack.c.b16 %v1307_v4, %v1307_v4  ;;  %v1316_v60 = vpack.c.b16 %v1306_v31, %v1306_v31  ;;  %12781 = vmatmul.msk.bf16.vlgmr.msra.gmra.mxu2 %vm697_vm11, %v14371_v23  ;;  %12782 = vmatmul.msk.bf16.vlgmr.msra.gmra.mxu3 %vm697_vm11, %v14371_v23 }
 0x1fc   : > { %vm1255_vm8 = vcmp.ge.f32.partialorder %v1245_v21, 0.0  ;;  %v1265_v10 = vmul.f32 0.1, %v1245_v21  ;;  %v1273_v39 = vsel %vm1253_vm9, %v1243_v18, %v1263_v29  ;;  %vm2006_vm9 = vcmask 23552  }
 0x1fd   : > { %v1276_v17 = vsel %vm1256_vm7, %v1246_v14, %v1266_v22  ;;  %v1180_v24 = vpop.f32.mrf.mxu2  ;;  %v1191_v25 = vpop.f32.mrf.mxu3  ;;  %1330 = vrot.lane.b32.xlu0 %v1317_v48, %s13793_s11  ;;  %1328 = vrot.lane.b32.xlu2 %v1316_v60, %s13793_s11  ;;  %v1367_v26 = vsel %vm701_vm10, %v1316_v60, 0  ;;  %v1370_v27 = vsel %vm701_vm10, %v1317_v48, 0  ;;  %v1288_v44 = vmul.f32 %v14343_v43, %v1273_v39 }
 0x1fe   : > { %v1291_v30 = vmul.f32 %v14379_v28, %v1276_v17  ;;  %v1275_v32 = vsel %vm1255_vm8, %v1245_v21, %v1265_v10  ;;  %v1228_v33 = vadd.f32 %v1191_v25, %v995_v61  ;;  %1423 = vmatpush.bf16.msra.mxu0 %v1367_v26  ;;  %1436 = vmatpush.bf16.msra.mxu1 %v1370_v27  ;;  %v1219_v63 = vpop.f32.mrf.mxu1 }
 0x1ff   : > { %v1290_v19 = vmul.f32 %v14394_v49, %v1275_v32  ;;  %v1206_v35 = vpop.f32.mrf.mxu0 }
 0x200   : > { %v1244_v36 = vadd.f32 %v14337_v34, %v1228_v33 }
 0x201   : > { %v1296_v38 = vpack.c.bf16 %v1291_v30, %v1290_v19  ;;  %12779 = vmatmul.msk.bf16.vlgmr.msra.gmra.mxu0 %vm697_vm11, %v14371_v23  ;;  %12780 = vmatmul.msk.bf16.vlgmr.msra.gmra.mxu1 %vm697_vm11, %v14371_v23 }
 0x202   : > { %vm1254_vm14 = vcmp.ge.f32.partialorder %v1244_v36, 0.0  ;;  %v1264_v40 = vmul.f32 0.1, %v1244_v36 }
 0x203   : > { %v1312_v41 = vunpack.c.l.b16 %v1296_v38  ;;  %v1313_v42 = vunpack.c.h.b16 %v1296_v38 }
 0x204   : > { %v1274_v45 = vsel %vm1254_vm14, %v1244_v36, %v1264_v40  ;;  %vm2368_vm14 = vcmask 1022976  }
 0x205   : > { %v1289_v47 = vmul.f32 %v14392_v9, %v1274_v45  ;;  %v1193_v51 = vpop.f32.mrf.mxu3  ;;  %1334 = vrot.lane.b32.xlu2 %v14404_v6, %s13793_s11  ;;  %v1322_v34 = vpack.c.b16 %v1312_v41, %v1312_v41  ;;  %v1323_v52 = vpack.c.b16 %v1313_v42, %v1313_v42 }
 0x207   : > { %v1385_v53 = vsel %vm701_vm10, %v1322_v34, 0  ;;  %v1388_v37 = vsel %vm701_vm10, %v1323_v52, 0  ;;  %v1295_v54 = vpack.c.bf16 %v1289_v47, %v1288_v44  ;;  %v12797_v47 = vld [vmem:[%s18463_s2 + $0x14] sm:$0xf] }
 0x208   : > { %1501 = vmatpush.bf16.msrb.mxu2 %v1385_v53  ;;  %1514 = vmatpush.bf16.msrb.mxu3 %v1388_v37 }
 0x209   : > { %v1311_v55 = vunpack.c.h.b16 %v1295_v54  ;;  %v1310_v56 = vunpack.c.l.b16 %v1295_v54 }
 0x20b   : > { %v1321_v57 = vpack.c.b16 %v1311_v55, %v1311_v55  ;;  %v1320_v58 = vpack.c.b16 %v1310_v56, %v1310_v56  ;;  %12785 = vmatmul.msk.bf16.vlgmr.msrb.gmra.mxu2 %vm697_vm11, %v14371_v23  ;;  %12786 = vmatmul.msk.bf16.vlgmr.msrb.gmra.mxu3 %vm697_vm11, %v14371_v23 }
 0x20d   : > { %1338 = vrot.lane.b32.xlu1 %v1321_v57, %s13793_s11  ;;  %1336 = vrot.lane.b32.xlu0 %v1320_v58, %s13793_s11  ;;  %v1379_v59 = vsel %vm701_vm10, %v1320_v58, 0  ;;  %v1382_v0 = vsel %vm701_vm10, %v1321_v57, 0 }
 0x20e   : > { %1340 = vrot.lane.b32.xlu2 %v1322_v34, %s13793_s11  ;;  %1475 = vmatpush.bf16.msrb.mxu0 %v1379_v59 }
 0x20f   : > { %1488 = vmatpush.bf16.msrb.mxu1 %v1382_v0 }
 0x211   : > { %12783 = vmatmul.msk.bf16.vlgmr.msrb.gmra.mxu0 %vm697_vm11, %v14371_v23 }
 0x212   : > { %12784 = vmatmul.msk.bf16.vlgmr.msrb.gmra.mxu1 %vm697_vm11, %v14371_v23 }
 0x215   : > { %1684 = vrot.lane.b32.xlu1 %v14357_v16, %s13794_s28  ;;  %1342 = vrot.lane.b32.xlu0 %v1323_v52, %s13793_s11  ;;  %v12808_v16 = vld [vmem:[%s18464_s3 + $0x8] sm:$0xff] }
 0x216   : > { %1686 = vrot.lane.b32.xlu2 %v14355_v15, %s13794_s28 }
 0x21d   : > { %1690 = vrot.lane.b32.xlu1 %v1317_v48, %s13794_s28  ;;  %1688 = vrot.lane.b32.xlu0 %v1316_v60, %s13794_s28 }
 0x21e   : > { %1692 = vrot.lane.b32.xlu2 %v14402_v3, %s13794_s28 }
 0x225   : > { %1696 = vrot.lane.b32.xlu1 %v1320_v58, %s13794_s28  ;;  %1694 = vrot.lane.b32.xlu0 %v14404_v6, %s13794_s28 }
 0x226   : > { %1698 = vrot.lane.b32.xlu2 %v1321_v57, %s13794_s28 }
 0x22d   : > { %1702 = vrot.lane.b32.xlu1 %v1323_v52, %s13794_s28  ;;  %1700 = vrot.lane.b32.xlu0 %v1322_v34, %s13794_s28 }
 0x22e   : > { %1891 = vperm.xlu2 %13571, %v12808_v16  }
 0x257   : > { %v1329_v15 = vpop.permute.xlu2 %1328 }
 0x259   : > { %v1327_v23 = vpop.permute.xlu1 %1326  ;;  %v1325_v1 = vpop.permute.xlu0 %1324 }
 0x25a   : > { %v1345_v2 = vsel %vm681_vm12, %v1327_v23, %v1329_v15  ;;  %v1344_v3 = vsel %vm681_vm12, %v1325_v1, %v1327_v23  ;;  %v1354_v6 = vsel %vm681_vm12, 0, %v1325_v1 }
 0x25b   : > { %v1523_v7 = vsel %vm701_vm10, %v1354_v6, 0  ;;  %v1526_v8 = vsel %vm701_vm10, %v1344_v3, 0  ;;  %v1529_v11 = vsel %vm701_vm10, %v1345_v2, 0 }
 0x25c   : > { %1559 = vmatpush.bf16.msra.mxu0 %v1523_v7  ;;  %1572 = vmatpush.bf16.msra.mxu1 %v1526_v8 }
 0x25d   : > { %1585 = vmatpush.bf16.msra.mxu2 %v1529_v11 }
 0x25f   : > { %12788 = vmatmul.msk.bf16.vlgmr.msra.gmra.mxu1 %vm697_vm11, %v12775_v62  ;;  %12787 = vmatmul.msk.bf16.vlgmr.msra.gmra.mxu0 %vm697_vm11, %v12775_v62  ;;  %v1335_v5 = vpop.permute.xlu2 %1334 }
 0x260   : > { %12789 = vmatmul.msk.bf16.vlgmr.msra.gmra.mxu2 %vm697_vm11, %v12775_v62 }
 0x268   : > { %v1341_v21 = vpop.permute.xlu2 %1340 }
 0x269   : > { %v1333_v20 = vpop.permute.xlu1 %1332 }
 0x26a   : > { %v1348_v50 = vsel %vm681_vm12, %v1333_v20, %v1335_v5 }
 0x26b   : > { %v1538_v12 = vsel %vm701_vm10, %v1348_v50, 0 }
 0x26c   : > { %1624 = vmatpush.bf16.msrb.mxu1 %v1538_v12 }
 0x26e   : > { %v14506_v35 = vpop.f32.mrf.mxu2  ;;  %v14524_v37 = vpop.f32.mrf.mxu3 }
 0x26f   : > { %v1331_v13 = vpop.permute.xlu0 %1330  ;;  %12792 = vmatmul.msk.bf16.vlgmr.msrb.gmra.mxu1 %vm697_vm11, %v12775_v62 }
 0x270   : > { %v1346_v14 = vsel %vm681_vm12, %v1329_v15, %v1331_v13  ;;  %v1347_v4 = vsel %vm681_vm12, %v1331_v13, %v1333_v20  ;;  %v1687_v60 = vpop.permute.xlu2 %1686 }
 0x271   : > { %v1532_v31 = vsel %vm701_vm10, %v1346_v14, 0  ;;  %v1535_v18 = vsel %vm701_vm10, %v1347_v4, 0 }
 0x272   : > { %1598 = vmatpush.bf16.msra.mxu3 %v1532_v31  ;;  %1611 = vmatpush.bf16.msrb.mxu0 %v1535_v18 }
 0x275   : > { %12790 = vmatmul.msk.bf16.vlgmr.msra.gmra.mxu3 %vm697_vm11, %v12775_v62  ;;  %12791 = vmatmul.msk.bf16.vlgmr.msrb.gmra.mxu0 %vm697_vm11, %v12775_v62 }
 0x276   : > { %v1401_v34 = vpop.f32.mrf.mxu2  ;;  %v1414_v2 = vpop.f32.mrf.mxu3 }
 0x278   : > { %v1693_v19 = vpop.permute.xlu2 %1692 }
 0x27e   : > { %v14519_v52 = vpop.f32.mrf.mxu0  ;;  %v14522_v53 = vpop.f32.mrf.mxu1 }
 0x27f   : > { %v1339_v22 = vpop.permute.xlu1 %1338  ;;  %v1337_v48 = vpop.permute.xlu0 %1336 }
 0x280   : > { %v1351_v61 = vsel %vm681_vm12, %v1339_v22, %v1341_v21  ;;  %v1349_v10 = vsel %vm681_vm12, %v1335_v5, %v1337_v48  ;;  %v1350_v17 = vsel %vm681_vm12, %v1337_v48, %v1339_v22  ;;  %v1699_v51 = vpop.permute.xlu2 %1698  ;;  %v14533_v15 = vpop.f32.mrf.mxu2 }
 0x281   : > { %v1541_v24 = vsel %vm701_vm10, %v1349_v10, 0  ;;  %v1544_v25 = vsel %vm701_vm10, %v1350_v17, 0  ;;  %v1547_v26 = vsel %vm701_vm10, %v1351_v61, 0  ;;  %v14548_v14 = vpop.f32.mrf.mxu3 }
 0x282   : > { %1637 = vmatpush.bf16.msrb.mxu2 %v1541_v24  ;;  %1650 = vmatpush.bf16.msrb.mxu3 %v1544_v25 }
 0x283   : > { %1663 = vmatpush.bf16.msra.mxu0 %v1547_v26 }
 0x285   : > { %12793 = vmatmul.msk.bf16.vlgmr.msrb.gmra.mxu2 %vm697_vm11, %v12775_v62  ;;  %12794 = vmatmul.msk.bf16.vlgmr.msrb.gmra.mxu3 %vm697_vm11, %v12775_v62 }
 0x286   : > { %12795 = vmatmul.msk.bf16.vlgmr.msra.gmra.mxu0 %vm697_vm11, %v12775_v62  ;;  %v1427_v23 = vpop.f32.mrf.mxu0  ;;  %v1440_v1 = vpop.f32.mrf.mxu1 }
 0x287   : > { %v1685_v27 = vpop.permute.xlu1 %1684  ;;  %v1343_v29 = vpop.permute.xlu0 %1342 }
 0x288   : > { %v1704_v30 = vsel %vm1046_vm13, %v1685_v27, %v1687_v60  ;;  %v1352_v32 = vsel %vm681_vm12, %v1341_v21, %v1343_v29  ;;  %v1453_v50 = vpop.f32.mrf.mxu2  ;;  %v14566_v34 = vpop.permute.xlu2 %1891 }
 0x289   : > { %v1719_v33 = vsel %vm701_vm10, %v1704_v30, 0  ;;  %v1550_v63 = vsel %vm701_vm10, %v1352_v32, 0  ;;  %v1466_v21 = vpop.f32.mrf.mxu3  ;;  %v13576_v50 = vld [vmem:[%s14161_s27 + $0x18] sm:$0xff] }
 0x28a   : > { %1676 = vmatpush.bf16.msra.mxu1 %v1550_v63  ;;  %1754 = vmatpush.bf16.msra.mxu2 %v1719_v33 }
 0x28d   : > { %12796 = vmatmul.msk.bf16.vlgmr.msra.gmra.mxu1 %vm697_vm11, %v12775_v62 }
 0x28e   : > { %v14543_v12 = vpop.f32.mrf.mxu0 }
 0x28f   : > { %v1691_v36 = vpop.permute.xlu1 %1690  ;;  %v1689_v38 = vpop.permute.xlu0 %1688 }
 0x290   : > { %v1707_v39 = vsel %vm1046_vm13, %v1691_v36, %v1693_v19  ;;  %v1705_v40 = vsel %vm1046_vm13, %v1687_v60, %v1689_v38  ;;  %v1706_v41 = vsel %vm1046_vm13, %v1689_v38, %v1691_v36  ;;  %v14546_v13 = vpop.f32.mrf.mxu1  ;;  %v14551_v4 = vpop.f32.mrf.mxu2 }
 0x291   : > { %v1722_v42 = vsel %vm701_vm10, %v1705_v40, 0  ;;  %v1725_v45 = vsel %vm701_vm10, %v1706_v41, 0  ;;  %v1728_v44 = vsel %vm701_vm10, %v1707_v39, 0  ;;  %v14555_v48 = vpop.f32.mrf.mxu3 }
 0x292   : > { %1767 = vmatpush.bf16.msra.mxu3 %v1722_v42  ;;  %1780 = vmatpush.bf16.msrb.mxu0 %v1725_v45 }
 0x293   : > { %1793 = vmatpush.bf16.msrb.mxu1 %v1728_v44 }
 0x295   : > { %12798 = vmatmul.msk.bf16.vlgmr.msra.gmra.mxu2 %vm697_vm11, %v12797_v47  ;;  %12799 = vmatmul.msk.bf16.vlgmr.msra.gmra.mxu3 %vm697_vm11, %v12797_v47 }
 0x296   : > { %12800 = vmatmul.msk.bf16.vlgmr.msrb.gmra.mxu0 %vm697_vm11, %v12797_v47  ;;  %v1479_v31 = vpop.f32.mrf.mxu0 }
 0x297   : > { %v1697_v54 = vpop.permute.xlu1 %1696  ;;  %v1695_v55 = vpop.permute.xlu0 %1694 }
 0x298   : > { %v1710_v56 = vsel %vm1046_vm13, %v1697_v54, %v1699_v51  ;;  %v1708_v57 = vsel %vm1046_vm13, %v1693_v19, %v1695_v55  ;;  %v1709_v58 = vsel %vm1046_vm13, %v1695_v55, %v1697_v54  ;;  %v1492_v18 = vpop.f32.mrf.mxu1  ;;  %v1505_v22 = vpop.f32.mrf.mxu2 }
 0x299   : > { %v1731_v59 = vsel %vm701_vm10, %v1708_v57, 0  ;;  %v1734_v0 = vsel %vm701_vm10, %v1709_v58, 0  ;;  %v1737_v16 = vsel %vm701_vm10, %v1710_v56, 0  ;;  %v1518_v60 = vpop.f32.mrf.mxu3  ;;  %v13573_v57 = vld [vmem:[%s14161_s27 + $0x10] sm:$0xff] }
 0x29a   : > { %1806 = vmatpush.bf16.msrb.mxu2 %v1731_v59  ;;  %1819 = vmatpush.bf16.msrb.mxu3 %v1734_v0 }
 0x29b   : > { %1832 = vmatpush.bf16.msra.mxu0 %v1737_v16 }
 0x29d   : > { %12801 = vmatmul.msk.bf16.vlgmr.msrb.gmra.mxu1 %vm697_vm11, %v12797_v47 }
 0x29f   : > { %v1703_v3 = vpop.permute.xlu1 %1702  ;;  %v1701_v6 = vpop.permute.xlu0 %1700 }
 0x2a0   : > { %v1714_v7 = vsel %vm1046_vm13, %v1703_v3, 0  ;;  %v1711_v8 = vsel %vm1046_vm13, %v1699_v51, %v1701_v6  ;;  %v1712_v11 = vsel %vm1046_vm13, %v1701_v6, %v1703_v3 }
 0x2a1   : > { %v1740_v62 = vsel %vm701_vm10, %v1711_v8, 0  ;;  %v1743_v5 = vsel %vm701_vm10, %v1712_v11, 0  ;;  %v1745_v20 = vsel %vm701_vm10, %v1714_v7, 0  ;;  %v13575_v11 = vld [vmem:[%s14161_s27 + $0x8] sm:$0xff] }
 0x2a2   : > { %1845 = vmatpush.bf16.msra.mxu1 %v1740_v62  ;;  %1858 = vmatpush.bf16.msra.mxu2 %v1743_v5 }
 0x2a3   : > { %1871 = vmatpush.bf16.msra.mxu3 %v1745_v20 }
 0x2a5   : > { %12802 = vmatmul.msk.bf16.vlgmr.msrb.gmra.mxu2 %vm697_vm11, %v12797_v47  ;;  %12803 = vmatmul.msk.bf16.vlgmr.msrb.gmra.mxu3 %vm697_vm11, %v12797_v47 }
 0x2a6   : > { %12804 = vmatmul.msk.bf16.vlgmr.msra.gmra.mxu0 %vm697_vm11, %v12797_v47 }
 0x2ad   : > { %12805 = vmatmul.msk.bf16.vlgmr.msra.gmra.mxu1 %vm697_vm11, %v12797_v47 }
 0x2b5   : > { %12806 = vmatmul.msk.bf16.vlgmr.msra.gmra.mxu2 %vm697_vm11, %v12797_v47  ;;  %12807 = vmatmul.msk.bf16.vlgmr.msra.gmra.mxu3 %vm697_vm11, %v12797_v47 }
 0x2dc   : > { %v1561_v61 = vpop.f32.mrf.mxu0  ;;  %v1574_v10 = vpop.f32.mrf.mxu1 }
 0x2dd   : > { %v1562_v55 = vadd.f32 %v1561_v61, %v14506_v35  ;;  %v1575_v56 = vadd.f32 %v1574_v10, %v14524_v37  ;;  %v13574_v37 = vld [vmem:[%s14161_s27] sm:$0xff] }
 0x2e3   : > { %v1587_v17 = vpop.f32.mrf.mxu2 }
 0x2e4   : > { %v1576_v24 = vpop.f32.mrf.mxu1  ;;  %v1563_v25 = vpop.f32.mrf.mxu0  ;;  %v1588_v45 = vadd.f32 %v1587_v17, %v14519_v52 }
 0x2eb   : > { %v1589_v26 = vpop.f32.mrf.mxu2 }
 0x2ec   : > { %v14557_v27 = vpop.f32.mrf.mxu1 }
 0x2f2   : > { %v14559_v29 = vpop.f32.mrf.mxu0 }
 0x2f4   : > { %v1628_v30 = vpop.f32.mrf.mxu1 }
 0x2f8   : > { %v1600_v32 = vpop.f32.mrf.mxu3 }
 0x2f9   : > { %v1601_v16 = vadd.f32 %v1600_v32, %v14522_v53 }
 0x2fa   : > { %v1615_v33 = vpop.f32.mrf.mxu0 }
 0x300   : > { %v1602_v63 = vpop.f32.mrf.mxu3 }
 0x303   : > { %v14561_v19 = vpop.f32.mrf.mxu0 }
 0x308   : > { %v1639_v36 = vpop.f32.mrf.mxu2  ;;  %v1652_v38 = vpop.f32.mrf.mxu3 }
 0x309   : > { %v1640_v10 = vadd.f32 %v1639_v36, %v14543_v12 }
 0x30a   : > { %v14563_v39 = vpop.f32.mrf.mxu1 }
 0x30b   : > { %v1667_v40 = vpop.f32.mrf.mxu0 }
 0x310   : > { %v1641_v41 = vpop.f32.mrf.mxu2  ;;  %v1654_v42 = vpop.f32.mrf.mxu3 }
 0x311   : > { %v1627_v42 = vadd.f32 %v14557_v27, %v14548_v14 }
 0x312   : > { %v1680_v44 = vpop.f32.mrf.mxu1 }
 0x313   : > { %v1782_v47 = vpop.f32.mrf.mxu0 }
 0x314   : > { %v1879_v51 = vadd.f32 %v1782_v47, %v1588_v45  ;;  %v1614_v45 = vadd.f32 %v14559_v29, %v14533_v15 }
 0x316   : > { %v1896_v54 = vadd.f32 %v14566_v34, %v1879_v51  ;;  %v1653_v51 = vadd.f32 %v1652_v38, %v14546_v13 }
 0x318   : > { %v1906_v58 = vadd.f32 %v13573_v57, %v1896_v54  ;;  %v1756_v59 = vpop.f32.mrf.mxu2  ;;  %v1769_v0 = vpop.f32.mrf.mxu3  ;;  %v13577_v54 = vld [vmem:[%s14161_s27 + $0x28] sm:$0xff] }
 0x319   : > { %v1877_v52 = vadd.f32 %v1756_v59, %v1562_v55  ;;  %v1878_v23 = vadd.f32 %v1769_v0, %v1575_v56 }
 0x31a   : > { %v1795_v1 = vpop.f32.mrf.mxu1  ;;  %v14576_v35 = vmul.f32 %v1906_v58, %v14392_v9 }
 0x31b   : > { %v1894_v2 = vadd.f32 %v14566_v34, %v1877_v52  ;;  %v1895_v3 = vadd.f32 %v14566_v34, %v1878_v23  ;;  %v1784_v6 = vpop.f32.mrf.mxu0  ;;  %v1880_v7 = vadd.f32 %v1795_v1, %v1601_v16 }
 0x31c   : > { %v1936_v22 = vmul.f32 0.1, %v14576_v35  ;;  %vm1926_vm1 = vcmp.ge.f32.partialorder %v14576_v35, 0.0 }
 0x31d   : > { %v1904_v8 = vadd.f32 %v13574_v37, %v1894_v2  ;;  %v1905_v62 = vadd.f32 %v13575_v11, %v1895_v3  ;;  %v1897_v5 = vadd.f32 %v14566_v34, %v1880_v7  ;;  %v13578_v11 = vld [vmem:[%s14170_s16] sm:$0xff] }
 0x31e   : > { %v1946_v40 = vsel %vm1926_vm1, %v14576_v35, %v1936_v22  ;;  %v13580_v22 = vld [vmem:[%s14161_s27 + $0x30] sm:$0xff] }
 0x31f   : > { %v14582_v53 = vmul.f32 %v1904_v8, %v14345_v46  ;;  %v14585_v20 = vmul.f32 %v1905_v62, %v14343_v43  ;;  %v1907_v31 = vadd.f32 %v13576_v50, %v1897_v5  ;;  %v14641_v8 = vld [vmem:[%s18463_s2 + $0x1c] sm:$0xf]  ;;  %v13579_v5 = vld [vmem:[%s14161_s27 + $0x20] sm:$0xff] }
 0x320   : > { %v1758_v18 = vpop.f32.mrf.mxu2  ;;  %v1771_v21 = vpop.f32.mrf.mxu3 }
 0x321   : > { %v14590_v60 = vmul.f32 %v1907_v31, %v14394_v49  ;;  %vm1924_vm15 = vcmp.ge.f32.partialorder %v14582_v53, 0.0  ;;  %vm1925_vm0 = vcmp.ge.f32.partialorder %v14585_v20, 0.0  ;;  %v1934_v61 = vmul.f32 0.1, %v14582_v53 }
 0x322   : > { %v1797_v17 = vpop.f32.mrf.mxu1  ;;  %v1935_v24 = vmul.f32 0.1, %v14585_v20 }
 0x323   : > { %v1834_v25 = vpop.f32.mrf.mxu0  ;;  %v1944_v26 = vsel %vm1924_vm15, %v14582_v53, %v1934_v61  ;;  %vm1927_vm2 = vcmp.ge.f32.partialorder %v14590_v60, 0.0  ;;  %v1937_v30 = vmul.f32 0.1, %v14590_v60 }
 0x324   : > { %v1883_v32 = vadd.f32 %v1834_v25, %v1640_v10  ;;  %v1945_v33 = vsel %vm1925_vm0, %v14585_v20, %v1935_v24 }
 0x325   : > { %v1954_v63 = vpack.c.bf16 %v1945_v33, %v1944_v26  ;;  %v1947_v12 = vsel %vm1927_vm2, %v14590_v60, %v1937_v30 }
 0x326   : > { %v1900_v36 = vadd.f32 %v14566_v34, %v1883_v32  ;;  %v1955_v41 = vpack.c.bf16 %v1947_v12, %v1946_v40 }
 0x327   : > { %v1967_v44 = vunpack.c.h.b16 %v1954_v63  ;;  %v1966_v47 = vunpack.c.l.b16 %v1954_v63 }
 0x328   : > { %v1910_v55 = vadd.f32 %v13577_v54, %v1900_v36  ;;  %v1808_v56 = vpop.f32.mrf.mxu2  ;;  %v1821_v57 = vpop.f32.mrf.mxu3  ;;  %v1968_v58 = vunpack.c.l.b16 %v1955_v41  ;;  %v1969_v59 = vunpack.c.h.b16 %v1955_v41 }
 0x329   : > { %v1881_v0 = vadd.f32 %v1808_v56, %v1614_v45  ;;  %v1882_v16 = vadd.f32 %v1821_v57, %v1627_v42  ;;  %v14611_v52 = vpack.c.b16 %v1967_v44, %v1967_v44  ;;  %v14613_v23 = vpack.c.b16 %v1966_v47, %v1966_v47 }
 0x32a   : > { %v1847_v14 = vpop.f32.mrf.mxu1  ;;  %v14615_v27 = vpack.c.b16 %v1968_v58, %v1968_v58  ;;  %v14617_v15 = vpack.c.b16 %v1969_v59, %v1969_v59  ;;  %v14628_v3 = vmul.f32 %v1910_v55, %v14343_v43  ;;  %v1666_v45 = vadd.f32 %v14561_v19, %v14551_v4 }
 0x32b   : > { %v1898_v13 = vadd.f32 %v14566_v34, %v1881_v0  ;;  %v1899_v29 = vadd.f32 %v14566_v34, %v1882_v16  ;;  %v1884_v38 = vadd.f32 %v1847_v14, %v1653_v51  ;;  %1988 = vrot.lane.b32.xlu1 %v14611_v52, %s13797_s14  ;;  %1986 = vrot.lane.b32.xlu0 %v14613_v23, %s13797_s14  ;;  %v2025_v1 = vsel %vm701_vm10, %v14613_v23, 0  ;;  %v1836_v2 = vpop.f32.mrf.mxu0 }
 0x32c   : > { %2061 = vmatpush.bf16.msrb.mxu0 %v2025_v1  ;;  %v2028_v6 = vsel %vm701_vm10, %v14611_v52, 0  ;;  %1990 = vrot.lane.b32.xlu2 %v14615_v27, %s13797_s14  ;;  %v2031_v7 = vsel %vm701_vm10, %v14615_v27, 0  ;;  %v2034_v37 = vsel %vm701_vm10, %v14617_v15, 0  ;;  %v1940_v24 = vmul.f32 0.1, %v14628_v3  ;;  %v13581_v1 = vld [vmem:[%s14161_s27 + $0x38] sm:$0xff] }
 0x32d   : > { %v1908_v62 = vadd.f32 %v13578_v11, %v1898_v13  ;;  %v1909_v50 = vadd.f32 %v13579_v5, %v1899_v29  ;;  %v1901_v31 = vadd.f32 %v14566_v34, %v1884_v38  ;;  %2074 = vmatpush.bf16.msrb.mxu1 %v2028_v6  ;;  %2087 = vmatpush.bf16.msrb.mxu2 %v2031_v7  ;;  %vm1930_vm5 = vcmp.ge.f32.partialorder %v14628_v3, 0.0  ;;  %v13582_v6 = vld [vmem:[%s14170_s16 + $0x8] sm:$0xff]  ;;  %s13798_s27 = smov 125   ;;  %s13801_s16 = smov 92  }
 0x32e   : > { %2100 = vmatpush.bf16.msrb.mxu3 %v2034_v37  ;;  %v1950_v36 = vsel %vm1930_vm5, %v14628_v3, %v1940_v24  ;;  %v1679_v44 = vadd.f32 %v14563_v39, %v14555_v48 }
 0x32f   : > { %v14647_v18 = vmul.f32 %v1908_v62, %v14379_v28  ;;  %v14650_v21 = vmul.f32 %v1909_v50, %v14345_v46  ;;  %v1911_v61 = vadd.f32 %v13580_v22, %v1901_v31  ;;  %12811 = vmatmul.msk.bf16.vlgmr.msrb.gmra.mxu0 %vm697_vm11, %v14641_v8 }
 0x330   : > { %v1810_v10 = vpop.f32.mrf.mxu2  ;;  %v1823_v17 = vpop.f32.mrf.mxu3  ;;  %12812 = vmatmul.msk.bf16.vlgmr.msrb.gmra.mxu1 %vm697_vm11, %v14641_v8  ;;  %12813 = vmatmul.msk.bf16.vlgmr.msrb.gmra.mxu2 %vm697_vm11, %v14641_v8 }
 0x331   : > { %v14661_v25 = vmul.f32 %v1911_v61, %v14392_v9  ;;  %vm1928_vm3 = vcmp.ge.f32.partialorder %v14647_v18, 0.0  ;;  %vm1929_vm4 = vcmp.ge.f32.partialorder %v14650_v21, 0.0  ;;  %v1938_v26 = vmul.f32 0.1, %v14647_v18  ;;  %12814 = vmatmul.msk.bf16.vlgmr.msrb.gmra.mxu3 %vm697_vm11, %v14641_v8 }
 0x332   : > { %v1849_v30 = vpop.f32.mrf.mxu1  ;;  %v1939_v32 = vmul.f32 0.1, %v14650_v21 }
 0x333   : > { %1992 = vrot.lane.b32.xlu0 %v14617_v15, %s13797_s14  ;;  %v1948_v33 = vsel %vm1928_vm3, %v14647_v18, %v1938_v26  ;;  %vm1931_vm6 = vcmp.ge.f32.partialorder %v14661_v25, 0.0  ;;  %v1941_v63 = vmul.f32 0.1, %v14661_v25 }
 0x334   : > { %v1949_v40 = vsel %vm1929_vm4, %v14650_v21, %v1939_v32 }
 0x335   : > { %v1956_v12 = vpack.c.bf16 %v1949_v40, %v1948_v33  ;;  %v1951_v41 = vsel %vm1931_vm6, %v14661_v25, %v1941_v63 }
 0x336   : > { %v1957_v42 = vpack.c.bf16 %v1951_v41, %v1950_v36  ;;  %v12809_v41 = vld [vmem:[%s18463_s2 + $0x18] sm:$0xf] }
 0x337   : > { %v1971_v47 = vunpack.c.h.b16 %v1956_v12  ;;  %v1970_v51 = vunpack.c.l.b16 %v1956_v12 }
 0x338   : > { %v1860_v54 = vpop.f32.mrf.mxu2  ;;  %v1873_v55 = vpop.f32.mrf.mxu3  ;;  %v1972_v56 = vunpack.c.l.b16 %v1957_v42  ;;  %v1973_v57 = vunpack.c.h.b16 %v1957_v42 }
 0x339   : > { %v1885_v58 = vadd.f32 %v1860_v54, %v1666_v45  ;;  %v1886_v59 = vadd.f32 %v1873_v55, %v1679_v44  ;;  %v1981_v0 = vpack.c.b16 %v1971_v47, %v1971_v47  ;;  %v1980_v16 = vpack.c.b16 %v1970_v51, %v1970_v51 }
 0x33a   : > { %v1982_v14 = vpack.c.b16 %v1972_v56, %v1972_v56  ;;  %v1983_v13 = vpack.c.b16 %v1973_v57, %v1973_v57 }
 0x33b   : > { %v1902_v29 = vadd.f32 %v14566_v34, %v1885_v58  ;;  %v1903_v4 = vadd.f32 %v14566_v34, %v1886_v59  ;;  %1996 = vrot.lane.b32.xlu2 %v1981_v0, %s13797_s14  ;;  %1994 = vrot.lane.b32.xlu1 %v1980_v16, %s13797_s14  ;;  %v2037_v48 = vsel %vm701_vm10, %v1980_v16, 0  ;;  %v2040_v19 = vsel %vm701_vm10, %v1981_v0, 0 }
 0x33c   : > { %2113 = vmatpush.bf16.msra.mxu0 %v2037_v48  ;;  %2126 = vmatpush.bf16.msra.mxu1 %v2040_v19  ;;  %v2043_v39 = vsel %vm701_vm10, %v1982_v14, 0  ;;  %v2046_v38 = vsel %vm701_vm10, %v1983_v13, 0 }
 0x33d   : > { %v1912_v2 = vadd.f32 %v13581_v1, %v1902_v29  ;;  %v1913_v7 = vadd.f32 %v13582_v6, %v1903_v4  ;;  %1998 = vrot.lane.b32.xlu0 %v1982_v14, %s13797_s14  ;;  %2139 = vmatpush.bf16.msra.mxu2 %v2043_v39 }
 0x33e   : > { %2152 = vmatpush.bf16.msra.mxu3 %v2046_v38 }
 0x33f   : > { %v14694_v34 = vmul.f32 %v1912_v2, %v14394_v49  ;;  %v14697_v37 = vmul.f32 %v1913_v7, %v14379_v28  ;;  %12815 = vmatmul.msk.bf16.vlgmr.msra.gmra.mxu0 %vm697_vm11, %v14641_v8 }
 0x340   : > { %v1862_v11 = vpop.f32.mrf.mxu2  ;;  %v1875_v62 = vpop.f32.mrf.mxu3  ;;  %12816 = vmatmul.msk.bf16.vlgmr.msra.gmra.mxu1 %vm697_vm11, %v14641_v8  ;;  %12817 = vmatmul.msk.bf16.vlgmr.msra.gmra.mxu2 %vm697_vm11, %v14641_v8 }
 0x341   : > { %vm1932_vm7 = vcmp.ge.f32.partialorder %v14694_v34, 0.0  ;;  %vm1933_vm8 = vcmp.ge.f32.partialorder %v14697_v37, 0.0  ;;  %v1942_v5 = vmul.f32 0.1, %v14694_v34  ;;  %v1943_v50 = vmul.f32 0.1, %v14697_v37  ;;  %12818 = vmatmul.msk.bf16.vlgmr.msra.gmra.mxu3 %vm697_vm11, %v14641_v8 }
 0x342   : > { %v12831_v62 = vld [vmem:[%s18463_s2 + $0x20] sm:$0xf] }
 0x343   : > { %2000 = vrot.lane.b32.xlu1 %v1983_v13, %s13797_s14  ;;  %v1952_v31 = vsel %vm1932_vm7, %v14694_v34, %v1942_v5  ;;  %v1953_v22 = vsel %vm1933_vm8, %v14697_v37, %v1943_v50 }
 0x344   : > { %v1958_v61 = vpack.c.bf16 %v1953_v22, %v1952_v31 }
 0x346   : > { %v1974_v10 = vunpack.c.l.b16 %v1958_v61  ;;  %v1975_v17 = vunpack.c.h.b16 %v1958_v61 }
 0x348   : > { %v1984_v24 = vpack.c.b16 %v1974_v10, %v1974_v10  ;;  %v1985_v26 = vpack.c.b16 %v1975_v17, %v1975_v17 }
 0x34a   : > { %2002 = vrot.lane.b32.xlu2 %v1984_v24, %s13797_s14  ;;  %2004 = vrot.lane.b32.xlu0 %v1985_v26, %s13797_s14  ;;  %v2049_v30 = vsel %vm701_vm10, %v1984_v24, 0  ;;  %v2052_v32 = vsel %vm701_vm10, %v1985_v26, 0 }
 0x34b   : > { %2348 = vrot.lane.b32.xlu1 %v14613_v23, %s13798_s27  ;;  %2165 = vmatpush.bf16.msrb.mxu0 %v2049_v30 }
 0x34c   : > { %2178 = vmatpush.bf16.msrb.mxu1 %v2052_v32 }
 0x34f   : > { %12819 = vmatmul.msk.bf16.vlgmr.msrb.gmra.mxu0 %vm697_vm11, %v14641_v8 }
 0x350   : > { %12820 = vmatmul.msk.bf16.vlgmr.msrb.gmra.mxu1 %vm697_vm11, %v14641_v8 }
 0x352   : > { %2350 = vrot.lane.b32.xlu2 %v14611_v52, %s13798_s27  ;;  %2352 = vrot.lane.b32.xlu0 %v14615_v27, %s13798_s27  ;;  %v12842_v52 = vld [vmem:[%s18464_s3 + $0x10] sm:$0xff] }
 0x353   : > { %2354 = vrot.lane.b32.xlu1 %v14617_v15, %s13798_s27 }
 0x35a   : > { %2356 = vrot.lane.b32.xlu2 %v1980_v16, %s13798_s27  ;;  %2358 = vrot.lane.b32.xlu0 %v1981_v0, %s13798_s27 }
 0x35b   : > { %2360 = vrot.lane.b32.xlu1 %v1982_v14, %s13798_s27 }
 0x362   : > { %2362 = vrot.lane.b32.xlu2 %v1983_v13, %s13798_s27  ;;  %2364 = vrot.lane.b32.xlu0 %v1984_v24, %s13798_s27 }
 0x363   : > { %2366 = vrot.lane.b32.xlu1 %v1985_v26, %s13798_s27 }
 0x36a   : > { %2557 = vperm.xlu2 %13571, %v12842_v52  }
 0x386   : > { %v1991_v23 = vpop.permute.xlu2 %1990 }
 0x395   : > { %v1997_v42 = vpop.permute.xlu2 %1996 }
 0x39d   : > { %v1989_v27 = vpop.permute.xlu1 %1988  ;;  %v1987_v15 = vpop.permute.xlu0 %1986 }
 0x39e   : > { %v2008_v8 = vsel %vm2006_vm9, %v1989_v27, %v1991_v23  ;;  %v2007_v33 = vsel %vm2006_vm9, %v1987_v15, %v1989_v27  ;;  %v2018_v63 = vsel %vm2006_vm9, 0, %v1987_v15 }
 0x39f   : > { %v2187_v40 = vsel %vm701_vm10, %v2018_v63, 0  ;;  %v2190_v12 = vsel %vm701_vm10, %v2007_v33, 0  ;;  %v2193_v36 = vsel %vm701_vm10, %v2008_v8, 0 }
 0x3a0   : > { %2223 = vmatpush.bf16.msrb.mxu2 %v2187_v40  ;;  %2236 = vmatpush.bf16.msrb.mxu3 %v2190_v12 }
 0x3a1   : > { %2249 = vmatpush.bf16.msra.mxu0 %v2193_v36 }
 0x3a3   : > { %12821 = vmatmul.msk.bf16.vlgmr.msrb.gmra.mxu2 %vm697_vm11, %v12809_v41  ;;  %12822 = vmatmul.msk.bf16.vlgmr.msrb.gmra.mxu3 %vm697_vm11, %v12809_v41 }
 0x3a4   : > { %12823 = vmatmul.msk.bf16.vlgmr.msra.gmra.mxu0 %vm697_vm11, %v12809_v41  ;;  %v2003_v51 = vpop.permute.xlu2 %2002 }
 0x3a5   : > { %v1993_v45 = vpop.permute.xlu0 %1992 }
 0x3a6   : > { %v2009_v44 = vsel %vm2006_vm9, %v1991_v23, %v1993_v45 }
 0x3a7   : > { %v2196_v47 = vsel %vm701_vm10, %v2009_v44, 0 }
 0x3a8   : > { %2262 = vmatpush.bf16.msra.mxu1 %v2196_v47 }
 0x3ab   : > { %12824 = vmatmul.msk.bf16.vlgmr.msra.gmra.mxu1 %vm697_vm11, %v12809_v41 }
 0x3ac   : > { %v2351_v13 = vpop.permute.xlu2 %2350  ;;  %v14785_v30 = vpop.f32.mrf.mxu0 }
 0x3ad   : > { %v1995_v54 = vpop.permute.xlu1 %1994  ;;  %v14787_v32 = vpop.f32.mrf.mxu1 }
 0x3ae   : > { %v2010_v55 = vsel %vm2006_vm9, %v1993_v45, %v1995_v54  ;;  %v2011_v56 = vsel %vm2006_vm9, %v1995_v54, %v1997_v42 }
 0x3af   : > { %v1999_v57 = vpop.permute.xlu0 %1998  ;;  %v2199_v58 = vsel %vm701_vm10, %v2010_v55, 0  ;;  %v2202_v59 = vsel %vm701_vm10, %v2011_v56, 0 }
 0x3b0   : > { %v2012_v0 = vsel %vm2006_vm9, %v1997_v42, %v1999_v57  ;;  %2275 = vmatpush.bf16.msra.mxu2 %v2199_v58  ;;  %2288 = vmatpush.bf16.msra.mxu3 %v2202_v59 }
 0x3b1   : > { %v2205_v16 = vsel %vm701_vm10, %v2012_v0, 0 }
 0x3b2   : > { %2301 = vmatpush.bf16.msrb.mxu0 %v2205_v16 }
 0x3b3   : > { %12825 = vmatmul.msk.bf16.vlgmr.msra.gmra.mxu2 %vm697_vm11, %v12809_v41  ;;  %12826 = vmatmul.msk.bf16.vlgmr.msra.gmra.mxu3 %vm697_vm11, %v12809_v41  ;;  %v14789_v23 = vpop.f32.mrf.mxu2 }
 0x3b4   : > { %v2357_v11 = vpop.permute.xlu2 %2356  ;;  %v14792_v8 = vpop.f32.mrf.mxu3 }
 0x3b5   : > { %v2001_v14 = vpop.permute.xlu1 %2000  ;;  %12827 = vmatmul.msk.bf16.vlgmr.msrb.gmra.mxu0 %vm697_vm11, %v12809_v41  ;;  %v2078_v42 = vpop.f32.mrf.mxu1 }
 0x3b6   : > { %v2013_v29 = vsel %vm2006_vm9, %v1999_v57, %v2001_v14  ;;  %v2014_v4 = vsel %vm2006_vm9, %v2001_v14, %v2003_v51 }
 0x3b7   : > { %v2208_v48 = vsel %vm701_vm10, %v2013_v29, 0  ;;  %v2211_v19 = vsel %vm701_vm10, %v2014_v4, 0 }
 0x3b8   : > { %2314 = vmatpush.bf16.msrb.mxu1 %v2208_v48  ;;  %2327 = vmatpush.bf16.msrb.mxu2 %v2211_v19 }
 0x3bb   : > { %12828 = vmatmul.msk.bf16.vlgmr.msrb.gmra.mxu1 %vm697_vm11, %v12809_v41  ;;  %v2091_v44 = vpop.f32.mrf.mxu2 }
 0x3bc   : > { %v2005_v39 = vpop.permute.xlu0 %2004  ;;  %v2363_v26 = vpop.permute.xlu2 %2362 }
 0x3bd   : > { %v2349_v38 = vpop.permute.xlu1 %2348  ;;  %v2015_v1 = vsel %vm2006_vm9, %v2003_v51, %v2005_v39  ;;  %v2104_v54 = vpop.f32.mrf.mxu3 }
 0x3be   : > { %v2369_v2 = vsel %vm2368_vm14, %v2349_v38, %v2351_v13  ;;  %v2214_v6 = vsel %vm701_vm10, %v2015_v1, 0  ;;  %v14809_v16 = vpop.f32.mrf.mxu1 }
 0x3bf   : > { %v2385_v7 = vsel %vm701_vm10, %v2369_v2, 0  ;;  %2340 = vmatpush.bf16.msrb.mxu3 %v2214_v6 }
 0x3c0   : > { %2420 = vmatpush.bf16.msra.mxu0 %v2385_v7 }
 0x3c3   : > { %12829 = vmatmul.msk.bf16.vlgmr.msrb.gmra.mxu2 %vm697_vm11, %v12809_v41  ;;  %12830 = vmatmul.msk.bf16.vlgmr.msrb.gmra.mxu3 %vm697_vm11, %v12809_v41  ;;  %v2065_v41 = vpop.f32.mrf.mxu0  ;;  %v14811_v14 = vpop.f32.mrf.mxu2 }
 0x3c4   : > { %v2353_v5 = vpop.permute.xlu0 %2352 }
 0x3c5   : > { %v2355_v50 = vpop.permute.xlu1 %2354  ;;  %v2370_v31 = vsel %vm2368_vm14, %v2351_v13, %v2353_v5  ;;  %12832 = vmatmul.msk.bf16.vlgmr.msra.gmra.mxu0 %vm697_vm11, %v12831_v62  ;;  %v14813_v13 = vpop.f32.mrf.mxu3 }
 0x3c6   : > { %v2372_v22 = vsel %vm2368_vm14, %v2355_v50, %v2357_v11  ;;  %v2371_v61 = vsel %vm2368_vm14, %v2353_v5, %v2355_v50  ;;  %v2388_v10 = vsel %vm701_vm10, %v2370_v31, 0  ;;  %v2130_v4 = vpop.f32.mrf.mxu1 }
 0x3c7   : > { %2433 = vmatpush.bf16.msra.mxu1 %v2388_v10  ;;  %v2391_v17 = vsel %vm701_vm10, %v2371_v61, 0  ;;  %v2394_v24 = vsel %vm701_vm10, %v2372_v22, 0 }
 0x3c8   : > { %2446 = vmatpush.bf16.msra.mxu2 %v2391_v17  ;;  %2459 = vmatpush.bf16.msra.mxu3 %v2394_v24 }
 0x3cb   : > { %12833 = vmatmul.msk.bf16.vlgmr.msra.gmra.mxu1 %vm697_vm11, %v12831_v62  ;;  %v2115_v0 = vpop.f32.mrf.mxu0  ;;  %v2143_v48 = vpop.f32.mrf.mxu2 }
 0x3cc   : > { %v2359_v52 = vpop.permute.xlu0 %2358 }
 0x3cd   : > { %v2361_v27 = vpop.permute.xlu1 %2360  ;;  %v2373_v15 = vsel %vm2368_vm14, %v2357_v11, %v2359_v52  ;;  %v2156_v19 = vpop.f32.mrf.mxu3 }
 0x3ce   : > { %v2375_v33 = vsel %vm2368_vm14, %v2361_v27, %v2363_v26  ;;  %v2374_v63 = vsel %vm2368_vm14, %v2359_v52, %v2361_v27  ;;  %v2397_v40 = vsel %vm701_vm10, %v2373_v15, 0  ;;  %v14821_v38 = vpop.f32.mrf.mxu1 }
 0x3cf   : > { %2472 = vmatpush.bf16.msrb.mxu0 %v2397_v40  ;;  %v2400_v12 = vsel %vm701_vm10, %v2374_v63, 0  ;;  %v2403_v36 = vsel %vm701_vm10, %v2375_v33, 0 }
 0x3d0   : > { %2485 = vmatpush.bf16.msrb.mxu1 %v2400_v12  ;;  %2498 = vmatpush.bf16.msrb.mxu2 %v2403_v36  ;;  %v14828_v12 = vpop.permute.xlu2 %2557 }
 0x3d3   : > { %12834 = vmatmul.msk.bf16.vlgmr.msra.gmra.mxu2 %vm697_vm11, %v12831_v62  ;;  %12835 = vmatmul.msk.bf16.vlgmr.msra.gmra.mxu3 %vm697_vm11, %v12831_v62  ;;  %v2117_v29 = vpop.f32.mrf.mxu0 }
 0x3d4   : > { %v2365_v45 = vpop.permute.xlu0 %2364 }
 0x3d5   : > { %v2367_v47 = vpop.permute.xlu1 %2366  ;;  %v2376_v51 = vsel %vm2368_vm14, %v2363_v26, %v2365_v45  ;;  %12836 = vmatmul.msk.bf16.vlgmr.msrb.gmra.mxu0 %vm697_vm11, %v12831_v62 }
 0x3d6   : > { %v2380_v55 = vsel %vm2368_vm14, %v2367_v47, 0  ;;  %v2377_v56 = vsel %vm2368_vm14, %v2365_v45, %v2367_v47  ;;  %v2406_v57 = vsel %vm701_vm10, %v2376_v51, 0  ;;  %v2182_v2 = vpop.f32.mrf.mxu1 }
 0x3d7   : > { %2511 = vmatpush.bf16.msrb.mxu3 %v2406_v57  ;;  %v2409_v58 = vsel %vm701_vm10, %v2377_v56, 0  ;;  %v2411_v59 = vsel %vm701_vm10, %v2380_v55, 0 }
 0x3d8   : > { %2524 = vmatpush.bf16.msra.mxu0 %v2409_v58  ;;  %2537 = vmatpush.bf16.msra.mxu1 %v2411_v59 }
 0x3db   : > { %12837 = vmatmul.msk.bf16.vlgmr.msrb.gmra.mxu1 %vm697_vm11, %v12831_v62  ;;  %v14819_v39 = vpop.f32.mrf.mxu0 }
 0x3e3   : > { %12838 = vmatmul.msk.bf16.vlgmr.msrb.gmra.mxu2 %vm697_vm11, %v12831_v62  ;;  %12839 = vmatmul.msk.bf16.vlgmr.msrb.gmra.mxu3 %vm697_vm11, %v12831_v62  ;;  %v2169_v1 = vpop.f32.mrf.mxu0 }
 0x3e5   : > { %12840 = vmatmul.msk.bf16.vlgmr.msra.gmra.mxu0 %vm697_vm11, %v12831_v62 }
 0x3eb   : > { %12841 = vmatmul.msk.bf16.vlgmr.msra.gmra.mxu1 %vm697_vm11, %v12831_v62 }
 0x421   : > { %v2251_v6 = vpop.f32.mrf.mxu0 }
 0x426   : > { %v2225_v7 = vpop.f32.mrf.mxu2  ;;  %v2238_v11 = vpop.f32.mrf.mxu3 }
 0x427   : > { %v2226_v33 = vadd.f32 %v2225_v7, %v14785_v30  ;;  %v2239_v45 = vadd.f32 %v2238_v11, %v14787_v32 }
 0x428   : > { %v2264_v5 = vpop.f32.mrf.mxu1 }
 0x429   : > { %v2253_v50 = vpop.f32.mrf.mxu0 }
 0x42a   : > { %v2252_v50 = vadd.f32 %v2251_v6, %v14789_v23 }
 0x42e   : > { %v2227_v31 = vpop.f32.mrf.mxu2  ;;  %v2240_v22 = vpop.f32.mrf.mxu3 }
 0x42f   : > { %v2265_v31 = vadd.f32 %v2264_v5, %v14792_v8 }
 0x430   : > { %v2266_v61 = vpop.f32.mrf.mxu1 }
 0x432   : > { %v14823_v10 = vpop.f32.mrf.mxu0 }
 0x436   : > { %v2277_v17 = vpop.f32.mrf.mxu2  ;;  %v2290_v24 = vpop.f32.mrf.mxu3 }
 0x437   : > { %v2278_v19 = vadd.f32 %v2277_v17, %v2115_v0 }
 0x438   : > { %v14825_v26 = vpop.f32.mrf.mxu1 }
 0x43a   : > { %v2305_v62 = vpop.f32.mrf.mxu0 }
 0x43e   : > { %v2279_v52 = vpop.f32.mrf.mxu2  ;;  %v2292_v27 = vpop.f32.mrf.mxu3 }
 0x440   : > { %v2318_v15 = vpop.f32.mrf.mxu1 }
 0x441   : > { %v2291_v15 = vadd.f32 %v2290_v24, %v14809_v16 }
 0x442   : > { %v2422_v63 = vpop.f32.mrf.mxu0 }
 0x443   : > { %v2543_v40 = vadd.f32 %v2422_v63, %v2226_v33  ;;  %v14860_v63 = vld [vmem:[%s18463_s2 + $0x28] sm:$0xf] }
 0x445   : > { %v2560_v36 = vadd.f32 %v14828_v12, %v2543_v40 }
 0x446   : > { %v14831_v41 = vpop.f32.mrf.mxu2  ;;  %v14833_v42 = vpop.f32.mrf.mxu3 }
 0x447   : > { %v2580_v47 = vmul.f32 0.1, %v2560_v36  ;;  %vm2570_vm15 = vcmp.ge.f32.partialorder %v2560_v36, 0.0 }
 0x448   : > { %v2435_v44 = vpop.f32.mrf.mxu1 }
 0x449   : > { %v2544_v51 = vadd.f32 %v2435_v44, %v2239_v45  ;;  %v2590_v30 = vsel %vm2570_vm15, %v2560_v36, %v2580_v47 }
 0x44a   : > { %v2424_v54 = vpop.f32.mrf.mxu0  ;;  %v2600_v29 = vmul.f32 %v2590_v30, %v14345_v46 }
 0x44b   : > { %v2561_v55 = vadd.f32 %v14828_v12, %v2544_v51 }
 0x44d   : > { %vm2571_vm0 = vcmp.ge.f32.partialorder %v2561_v55, 0.0  ;;  %v2581_v56 = vmul.f32 0.1, %v2561_v55 }
 0x44e   : > { %v2331_v57 = vpop.f32.mrf.mxu2  ;;  %v2344_v58 = vpop.f32.mrf.mxu3 }
 0x44f   : > { %v2591_v59 = vsel %vm2571_vm0, %v2561_v55, %v2581_v56 }
 0x450   : > { %v2601_v4 = vmul.f32 %v2591_v59, %v14343_v43  ;;  %v2437_v48 = vpop.f32.mrf.mxu1 }
 0x451   : > { %v2330_v48 = vadd.f32 %v14831_v41, %v14819_v39 }
 0x452   : > { %v2474_v32 = vpop.f32.mrf.mxu0  ;;  %v2610_v1 = vpack.c.bf16 %v2601_v4, %v2600_v29 }
 0x453   : > { %v2547_v2 = vadd.f32 %v2474_v32, %v2278_v19 }
 0x454   : > { %v2623_v7 = vunpack.c.h.b16 %v2610_v1  ;;  %v2622_v11 = vunpack.c.l.b16 %v2610_v1 }
 0x455   : > { %v2564_v22 = vadd.f32 %v14828_v12, %v2547_v2 }
 0x456   : > { %v2448_v61 = vpop.f32.mrf.mxu2  ;;  %v2461_v62 = vpop.f32.mrf.mxu3  ;;  %v14842_v52 = vpack.c.b16 %v2623_v7, %v2623_v7  ;;  %v14844_v27 = vpack.c.b16 %v2622_v11, %v2622_v11 }
 0x457   : > { %v2545_v0 = vadd.f32 %v2448_v61, %v2252_v50  ;;  %v2546_v17 = vadd.f32 %v2461_v62, %v2265_v31  ;;  %v2584_v6 = vmul.f32 0.1, %v2564_v22  ;;  %vm2574_vm1 = vcmp.ge.f32.partialorder %v2564_v22, 0.0 }
 0x458   : > { %v2487_v33 = vpop.f32.mrf.mxu1  ;;  %2644 = vrot.lane.b32.xlu1 %v14842_v52, %s13793_s11  ;;  %2642 = vrot.lane.b32.xlu0 %v14844_v27, %s13793_s11  ;;  %v2679_v23 = vsel %vm701_vm10, %v14844_v27, 0  ;;  %v2682_v8 = vsel %vm701_vm10, %v14842_v52, 0  ;;  %v2304_v31 = vadd.f32 %v14823_v10, %v14811_v14  ;;  %v2317_v62 = vadd.f32 %v14825_v26, %v14813_v13 }
 0x459   : > { %v2562_v5 = vadd.f32 %v14828_v12, %v2545_v0  ;;  %v2563_v16 = vadd.f32 %v14828_v12, %v2546_v17  ;;  %v2548_v24 = vadd.f32 %v2487_v33, %v2291_v15  ;;  %2715 = vmatpush.bf16.msra.mxu2 %v2679_v23  ;;  %2728 = vmatpush.bf16.msra.mxu3 %v2682_v8 }
 0x45a   : > { %v2476_v40 = vpop.f32.mrf.mxu0  ;;  %v2594_v47 = vsel %vm2574_vm1, %v2564_v22, %v2584_v6  ;;  %v2343_v13 = vadd.f32 %v14833_v42, %v14821_v38 }
 0x45b   : > { %vm2572_vm2 = vcmp.ge.f32.partialorder %v2562_v5, 0.0  ;;  %v2582_v36 = vmul.f32 0.1, %v2562_v5  ;;  %vm2573_vm3 = vcmp.ge.f32.partialorder %v2563_v16, 0.0  ;;  %v2583_v45 = vmul.f32 0.1, %v2563_v16 }
 0x45c   : > { %v2565_v44 = vadd.f32 %v14828_v12, %v2548_v24  ;;  %12845 = vmatmul.msk.bf16.vlgmr.msra.gmra.mxu2 %vm697_vm11, %v14860_v63  ;;  %12846 = vmatmul.msk.bf16.vlgmr.msra.gmra.mxu3 %vm697_vm11, %v14860_v63  ;;  %v2604_v19 = vmul.f32 %v2594_v47, %v14379_v28 }
 0x45d   : > { %v2592_v51 = vsel %vm2572_vm2, %v2562_v5, %v2582_v36  ;;  %v2593_v54 = vsel %vm2573_vm3, %v2563_v16, %v2583_v45 }
 0x45e   : > { %v2602_v55 = vmul.f32 %v2592_v51, %v14392_v9  ;;  %v2603_v30 = vmul.f32 %v2593_v54, %v14394_v49  ;;  %vm2575_vm4 = vcmp.ge.f32.partialorder %v2565_v44, 0.0  ;;  %v2585_v56 = vmul.f32 0.1, %v2565_v44  ;;  %v2450_v57 = vpop.f32.mrf.mxu2  ;;  %v2463_v58 = vpop.f32.mrf.mxu3 }
 0x460   : > { %v2595_v59 = vsel %vm2575_vm4, %v2565_v44, %v2585_v56  ;;  %v2489_v29 = vpop.f32.mrf.mxu1  ;;  %v2611_v4 = vpack.c.bf16 %v2603_v30, %v2602_v55 }
 0x461   : > { %v2605_v32 = vmul.f32 %v2595_v59, %v14345_v46 }
 0x462   : > { %v2526_v1 = vpop.f32.mrf.mxu0  ;;  %v2625_v2 = vunpack.c.h.b16 %v2611_v4  ;;  %v2624_v7 = vunpack.c.l.b16 %v2611_v4 }
 0x463   : > { %v2551_v11 = vadd.f32 %v2526_v1, %v2330_v48  ;;  %v2612_v50 = vpack.c.bf16 %v2605_v32, %v2604_v19 }
 0x464   : > { %v14875_v22 = vpack.c.b16 %v2625_v2, %v2625_v2  ;;  %v14877_v61 = vpack.c.b16 %v2624_v7, %v2624_v7 }
 0x465   : > { %v2568_v39 = vadd.f32 %v14828_v12, %v2551_v11  ;;  %v2626_v41 = vunpack.c.l.b16 %v2612_v50  ;;  %v2627_v15 = vunpack.c.h.b16 %v2612_v50 }
 0x466   : > { %v2500_v0 = vpop.f32.mrf.mxu2  ;;  %v2513_v17 = vpop.f32.mrf.mxu3  ;;  %2648 = vrot.lane.b32.xlu0 %v14875_v22, %s13793_s11  ;;  %2646 = vrot.lane.b32.xlu2 %v14877_v61, %s13793_s11  ;;  %v2685_v14 = vsel %vm701_vm10, %v14877_v61, 0  ;;  %v2688_v10 = vsel %vm701_vm10, %v14875_v22, 0 }
 0x467   : > { %v2549_v26 = vadd.f32 %v2500_v0, %v2304_v31  ;;  %v2550_v33 = vadd.f32 %v2513_v17, %v2317_v62  ;;  %2741 = vmatpush.bf16.msrb.mxu0 %v2685_v14  ;;  %2754 = vmatpush.bf16.msrb.mxu1 %v2688_v10  ;;  %v14892_v8 = vpack.c.b16 %v2626_v41, %v2626_v41  ;;  %v2588_v5 = vmul.f32 0.1, %v2568_v39 }
 0x468   : > { %v2539_v23 = vpop.f32.mrf.mxu1  ;;  %v14894_v6 = vpack.c.b16 %v2627_v15, %v2627_v15  ;;  %vm2578_vm5 = vcmp.ge.f32.partialorder %v2568_v39, 0.0 }
 0x469   : > { %v2566_v16 = vadd.f32 %v14828_v12, %v2549_v26  ;;  %v2567_v24 = vadd.f32 %v14828_v12, %v2550_v33  ;;  %v2552_v40 = vadd.f32 %v2539_v23, %v2343_v13  ;;  %2650 = vrot.lane.b32.xlu1 %v14892_v8, %s13793_s11  ;;  %v2691_v38 = vsel %vm701_vm10, %v14892_v8, 0  ;;  %v12843_v23 = vld [vmem:[%s18463_s2 + $0x24] sm:$0xf] }
 0x46a   : > { %v2694_v42 = vsel %vm701_vm10, %v14894_v6, 0  ;;  %v2528_v36 = vpop.f32.mrf.mxu0  ;;  %12847 = vmatmul.msk.bf16.vlgmr.msrb.gmra.mxu0 %vm697_vm11, %v14860_v63  ;;  %2767 = vmatpush.bf16.msrb.mxu2 %v2691_v38  ;;  %v2598_v51 = vsel %vm2578_vm5, %v2568_v39, %v2588_v5 }
 0x46b   : > { %vm2576_vm6 = vcmp.ge.f32.partialorder %v2566_v16, 0.0  ;;  %v2586_v45 = vmul.f32 0.1, %v2566_v16  ;;  %vm2577_vm7 = vcmp.ge.f32.partialorder %v2567_v24, 0.0  ;;  %v2587_v44 = vmul.f32 0.1, %v2567_v24  ;;  %2780 = vmatpush.bf16.msrb.mxu3 %v2694_v42  ;;  %12848 = vmatmul.msk.bf16.vlgmr.msrb.gmra.mxu1 %vm697_vm11, %v14860_v63 }
 0x46c   : > { %v2569_v47 = vadd.f32 %v14828_v12, %v2552_v40  ;;  %v2608_v48 = vmul.f32 %v2598_v51, %v14394_v49 }
 0x46d   : > { %v2596_v54 = vsel %vm2576_vm6, %v2566_v16, %v2586_v45  ;;  %v2597_v55 = vsel %vm2577_vm7, %v2567_v24, %v2587_v44  ;;  %12849 = vmatmul.msk.bf16.vlgmr.msrb.gmra.mxu2 %vm697_vm11, %v14860_v63 }
 0x46e   : > { %v2606_v30 = vmul.f32 %v2596_v54, %v14343_v43  ;;  %v2607_v56 = vmul.f32 %v2597_v55, %v14392_v9  ;;  %vm2579_vm8 = vcmp.ge.f32.partialorder %v2569_v47, 0.0  ;;  %v2589_v57 = vmul.f32 0.1, %v2569_v47  ;;  %v2502_v58 = vpop.f32.mrf.mxu2  ;;  %v2515_v59 = vpop.f32.mrf.mxu3  ;;  %2652 = vrot.lane.b32.xlu2 %v14894_v6, %s13793_s11  ;;  %12850 = vmatmul.msk.bf16.vlgmr.msrb.gmra.mxu3 %vm697_vm11, %v14860_v63 }
 0x470   : > { %v2599_v12 = vsel %vm2579_vm8, %v2569_v47, %v2589_v57  ;;  %v2541_v29 = vpop.f32.mrf.mxu1  ;;  %v2613_v4 = vpack.c.bf16 %v2607_v56, %v2606_v30 }
 0x471   : > { %v2609_v19 = vmul.f32 %v2599_v12, %v14379_v28 }
 0x472   : > { %v2629_v32 = vunpack.c.h.b16 %v2613_v4  ;;  %v2628_v1 = vunpack.c.l.b16 %v2613_v4 }
 0x473   : > { %v2614_v2 = vpack.c.bf16 %v2609_v19, %v2608_v48 }
 0x474   : > { %v2639_v7 = vpack.c.b16 %v2629_v32, %v2629_v32  ;;  %v2638_v11 = vpack.c.b16 %v2628_v1, %v2628_v1 }
 0x475   : > { %v2630_v50 = vunpack.c.l.b16 %v2614_v2  ;;  %v2631_v31 = vunpack.c.h.b16 %v2614_v2 }
 0x476   : > { %2656 = vrot.lane.b32.xlu1 %v2639_v7, %s13793_s11  ;;  %2654 = vrot.lane.b32.xlu0 %v2638_v11, %s13793_s11  ;;  %v2697_v62 = vsel %vm701_vm10, %v2638_v11, 0  ;;  %v2700_v39 = vsel %vm701_vm10, %v2639_v7, 0 }
 0x477   : > { %2793 = vmatpush.bf16.msra.mxu0 %v2697_v62  ;;  %2806 = vmatpush.bf16.msra.mxu1 %v2700_v39  ;;  %v2640_v41 = vpack.c.b16 %v2630_v50, %v2630_v50  ;;  %v2641_v15 = vpack.c.b16 %v2631_v31, %v2631_v31 }
 0x479   : > { %2658 = vrot.lane.b32.xlu2 %v2640_v41, %s13793_s11  ;;  %v2703_v0 = vsel %vm701_vm10, %v2640_v41, 0  ;;  %v2706_v17 = vsel %vm701_vm10, %v2641_v15, 0 }
 0x47a   : > { %2819 = vmatpush.bf16.msra.mxu2 %v2703_v0  ;;  %2832 = vmatpush.bf16.msra.mxu3 %v2706_v17 }
 0x47b   : > { %12851 = vmatmul.msk.bf16.vlgmr.msra.gmra.mxu0 %vm697_vm11, %v14860_v63  ;;  %12852 = vmatmul.msk.bf16.vlgmr.msra.gmra.mxu1 %vm697_vm11, %v14860_v63 }
 0x47d   : > { %12853 = vmatmul.msk.bf16.vlgmr.msra.gmra.mxu2 %vm697_vm11, %v14860_v63 }
 0x47e   : > { %3002 = vrot.lane.b32.xlu1 %v14844_v27, %s13794_s28  ;;  %2660 = vrot.lane.b32.xlu0 %v2641_v15, %s13793_s11 }
 0x47f   : > { %12854 = vmatmul.msk.bf16.vlgmr.msra.gmra.mxu3 %vm697_vm11, %v14860_v63 }
 0x481   : > { %3004 = vrot.lane.b32.xlu2 %v14842_v52, %s13794_s28  ;;  %v12876_v52 = vld [vmem:[%s18464_s3 + $0x18] sm:$0xff] }
 0x486   : > { %3008 = vrot.lane.b32.xlu1 %v14875_v22, %s13794_s28  ;;  %3006 = vrot.lane.b32.xlu0 %v14877_v61, %s13794_s28 }
 0x489   : > { %3010 = vrot.lane.b32.xlu2 %v14892_v8, %s13794_s28 }
 0x48e   : > { %3014 = vrot.lane.b32.xlu1 %v2638_v11, %s13794_s28  ;;  %3012 = vrot.lane.b32.xlu0 %v14894_v6, %s13794_s28 }
 0x491   : > { %3016 = vrot.lane.b32.xlu2 %v2639_v7, %s13794_s28 }
 0x496   : > { %3020 = vrot.lane.b32.xlu1 %v2641_v15, %s13794_s28  ;;  %3018 = vrot.lane.b32.xlu0 %v2640_v41, %s13794_s28  ;;  %v12865_v41 = vld [vmem:[%s18463_s2 + $0x2c] sm:$0xf] }
 0x499   : > { %3209 = vperm.xlu2 %13571, %v12876_v52  }
 0x4c0   : > { %v2647_v27 = vpop.permute.xlu2 %2646 }
 0x4c8   : > { %v2653_v8 = vpop.permute.xlu2 %2652 }
 0x4ca   : > { %v2645_v63 = vpop.permute.xlu1 %2644  ;;  %v2643_v22 = vpop.permute.xlu0 %2642 }
 0x4cb   : > { %v2663_v61 = vsel %vm681_vm12, %v2645_v63, %v2647_v27  ;;  %v2662_v14 = vsel %vm681_vm12, %v2643_v22, %v2645_v63  ;;  %v2672_v10 = vsel %vm681_vm12, 0, %v2643_v22 }
 0x4cc   : > { %v2841_v13 = vsel %vm701_vm10, %v2672_v10, 0  ;;  %v2844_v26 = vsel %vm701_vm10, %v2662_v14, 0  ;;  %v2847_v33 = vsel %vm701_vm10, %v2663_v61, 0 }
 0x4cd   : > { %2877 = vmatpush.bf16.msrb.mxu0 %v2841_v13  ;;  %2890 = vmatpush.bf16.msrb.mxu1 %v2844_v26 }
 0x4ce   : > { %2903 = vmatpush.bf16.msrb.mxu2 %v2847_v33 }
 0x4d0   : > { %12855 = vmatmul.msk.bf16.vlgmr.msrb.gmra.mxu0 %vm697_vm11, %v12843_v23  ;;  %12856 = vmatmul.msk.bf16.vlgmr.msrb.gmra.mxu1 %vm697_vm11, %v12843_v23 }
 0x4d1   : > { %12857 = vmatmul.msk.bf16.vlgmr.msrb.gmra.mxu2 %vm697_vm11, %v12843_v23 }
 0x4d3   : > { %v2659_v45 = vpop.permute.xlu2 %2658 }
 0x4d8   : > { %v2649_v6 = vpop.permute.xlu0 %2648 }
 0x4d9   : > { %v2664_v5 = vsel %vm681_vm12, %v2647_v27, %v2649_v6 }
 0x4da   : > { %v2850_v16 = vsel %vm701_vm10, %v2664_v5, 0 }
 0x4db   : > { %2916 = vmatpush.bf16.msrb.mxu3 %v2850_v16  ;;  %v2651_v24 = vpop.permute.xlu1 %2650  ;;  %v3005_v51 = vpop.permute.xlu2 %3004 }
 0x4dc   : > { %v2665_v40 = vsel %vm681_vm12, %v2649_v6, %v2651_v24  ;;  %v2666_v38 = vsel %vm681_vm12, %v2651_v24, %v2653_v8 }
 0x4dd   : > { %v2853_v42 = vsel %vm701_vm10, %v2665_v40, 0  ;;  %v2856_v36 = vsel %vm701_vm10, %v2666_v38, 0 }
 0x4de   : > { %12858 = vmatmul.msk.bf16.vlgmr.msrb.gmra.mxu3 %vm697_vm11, %v12843_v23  ;;  %2929 = vmatpush.bf16.msra.mxu0 %v2853_v42 }
 0x4df   : > { %2942 = vmatpush.bf16.msra.mxu1 %v2856_v36  ;;  %v15000_v0 = vpop.f32.mrf.mxu2  ;;  %v15002_v17 = vpop.f32.mrf.mxu3 }
 0x4e1   : > { %12859 = vmatmul.msk.bf16.vlgmr.msra.gmra.mxu0 %vm697_vm11, %v12843_v23 }
 0x4e2   : > { %12860 = vmatmul.msk.bf16.vlgmr.msra.gmra.mxu1 %vm697_vm11, %v12843_v23 }
 0x4e3   : > { %v3011_v32 = vpop.permute.xlu2 %3010 }
 0x4e7   : > { %v15004_v52 = vpop.f32.mrf.mxu0 }
 0x4e8   : > { %v2657_v44 = vpop.permute.xlu1 %2656  ;;  %v2655_v47 = vpop.permute.xlu0 %2654 }
 0x4e9   : > { %v2669_v54 = vsel %vm681_vm12, %v2657_v44, %v2659_v45  ;;  %v2667_v55 = vsel %vm681_vm12, %v2653_v8, %v2655_v47  ;;  %v2668_v30 = vsel %vm681_vm12, %v2655_v47, %v2657_v44  ;;  %v15006_v27 = vpop.f32.mrf.mxu1  ;;  %v2732_v8 = vpop.f32.mrf.mxu3 }
 0x4ea   : > { %v2859_v56 = vsel %vm701_vm10, %v2667_v55, 0  ;;  %v2862_v57 = vsel %vm701_vm10, %v2668_v30, 0  ;;  %v2865_v58 = vsel %vm701_vm10, %v2669_v54, 0 }
 0x4eb   : > { %2955 = vmatpush.bf16.msra.mxu2 %v2859_v56  ;;  %2968 = vmatpush.bf16.msra.mxu3 %v2862_v57  ;;  %v3017_v15 = vpop.permute.xlu2 %3016 }
 0x4ec   : > { %2981 = vmatpush.bf16.msrb.mxu0 %v2865_v58 }
 0x4ee   : > { %12861 = vmatmul.msk.bf16.vlgmr.msra.gmra.mxu2 %vm697_vm11, %v12843_v23  ;;  %12862 = vmatmul.msk.bf16.vlgmr.msra.gmra.mxu3 %vm697_vm11, %v12843_v23 }
 0x4ef   : > { %v2745_v6 = vpop.f32.mrf.mxu0 }
 0x4f0   : > { %v3003_v59 = vpop.permute.xlu1 %3002  ;;  %v2661_v12 = vpop.permute.xlu0 %2660 }
 0x4f1   : > { %v3022_v29 = vsel %vm1046_vm13, %v3003_v59, %v3005_v51  ;;  %v2670_v4 = vsel %vm681_vm12, %v2659_v45, %v2661_v12  ;;  %12863 = vmatmul.msk.bf16.vlgmr.msrb.gmra.mxu0 %vm697_vm11, %v12843_v23  ;;  %v2758_v5 = vpop.f32.mrf.mxu1 }
 0x4f2   : > { %v3037_v48 = vsel %vm701_vm10, %v3022_v29, 0  ;;  %v2868_v19 = vsel %vm701_vm10, %v2670_v4, 0 }
 0x4f3   : > { %2994 = vmatpush.bf16.msrb.mxu1 %v2868_v19  ;;  %3072 = vmatpush.bf16.msrb.mxu2 %v3037_v48  ;;  %v15045_v8 = vpop.permute.xlu2 %3209 }
 0x4f6   : > { %12864 = vmatmul.msk.bf16.vlgmr.msrb.gmra.mxu1 %vm697_vm11, %v12843_v23  ;;  %v2719_v23 = vpop.f32.mrf.mxu2 }
 0x4f8   : > { %v3009_v1 = vpop.permute.xlu1 %3008  ;;  %v3007_v2 = vpop.permute.xlu0 %3006 }
 0x4f9   : > { %v3025_v7 = vsel %vm1046_vm13, %v3009_v1, %v3011_v32  ;;  %v3023_v11 = vsel %vm1046_vm13, %v3005_v51, %v3007_v2  ;;  %v3024_v50 = vsel %vm1046_vm13, %v3007_v2, %v3009_v1  ;;  %v15026_v51 = vpop.f32.mrf.mxu3  ;;  %v15028_v54 = vpop.f32.mrf.mxu0 }
 0x4fa   : > { %v3040_v31 = vsel %vm701_vm10, %v3023_v11, 0  ;;  %v3043_v62 = vsel %vm701_vm10, %v3024_v50, 0  ;;  %v3046_v39 = vsel %vm701_vm10, %v3025_v7, 0  ;;  %v15030_v55 = vpop.f32.mrf.mxu1 }
 0x4fb   : > { %3085 = vmatpush.bf16.msrb.mxu3 %v3040_v31  ;;  %3098 = vmatpush.bf16.msra.mxu0 %v3043_v62 }
 0x4fc   : > { %3111 = vmatpush.bf16.msra.mxu1 %v3046_v39 }
 0x4fe   : > { %12866 = vmatmul.msk.bf16.vlgmr.msrb.gmra.mxu2 %vm697_vm11, %v12865_v41  ;;  %12867 = vmatmul.msk.bf16.vlgmr.msrb.gmra.mxu3 %vm697_vm11, %v12865_v41  ;;  %v15024_v47 = vpop.f32.mrf.mxu2 }
 0x500   : > { %v3015_v63 = vpop.permute.xlu1 %3014  ;;  %v3013_v22 = vpop.permute.xlu0 %3012 }
 0x501   : > { %v3028_v61 = vsel %vm1046_vm13, %v3015_v63, %v3017_v15  ;;  %v3026_v14 = vsel %vm1046_vm13, %v3011_v32, %v3013_v22  ;;  %v3027_v10 = vsel %vm1046_vm13, %v3013_v22, %v3015_v63  ;;  %12868 = vmatmul.msk.bf16.vlgmr.msra.gmra.mxu0 %vm697_vm11, %v12865_v41  ;;  %v2784_v56 = vpop.f32.mrf.mxu3  ;;  %v2797_v57 = vpop.f32.mrf.mxu0 }
 0x502   : > { %v3049_v13 = vsel %vm701_vm10, %v3026_v14, 0  ;;  %v3052_v26 = vsel %vm701_vm10, %v3027_v10, 0  ;;  %v3055_v33 = vsel %vm701_vm10, %v3028_v61, 0  ;;  %v2810_v58 = vpop.f32.mrf.mxu1 }
 0x503   : > { %3124 = vmatpush.bf16.msra.mxu2 %v3049_v13  ;;  %3137 = vmatpush.bf16.msra.mxu3 %v3052_v26 }
 0x504   : > { %3150 = vmatpush.bf16.msrb.mxu0 %v3055_v33 }
 0x506   : > { %12869 = vmatmul.msk.bf16.vlgmr.msra.gmra.mxu1 %vm697_vm11, %v12865_v41  ;;  %v2771_v30 = vpop.f32.mrf.mxu2 }
 0x508   : > { %v3021_v16 = vpop.permute.xlu1 %3020  ;;  %v3019_v24 = vpop.permute.xlu0 %3018 }
 0x509   : > { %v3032_v40 = vsel %vm1046_vm13, %v3021_v16, 0  ;;  %v3029_v38 = vsel %vm1046_vm13, %v3017_v15, %v3019_v24  ;;  %v3030_v42 = vsel %vm1046_vm13, %v3019_v24, %v3021_v16  ;;  %v15038_v12 = vpop.f32.mrf.mxu3 }
 0x50a   : > { %v3058_v36 = vsel %vm701_vm10, %v3029_v38, 0  ;;  %v3061_v45 = vsel %vm701_vm10, %v3030_v42, 0  ;;  %v3063_v44 = vsel %vm701_vm10, %v3032_v40, 0 }
 0x50b   : > { %3163 = vmatpush.bf16.msrb.mxu1 %v3058_v36  ;;  %3176 = vmatpush.bf16.msrb.mxu2 %v3061_v45 }
 0x50c   : > { %3189 = vmatpush.bf16.msrb.mxu3 %v3063_v44 }
 0x50e   : > { %12870 = vmatmul.msk.bf16.vlgmr.msra.gmra.mxu2 %vm697_vm11, %v12865_v41  ;;  %12871 = vmatmul.msk.bf16.vlgmr.msra.gmra.mxu3 %vm697_vm11, %v12865_v41  ;;  %v15036_v59 = vpop.f32.mrf.mxu2 }
 0x511   : > { %12872 = vmatmul.msk.bf16.vlgmr.msrb.gmra.mxu0 %vm697_vm11, %v12865_v41  ;;  %v2836_v4 = vpop.f32.mrf.mxu3 }
 0x516   : > { %12873 = vmatmul.msk.bf16.vlgmr.msrb.gmra.mxu1 %vm697_vm11, %v12865_v41  ;;  %v2823_v29 = vpop.f32.mrf.mxu2 }
 0x51e   : > { %12874 = vmatmul.msk.bf16.vlgmr.msrb.gmra.mxu2 %vm697_vm11, %v12865_v41  ;;  %12875 = vmatmul.msk.bf16.vlgmr.msrb.gmra.mxu3 %vm697_vm11, %v12865_v41 }
 0x54d   : > { %v2879_v48 = vpop.f32.mrf.mxu0  ;;  %v2892_v19 = vpop.f32.mrf.mxu1 }
 0x54e   : > { %v2880_v6 = vadd.f32 %v2879_v48, %v15000_v0  ;;  %v2893_v5 = vadd.f32 %v2892_v19, %v15002_v17 }
 0x554   : > { %v2905_v32 = vpop.f32.mrf.mxu2 }
 0x555   : > { %v2881_v1 = vpop.f32.mrf.mxu0  ;;  %v2894_v2 = vpop.f32.mrf.mxu1  ;;  %v2906_v33 = vadd.f32 %v2905_v32, %v15004_v52 }
 0x55c   : > { %v2907_v7 = vpop.f32.mrf.mxu2 }
 0x55e   : > { %v2931_v11 = vpop.f32.mrf.mxu0 }
 0x55f   : > { %v2944_v50 = vpop.f32.mrf.mxu1 }
 0x561   : > { %v2918_v31 = vpop.f32.mrf.mxu3 }
 0x562   : > { %v2919_v38 = vadd.f32 %v2918_v31, %v15006_v27 }
 0x566   : > { %v2933_v62 = vpop.f32.mrf.mxu0 }
 0x567   : > { %v2946_v39 = vpop.f32.mrf.mxu1 }
 0x569   : > { %v2920_v15 = vpop.f32.mrf.mxu3 }
 0x56e   : > { %v15040_v63 = vpop.f32.mrf.mxu0 }
 0x571   : > { %v2957_v41 = vpop.f32.mrf.mxu2  ;;  %v2970_v22 = vpop.f32.mrf.mxu3 }
 0x572   : > { %v2958_v39 = vadd.f32 %v2957_v41, %v15028_v54 }
 0x573   : > { %v15042_v61 = vpop.f32.mrf.mxu1 }
 0x576   : > { %v2985_v14 = vpop.f32.mrf.mxu0 }
 0x579   : > { %v2959_v10 = vpop.f32.mrf.mxu2  ;;  %v2972_v13 = vpop.f32.mrf.mxu3 }
 0x57a   : > { %v2932_v13 = vadd.f32 %v2931_v11, %v15024_v47 }
 0x57b   : > { %v2998_v26 = vpop.f32.mrf.mxu1 }
 0x57e   : > { %v3100_v23 = vpop.f32.mrf.mxu0 }
 0x57f   : > { %v3197_v16 = vadd.f32 %v3100_v23, %v2906_v33  ;;  %v2945_v23 = vadd.f32 %v2944_v50, %v15026_v51 }
 0x581   : > { %v3074_v24 = vpop.f32.mrf.mxu2  ;;  %v3087_v40 = vpop.f32.mrf.mxu3  ;;  %v3214_v42 = vadd.f32 %v15045_v8, %v3197_v16 }
 0x582   : > { %v3195_v36 = vadd.f32 %v3074_v24, %v2880_v6  ;;  %v3196_v45 = vadd.f32 %v3087_v40, %v2893_v5  ;;  %v2971_v24 = vadd.f32 %v2970_v22, %v15030_v55 }
 0x583   : > { %v3113_v44 = vpop.f32.mrf.mxu1  ;;  %v3224_v30 = vadd.f32 %v3214_v42, %v14576_v35 }
 0x584   : > { %v3212_v52 = vadd.f32 %v15045_v8, %v3195_v36  ;;  %v3213_v56 = vadd.f32 %v15045_v8, %v3196_v45  ;;  %v3198_v57 = vadd.f32 %v3113_v44, %v2919_v38 }
 0x585   : > { %v15055_v0 = vmul.f32 %v3224_v30, %v14392_v9 }
 0x586   : > { %v3222_v17 = vadd.f32 %v3212_v52, %v14582_v53  ;;  %v3223_v58 = vadd.f32 %v3213_v56, %v14585_v20  ;;  %v3215_v27 = vadd.f32 %v15045_v8, %v3198_v57  ;;  %v3102_v29 = vpop.f32.mrf.mxu0 }
 0x587   : > { %v3254_v1 = vmul.f32 0.1, %v15055_v0  ;;  %vm3244_vm1 = vcmp.ge.f32.partialorder %v15055_v0, 0.0 }
 0x588   : > { %v15061_v4 = vmul.f32 %v3222_v17, %v14345_v46  ;;  %v15064_v35 = vmul.f32 %v3223_v58, %v14343_v43  ;;  %v3225_v48 = vadd.f32 %v3215_v27, %v14590_v60 }
 0x589   : > { %v3076_v19 = vpop.f32.mrf.mxu2  ;;  %v3089_v32 = vpop.f32.mrf.mxu3  ;;  %v3264_v14 = vsel %vm3244_vm1, %v15055_v0, %v3254_v1 }
 0x58a   : > { %v15069_v2 = vmul.f32 %v3225_v48, %v14394_v49  ;;  %vm3242_vm15 = vcmp.ge.f32.partialorder %v15061_v4, 0.0  ;;  %vm3243_vm0 = vcmp.ge.f32.partialorder %v15064_v35, 0.0  ;;  %v3252_v53 = vmul.f32 0.1, %v15061_v4  ;;  %v15121_v19 = vld [vmem:[%s18463_s2 + $0x34] sm:$0xf] }
 0x58b   : > { %v3115_v20 = vpop.f32.mrf.mxu1  ;;  %v3253_v7 = vmul.f32 0.1, %v15064_v35 }
 0x58c   : > { %v3262_v60 = vsel %vm3242_vm15, %v15061_v4, %v3252_v53  ;;  %vm3245_vm2 = vcmp.ge.f32.partialorder %v15069_v2, 0.0  ;;  %v3255_v31 = vmul.f32 0.1, %v15069_v2  ;;  %vm3324_vm15 = vcmask 39936  }
 0x58d   : > { %v3263_v62 = vsel %vm3243_vm0, %v15064_v35, %v3253_v7  ;;  %vm3686_vm0 = vcmask 1006592  }
 0x58e   : > { %v3272_v15 = vpack.c.bf16 %v3263_v62, %v3262_v60  ;;  %v3265_v10 = vsel %vm3245_vm2, %v15069_v2, %v3255_v31  ;;  %v3152_v26 = vpop.f32.mrf.mxu0 }
 0x58f   : > { %v3273_v33 = vpack.c.bf16 %v3265_v10, %v3264_v14  ;;  %v3201_v6 = vadd.f32 %v3152_v26, %v2958_v39 }
 0x590   : > { %v3285_v5 = vunpack.c.h.b16 %v3272_v15  ;;  %v3284_v16 = vunpack.c.l.b16 %v3272_v15 }
 0x591   : > { %v3126_v40 = vpop.f32.mrf.mxu2  ;;  %v3139_v38 = vpop.f32.mrf.mxu3  ;;  %v3286_v42 = vunpack.c.l.b16 %v3273_v33  ;;  %v3287_v54 = vunpack.c.h.b16 %v3273_v33  ;;  %v3218_v41 = vadd.f32 %v15045_v8, %v3201_v6  ;;  %v2997_v6 = vadd.f32 %v15042_v61, %v15038_v12 }
 0x592   : > { %v3199_v36 = vadd.f32 %v3126_v40, %v2932_v13  ;;  %v3200_v45 = vadd.f32 %v3139_v38, %v2945_v23  ;;  %v15087_v44 = vpack.c.b16 %v3285_v5, %v3285_v5  ;;  %v15089_v11 = vpack.c.b16 %v3284_v16, %v3284_v16 }
 0x593   : > { %v3165_v47 = vpop.f32.mrf.mxu1  ;;  %v15091_v30 = vpack.c.b16 %v3286_v42, %v3286_v42  ;;  %v15093_v51 = vpack.c.b16 %v3287_v54, %v3287_v54  ;;  %v3228_v50 = vadd.f32 %v3218_v41, %v14628_v3  ;;  %v2984_v23 = vadd.f32 %v15040_v63, %v15036_v59 }
 0x594   : > { %v3216_v55 = vadd.f32 %v15045_v8, %v3199_v36  ;;  %v3217_v22 = vadd.f32 %v15045_v8, %v3200_v45  ;;  %v3202_v52 = vadd.f32 %v3165_v47, %v2971_v24  ;;  %3306 = vrot.lane.b32.xlu1 %v15087_v44, %s13799_s10  ;;  %3304 = vrot.lane.b32.xlu0 %v15089_v11, %s13799_s10  ;;  %v3343_v56 = vsel %vm701_vm10, %v15089_v11, 0 }
 0x595   : > { %v3346_v57 = vsel %vm701_vm10, %v15087_v44, 0  ;;  %3308 = vrot.lane.b32.xlu2 %v15091_v30, %s13799_s10  ;;  %v3349_v3 = vsel %vm701_vm10, %v15091_v30, 0  ;;  %v3352_v17 = vsel %vm701_vm10, %v15093_v51, 0  ;;  %v15113_v58 = vmul.f32 %v3228_v50, %v14343_v43  ;;  %3379 = vmatpush.bf16.msra.mxu0 %v3343_v56 }
 0x596   : > { %v3226_v27 = vadd.f32 %v3216_v55, %v14647_v18  ;;  %v3227_v29 = vadd.f32 %v3217_v22, %v14650_v21  ;;  %v3219_v48 = vadd.f32 %v15045_v8, %v3202_v52  ;;  %3392 = vmatpush.bf16.msra.mxu1 %v3346_v57  ;;  %3405 = vmatpush.bf16.msra.mxu2 %v3349_v3  ;;  %v3154_v32 = vpop.f32.mrf.mxu0 }
 0x597   : > { %3418 = vmatpush.bf16.msra.mxu3 %v3352_v17  ;;  %v3258_v7 = vmul.f32 0.1, %v15113_v58  ;;  %vm3248_vm5 = vcmp.ge.f32.partialorder %v15113_v58, 0.0 }
 0x598   : > { %v15124_v1 = vmul.f32 %v3226_v27, %v14379_v28  ;;  %v15127_v53 = vmul.f32 %v3227_v29, %v14345_v46  ;;  %v3229_v18 = vadd.f32 %v3219_v48, %v14661_v25  ;;  %12879 = vmatmul.msk.bf16.vlgmr.msra.gmra.mxu0 %vm697_vm11, %v15121_v19 }
 0x599   : > { %v3128_v21 = vpop.f32.mrf.mxu2  ;;  %v3141_v20 = vpop.f32.mrf.mxu3  ;;  %12880 = vmatmul.msk.bf16.vlgmr.msra.gmra.mxu1 %vm697_vm11, %v15121_v19  ;;  %12881 = vmatmul.msk.bf16.vlgmr.msra.gmra.mxu2 %vm697_vm11, %v15121_v19  ;;  %v3268_v13 = vsel %vm3248_vm5, %v15113_v58, %v3258_v7 }
 0x59a   : > { %v15134_v60 = vmul.f32 %v3229_v18, %v14392_v9  ;;  %vm3246_vm3 = vcmp.ge.f32.partialorder %v15124_v1, 0.0  ;;  %vm3247_vm4 = vcmp.ge.f32.partialorder %v15127_v53, 0.0  ;;  %v3256_v31 = vmul.f32 0.1, %v15124_v1  ;;  %12882 = vmatmul.msk.bf16.vlgmr.msra.gmra.mxu3 %vm697_vm11, %v15121_v19 }
 0x59b   : > { %v3167_v25 = vpop.f32.mrf.mxu1  ;;  %v3257_v62 = vmul.f32 0.1, %v15127_v53 }
 0x59c   : > { %v3266_v39 = vsel %vm3246_vm3, %v15124_v1, %v3256_v31  ;;  %vm3249_vm6 = vcmp.ge.f32.partialorder %v15134_v60, 0.0  ;;  %v3259_v15 = vmul.f32 0.1, %v15134_v60  ;;  %3310 = vrot.lane.b32.xlu0 %v15093_v51, %s13799_s10 }
 0x59d   : > { %v3267_v14 = vsel %vm3247_vm4, %v15127_v53, %v3257_v62 }
 0x59e   : > { %v3274_v10 = vpack.c.bf16 %v3267_v14, %v3266_v39  ;;  %v3269_v26 = vsel %vm3249_vm6, %v15134_v60, %v3259_v15 }
 0x59f   : > { %v3275_v33 = vpack.c.bf16 %v3269_v26, %v3268_v13 }
 0x5a0   : > { %v3289_v5 = vunpack.c.h.b16 %v3274_v10  ;;  %v3288_v16 = vunpack.c.l.b16 %v3274_v10  ;;  %v12877_v10 = vld [vmem:[%s18463_s2 + $0x30] sm:$0xf] }
 0x5a1   : > { %v3178_v24 = vpop.f32.mrf.mxu2  ;;  %v3191_v40 = vpop.f32.mrf.mxu3  ;;  %v3290_v38 = vunpack.c.l.b16 %v3275_v33  ;;  %v3291_v42 = vunpack.c.h.b16 %v3275_v33 }
 0x5a2   : > { %v3203_v54 = vadd.f32 %v3178_v24, %v2984_v23  ;;  %v3204_v41 = vadd.f32 %v3191_v40, %v2997_v6  ;;  %v3299_v36 = vpack.c.b16 %v3289_v5, %v3289_v5  ;;  %v3298_v45 = vpack.c.b16 %v3288_v16, %v3288_v16 }
 0x5a3   : > { %v3300_v47 = vpack.c.b16 %v3290_v38, %v3290_v38  ;;  %v3301_v50 = vpack.c.b16 %v3291_v42, %v3291_v42 }
 0x5a4   : > { %v3220_v55 = vadd.f32 %v15045_v8, %v3203_v54  ;;  %v3221_v22 = vadd.f32 %v15045_v8, %v3204_v41  ;;  %3314 = vrot.lane.b32.xlu2 %v3299_v36, %s13799_s10  ;;  %3312 = vrot.lane.b32.xlu1 %v3298_v45, %s13799_s10  ;;  %v3355_v59 = vsel %vm701_vm10, %v3298_v45, 0  ;;  %v3358_v12 = vsel %vm701_vm10, %v3299_v36, 0 }
 0x5a5   : > { %3431 = vmatpush.bf16.msrb.mxu0 %v3355_v59  ;;  %3444 = vmatpush.bf16.msrb.mxu1 %v3358_v12  ;;  %v3361_v63 = vsel %vm701_vm10, %v3300_v47, 0  ;;  %v3364_v61 = vsel %vm701_vm10, %v3301_v50, 0 }
 0x5a6   : > { %v3230_v52 = vadd.f32 %v3220_v55, %v14694_v34  ;;  %v3231_v56 = vadd.f32 %v3221_v22, %v14697_v37  ;;  %3316 = vrot.lane.b32.xlu0 %v3300_v47, %s13799_s10  ;;  %3457 = vmatpush.bf16.msrb.mxu2 %v3361_v63 }
 0x5a7   : > { %3470 = vmatpush.bf16.msrb.mxu3 %v3364_v61 }
 0x5a8   : > { %v15171_v8 = vmul.f32 %v3230_v52, %v14394_v49  ;;  %v15174_v57 = vmul.f32 %v3231_v56, %v14379_v28  ;;  %12883 = vmatmul.msk.bf16.vlgmr.msrb.gmra.mxu0 %vm697_vm11, %v15121_v19 }
 0x5a9   : > { %v3180_v3 = vpop.f32.mrf.mxu2  ;;  %v3193_v17 = vpop.f32.mrf.mxu3  ;;  %12884 = vmatmul.msk.bf16.vlgmr.msrb.gmra.mxu1 %vm697_vm11, %v15121_v19  ;;  %12885 = vmatmul.msk.bf16.vlgmr.msrb.gmra.mxu2 %vm697_vm11, %v15121_v19 }
 0x5aa   : > { %vm3250_vm7 = vcmp.ge.f32.partialorder %v15171_v8, 0.0  ;;  %vm3251_vm8 = vcmp.ge.f32.partialorder %v15174_v57, 0.0  ;;  %v3260_v34 = vmul.f32 0.1, %v15171_v8  ;;  %v3261_v37 = vmul.f32 0.1, %v15174_v57  ;;  %12886 = vmatmul.msk.bf16.vlgmr.msrb.gmra.mxu3 %vm697_vm11, %v15121_v19 }
 0x5ab   : > { %v12899_v17 = vld [vmem:[%s18463_s2 + $0x38] sm:$0xf] }
 0x5ac   : > { %3318 = vrot.lane.b32.xlu1 %v3301_v50, %s13799_s10  ;;  %v3270_v27 = vsel %vm3250_vm7, %v15171_v8, %v3260_v34  ;;  %v3271_v29 = vsel %vm3251_vm8, %v15174_v57, %v3261_v37 }
 0x5ad   : > { %v3276_v48 = vpack.c.bf16 %v3271_v29, %v3270_v27 }
 0x5af   : > { %v3292_v32 = vunpack.c.l.b16 %v3276_v48  ;;  %v3293_v18 = vunpack.c.h.b16 %v3276_v48 }
 0x5b1   : > { %v3302_v21 = vpack.c.b16 %v3292_v32, %v3292_v32  ;;  %v3303_v20 = vpack.c.b16 %v3293_v18, %v3293_v18 }
 0x5b3   : > { %3320 = vrot.lane.b32.xlu2 %v3302_v21, %s13799_s10  ;;  %3322 = vrot.lane.b32.xlu0 %v3303_v20, %s13799_s10  ;;  %v3367_v7 = vsel %vm701_vm10, %v3302_v21, 0  ;;  %v3370_v31 = vsel %vm701_vm10, %v3303_v20, 0 }
 0x5b4   : > { %3666 = vrot.lane.b32.xlu1 %v15089_v11, %s13800_s12  ;;  %3483 = vmatpush.bf16.msra.mxu0 %v3367_v7 }
 0x5b5   : > { %3496 = vmatpush.bf16.msra.mxu1 %v3370_v31 }
 0x5b8   : > { %12887 = vmatmul.msk.bf16.vlgmr.msra.gmra.mxu0 %vm697_vm11, %v15121_v19 }
 0x5b9   : > { %12888 = vmatmul.msk.bf16.vlgmr.msra.gmra.mxu1 %vm697_vm11, %v15121_v19 }
 0x5bb   : > { %3668 = vrot.lane.b32.xlu2 %v15087_v44, %s13800_s12  ;;  %3670 = vrot.lane.b32.xlu0 %v15091_v30, %s13800_s12  ;;  %v12910_v44 = vld [vmem:[%s18464_s3 + $0x20] sm:$0xff] }
 0x5bc   : > { %3672 = vrot.lane.b32.xlu1 %v15093_v51, %s13800_s12 }
 0x5c3   : > { %3674 = vrot.lane.b32.xlu2 %v3298_v45, %s13800_s12  ;;  %3676 = vrot.lane.b32.xlu0 %v3299_v36, %s13800_s12 }
 0x5c4   : > { %3678 = vrot.lane.b32.xlu1 %v3300_v47, %s13800_s12 }
 0x5cb   : > { %3680 = vrot.lane.b32.xlu2 %v3301_v50, %s13800_s12  ;;  %3682 = vrot.lane.b32.xlu0 %v3302_v21, %s13800_s12 }
 0x5cc   : > { %3684 = vrot.lane.b32.xlu1 %v3303_v20, %s13800_s12 }
 0x5d3   : > { %3875 = vperm.xlu2 %13571, %v12910_v44  }
 0x5ef   : > { %v3309_v11 = vpop.permute.xlu2 %3308 }
 0x5fe   : > { %v3315_v13 = vpop.permute.xlu2 %3314 }
 0x606   : > { %v3307_v30 = vpop.permute.xlu1 %3306  ;;  %v3305_v19 = vpop.permute.xlu0 %3304 }
 0x607   : > { %v3326_v51 = vsel %vm3324_vm15, %v3307_v30, %v3309_v11  ;;  %v3325_v25 = vsel %vm3324_vm15, %v3305_v19, %v3307_v30  ;;  %v3336_v62 = vsel %vm3324_vm15, 0, %v3305_v19 }
 0x608   : > { %v3511_v39 = vsel %vm701_vm10, %v3326_v51, 0  ;;  %v3505_v15 = vsel %vm701_vm10, %v3336_v62, 0  ;;  %v3508_v14 = vsel %vm701_vm10, %v3325_v25, 0 }
 0x609   : > { %3567 = vmatpush.bf16.msrb.mxu0 %v3511_v39  ;;  %3541 = vmatpush.bf16.msra.mxu2 %v3505_v15 }
 0x60a   : > { %3554 = vmatpush.bf16.msra.mxu3 %v3508_v14 }
 0x60c   : > { %12891 = vmatmul.msk.bf16.vlgmr.msrb.gmra.mxu0 %vm697_vm11, %v12877_v10  ;;  %12889 = vmatmul.msk.bf16.vlgmr.msra.gmra.mxu2 %vm697_vm11, %v12877_v10 }
 0x60d   : > { %12890 = vmatmul.msk.bf16.vlgmr.msra.gmra.mxu3 %vm697_vm11, %v12877_v10  ;;  %v3321_v6 = vpop.permute.xlu2 %3320 }
 0x60e   : > { %v3311_v26 = vpop.permute.xlu0 %3310 }
 0x60f   : > { %v3327_v33 = vsel %vm3324_vm15, %v3309_v11, %v3311_v26 }
 0x610   : > { %v3514_v23 = vsel %vm701_vm10, %v3327_v33, 0 }
 0x611   : > { %3580 = vmatpush.bf16.msrb.mxu1 %v3514_v23 }
 0x614   : > { %12892 = vmatmul.msk.bf16.vlgmr.msrb.gmra.mxu1 %vm697_vm11, %v12877_v10 }
 0x615   : > { %v3669_v50 = vpop.permute.xlu2 %3668  ;;  %v15262_v31 = vpop.f32.mrf.mxu0 }
 0x616   : > { %v3313_v5 = vpop.permute.xlu1 %3312  ;;  %v15265_v30 = vpop.f32.mrf.mxu1 }
 0x617   : > { %v3328_v16 = vsel %vm3324_vm15, %v3311_v26, %v3313_v5  ;;  %v3329_v24 = vsel %vm3324_vm15, %v3313_v5, %v3315_v13 }
 0x618   : > { %v3317_v40 = vpop.permute.xlu0 %3316  ;;  %v3517_v38 = vsel %vm701_vm10, %v3328_v16, 0  ;;  %v3520_v42 = vsel %vm701_vm10, %v3329_v24, 0 }
 0x619   : > { %v3330_v54 = vsel %vm3324_vm15, %v3315_v13, %v3317_v40  ;;  %3593 = vmatpush.bf16.msrb.mxu2 %v3517_v38  ;;  %3606 = vmatpush.bf16.msrb.mxu3 %v3520_v42 }
 0x61a   : > { %v3523_v41 = vsel %vm701_vm10, %v3330_v54, 0 }
 0x61b   : > { %3619 = vmatpush.bf16.msra.mxu0 %v3523_v41 }
 0x61c   : > { %12893 = vmatmul.msk.bf16.vlgmr.msrb.gmra.mxu2 %vm697_vm11, %v12877_v10  ;;  %v15270_v62 = vpop.f32.mrf.mxu2 }
 0x61d   : > { %12894 = vmatmul.msk.bf16.vlgmr.msrb.gmra.mxu3 %vm697_vm11, %v12877_v10  ;;  %v3675_v3 = vpop.permute.xlu2 %3674  ;;  %v15272_v39 = vpop.f32.mrf.mxu3 }
 0x61e   : > { %v3319_v36 = vpop.permute.xlu1 %3318  ;;  %12895 = vmatmul.msk.bf16.vlgmr.msra.gmra.mxu0 %vm697_vm11, %v12877_v10  ;;  %v3383_v13 = vpop.f32.mrf.mxu0 }
 0x61f   : > { %v3331_v45 = vsel %vm3324_vm15, %v3317_v40, %v3319_v36  ;;  %v3332_v47 = vsel %vm3324_vm15, %v3319_v36, %v3321_v6  ;;  %v3396_v23 = vpop.f32.mrf.mxu1 }
 0x620   : > { %v3526_v55 = vsel %vm701_vm10, %v3331_v45, 0  ;;  %v3529_v22 = vsel %vm701_vm10, %v3332_v47, 0 }
 0x621   : > { %3632 = vmatpush.bf16.msra.mxu1 %v3526_v55  ;;  %3645 = vmatpush.bf16.msra.mxu2 %v3529_v22 }
 0x624   : > { %12896 = vmatmul.msk.bf16.vlgmr.msra.gmra.mxu1 %vm697_vm11, %v12877_v10  ;;  %v3409_v24 = vpop.f32.mrf.mxu2 }
 0x625   : > { %v3323_v59 = vpop.permute.xlu0 %3322  ;;  %v3681_v20 = vpop.permute.xlu2 %3680 }
 0x626   : > { %v3667_v12 = vpop.permute.xlu1 %3666  ;;  %v3333_v63 = vsel %vm3324_vm15, %v3321_v6, %v3323_v59  ;;  %v3422_v40 = vpop.f32.mrf.mxu3 }
 0x627   : > { %v3687_v61 = vsel %vm3686_vm0, %v3667_v12, %v3669_v50  ;;  %v3532_v52 = vsel %vm701_vm10, %v3333_v63, 0  ;;  %v3433_v54 = vpop.f32.mrf.mxu0  ;;  %v15286_v41 = vpop.f32.mrf.mxu1 }
 0x628   : > { %v3703_v56 = vsel %vm701_vm10, %v3687_v61, 0  ;;  %3658 = vmatpush.bf16.msra.mxu3 %v3532_v52 }
 0x629   : > { %3738 = vmatpush.bf16.msrb.mxu0 %v3703_v56 }
 0x62c   : > { %12897 = vmatmul.msk.bf16.vlgmr.msra.gmra.mxu2 %vm697_vm11, %v12877_v10  ;;  %v15288_v36 = vpop.f32.mrf.mxu2 }
 0x62d   : > { %12898 = vmatmul.msk.bf16.vlgmr.msra.gmra.mxu3 %vm697_vm11, %v12877_v10  ;;  %v3671_v34 = vpop.permute.xlu0 %3670 }
 0x62e   : > { %v3673_v37 = vpop.permute.xlu1 %3672  ;;  %v3688_v27 = vsel %vm3686_vm0, %v3669_v50, %v3671_v34  ;;  %12900 = vmatmul.msk.bf16.vlgmr.msrb.gmra.mxu0 %vm697_vm11, %v12899_v17  ;;  %v15290_v45 = vpop.f32.mrf.mxu3 }
 0x62f   : > { %v3690_v29 = vsel %vm3686_vm0, %v3673_v37, %v3675_v3  ;;  %v3689_v48 = vsel %vm3686_vm0, %v3671_v34, %v3673_v37  ;;  %v3706_v32 = vsel %vm701_vm10, %v3688_v27, 0  ;;  %v3435_v47 = vpop.f32.mrf.mxu0  ;;  %v3448_v50 = vpop.f32.mrf.mxu1 }
 0x630   : > { %3751 = vmatpush.bf16.msrb.mxu1 %v3706_v32  ;;  %v3709_v18 = vsel %vm701_vm10, %v3689_v48, 0  ;;  %v3712_v21 = vsel %vm701_vm10, %v3690_v29, 0 }
 0x631   : > { %3764 = vmatpush.bf16.msrb.mxu2 %v3709_v18  ;;  %3777 = vmatpush.bf16.msrb.mxu3 %v3712_v21 }
 0x634   : > { %12901 = vmatmul.msk.bf16.vlgmr.msrb.gmra.mxu1 %vm697_vm11, %v12899_v17  ;;  %v3461_v55 = vpop.f32.mrf.mxu2 }
 0x635   : > { %v3677_v7 = vpop.permute.xlu0 %3676 }
 0x636   : > { %v3679_v44 = vpop.permute.xlu1 %3678  ;;  %v3691_v11 = vsel %vm3686_vm0, %v3675_v3, %v3677_v7  ;;  %v3474_v22 = vpop.f32.mrf.mxu3 }
 0x637   : > { %v3693_v51 = vsel %vm3686_vm0, %v3679_v44, %v3681_v20  ;;  %v3692_v19 = vsel %vm3686_vm0, %v3677_v7, %v3679_v44  ;;  %v3715_v25 = vsel %vm701_vm10, %v3691_v11, 0  ;;  %v15296_v59 = vpop.f32.mrf.mxu0  ;;  %v15298_v12 = vpop.f32.mrf.mxu1 }
 0x638   : > { %3790 = vmatpush.bf16.msra.mxu0 %v3715_v25  ;;  %v3718_v15 = vsel %vm701_vm10, %v3692_v19, 0  ;;  %v3721_v14 = vsel %vm701_vm10, %v3693_v51, 0 }
 0x639   : > { %3803 = vmatpush.bf16.msra.mxu1 %v3718_v15  ;;  %3816 = vmatpush.bf16.msra.mxu2 %v3721_v14  ;;  %v15305_v15 = vpop.permute.xlu2 %3875 }
 0x63c   : > { %12902 = vmatmul.msk.bf16.vlgmr.msrb.gmra.mxu2 %vm697_vm11, %v12899_v17 }
 0x63d   : > { %12903 = vmatmul.msk.bf16.vlgmr.msrb.gmra.mxu3 %vm697_vm11, %v12899_v17  ;;  %v3683_v10 = vpop.permute.xlu0 %3682 }
 0x63e   : > { %v3685_v26 = vpop.permute.xlu1 %3684  ;;  %v3694_v33 = vsel %vm3686_vm0, %v3681_v20, %v3683_v10  ;;  %12904 = vmatmul.msk.bf16.vlgmr.msra.gmra.mxu0 %vm697_vm11, %v12899_v17 }
 0x63f   : > { %v3698_v6 = vsel %vm3686_vm0, %v3685_v26, 0  ;;  %v3695_v5 = vsel %vm3686_vm0, %v3683_v10, %v3685_v26  ;;  %v3724_v16 = vsel %vm701_vm10, %v3694_v33, 0  ;;  %v3487_v63 = vpop.f32.mrf.mxu0  ;;  %v3500_v61 = vpop.f32.mrf.mxu1 }
 0x640   : > { %3829 = vmatpush.bf16.msra.mxu3 %v3724_v16  ;;  %v3727_v38 = vsel %vm701_vm10, %v3695_v5, 0  ;;  %v3729_v42 = vsel %vm701_vm10, %v3698_v6, 0 }
 0x641   : > { %3842 = vmatpush.bf16.msrb.mxu0 %v3727_v38  ;;  %3855 = vmatpush.bf16.msrb.mxu1 %v3729_v42 }
 0x644   : > { %12905 = vmatmul.msk.bf16.vlgmr.msra.gmra.mxu1 %vm697_vm11, %v12899_v17 }
 0x64c   : > { %12906 = vmatmul.msk.bf16.vlgmr.msra.gmra.mxu2 %vm697_vm11, %v12899_v17 }
 0x64d   : > { %12907 = vmatmul.msk.bf16.vlgmr.msra.gmra.mxu3 %vm697_vm11, %v12899_v17 }
 0x64e   : > { %12908 = vmatmul.msk.bf16.vlgmr.msrb.gmra.mxu0 %vm697_vm11, %v12899_v17 }
 0x654   : > { %12909 = vmatmul.msk.bf16.vlgmr.msrb.gmra.mxu1 %vm697_vm11, %v12899_v17 }
 0x689   : > { %v3569_v52 = vpop.f32.mrf.mxu0 }
 0x68f   : > { %v3543_v56 = vpop.f32.mrf.mxu2 }
 0x690   : > { %v3556_v3 = vpop.f32.mrf.mxu3  ;;  %v3544_v11 = vadd.f32 %v3543_v56, %v15262_v31 }
 0x691   : > { %v3571_v34 = vpop.f32.mrf.mxu0  ;;  %v3582_v37 = vpop.f32.mrf.mxu1  ;;  %v3557_v26 = vadd.f32 %v3556_v3, %v15265_v30 }
 0x692   : > { %v3570_v34 = vadd.f32 %v3569_v52, %v15270_v62 }
 0x697   : > { %v3545_v27 = vpop.f32.mrf.mxu2 }
 0x698   : > { %v3558_v29 = vpop.f32.mrf.mxu3  ;;  %v3583_v27 = vadd.f32 %v3582_v37, %v15272_v39 }
 0x699   : > { %v3584_v48 = vpop.f32.mrf.mxu1 }
 0x69b   : > { %v15300_v32 = vpop.f32.mrf.mxu0 }
 0x69f   : > { %v3595_v18 = vpop.f32.mrf.mxu2 }
 0x6a0   : > { %v3608_v21 = vpop.f32.mrf.mxu3  ;;  %v3596_v47 = vadd.f32 %v3595_v18, %v3433_v54 }
 0x6a1   : > { %v15302_v20 = vpop.f32.mrf.mxu1  ;;  %v3609_v18 = vadd.f32 %v3608_v21, %v15286_v41 }
 0x6a3   : > { %v3623_v17 = vpop.f32.mrf.mxu0 }
 0x6a7   : > { %v3597_v7 = vpop.f32.mrf.mxu2 }
 0x6a8   : > { %v3610_v44 = vpop.f32.mrf.mxu3 }
 0x6a9   : > { %v3636_v51 = vpop.f32.mrf.mxu1 }
 0x6ab   : > { %v3740_v19 = vpop.f32.mrf.mxu0 }
 0x6ac   : > { %v3861_v25 = vadd.f32 %v3740_v19, %v3544_v11 }
 0x6ae   : > { %v3878_v14 = vadd.f32 %v15305_v15, %v3861_v25  ;;  %v15337_v25 = vld [vmem:[%s18463_s2 + $0x40] sm:$0xf] }
 0x6af   : > { %v15308_v10 = vpop.f32.mrf.mxu2 }
 0x6b0   : > { %v15310_v13 = vpop.f32.mrf.mxu3  ;;  %v3898_v23 = vmul.f32 0.1, %v3878_v14  ;;  %vm3888_vm1 = vcmp.ge.f32.partialorder %v3878_v14, 0.0 }
 0x6b1   : > { %v3753_v33 = vpop.f32.mrf.mxu1 }
 0x6b2   : > { %v3862_v6 = vadd.f32 %v3753_v33, %v3557_v26  ;;  %v3908_v16 = vsel %vm3888_vm1, %v3878_v14, %v3898_v23 }
 0x6b3   : > { %v3742_v5 = vpop.f32.mrf.mxu0  ;;  %v3918_v50 = vmul.f32 %v3908_v16, %v14345_v46 }
 0x6b4   : > { %v3879_v31 = vadd.f32 %v15305_v15, %v3862_v6 }
 0x6b6   : > { %vm3889_vm2 = vcmp.ge.f32.partialorder %v3879_v31, 0.0  ;;  %v3899_v24 = vmul.f32 0.1, %v3879_v31 }
 0x6b7   : > { %v3649_v40 = vpop.f32.mrf.mxu2 }
 0x6b8   : > { %v3662_v38 = vpop.f32.mrf.mxu3  ;;  %v3909_v42 = vsel %vm3889_vm2, %v3879_v31, %v3899_v24 }
 0x6b9   : > { %v3919_v55 = vmul.f32 %v3909_v42, %v14343_v43  ;;  %v3755_v22 = vpop.f32.mrf.mxu1  ;;  %v3648_v42 = vadd.f32 %v15308_v10, %v15296_v59  ;;  %v3635_v59 = vadd.f32 %v15302_v20, %v15290_v45 }
 0x6bb   : > { %v3792_v30 = vpop.f32.mrf.mxu0  ;;  %v3928_v61 = vpack.c.bf16 %v3919_v55, %v3918_v50 }
 0x6bc   : > { %v3865_v63 = vadd.f32 %v3792_v30, %v3596_v47 }
 0x6bd   : > { %v3941_v56 = vunpack.c.h.b16 %v3928_v61  ;;  %v3940_v3 = vunpack.c.l.b16 %v3928_v61 }
 0x6be   : > { %v3882_v29 = vadd.f32 %v15305_v15, %v3865_v63 }
 0x6bf   : > { %v3766_v48 = vpop.f32.mrf.mxu2  ;;  %v15319_v7 = vpack.c.b16 %v3941_v56, %v3941_v56  ;;  %v15321_v54 = vpack.c.b16 %v3940_v3, %v3940_v3 }
 0x6c0   : > { %v3779_v17 = vpop.f32.mrf.mxu3  ;;  %v3863_v44 = vadd.f32 %v3766_v48, %v3570_v34  ;;  %v3902_v52 = vmul.f32 0.1, %v3882_v29  ;;  %vm3892_vm3 = vcmp.ge.f32.partialorder %v3882_v29, 0.0 }
 0x6c1   : > { %v3864_v11 = vadd.f32 %v3779_v17, %v3583_v27  ;;  %v3805_v51 = vpop.f32.mrf.mxu1  ;;  %3962 = vrot.lane.b32.xlu1 %v15319_v7, %s13793_s11  ;;  %3960 = vrot.lane.b32.xlu0 %v15321_v54, %s13793_s11  ;;  %v3997_v62 = vsel %vm701_vm10, %v15321_v54, 0  ;;  %v4000_v39 = vsel %vm701_vm10, %v15319_v7, 0  ;;  %v3622_v27 = vadd.f32 %v15300_v32, %v15288_v36 }
 0x6c2   : > { %v3880_v37 = vadd.f32 %v15305_v15, %v3863_v44  ;;  %v3866_v21 = vadd.f32 %v3805_v51, %v3609_v18  ;;  %4033 = vmatpush.bf16.msrb.mxu2 %v3997_v62  ;;  %4046 = vmatpush.bf16.msrb.mxu3 %v4000_v39  ;;  %v3912_v23 = vsel %vm3892_vm3, %v3882_v29, %v3902_v52 }
 0x6c3   : > { %v3881_v41 = vadd.f32 %v15305_v15, %v3864_v11  ;;  %v3794_v19 = vpop.f32.mrf.mxu0  ;;  %v3922_v22 = vmul.f32 %v3912_v23, %v14379_v28  ;;  %v3661_v44 = vadd.f32 %v15310_v13, %v15298_v12 }
 0x6c4   : > { %vm3890_vm4 = vcmp.ge.f32.partialorder %v3880_v37, 0.0  ;;  %v3900_v14 = vmul.f32 0.1, %v3880_v37  ;;  %v3883_v33 = vadd.f32 %v15305_v15, %v3866_v21 }
 0x6c5   : > { %vm3891_vm5 = vcmp.ge.f32.partialorder %v3881_v41, 0.0  ;;  %v3901_v26 = vmul.f32 0.1, %v3881_v41  ;;  %12913 = vmatmul.msk.bf16.vlgmr.msrb.gmra.mxu2 %vm697_vm11, %v15337_v25  ;;  %12914 = vmatmul.msk.bf16.vlgmr.msrb.gmra.mxu3 %vm697_vm11, %v15337_v25 }
 0x6c6   : > { %v3910_v6 = vsel %vm3890_vm4, %v3880_v37, %v3900_v14  ;;  %vm3893_vm6 = vcmp.ge.f32.partialorder %v3883_v33, 0.0  ;;  %v3903_v24 = vmul.f32 0.1, %v3883_v33 }
 0x6c7   : > { %v3911_v5 = vsel %vm3891_vm5, %v3881_v41, %v3901_v26  ;;  %v3920_v31 = vmul.f32 %v3910_v6, %v14392_v9  ;;  %v3768_v40 = vpop.f32.mrf.mxu2 }
 0x6c8   : > { %v3921_v16 = vmul.f32 %v3911_v5, %v14394_v49  ;;  %v3781_v38 = vpop.f32.mrf.mxu3  ;;  %v3913_v47 = vsel %vm3893_vm6, %v3883_v33, %v3903_v24 }
 0x6c9   : > { %v3807_v50 = vpop.f32.mrf.mxu1  ;;  %v3923_v30 = vmul.f32 %v3913_v47, %v14345_v46 }
 0x6ca   : > { %v3929_v55 = vpack.c.bf16 %v3921_v16, %v3920_v31 }
 0x6cb   : > { %v3844_v63 = vpop.f32.mrf.mxu0  ;;  %v3930_v34 = vpack.c.bf16 %v3923_v30, %v3922_v22 }
 0x6cc   : > { %v3869_v61 = vadd.f32 %v3844_v63, %v3648_v42  ;;  %v3943_v56 = vunpack.c.h.b16 %v3929_v55  ;;  %v3942_v3 = vunpack.c.l.b16 %v3929_v55 }
 0x6cd   : > { %v3944_v17 = vunpack.c.l.b16 %v3930_v34  ;;  %v3945_v18 = vunpack.c.h.b16 %v3930_v34 }
 0x6ce   : > { %v15352_v29 = vpack.c.b16 %v3943_v56, %v3943_v56  ;;  %v15354_v48 = vpack.c.b16 %v3942_v3, %v3942_v3  ;;  %v3886_v10 = vadd.f32 %v15305_v15, %v3869_v61 }
 0x6cf   : > { %v3818_v11 = vpop.f32.mrf.mxu2  ;;  %v15369_v62 = vpack.c.b16 %v3944_v17, %v3944_v17  ;;  %v15371_v13 = vpack.c.b16 %v3945_v18, %v3945_v18 }
 0x6d0   : > { %v3831_v51 = vpop.f32.mrf.mxu3  ;;  %3966 = vrot.lane.b32.xlu0 %v15352_v29, %s13793_s11  ;;  %3964 = vrot.lane.b32.xlu2 %v15354_v48, %s13793_s11  ;;  %v4003_v36 = vsel %vm701_vm10, %v15354_v48, 0  ;;  %v4006_v45 = vsel %vm701_vm10, %v15352_v29, 0  ;;  %v3867_v32 = vadd.f32 %v3818_v11, %v3622_v27  ;;  %v3906_v39 = vmul.f32 0.1, %v3886_v10 }
 0x6d1   : > { %v3868_v20 = vadd.f32 %v3831_v51, %v3635_v59  ;;  %4059 = vmatpush.bf16.msra.mxu0 %v4003_v36  ;;  %4072 = vmatpush.bf16.msra.mxu1 %v4006_v45  ;;  %v3857_v12 = vpop.f32.mrf.mxu1  ;;  %vm3896_vm7 = vcmp.ge.f32.partialorder %v3886_v10, 0.0  ;;  %v4009_v19 = vsel %vm701_vm10, %v15369_v62, 0  ;;  %v4012_v14 = vsel %vm701_vm10, %v15371_v13, 0 }
 0x6d2   : > { %v3884_v52 = vadd.f32 %v15305_v15, %v3867_v32  ;;  %v3870_v41 = vadd.f32 %v3857_v12, %v3661_v44  ;;  %3968 = vrot.lane.b32.xlu1 %v15369_v62, %s13793_s11  ;;  %4085 = vmatpush.bf16.msra.mxu2 %v4009_v19  ;;  %v3916_v6 = vsel %vm3896_vm7, %v3886_v10, %v3906_v39 }
 0x6d3   : > { %v3885_v37 = vadd.f32 %v15305_v15, %v3868_v20  ;;  %v3846_v21 = vpop.f32.mrf.mxu0  ;;  %4098 = vmatpush.bf16.msra.mxu3 %v4012_v14  ;;  %v3926_v55 = vmul.f32 %v3916_v6, %v14394_v49 }
 0x6d4   : > { %12915 = vmatmul.msk.bf16.vlgmr.msra.gmra.mxu0 %vm697_vm11, %v15337_v25  ;;  %12916 = vmatmul.msk.bf16.vlgmr.msra.gmra.mxu1 %vm697_vm11, %v15337_v25  ;;  %vm3894_vm8 = vcmp.ge.f32.partialorder %v3884_v52, 0.0  ;;  %v3904_v26 = vmul.f32 0.1, %v3884_v52  ;;  %v3887_v23 = vadd.f32 %v15305_v15, %v3870_v41 }
 0x6d5   : > { %vm3895_vm1 = vcmp.ge.f32.partialorder %v3885_v37, 0.0  ;;  %v3905_v33 = vmul.f32 0.1, %v3885_v37  ;;  %12917 = vmatmul.msk.bf16.vlgmr.msra.gmra.mxu2 %vm697_vm11, %v15337_v25 }
 0x6d6   : > { %v3914_v5 = vsel %vm3894_vm8, %v3884_v52, %v3904_v26  ;;  %vm3897_vm2 = vcmp.ge.f32.partialorder %v3887_v23, 0.0  ;;  %v3907_v40 = vmul.f32 0.1, %v3887_v23  ;;  %12918 = vmatmul.msk.bf16.vlgmr.msra.gmra.mxu3 %vm697_vm11, %v15337_v25 }
 0x6d7   : > { %v3915_v31 = vsel %vm3895_vm1, %v3885_v37, %v3905_v33  ;;  %v3924_v16 = vmul.f32 %v3914_v5, %v14343_v43  ;;  %v3820_v38 = vpop.f32.mrf.mxu2 }
 0x6d8   : > { %v3925_v24 = vmul.f32 %v3915_v31, %v14392_v9  ;;  %v3833_v42 = vpop.f32.mrf.mxu3  ;;  %3970 = vrot.lane.b32.xlu2 %v15371_v13, %s13793_s11  ;;  %v3917_v15 = vsel %vm3897_vm2, %v3887_v23, %v3907_v40 }
 0x6d9   : > { %v3859_v47 = vpop.f32.mrf.mxu1  ;;  %v3927_v22 = vmul.f32 %v3917_v15, %v14379_v28 }
 0x6da   : > { %v3931_v50 = vpack.c.bf16 %v3925_v24, %v3924_v16 }
 0x6db   : > { %v3932_v61 = vpack.c.bf16 %v3927_v22, %v3926_v55 }
 0x6dc   : > { %v3947_v30 = vunpack.c.h.b16 %v3931_v50  ;;  %v3946_v63 = vunpack.c.l.b16 %v3931_v50 }
 0x6dd   : > { %v3948_v34 = vunpack.c.l.b16 %v3932_v61  ;;  %v3949_v27 = vunpack.c.h.b16 %v3932_v61 }
 0x6de   : > { %v3957_v56 = vpack.c.b16 %v3947_v30, %v3947_v30  ;;  %v3956_v3 = vpack.c.b16 %v3946_v63, %v3946_v63 }
 0x6df   : > { %v3958_v17 = vpack.c.b16 %v3948_v34, %v3948_v34  ;;  %v3959_v18 = vpack.c.b16 %v3949_v27, %v3949_v27 }
 0x6e0   : > { %3974 = vrot.lane.b32.xlu1 %v3957_v56, %s13793_s11  ;;  %3972 = vrot.lane.b32.xlu0 %v3956_v3, %s13793_s11  ;;  %v4015_v59 = vsel %vm701_vm10, %v3956_v3, 0  ;;  %v4018_v10 = vsel %vm701_vm10, %v3957_v56, 0 }
 0x6e1   : > { %4111 = vmatpush.bf16.msrb.mxu0 %v4015_v59  ;;  %4124 = vmatpush.bf16.msrb.mxu1 %v4018_v10  ;;  %v4021_v44 = vsel %vm701_vm10, %v3958_v17, 0  ;;  %v4024_v11 = vsel %vm701_vm10, %v3959_v18, 0 }
 0x6e2   : > { %3976 = vrot.lane.b32.xlu2 %v3958_v17, %s13793_s11  ;;  %4137 = vmatpush.bf16.msrb.mxu2 %v4021_v44 }
 0x6e3   : > { %4150 = vmatpush.bf16.msrb.mxu3 %v4024_v11 }
 0x6e4   : > { %12920 = vmatmul.msk.bf16.vlgmr.msrb.gmra.mxu1 %vm697_vm11, %v15337_v25  ;;  %12919 = vmatmul.msk.bf16.vlgmr.msrb.gmra.mxu0 %vm697_vm11, %v15337_v25 }
 0x6e5   : > { %12921 = vmatmul.msk.bf16.vlgmr.msrb.gmra.mxu2 %vm697_vm11, %v15337_v25 }
 0x6e6   : > { %12922 = vmatmul.msk.bf16.vlgmr.msrb.gmra.mxu3 %vm697_vm11, %v15337_v25 }
 0x6e8   : > { %4320 = vrot.lane.b32.xlu1 %v15321_v54, %s13794_s28  ;;  %3978 = vrot.lane.b32.xlu0 %v3959_v18, %s13793_s11 }
 0x6ea   : > { %4322 = vrot.lane.b32.xlu2 %v15319_v7, %s13794_s28  ;;  %v12944_v7 = vld [vmem:[%s18464_s3 + $0x28] sm:$0xff] }
 0x6f0   : > { %4326 = vrot.lane.b32.xlu1 %v15352_v29, %s13794_s28  ;;  %4324 = vrot.lane.b32.xlu0 %v15354_v48, %s13794_s28 }
 0x6f2   : > { %4328 = vrot.lane.b32.xlu2 %v15369_v62, %s13794_s28  ;;  %v12911_v62 = vld [vmem:[%s18463_s2 + $0x3c] sm:$0xf] }
 0x6f8   : > { %4332 = vrot.lane.b32.xlu1 %v3956_v3, %s13794_s28  ;;  %4330 = vrot.lane.b32.xlu0 %v15371_v13, %s13794_s28 }
 0x6fa   : > { %4334 = vrot.lane.b32.xlu2 %v3957_v56, %s13794_s28 }
 0x700   : > { %4338 = vrot.lane.b32.xlu1 %v3959_v18, %s13794_s28  ;;  %4336 = vrot.lane.b32.xlu0 %v3958_v17, %s13794_s28  ;;  %v12933_v17 = vld [vmem:[%s18463_s2 + $0x44] sm:$0xf] }
 0x702   : > { %4527 = vperm.xlu2 %13571, %v12944_v7  }
 0x72a   : > { %v3965_v54 = vpop.permute.xlu2 %3964 }
 0x732   : > { %v3971_v12 = vpop.permute.xlu2 %3970 }
 0x733   : > { %v3963_v25 = vpop.permute.xlu1 %3962  ;;  %v3961_v29 = vpop.permute.xlu0 %3960 }
 0x734   : > { %v3981_v48 = vsel %vm681_vm12, %v3963_v25, %v3965_v54  ;;  %v3980_v51 = vsel %vm681_vm12, %v3961_v29, %v3963_v25  ;;  %v3990_v36 = vsel %vm681_vm12, 0, %v3961_v29 }
 0x735   : > { %v4159_v45 = vsel %vm701_vm10, %v3990_v36, 0  ;;  %v4162_v32 = vsel %vm701_vm10, %v3980_v51, 0  ;;  %v4165_v20 = vsel %vm701_vm10, %v3981_v48, 0 }
 0x736   : > { %4195 = vmatpush.bf16.msra.mxu0 %v4159_v45  ;;  %4208 = vmatpush.bf16.msra.mxu1 %v4162_v32 }
 0x737   : > { %4221 = vmatpush.bf16.msra.mxu2 %v4165_v20 }
 0x739   : > { %12923 = vmatmul.msk.bf16.vlgmr.msra.gmra.mxu0 %vm697_vm11, %v12911_v62  ;;  %12924 = vmatmul.msk.bf16.vlgmr.msra.gmra.mxu1 %vm697_vm11, %v12911_v62 }
 0x73a   : > { %12925 = vmatmul.msk.bf16.vlgmr.msra.gmra.mxu2 %vm697_vm11, %v12911_v62 }
 0x73c   : > { %v3977_v26 = vpop.permute.xlu2 %3976 }
 0x742   : > { %v3967_v13 = vpop.permute.xlu0 %3966 }
 0x743   : > { %v3982_v39 = vsel %vm681_vm12, %v3965_v54, %v3967_v13 }
 0x744   : > { %v4168_v52 = vsel %vm701_vm10, %v3982_v39, 0  ;;  %v3969_v37 = vpop.permute.xlu1 %3968  ;;  %v4323_v16 = vpop.permute.xlu2 %4322 }
 0x745   : > { %4234 = vmatpush.bf16.msra.mxu3 %v4168_v52  ;;  %v3983_v41 = vsel %vm681_vm12, %v3967_v13, %v3969_v37  ;;  %v3984_v21 = vsel %vm681_vm12, %v3969_v37, %v3971_v12 }
 0x746   : > { %v4171_v19 = vsel %vm701_vm10, %v3983_v41, 0  ;;  %v4174_v14 = vsel %vm701_vm10, %v3984_v21, 0 }
 0x747   : > { %4247 = vmatpush.bf16.msrb.mxu0 %v4171_v19  ;;  %4260 = vmatpush.bf16.msrb.mxu1 %v4174_v14 }
 0x748   : > { %12926 = vmatmul.msk.bf16.vlgmr.msra.gmra.mxu3 %vm697_vm11, %v12911_v62  ;;  %v15477_v44 = vpop.f32.mrf.mxu2  ;;  %v15479_v11 = vpop.f32.mrf.mxu3 }
 0x74a   : > { %12927 = vmatmul.msk.bf16.vlgmr.msrb.gmra.mxu0 %vm697_vm11, %v12911_v62  ;;  %12928 = vmatmul.msk.bf16.vlgmr.msrb.gmra.mxu1 %vm697_vm11, %v12911_v62 }
 0x74c   : > { %v4329_v30 = vpop.permute.xlu2 %4328 }
 0x751   : > { %v4061_v51 = vpop.f32.mrf.mxu0  ;;  %v15485_v36 = vpop.f32.mrf.mxu1 }
 0x752   : > { %v3975_v33 = vpop.permute.xlu1 %3974  ;;  %v3973_v23 = vpop.permute.xlu0 %3972 }
 0x753   : > { %v3987_v6 = vsel %vm681_vm12, %v3975_v33, %v3977_v26  ;;  %v3985_v5 = vsel %vm681_vm12, %v3971_v12, %v3973_v23  ;;  %v3986_v31 = vsel %vm681_vm12, %v3973_v23, %v3975_v33  ;;  %v4050_v12 = vpop.f32.mrf.mxu3 }
 0x754   : > { %v4177_v24 = vsel %vm701_vm10, %v3985_v5, 0  ;;  %v4180_v40 = vsel %vm701_vm10, %v3986_v31, 0  ;;  %v4183_v38 = vsel %vm701_vm10, %v3987_v6, 0  ;;  %v4335_v18 = vpop.permute.xlu2 %4334 }
 0x755   : > { %4273 = vmatpush.bf16.msrb.mxu2 %v4177_v24  ;;  %4286 = vmatpush.bf16.msrb.mxu3 %v4180_v40 }
 0x756   : > { %4299 = vmatpush.bf16.msra.mxu0 %v4183_v38 }
 0x758   : > { %12929 = vmatmul.msk.bf16.vlgmr.msrb.gmra.mxu2 %vm697_vm11, %v12911_v62  ;;  %12930 = vmatmul.msk.bf16.vlgmr.msrb.gmra.mxu3 %vm697_vm11, %v12911_v62 }
 0x759   : > { %v4063_v21 = vpop.f32.mrf.mxu0  ;;  %v4076_v19 = vpop.f32.mrf.mxu1 }
 0x75a   : > { %v4321_v42 = vpop.permute.xlu1 %4320  ;;  %v3979_v15 = vpop.permute.xlu0 %3978  ;;  %12931 = vmatmul.msk.bf16.vlgmr.msra.gmra.mxu0 %vm697_vm11, %v12911_v62 }
 0x75b   : > { %v4340_v47 = vsel %vm1046_vm13, %v4321_v42, %v4323_v16  ;;  %v3988_v50 = vsel %vm681_vm12, %v3977_v26, %v3979_v15  ;;  %v15501_v6 = vpop.f32.mrf.mxu3 }
 0x75c   : > { %v4355_v55 = vsel %vm701_vm10, %v4340_v47, 0  ;;  %v4186_v22 = vsel %vm701_vm10, %v3988_v50, 0 }
 0x75d   : > { %4312 = vmatpush.bf16.msra.mxu1 %v4186_v22  ;;  %4390 = vmatpush.bf16.msra.mxu2 %v4355_v55 }
 0x760   : > { %12932 = vmatmul.msk.bf16.vlgmr.msra.gmra.mxu1 %vm697_vm11, %v12911_v62  ;;  %v4037_v62 = vpop.f32.mrf.mxu2 }
 0x761   : > { %v15504_v5 = vpop.f32.mrf.mxu0  ;;  %v15506_v31 = vpop.f32.mrf.mxu1 }
 0x762   : > { %v4327_v63 = vpop.permute.xlu1 %4326  ;;  %v4325_v61 = vpop.permute.xlu0 %4324 }
 0x763   : > { %v4343_v56 = vsel %vm1046_vm13, %v4327_v63, %v4329_v30  ;;  %v4341_v3 = vsel %vm1046_vm13, %v4323_v16, %v4325_v61  ;;  %v4342_v34 = vsel %vm1046_vm13, %v4325_v61, %v4327_v63  ;;  %v4102_v24 = vpop.f32.mrf.mxu3 }
 0x764   : > { %v4358_v27 = vsel %vm701_vm10, %v4341_v3, 0  ;;  %v4361_v59 = vsel %vm701_vm10, %v4342_v34, 0  ;;  %v4364_v10 = vsel %vm701_vm10, %v4343_v56, 0 }
 0x765   : > { %4403 = vmatpush.bf16.msra.mxu3 %v4358_v27  ;;  %4416 = vmatpush.bf16.msrb.mxu0 %v4361_v59 }
 0x766   : > { %4429 = vmatpush.bf16.msrb.mxu1 %v4364_v10 }
 0x768   : > { %12934 = vmatmul.msk.bf16.vlgmr.msra.gmra.mxu2 %vm697_vm11, %v12933_v17  ;;  %12935 = vmatmul.msk.bf16.vlgmr.msra.gmra.mxu3 %vm697_vm11, %v12933_v17  ;;  %v15499_v23 = vpop.f32.mrf.mxu2 }
 0x769   : > { %v4115_v40 = vpop.f32.mrf.mxu0  ;;  %v4128_v38 = vpop.f32.mrf.mxu1 }
 0x76a   : > { %v4333_v7 = vpop.permute.xlu1 %4332  ;;  %v4331_v54 = vpop.permute.xlu0 %4330  ;;  %12936 = vmatmul.msk.bf16.vlgmr.msrb.gmra.mxu0 %vm697_vm11, %v12933_v17 }
 0x76b   : > { %v4346_v25 = vsel %vm1046_vm13, %v4333_v7, %v4335_v18  ;;  %v4344_v29 = vsel %vm1046_vm13, %v4329_v30, %v4331_v54  ;;  %v4345_v48 = vsel %vm1046_vm13, %v4331_v54, %v4333_v7  ;;  %v15513_v15 = vpop.f32.mrf.mxu3 }
 0x76c   : > { %v4367_v45 = vsel %vm701_vm10, %v4344_v29, 0  ;;  %v4370_v32 = vsel %vm701_vm10, %v4345_v48, 0  ;;  %v4373_v20 = vsel %vm701_vm10, %v4346_v25, 0 }
 0x76d   : > { %4442 = vmatpush.bf16.msrb.mxu2 %v4367_v45  ;;  %4455 = vmatpush.bf16.msrb.mxu3 %v4370_v32 }
 0x76e   : > { %4468 = vmatpush.bf16.msra.mxu0 %v4373_v20 }
 0x770   : > { %12937 = vmatmul.msk.bf16.vlgmr.msrb.gmra.mxu1 %vm697_vm11, %v12933_v17  ;;  %v4089_v16 = vpop.f32.mrf.mxu2 }
 0x772   : > { %v4339_v13 = vpop.permute.xlu1 %4338  ;;  %v4337_v39 = vpop.permute.xlu0 %4336 }
 0x773   : > { %v4350_v52 = vsel %vm1046_vm13, %v4339_v13, 0  ;;  %v4347_v37 = vsel %vm1046_vm13, %v4335_v18, %v4337_v39  ;;  %v4348_v41 = vsel %vm1046_vm13, %v4337_v39, %v4339_v13  ;;  %v4154_v50 = vpop.f32.mrf.mxu3  ;;  %v15519_v13 = vpop.permute.xlu2 %4527 }
 0x774   : > { %v4376_v14 = vsel %vm701_vm10, %v4347_v37, 0  ;;  %v4379_v26 = vsel %vm701_vm10, %v4348_v41, 0  ;;  %v4381_v33 = vsel %vm701_vm10, %v4350_v52, 0 }
 0x775   : > { %4481 = vmatpush.bf16.msra.mxu1 %v4376_v14  ;;  %4494 = vmatpush.bf16.msra.mxu2 %v4379_v26 }
 0x776   : > { %4507 = vmatpush.bf16.msra.mxu3 %v4381_v33 }
 0x778   : > { %12938 = vmatmul.msk.bf16.vlgmr.msrb.gmra.mxu2 %vm697_vm11, %v12933_v17  ;;  %12939 = vmatmul.msk.bf16.vlgmr.msrb.gmra.mxu3 %vm697_vm11, %v12933_v17  ;;  %v15511_v42 = vpop.f32.mrf.mxu2 }
 0x77a   : > { %12940 = vmatmul.msk.bf16.vlgmr.msra.gmra.mxu0 %vm697_vm11, %v12933_v17 }
 0x780   : > { %12941 = vmatmul.msk.bf16.vlgmr.msra.gmra.mxu1 %vm697_vm11, %v12933_v17  ;;  %v4141_v47 = vpop.f32.mrf.mxu2 }
 0x788   : > { %12942 = vmatmul.msk.bf16.vlgmr.msra.gmra.mxu2 %vm697_vm11, %v12933_v17  ;;  %12943 = vmatmul.msk.bf16.vlgmr.msra.gmra.mxu3 %vm697_vm11, %v12933_v17 }
 0x7b6   : > { %v4197_v55 = vpop.f32.mrf.mxu0  ;;  %v4210_v22 = vpop.f32.mrf.mxu1 }
 0x7b7   : > { %v4198_v39 = vadd.f32 %v4197_v55, %v15477_v44  ;;  %v4211_v52 = vadd.f32 %v4210_v22, %v15479_v11 }
 0x7bd   : > { %v4223_v30 = vpop.f32.mrf.mxu2 }
 0x7be   : > { %v4199_v63 = vpop.f32.mrf.mxu0  ;;  %v4212_v61 = vpop.f32.mrf.mxu1  ;;  %v4224_v20 = vadd.f32 %v4223_v30, %v4061_v51 }
 0x7c5   : > { %v4225_v56 = vpop.f32.mrf.mxu2 }
 0x7c7   : > { %v4249_v3 = vpop.f32.mrf.mxu0  ;;  %v4262_v34 = vpop.f32.mrf.mxu1 }
 0x7cb   : > { %v4236_v27 = vpop.f32.mrf.mxu3 }
 0x7cc   : > { %v4237_v21 = vadd.f32 %v4236_v27, %v15485_v36 }
 0x7cf   : > { %v4251_v59 = vpop.f32.mrf.mxu0  ;;  %v4264_v10 = vpop.f32.mrf.mxu1 }
 0x7d3   : > { %v4238_v18 = vpop.f32.mrf.mxu3 }
 0x7d7   : > { %v15515_v7 = vpop.f32.mrf.mxu0 }
 0x7db   : > { %v4275_v17 = vpop.f32.mrf.mxu2  ;;  %v4288_v54 = vpop.f32.mrf.mxu3 }
 0x7dc   : > { %v4276_v59 = vadd.f32 %v4275_v17, %v15504_v5 }
 0x7dd   : > { %v15517_v25 = vpop.f32.mrf.mxu1 }
 0x7df   : > { %v4303_v29 = vpop.f32.mrf.mxu0 }
 0x7e3   : > { %v4277_v48 = vpop.f32.mrf.mxu2  ;;  %v4290_v45 = vpop.f32.mrf.mxu3 }
 0x7e5   : > { %v4316_v32 = vpop.f32.mrf.mxu1 }
 0x7e7   : > { %v4418_v62 = vpop.f32.mrf.mxu0 }
 0x7e8   : > { %v4515_v12 = vadd.f32 %v4418_v62, %v4224_v20  ;;  %v4250_v62 = vadd.f32 %v4249_v3, %v15499_v23 }
 0x7ea   : > { %v4532_v37 = vadd.f32 %v15519_v13, %v4515_v12 }
 0x7eb   : > { %v4392_v41 = vpop.f32.mrf.mxu2  ;;  %v4405_v14 = vpop.f32.mrf.mxu3 }
 0x7ec   : > { %v4513_v19 = vadd.f32 %v4392_v41, %v4198_v39  ;;  %v4542_v26 = vadd.f32 %v4532_v37, %v15055_v0  ;;  %v4514_v33 = vadd.f32 %v4405_v14, %v4211_v52  ;;  %v4263_v52 = vadd.f32 %v4262_v34, %v15501_v6 }
 0x7ed   : > { %v4431_v16 = vpop.f32.mrf.mxu1 }
 0x7ee   : > { %v4530_v51 = vadd.f32 %v15519_v13, %v4513_v19  ;;  %v4516_v24 = vadd.f32 %v4431_v16, %v4237_v21  ;;  %v4531_v40 = vadd.f32 %v15519_v13, %v4514_v33  ;;  %v15529_v44 = vmul.f32 %v4542_v26, %v14392_v9 }
 0x7ef   : > { %v4420_v47 = vpop.f32.mrf.mxu0  ;;  %v4289_v21 = vadd.f32 %v4288_v54, %v15506_v31 }
 0x7f0   : > { %v4540_v11 = vadd.f32 %v4530_v51, %v15061_v4  ;;  %v4533_v38 = vadd.f32 %v15519_v13, %v4516_v24  ;;  %v4541_v36 = vadd.f32 %v4531_v40, %v15064_v35  ;;  %v4572_v61 = vmul.f32 0.1, %v15529_v44 }
 0x7f1   : > { %vm4562_vm5 = vcmp.ge.f32.partialorder %v15529_v44, 0.0 }
 0x7f2   : > { %v15535_v50 = vmul.f32 %v4540_v11, %v14345_v46  ;;  %v4543_v0 = vadd.f32 %v4533_v38, %v15069_v2  ;;  %v15539_v55 = vmul.f32 %v4541_v36, %v14343_v43  ;;  %v4582_v48 = vsel %vm4562_vm5, %v15529_v44, %v4572_v61  ;;  %v15587_v38 = vld [vmem:[%s18463_s2 + $0x4c] sm:$0xf] }
 0x7f3   : > { %v4394_v22 = vpop.f32.mrf.mxu2  ;;  %v4407_v63 = vpop.f32.mrf.mxu3 }
 0x7f4   : > { %v15542_v30 = vmul.f32 %v4543_v0, %v14394_v49  ;;  %vm4560_vm3 = vcmp.ge.f32.partialorder %v15535_v50, 0.0  ;;  %v4570_v4 = vmul.f32 0.1, %v15535_v50  ;;  %vm4561_vm4 = vcmp.ge.f32.partialorder %v15539_v55, 0.0 }
 0x7f5   : > { %v4433_v35 = vpop.f32.mrf.mxu1  ;;  %v4571_v56 = vmul.f32 0.1, %v15539_v55 }
 0x7f6   : > { %v4580_v2 = vsel %vm4560_vm3, %v15535_v50, %v4570_v4  ;;  %vm4563_vm6 = vcmp.ge.f32.partialorder %v15542_v30, 0.0  ;;  %v4573_v27 = vmul.f32 0.1, %v15542_v30 }
 0x7f7   : > { %v4581_v10 = vsel %vm4561_vm4, %v15539_v55, %v4571_v56  ;;  %v4470_v18 = vpop.f32.mrf.mxu0 }
 0x7f8   : > { %v4590_v29 = vpack.c.bf16 %v4581_v10, %v4580_v2  ;;  %v4583_v45 = vsel %vm4563_vm6, %v15542_v30, %v4573_v27  ;;  %v4519_v32 = vadd.f32 %v4470_v18, %v4276_v59 }
 0x7f9   : > { %v4591_v20 = vpack.c.bf16 %v4583_v45, %v4582_v48 }
 0x7fa   : > { %v4603_v12 = vunpack.c.h.b16 %v4590_v29  ;;  %v4602_v39 = vunpack.c.l.b16 %v4590_v29  ;;  %v4536_v37 = vadd.f32 %v15519_v13, %v4519_v32 }
 0x7fb   : > { %v4444_v41 = vpop.f32.mrf.mxu2  ;;  %v4604_v5 = vunpack.c.l.b16 %v4591_v20  ;;  %v4605_v17 = vunpack.c.h.b16 %v4591_v20  ;;  %v4457_v14 = vpop.f32.mrf.mxu3 }
 0x7fc   : > { %v4517_v19 = vadd.f32 %v4444_v41, %v4250_v62  ;;  %v15561_v26 = vpack.c.b16 %v4603_v12, %v4603_v12  ;;  %v15563_v33 = vpack.c.b16 %v4602_v39, %v4602_v39  ;;  %v4546_v16 = vadd.f32 %v4536_v37, %v15113_v58 }
 0x7fd   : > { %v4518_v23 = vadd.f32 %v4457_v14, %v4263_v52  ;;  %v4483_v3 = vpop.f32.mrf.mxu1  ;;  %v15566_v51 = vpack.c.b16 %v4604_v5, %v4604_v5  ;;  %v15568_v6 = vpack.c.b16 %v4605_v17, %v4605_v17  ;;  %v4302_v62 = vadd.f32 %v15515_v7, %v15511_v42 }
 0x7fe   : > { %v4534_v34 = vadd.f32 %v15519_v13, %v4517_v19  ;;  %v4520_v24 = vadd.f32 %v4483_v3, %v4289_v21  ;;  %4624 = vrot.lane.b32.xlu1 %v15561_v26, %s13793_s11  ;;  %4622 = vrot.lane.b32.xlu0 %v15563_v33, %s13793_s11  ;;  %v4659_v31 = vsel %vm701_vm10, %v15563_v33, 0  ;;  %v4662_v58 = vsel %vm701_vm10, %v15561_v26, 0 }
 0x7ff   : > { %v4535_v54 = vadd.f32 %v15519_v13, %v4518_v23  ;;  %4695 = vmatpush.bf16.msrb.mxu0 %v4659_v31  ;;  %4708 = vmatpush.bf16.msrb.mxu1 %v4662_v58  ;;  %v4665_v40 = vsel %vm701_vm10, %v15566_v51, 0  ;;  %v4668_v11 = vsel %vm701_vm10, %v15568_v6, 0  ;;  %v15590_v47 = vmul.f32 %v4546_v16, %v14343_v43  ;;  %v4472_v22 = vpop.f32.mrf.mxu0 }
 0x800   : > { %v4544_v36 = vadd.f32 %v4534_v34, %v15124_v1  ;;  %v4537_v0 = vadd.f32 %v15519_v13, %v4520_v24  ;;  %4626 = vrot.lane.b32.xlu2 %v15566_v51, %s13793_s11  ;;  %4721 = vmatpush.bf16.msrb.mxu2 %v4665_v40  ;;  %v4315_v52 = vadd.f32 %v15517_v25, %v15513_v15 }
 0x801   : > { %v4545_v63 = vadd.f32 %v4535_v54, %v15127_v53  ;;  %4734 = vmatpush.bf16.msrb.mxu3 %v4668_v11  ;;  %v4576_v2 = vmul.f32 0.1, %v15590_v47  ;;  %vm4566_vm1 = vcmp.ge.f32.partialorder %v15590_v47, 0.0 }
 0x802   : > { %v15598_v4 = vmul.f32 %v4544_v36, %v14379_v28  ;;  %v4547_v61 = vadd.f32 %v4537_v0, %v15134_v60  ;;  %12947 = vmatmul.msk.bf16.vlgmr.msrb.gmra.mxu0 %vm697_vm11, %v15587_v38  ;;  %12948 = vmatmul.msk.bf16.vlgmr.msrb.gmra.mxu1 %vm697_vm11, %v15587_v38 }
 0x803   : > { %v15606_v1 = vmul.f32 %v4545_v63, %v14345_v46  ;;  %v4446_v35 = vpop.f32.mrf.mxu2  ;;  %12949 = vmatmul.msk.bf16.vlgmr.msrb.gmra.mxu2 %vm697_vm11, %v15587_v38  ;;  %v4459_v56 = vpop.f32.mrf.mxu3  ;;  %v4586_v45 = vsel %vm4566_vm1, %v15590_v47, %v4576_v2 }
 0x804   : > { %v15611_v53 = vmul.f32 %v4547_v61, %v14392_v9  ;;  %vm4564_vm7 = vcmp.ge.f32.partialorder %v15598_v4, 0.0  ;;  %v4574_v60 = vmul.f32 0.1, %v15598_v4  ;;  %12950 = vmatmul.msk.bf16.vlgmr.msrb.gmra.mxu3 %vm697_vm11, %v15587_v38 }
 0x805   : > { %v4485_v27 = vpop.f32.mrf.mxu1  ;;  %vm4565_vm8 = vcmp.ge.f32.partialorder %v15606_v1, 0.0  ;;  %v4575_v59 = vmul.f32 0.1, %v15606_v1 }
 0x806   : > { %4628 = vrot.lane.b32.xlu0 %v15568_v6, %s13793_s11  ;;  %v4584_v10 = vsel %vm4564_vm7, %v15598_v4, %v4574_v60  ;;  %vm4567_vm2 = vcmp.ge.f32.partialorder %v15611_v53, 0.0  ;;  %v4577_v18 = vmul.f32 0.1, %v15611_v53 }
 0x807   : > { %v4585_v29 = vsel %vm4565_vm8, %v15606_v1, %v4575_v59 }
 0x808   : > { %v4592_v48 = vpack.c.bf16 %v4585_v29, %v4584_v10  ;;  %v4587_v32 = vsel %vm4567_vm2, %v15611_v53, %v4577_v18 }
 0x809   : > { %v4593_v20 = vpack.c.bf16 %v4587_v32, %v4586_v45 }
 0x80a   : > { %v4607_v12 = vunpack.c.h.b16 %v4592_v48  ;;  %v4606_v39 = vunpack.c.l.b16 %v4592_v48  ;;  %v12945_v48 = vld [vmem:[%s18463_s2 + $0x48] sm:$0xf] }
 0x80b   : > { %v4496_v37 = vpop.f32.mrf.mxu2  ;;  %v4608_v41 = vunpack.c.l.b16 %v4593_v20  ;;  %v4609_v5 = vunpack.c.h.b16 %v4593_v20  ;;  %v4509_v21 = vpop.f32.mrf.mxu3 }
 0x80c   : > { %v4521_v17 = vadd.f32 %v4496_v37, %v4302_v62  ;;  %v4617_v19 = vpack.c.b16 %v4607_v12, %v4607_v12  ;;  %v4616_v14 = vpack.c.b16 %v4606_v39, %v4606_v39  ;;  %v4522_v16 = vadd.f32 %v4509_v21, %v4315_v52 }
 0x80d   : > { %v4618_v23 = vpack.c.b16 %v4608_v41, %v4608_v41  ;;  %v4619_v3 = vpack.c.b16 %v4609_v5, %v4609_v5 }
 0x80e   : > { %v4538_v34 = vadd.f32 %v15519_v13, %v4521_v17  ;;  %4632 = vrot.lane.b32.xlu2 %v4617_v19, %s13793_s11  ;;  %4630 = vrot.lane.b32.xlu1 %v4616_v14, %s13793_s11  ;;  %v4671_v42 = vsel %vm701_vm10, %v4616_v14, 0  ;;  %v4674_v15 = vsel %vm701_vm10, %v4617_v19, 0  ;;  %v4539_v7 = vadd.f32 %v15519_v13, %v4522_v16 }
 0x80f   : > { %4747 = vmatpush.bf16.msra.mxu0 %v4671_v42  ;;  %4760 = vmatpush.bf16.msra.mxu1 %v4674_v15  ;;  %v4677_v25 = vsel %vm701_vm10, %v4618_v23, 0  ;;  %v4680_v24 = vsel %vm701_vm10, %v4619_v3, 0 }
 0x810   : > { %v4548_v31 = vadd.f32 %v4538_v34, %v15171_v8  ;;  %4634 = vrot.lane.b32.xlu0 %v4618_v23, %s13793_s11  ;;  %4773 = vmatpush.bf16.msra.mxu2 %v4677_v25  ;;  %v4549_v58 = vadd.f32 %v4539_v7, %v15174_v57 }
 0x811   : > { %4786 = vmatpush.bf16.msra.mxu3 %v4680_v24 }
 0x812   : > { %v15645_v54 = vmul.f32 %v4548_v31, %v14394_v49  ;;  %12951 = vmatmul.msk.bf16.vlgmr.msra.gmra.mxu0 %vm697_vm11, %v15587_v38  ;;  %12952 = vmatmul.msk.bf16.vlgmr.msra.gmra.mxu1 %vm697_vm11, %v15587_v38  ;;  %v15652_v13 = vmul.f32 %v4549_v58, %v14379_v28 }
 0x813   : > { %v4498_v40 = vpop.f32.mrf.mxu2  ;;  %12953 = vmatmul.msk.bf16.vlgmr.msra.gmra.mxu2 %vm697_vm11, %v15587_v38  ;;  %v4511_v8 = vpop.f32.mrf.mxu3 }
 0x814   : > { %vm4568_vm3 = vcmp.ge.f32.partialorder %v15645_v54, 0.0  ;;  %v4578_v57 = vmul.f32 0.1, %v15645_v54  ;;  %12954 = vmatmul.msk.bf16.vlgmr.msra.gmra.mxu3 %vm697_vm11, %v15587_v38  ;;  %vm4569_vm4 = vcmp.ge.f32.partialorder %v15652_v13, 0.0  ;;  %v4579_v11 = vmul.f32 0.1, %v15652_v13 }
 0x815   : > { %v12967_v8 = vld [vmem:[%s18463_s2 + $0x50] sm:$0xf] }
 0x816   : > { %4636 = vrot.lane.b32.xlu1 %v4619_v3, %s13793_s11  ;;  %v4588_v36 = vsel %vm4568_vm3, %v15645_v54, %v4578_v57  ;;  %v4589_v0 = vsel %vm4569_vm4, %v15652_v13, %v4579_v11 }
 0x817   : > { %v4594_v22 = vpack.c.bf16 %v4589_v0, %v4588_v36 }
 0x819   : > { %v4610_v63 = vunpack.c.l.b16 %v4594_v22  ;;  %v4611_v61 = vunpack.c.h.b16 %v4594_v22 }
 0x81b   : > { %v4620_v35 = vpack.c.b16 %v4610_v63, %v4610_v63  ;;  %v4621_v56 = vpack.c.b16 %v4611_v61, %v4611_v61 }
 0x81d   : > { %4638 = vrot.lane.b32.xlu2 %v4620_v35, %s13793_s11  ;;  %v4683_v60 = vsel %vm701_vm10, %v4620_v35, 0  ;;  %v4686_v2 = vsel %vm701_vm10, %v4621_v56, 0  ;;  %4640 = vrot.lane.b32.xlu0 %v4621_v56, %s13793_s11 }
 0x81e   : > { %4982 = vrot.lane.b32.xlu1 %v15563_v33, %s13794_s28  ;;  %4799 = vmatpush.bf16.msrb.mxu0 %v4683_v60 }
 0x81f   : > { %4812 = vmatpush.bf16.msrb.mxu1 %v4686_v2 }
 0x822   : > { %12955 = vmatmul.msk.bf16.vlgmr.msrb.gmra.mxu0 %vm697_vm11, %v15587_v38  ;;  %12956 = vmatmul.msk.bf16.vlgmr.msrb.gmra.mxu1 %vm697_vm11, %v15587_v38 }
 0x825   : > { %4984 = vrot.lane.b32.xlu2 %v15561_v26, %s13794_s28  ;;  %4986 = vrot.lane.b32.xlu0 %v15566_v51, %s13794_s28  ;;  %v12978_v26 = vld [vmem:[%s18464_s3 + $0x30] sm:$0xff] }
 0x826   : > { %4988 = vrot.lane.b32.xlu1 %v15568_v6, %s13794_s28 }
 0x82d   : > { %4990 = vrot.lane.b32.xlu2 %v4616_v14, %s13794_s28  ;;  %4992 = vrot.lane.b32.xlu0 %v4617_v19, %s13794_s28 }
 0x82e   : > { %4994 = vrot.lane.b32.xlu1 %v4618_v23, %s13794_s28 }
 0x835   : > { %4996 = vrot.lane.b32.xlu2 %v4619_v3, %s13794_s28  ;;  %4998 = vrot.lane.b32.xlu0 %v4620_v35, %s13794_s28 }
 0x836   : > { %5000 = vrot.lane.b32.xlu1 %v4621_v56, %s13794_s28 }
 0x83d   : > { %5189 = vperm.xlu2 %13571, %v12978_v26  }
 0x85a   : > { %v4627_v33 = vpop.permute.xlu2 %4626 }
 0x868   : > { %v4633_v45 = vpop.permute.xlu2 %4632 }
 0x870   : > { %v4625_v6 = vpop.permute.xlu1 %4624  ;;  %v4623_v51 = vpop.permute.xlu0 %4622 }
 0x871   : > { %v4643_v38 = vsel %vm681_vm12, %v4625_v6, %v4627_v33  ;;  %v4642_v27 = vsel %vm681_vm12, %v4623_v51, %v4625_v6  ;;  %v4652_v59 = vsel %vm681_vm12, 0, %v4623_v51 }
 0x872   : > { %v4821_v10 = vsel %vm701_vm10, %v4652_v59, 0  ;;  %v4824_v18 = vsel %vm701_vm10, %v4642_v27, 0  ;;  %v4827_v29 = vsel %vm701_vm10, %v4643_v38, 0 }
 0x873   : > { %4857 = vmatpush.bf16.msrb.mxu2 %v4821_v10  ;;  %4870 = vmatpush.bf16.msrb.mxu3 %v4824_v18 }
 0x874   : > { %4883 = vmatpush.bf16.msra.mxu0 %v4827_v29 }
 0x876   : > { %12957 = vmatmul.msk.bf16.vlgmr.msrb.gmra.mxu2 %vm697_vm11, %v12945_v48  ;;  %12958 = vmatmul.msk.bf16.vlgmr.msrb.gmra.mxu3 %vm697_vm11, %v12945_v48 }
 0x877   : > { %12959 = vmatmul.msk.bf16.vlgmr.msra.gmra.mxu0 %vm697_vm11, %v12945_v48  ;;  %v4639_v12 = vpop.permute.xlu2 %4638 }
 0x878   : > { %v4629_v32 = vpop.permute.xlu0 %4628 }
 0x879   : > { %v4644_v20 = vsel %vm681_vm12, %v4627_v33, %v4629_v32 }
 0x87a   : > { %v4830_v62 = vsel %vm701_vm10, %v4644_v20, 0 }
 0x87b   : > { %4896 = vmatpush.bf16.msra.mxu1 %v4830_v62 }
 0x87e   : > { %12960 = vmatmul.msk.bf16.vlgmr.msra.gmra.mxu1 %vm697_vm11, %v12945_v48 }
 0x87f   : > { %v4985_v3 = vpop.permute.xlu2 %4984  ;;  %v15736_v60 = vpop.f32.mrf.mxu0 }
 0x880   : > { %v4631_v39 = vpop.permute.xlu1 %4630  ;;  %v15738_v2 = vpop.f32.mrf.mxu1 }
 0x881   : > { %v4645_v52 = vsel %vm681_vm12, %v4629_v32, %v4631_v39  ;;  %v4646_v37 = vsel %vm681_vm12, %v4631_v39, %v4633_v45 }
 0x882   : > { %v4635_v41 = vpop.permute.xlu0 %4634  ;;  %v4833_v5 = vsel %vm701_vm10, %v4645_v52, 0  ;;  %v4836_v17 = vsel %vm701_vm10, %v4646_v37, 0 }
 0x883   : > { %v4647_v21 = vsel %vm681_vm12, %v4633_v45, %v4635_v41  ;;  %4909 = vmatpush.bf16.msra.mxu2 %v4833_v5  ;;  %4922 = vmatpush.bf16.msra.mxu3 %v4836_v17 }
 0x884   : > { %v4839_v19 = vsel %vm701_vm10, %v4647_v21, 0 }
 0x885   : > { %4935 = vmatpush.bf16.msrb.mxu0 %v4839_v19 }
 0x886   : > { %12961 = vmatmul.msk.bf16.vlgmr.msra.gmra.mxu2 %vm697_vm11, %v12945_v48  ;;  %12962 = vmatmul.msk.bf16.vlgmr.msra.gmra.mxu3 %vm697_vm11, %v12945_v48  ;;  %v15740_v33 = vpop.f32.mrf.mxu2 }
 0x887   : > { %v4991_v40 = vpop.permute.xlu2 %4990  ;;  %v15743_v38 = vpop.f32.mrf.mxu3 }
 0x888   : > { %v4637_v14 = vpop.permute.xlu1 %4636  ;;  %12963 = vmatmul.msk.bf16.vlgmr.msrb.gmra.mxu0 %vm697_vm11, %v12945_v48  ;;  %v4712_v45 = vpop.f32.mrf.mxu1 }
 0x889   : > { %v4648_v16 = vsel %vm681_vm12, %v4635_v41, %v4637_v14  ;;  %v4649_v23 = vsel %vm681_vm12, %v4637_v14, %v4639_v12 }
 0x88a   : > { %v4842_v34 = vsel %vm701_vm10, %v4648_v16, 0  ;;  %v4845_v42 = vsel %vm701_vm10, %v4649_v23, 0 }
 0x88b   : > { %4948 = vmatpush.bf16.msrb.mxu1 %v4842_v34  ;;  %4961 = vmatpush.bf16.msrb.mxu2 %v4845_v42 }
 0x88e   : > { %12964 = vmatmul.msk.bf16.vlgmr.msrb.gmra.mxu1 %vm697_vm11, %v12945_v48  ;;  %v4725_v20 = vpop.f32.mrf.mxu2 }
 0x88f   : > { %v4641_v25 = vpop.permute.xlu0 %4640  ;;  %v4997_v56 = vpop.permute.xlu2 %4996 }
 0x890   : > { %v4983_v15 = vpop.permute.xlu1 %4982  ;;  %v4650_v31 = vsel %vm681_vm12, %v4639_v12, %v4641_v25  ;;  %v4738_v39 = vpop.f32.mrf.mxu3 }
 0x891   : > { %v5002_v7 = vsel %vm1046_vm13, %v4983_v15, %v4985_v3  ;;  %v4848_v58 = vsel %vm701_vm10, %v4650_v31, 0  ;;  %v15760_v19 = vpop.f32.mrf.mxu1 }
 0x892   : > { %v5017_v24 = vsel %vm701_vm10, %v5002_v7, 0  ;;  %4974 = vmatpush.bf16.msrb.mxu3 %v4848_v58 }
 0x893   : > { %5052 = vmatpush.bf16.msra.mxu0 %v5017_v24 }
 0x896   : > { %12965 = vmatmul.msk.bf16.vlgmr.msrb.gmra.mxu2 %vm697_vm11, %v12945_v48  ;;  %12966 = vmatmul.msk.bf16.vlgmr.msrb.gmra.mxu3 %vm697_vm11, %v12945_v48  ;;  %v4699_v48 = vpop.f32.mrf.mxu0  ;;  %v15762_v14 = vpop.f32.mrf.mxu2 }
 0x897   : > { %v4987_v36 = vpop.permute.xlu0 %4986 }
 0x898   : > { %v4989_v57 = vpop.permute.xlu1 %4988  ;;  %12968 = vmatmul.msk.bf16.vlgmr.msra.gmra.mxu0 %vm697_vm11, %v12967_v8  ;;  %v5003_v0 = vsel %vm1046_vm13, %v4985_v3, %v4987_v36  ;;  %v15764_v16 = vpop.f32.mrf.mxu3 }
 0x899   : > { %v5005_v11 = vsel %vm1046_vm13, %v4989_v57, %v4991_v40  ;;  %v5004_v22 = vsel %vm1046_vm13, %v4987_v36, %v4989_v57  ;;  %v5020_v61 = vsel %vm701_vm10, %v5003_v0, 0  ;;  %v4764_v3 = vpop.f32.mrf.mxu1 }
 0x89a   : > { %v5026_v63 = vsel %vm701_vm10, %v5005_v11, 0  ;;  %v5023_v35 = vsel %vm701_vm10, %v5004_v22, 0  ;;  %5065 = vmatpush.bf16.msra.mxu1 %v5020_v61 }
 0x89b   : > { %5091 = vmatpush.bf16.msra.mxu3 %v5026_v63  ;;  %5078 = vmatpush.bf16.msra.mxu2 %v5023_v35 }
 0x89e   : > { %12969 = vmatmul.msk.bf16.vlgmr.msra.gmra.mxu1 %vm697_vm11, %v12967_v8  ;;  %v4749_v21 = vpop.f32.mrf.mxu0  ;;  %v4777_v34 = vpop.f32.mrf.mxu2 }
 0x89f   : > { %v4993_v51 = vpop.permute.xlu0 %4992 }
 0x8a0   : > { %v4995_v26 = vpop.permute.xlu1 %4994  ;;  %v5006_v27 = vsel %vm1046_vm13, %v4991_v40, %v4993_v51  ;;  %v4790_v42 = vpop.f32.mrf.mxu3 }
 0x8a1   : > { %v5008_v6 = vsel %vm1046_vm13, %v4995_v26, %v4997_v56  ;;  %v5007_v59 = vsel %vm1046_vm13, %v4993_v51, %v4995_v26  ;;  %v5029_v18 = vsel %vm701_vm10, %v5006_v27, 0  ;;  %v15772_v7 = vpop.f32.mrf.mxu1 }
 0x8a2   : > { %v5035_v10 = vsel %vm701_vm10, %v5008_v6, 0  ;;  %v5032_v29 = vsel %vm701_vm10, %v5007_v59, 0  ;;  %5104 = vmatpush.bf16.msrb.mxu0 %v5029_v18  ;;  %v15779_v18 = vpop.permute.xlu2 %5189 }
 0x8a3   : > { %5130 = vmatpush.bf16.msrb.mxu2 %v5035_v10  ;;  %5117 = vmatpush.bf16.msrb.mxu1 %v5032_v29 }
 0x8a6   : > { %12970 = vmatmul.msk.bf16.vlgmr.msra.gmra.mxu2 %vm697_vm11, %v12967_v8  ;;  %12971 = vmatmul.msk.bf16.vlgmr.msra.gmra.mxu3 %vm697_vm11, %v12967_v8  ;;  %v4751_v23 = vpop.f32.mrf.mxu0 }
 0x8a7   : > { %v4999_v12 = vpop.permute.xlu0 %4998 }
 0x8a8   : > { %v5001_v32 = vpop.permute.xlu1 %5000  ;;  %12972 = vmatmul.msk.bf16.vlgmr.msrb.gmra.mxu0 %vm697_vm11, %v12967_v8  ;;  %v5009_v52 = vsel %vm1046_vm13, %v4997_v56, %v4999_v12 }
 0x8a9   : > { %v5012_v62 = vsel %vm1046_vm13, %v5001_v32, 0  ;;  %v5010_v37 = vsel %vm1046_vm13, %v4999_v12, %v5001_v32  ;;  %v5038_v5 = vsel %vm701_vm10, %v5009_v52, 0  ;;  %v4816_v24 = vpop.f32.mrf.mxu1 }
 0x8aa   : > { %v5043_v41 = vsel %vm701_vm10, %v5012_v62, 0  ;;  %v5041_v17 = vsel %vm701_vm10, %v5010_v37, 0  ;;  %5143 = vmatpush.bf16.msrb.mxu3 %v5038_v5 }
 0x8ab   : > { %5169 = vmatpush.bf16.msra.mxu1 %v5043_v41  ;;  %5156 = vmatpush.bf16.msra.mxu0 %v5041_v17 }
 0x8ae   : > { %12973 = vmatmul.msk.bf16.vlgmr.msrb.gmra.mxu1 %vm697_vm11, %v12967_v8  ;;  %v15770_v15 = vpop.f32.mrf.mxu0 }
 0x8b6   : > { %12974 = vmatmul.msk.bf16.vlgmr.msrb.gmra.mxu2 %vm697_vm11, %v12967_v8  ;;  %12975 = vmatmul.msk.bf16.vlgmr.msrb.gmra.mxu3 %vm697_vm11, %v12967_v8  ;;  %v4803_v25 = vpop.f32.mrf.mxu0 }
 0x8b8   : > { %12976 = vmatmul.msk.bf16.vlgmr.msra.gmra.mxu0 %vm697_vm11, %v12967_v8 }
 0x8be   : > { %12977 = vmatmul.msk.bf16.vlgmr.msra.gmra.mxu1 %vm697_vm11, %v12967_v8 }
 0x8f4   : > { %v4885_v31 = vpop.f32.mrf.mxu0 }
 0x8f9   : > { %v4859_v58 = vpop.f32.mrf.mxu2  ;;  %v4872_v40 = vpop.f32.mrf.mxu3 }
 0x8fa   : > { %v4860_v27 = vadd.f32 %v4859_v58, %v15736_v60  ;;  %v4873_v32 = vadd.f32 %v4872_v40, %v15738_v2  ;;  %v4886_v58 = vadd.f32 %v4885_v31, %v15740_v33 }
 0x8fb   : > { %v4898_v57 = vpop.f32.mrf.mxu1 }
 0x8fc   : > { %v4887_v11 = vpop.f32.mrf.mxu0 }
 0x901   : > { %v4861_v36 = vpop.f32.mrf.mxu2  ;;  %v4874_v0 = vpop.f32.mrf.mxu3 }
 0x902   : > { %v4899_v0 = vadd.f32 %v4898_v57, %v15743_v38 }
 0x903   : > { %v4900_v22 = vpop.f32.mrf.mxu1 }
 0x905   : > { %v15774_v63 = vpop.f32.mrf.mxu0 }
 0x909   : > { %v4911_v61 = vpop.f32.mrf.mxu2  ;;  %v4924_v35 = vpop.f32.mrf.mxu3 }
 0x90a   : > { %v4912_v23 = vadd.f32 %v4911_v61, %v4749_v21  ;;  %v4925_v61 = vadd.f32 %v4924_v35, %v15760_v19 }
 0x90b   : > { %v15776_v56 = vpop.f32.mrf.mxu1 }
 0x90d   : > { %v4939_v8 = vpop.f32.mrf.mxu0 }
 0x911   : > { %v4913_v26 = vpop.f32.mrf.mxu2  ;;  %v4926_v6 = vpop.f32.mrf.mxu3 }
 0x913   : > { %v4952_v51 = vpop.f32.mrf.mxu1 }
 0x915   : > { %v5054_v59 = vpop.f32.mrf.mxu0 }
 0x916   : > { %v5175_v10 = vadd.f32 %v5054_v59, %v4860_v27 }
 0x918   : > { %v5192_v29 = vadd.f32 %v15779_v18, %v5175_v10  ;;  %v15811_v10 = vld [vmem:[%s18463_s2 + $0x58] sm:$0xf] }
 0x919   : > { %v15782_v48 = vpop.f32.mrf.mxu2  ;;  %v15784_v45 = vpop.f32.mrf.mxu3 }
 0x91a   : > { %v5212_v62 = vmul.f32 0.1, %v5192_v29  ;;  %vm5202_vm5 = vcmp.ge.f32.partialorder %v5192_v29, 0.0 }
 0x91b   : > { %v5067_v20 = vpop.f32.mrf.mxu1 }
 0x91c   : > { %v5176_v12 = vadd.f32 %v5067_v20, %v4873_v32  ;;  %v5222_v60 = vsel %vm5202_vm5, %v5192_v29, %v5212_v62 }
 0x91d   : > { %v5056_v39 = vpop.f32.mrf.mxu0  ;;  %v5232_v3 = vmul.f32 %v5222_v60, %v14345_v46 }
 0x91e   : > { %v5193_v52 = vadd.f32 %v15779_v18, %v5176_v12 }
 0x920   : > { %vm5203_vm6 = vcmp.ge.f32.partialorder %v5193_v52, 0.0  ;;  %v5213_v37 = vmul.f32 0.1, %v5193_v52 }
 0x921   : > { %v4965_v41 = vpop.f32.mrf.mxu2  ;;  %v4978_v5 = vpop.f32.mrf.mxu3 }
 0x922   : > { %v5223_v17 = vsel %vm5203_vm6, %v5193_v52, %v5213_v37 }
 0x923   : > { %v5233_v34 = vmul.f32 %v5223_v17, %v14343_v43  ;;  %v5069_v42 = vpop.f32.mrf.mxu1 }
 0x925   : > { %v5106_v2 = vpop.f32.mrf.mxu0  ;;  %v5242_v24 = vpack.c.bf16 %v5233_v34, %v5232_v3 }
 0x926   : > { %v5179_v25 = vadd.f32 %v5106_v2, %v4912_v23  ;;  %v4964_v23 = vadd.f32 %v15782_v48, %v15770_v15  ;;  %v4951_v48 = vadd.f32 %v15776_v56, %v15764_v16 }
 0x927   : > { %v5255_v11 = vunpack.c.h.b16 %v5242_v24  ;;  %v5254_v36 = vunpack.c.l.b16 %v5242_v24 }
 0x928   : > { %v5196_v40 = vadd.f32 %v15779_v18, %v5179_v25 }
 0x929   : > { %v5080_v22 = vpop.f32.mrf.mxu2  ;;  %v5093_v26 = vpop.f32.mrf.mxu3  ;;  %v15793_v21 = vpack.c.b16 %v5255_v11, %v5255_v11  ;;  %v15796_v51 = vpack.c.b16 %v5254_v36, %v5254_v36  ;;  %v4938_v36 = vadd.f32 %v15774_v63, %v15762_v14 }
 0x92a   : > { %v5177_v8 = vadd.f32 %v5080_v22, %v4886_v58  ;;  %v5178_v6 = vadd.f32 %v5093_v26, %v4899_v0  ;;  %v5216_v27 = vmul.f32 0.1, %v5196_v40  ;;  %vm5206_vm7 = vcmp.ge.f32.partialorder %v5196_v40, 0.0 }
 0x92b   : > { %v5119_v33 = vpop.f32.mrf.mxu1  ;;  %5276 = vrot.lane.b32.xlu1 %v15793_v21, %s13793_s11  ;;  %v5314_v38 = vsel %vm701_vm10, %v15793_v21, 0  ;;  %5274 = vrot.lane.b32.xlu0 %v15796_v51, %s13793_s11  ;;  %v5311_v19 = vsel %vm701_vm10, %v15796_v51, 0 }
 0x92c   : > { %v5194_v59 = vadd.f32 %v15779_v18, %v5177_v8  ;;  %v5195_v31 = vadd.f32 %v15779_v18, %v5178_v6  ;;  %v5180_v57 = vadd.f32 %v5119_v33, %v4925_v61  ;;  %5360 = vmatpush.bf16.msra.mxu3 %v5314_v38  ;;  %5347 = vmatpush.bf16.msra.mxu2 %v5311_v19 }
 0x92d   : > { %v5108_v35 = vpop.f32.mrf.mxu0  ;;  %v5226_v62 = vsel %vm5206_vm7, %v5196_v40, %v5216_v27  ;;  %v4977_v6 = vadd.f32 %v15784_v45, %v15772_v7 }
 0x92e   : > { %vm5204_vm8 = vcmp.ge.f32.partialorder %v5194_v59, 0.0  ;;  %v5214_v29 = vmul.f32 0.1, %v5194_v59  ;;  %vm5205_vm1 = vcmp.ge.f32.partialorder %v5195_v31, 0.0  ;;  %v5215_v32 = vmul.f32 0.1, %v5195_v31 }
 0x92f   : > { %v5197_v20 = vadd.f32 %v15779_v18, %v5180_v57  ;;  %12982 = vmatmul.msk.bf16.vlgmr.msra.gmra.mxu3 %vm697_vm11, %v15811_v10  ;;  %12981 = vmatmul.msk.bf16.vlgmr.msra.gmra.mxu2 %vm697_vm11, %v15811_v10  ;;  %v5236_v3 = vmul.f32 %v5226_v62, %v14379_v28 }
 0x930   : > { %v5224_v12 = vsel %vm5204_vm8, %v5194_v59, %v5214_v29  ;;  %v5225_v52 = vsel %vm5205_vm1, %v5195_v31, %v5215_v32 }
 0x931   : > { %v5234_v39 = vmul.f32 %v5224_v12, %v14392_v9  ;;  %vm5207_vm2 = vcmp.ge.f32.partialorder %v5197_v20, 0.0  ;;  %v5217_v60 = vmul.f32 0.1, %v5197_v20  ;;  %v5082_v37 = vpop.f32.mrf.mxu2  ;;  %v5235_v41 = vmul.f32 %v5225_v52, %v14394_v49  ;;  %v5095_v5 = vpop.f32.mrf.mxu3 }
 0x933   : > { %v5227_v17 = vsel %vm5207_vm2, %v5197_v20, %v5217_v60  ;;  %v5121_v42 = vpop.f32.mrf.mxu1  ;;  %v5243_v2 = vpack.c.bf16 %v5235_v41, %v5234_v39 }
 0x934   : > { %v5237_v34 = vmul.f32 %v5227_v17, %v14345_v46 }
 0x935   : > { %v5158_v25 = vpop.f32.mrf.mxu0  ;;  %v5257_v58 = vunpack.c.h.b16 %v5243_v2  ;;  %v5256_v40 = vunpack.c.l.b16 %v5243_v2 }
 0x936   : > { %v5183_v24 = vadd.f32 %v5158_v25, %v4964_v23  ;;  %v5244_v11 = vpack.c.bf16 %v5237_v34, %v5236_v3 }
 0x937   : > { %v15827_v22 = vpack.c.b16 %v5257_v58, %v5257_v58  ;;  %v15829_v8 = vpack.c.b16 %v5256_v40, %v5256_v40 }
 0x938   : > { %v5200_v0 = vadd.f32 %v15779_v18, %v5183_v24  ;;  %v5258_v15 = vunpack.c.l.b16 %v5244_v11  ;;  %v5259_v61 = vunpack.c.h.b16 %v5244_v11 }
 0x939   : > { %v5132_v26 = vpop.f32.mrf.mxu2  ;;  %v5145_v59 = vpop.f32.mrf.mxu3  ;;  %5280 = vrot.lane.b32.xlu0 %v15827_v22, %s13793_s11  ;;  %5278 = vrot.lane.b32.xlu2 %v15829_v8, %s13793_s11  ;;  %v5317_v14 = vsel %vm701_vm10, %v15829_v8, 0  ;;  %v5320_v16 = vsel %vm701_vm10, %v15827_v22, 0 }
 0x93a   : > { %v5181_v27 = vadd.f32 %v5132_v26, %v4938_v36  ;;  %v5182_v63 = vadd.f32 %v5145_v59, %v4951_v48  ;;  %5373 = vmatpush.bf16.msrb.mxu0 %v5317_v14  ;;  %v15843_v56 = vpack.c.b16 %v5258_v15, %v5258_v15  ;;  %v15845_v33 = vpack.c.b16 %v5259_v61, %v5259_v61 }
 0x93b   : > { %v5220_v7 = vmul.f32 0.1, %v5200_v0  ;;  %5386 = vmatpush.bf16.msrb.mxu1 %v5320_v16  ;;  %v5171_v38 = vpop.f32.mrf.mxu1  ;;  %vm5210_vm3 = vcmp.ge.f32.partialorder %v5200_v0, 0.0 }
 0x93c   : > { %v5198_v45 = vadd.f32 %v15779_v18, %v5181_v27  ;;  %v5199_v31 = vadd.f32 %v15779_v18, %v5182_v63  ;;  %v5184_v57 = vadd.f32 %v5171_v38, %v4977_v6  ;;  %5282 = vrot.lane.b32.xlu1 %v15843_v56, %s13793_s11  ;;  %v5323_v19 = vsel %vm701_vm10, %v15843_v56, 0 }
 0x93d   : > { %v5160_v35 = vpop.f32.mrf.mxu0  ;;  %5399 = vmatpush.bf16.msrb.mxu2 %v5323_v19  ;;  %v5326_v32 = vsel %vm701_vm10, %v15845_v33, 0  ;;  %12983 = vmatmul.msk.bf16.vlgmr.msrb.gmra.mxu0 %vm697_vm11, %v15811_v10  ;;  %v5230_v12 = vsel %vm5210_vm3, %v5200_v0, %v5220_v7 }
 0x93e   : > { %vm5208_vm4 = vcmp.ge.f32.partialorder %v5198_v45, 0.0  ;;  %v5218_v29 = vmul.f32 0.1, %v5198_v45  ;;  %vm5209_vm5 = vcmp.ge.f32.partialorder %v5199_v31, 0.0  ;;  %v5219_v20 = vmul.f32 0.1, %v5199_v31  ;;  %5412 = vmatpush.bf16.msrb.mxu3 %v5326_v32  ;;  %12984 = vmatmul.msk.bf16.vlgmr.msrb.gmra.mxu1 %vm697_vm11, %v15811_v10 }
 0x93f   : > { %v5201_v62 = vadd.f32 %v15779_v18, %v5184_v57  ;;  %v5240_v23 = vmul.f32 %v5230_v12, %v14394_v49 }
 0x940   : > { %v5228_v39 = vsel %vm5208_vm4, %v5198_v45, %v5218_v29  ;;  %v5229_v60 = vsel %vm5209_vm5, %v5199_v31, %v5219_v20  ;;  %12985 = vmatmul.msk.bf16.vlgmr.msrb.gmra.mxu2 %vm697_vm11, %v15811_v10 }
 0x941   : > { %v5238_v52 = vmul.f32 %v5228_v39, %v14343_v43  ;;  %vm5211_vm6 = vcmp.ge.f32.partialorder %v5201_v62, 0.0  ;;  %v5221_v37 = vmul.f32 0.1, %v5201_v62  ;;  %v5134_v41 = vpop.f32.mrf.mxu2  ;;  %v5239_v5 = vmul.f32 %v5229_v60, %v14392_v9  ;;  %v5147_v17 = vpop.f32.mrf.mxu3  ;;  %5284 = vrot.lane.b32.xlu2 %v15845_v33, %s13793_s11  ;;  %12986 = vmatmul.msk.bf16.vlgmr.msrb.gmra.mxu3 %vm697_vm11, %v15811_v10 }
 0x943   : > { %v5231_v18 = vsel %vm5211_vm6, %v5201_v62, %v5221_v37  ;;  %v5173_v34 = vpop.f32.mrf.mxu1  ;;  %v5245_v42 = vpack.c.bf16 %v5239_v5, %v5238_v52 }
 0x944   : > { %v5241_v3 = vmul.f32 %v5231_v18, %v14379_v28 }
 0x945   : > { %v5261_v2 = vunpack.c.h.b16 %v5245_v42  ;;  %v5260_v25 = vunpack.c.l.b16 %v5245_v42 }
 0x946   : > { %v5246_v24 = vpack.c.bf16 %v5241_v3, %v5240_v23 }
 0x947   : > { %v5271_v58 = vpack.c.b16 %v5261_v2, %v5261_v2  ;;  %v5270_v40 = vpack.c.b16 %v5260_v25, %v5260_v25 }
 0x948   : > { %v5262_v11 = vunpack.c.l.b16 %v5246_v24  ;;  %v5263_v36 = vunpack.c.h.b16 %v5246_v24 }
 0x949   : > { %5288 = vrot.lane.b32.xlu1 %v5271_v58, %s13793_s11  ;;  %5286 = vrot.lane.b32.xlu0 %v5270_v40, %s13793_s11  ;;  %v5329_v0 = vsel %vm701_vm10, %v5270_v40, 0  ;;  %v5332_v15 = vsel %vm701_vm10, %v5271_v58, 0 }
 0x94a   : > { %v5272_v48 = vpack.c.b16 %v5262_v11, %v5262_v11  ;;  %v5273_v26 = vpack.c.b16 %v5263_v36, %v5263_v36  ;;  %5425 = vmatpush.bf16.msra.mxu0 %v5329_v0  ;;  %5438 = vmatpush.bf16.msra.mxu1 %v5332_v15 }
 0x94c   : > { %5290 = vrot.lane.b32.xlu2 %v5272_v48, %s13793_s11  ;;  %v5335_v61 = vsel %vm701_vm10, %v5272_v48, 0  ;;  %v5338_v6 = vsel %vm701_vm10, %v5273_v26, 0 }
 0x94d   : > { %5451 = vmatpush.bf16.msra.mxu2 %v5335_v61  ;;  %5464 = vmatpush.bf16.msra.mxu3 %v5338_v6 }
 0x94e   : > { %12987 = vmatmul.msk.bf16.vlgmr.msra.gmra.mxu0 %vm697_vm11, %v15811_v10  ;;  %12988 = vmatmul.msk.bf16.vlgmr.msra.gmra.mxu1 %vm697_vm11, %v15811_v10 }
 0x950   : > { %12989 = vmatmul.msk.bf16.vlgmr.msra.gmra.mxu2 %vm697_vm11, %v15811_v10 }
 0x951   : > { %5634 = vrot.lane.b32.xlu1 %v15796_v51, %s13794_s28  ;;  %5292 = vrot.lane.b32.xlu0 %v5273_v26, %s13793_s11 }
 0x952   : > { %12990 = vmatmul.msk.bf16.vlgmr.msra.gmra.mxu3 %vm697_vm11, %v15811_v10 }
 0x954   : > { %5636 = vrot.lane.b32.xlu2 %v15793_v21, %s13794_s28  ;;  %v13012_v21 = vld [vmem:[%s18464_s3 + $0x38] sm:$0xff] }
 0x959   : > { %5640 = vrot.lane.b32.xlu1 %v15827_v22, %s13794_s28  ;;  %5638 = vrot.lane.b32.xlu0 %v15829_v8, %s13794_s28 }
 0x95c   : > { %5642 = vrot.lane.b32.xlu2 %v15843_v56, %s13794_s28  ;;  %v12979_v56 = vld [vmem:[%s18463_s2 + $0x54] sm:$0xf] }
 0x961   : > { %5646 = vrot.lane.b32.xlu1 %v5270_v40, %s13794_s28  ;;  %5644 = vrot.lane.b32.xlu0 %v15845_v33, %s13794_s28 }
 0x964   : > { %5648 = vrot.lane.b32.xlu2 %v5271_v58, %s13794_s28 }
 0x969   : > { %5652 = vrot.lane.b32.xlu1 %v5273_v26, %s13794_s28  ;;  %5650 = vrot.lane.b32.xlu0 %v5272_v48, %s13794_s28  ;;  %v13001_v48 = vld [vmem:[%s18463_s2 + $0x5c] sm:$0xf] }
 0x96c   : > { %5841 = vperm.xlu2 %13571, %v13012_v21  }
 0x993   : > { %v5279_v51 = vpop.permute.xlu2 %5278 }
 0x99b   : > { %v5285_v33 = vpop.permute.xlu2 %5284 }
 0x99d   : > { %v5277_v10 = vpop.permute.xlu1 %5276  ;;  %v5275_v8 = vpop.permute.xlu0 %5274 }
 0x99e   : > { %v5295_v22 = vsel %vm681_vm12, %v5277_v10, %v5279_v51  ;;  %v5294_v27 = vsel %vm681_vm12, %v5275_v8, %v5277_v10  ;;  %v5304_v59 = vsel %vm681_vm12, 0, %v5275_v8 }
 0x99f   : > { %v5479_v14 = vsel %vm701_vm10, %v5295_v22, 0  ;;  %v5473_v63 = vsel %vm701_vm10, %v5304_v59, 0  ;;  %v5476_v16 = vsel %vm701_vm10, %v5294_v27, 0 }
 0x9a0   : > { %5535 = vmatpush.bf16.msrb.mxu2 %v5479_v14  ;;  %5509 = vmatpush.bf16.msrb.mxu0 %v5473_v63 }
 0x9a1   : > { %5522 = vmatpush.bf16.msrb.mxu1 %v5476_v16 }
 0x9a3   : > { %12993 = vmatmul.msk.bf16.vlgmr.msrb.gmra.mxu2 %vm697_vm11, %v12979_v56  ;;  %12991 = vmatmul.msk.bf16.vlgmr.msrb.gmra.mxu0 %vm697_vm11, %v12979_v56 }
 0x9a4   : > { %12992 = vmatmul.msk.bf16.vlgmr.msrb.gmra.mxu1 %vm697_vm11, %v12979_v56 }
 0x9a6   : > { %v5291_v32 = vpop.permute.xlu2 %5290 }
 0x9ab   : > { %v5281_v7 = vpop.permute.xlu0 %5280 }
 0x9ac   : > { %v5296_v45 = vsel %vm681_vm12, %v5279_v51, %v5281_v7 }
 0x9ad   : > { %v5482_v38 = vsel %vm701_vm10, %v5296_v45, 0 }
 0x9ae   : > { %v5283_v31 = vpop.permute.xlu1 %5282  ;;  %5548 = vmatpush.bf16.msrb.mxu3 %v5482_v38  ;;  %v5637_v60 = vpop.permute.xlu2 %5636 }
 0x9af   : > { %v5297_v57 = vsel %vm681_vm12, %v5281_v7, %v5283_v31  ;;  %v5298_v19 = vsel %vm681_vm12, %v5283_v31, %v5285_v33 }
 0x9b0   : > { %v5485_v35 = vsel %vm701_vm10, %v5297_v57, 0  ;;  %v5488_v29 = vsel %vm701_vm10, %v5298_v19, 0 }
 0x9b1   : > { %5561 = vmatpush.bf16.msra.mxu0 %v5485_v35  ;;  %5574 = vmatpush.bf16.msra.mxu1 %v5488_v29 }
 0x9b2   : > { %12994 = vmatmul.msk.bf16.vlgmr.msrb.gmra.mxu3 %vm697_vm11, %v12979_v56  ;;  %v15952_v61 = vpop.f32.mrf.mxu2  ;;  %v15954_v6 = vpop.f32.mrf.mxu3 }
 0x9b4   : > { %12995 = vmatmul.msk.bf16.vlgmr.msra.gmra.mxu0 %vm697_vm11, %v12979_v56  ;;  %12996 = vmatmul.msk.bf16.vlgmr.msra.gmra.mxu1 %vm697_vm11, %v12979_v56 }
 0x9b6   : > { %v5643_v2 = vpop.permute.xlu2 %5642 }
 0x9ba   : > { %v5375_v27 = vpop.f32.mrf.mxu0 }
 0x9bb   : > { %v5289_v20 = vpop.permute.xlu1 %5288  ;;  %v5287_v62 = vpop.permute.xlu0 %5286 }
 0x9bc   : > { %v5301_v12 = vsel %vm681_vm12, %v5289_v20, %v5291_v32  ;;  %v5299_v39 = vsel %vm681_vm12, %v5285_v33, %v5287_v62  ;;  %v5300_v52 = vsel %vm681_vm12, %v5287_v62, %v5289_v20  ;;  %v15960_v59 = vpop.f32.mrf.mxu1  ;;  %v5364_v33 = vpop.f32.mrf.mxu3 }
 0x9bd   : > { %v5491_v37 = vsel %vm701_vm10, %v5299_v39, 0  ;;  %v5494_v41 = vsel %vm701_vm10, %v5300_v52, 0  ;;  %v5497_v5 = vsel %vm701_vm10, %v5301_v12, 0 }
 0x9be   : > { %5587 = vmatpush.bf16.msra.mxu2 %v5491_v37  ;;  %5600 = vmatpush.bf16.msra.mxu3 %v5494_v41  ;;  %v5649_v26 = vpop.permute.xlu2 %5648 }
 0x9bf   : > { %5613 = vmatpush.bf16.msrb.mxu0 %v5497_v5 }
 0x9c1   : > { %12997 = vmatmul.msk.bf16.vlgmr.msra.gmra.mxu2 %vm697_vm11, %v12979_v56 }
 0x9c2   : > { %12998 = vmatmul.msk.bf16.vlgmr.msra.gmra.mxu3 %vm697_vm11, %v12979_v56  ;;  %v5377_v19 = vpop.f32.mrf.mxu0 }
 0x9c3   : > { %v5635_v17 = vpop.permute.xlu1 %5634  ;;  %v5293_v18 = vpop.permute.xlu0 %5292 }
 0x9c4   : > { %v5654_v23 = vsel %vm1046_vm13, %v5635_v17, %v5637_v60  ;;  %v5302_v3 = vsel %vm681_vm12, %v5291_v32, %v5293_v18  ;;  %12999 = vmatmul.msk.bf16.vlgmr.msrb.gmra.mxu0 %vm697_vm11, %v12979_v56  ;;  %v5390_v35 = vpop.f32.mrf.mxu1  ;;  %v15976_v12 = vpop.f32.mrf.mxu3 }
 0x9c5   : > { %v5669_v34 = vsel %vm701_vm10, %v5654_v23, 0  ;;  %v5500_v42 = vsel %vm701_vm10, %v5302_v3, 0 }
 0x9c6   : > { %5626 = vmatpush.bf16.msrb.mxu1 %v5500_v42  ;;  %5704 = vmatpush.bf16.msrb.mxu2 %v5669_v34 }
 0x9c9   : > { %13000 = vmatmul.msk.bf16.vlgmr.msrb.gmra.mxu1 %vm697_vm11, %v12979_v56  ;;  %v5351_v56 = vpop.f32.mrf.mxu2 }
 0x9cb   : > { %v5641_v25 = vpop.permute.xlu1 %5640  ;;  %v5639_v24 = vpop.permute.xlu0 %5638 }
 0x9cc   : > { %v5657_v58 = vsel %vm1046_vm13, %v5641_v25, %v5643_v2  ;;  %v5655_v40 = vsel %vm1046_vm13, %v5637_v60, %v5639_v24  ;;  %v5656_v11 = vsel %vm1046_vm13, %v5639_v24, %v5641_v25  ;;  %v15979_v39 = vpop.f32.mrf.mxu0  ;;  %v15981_v52 = vpop.f32.mrf.mxu1 }
 0x9cd   : > { %v5672_v36 = vsel %vm701_vm10, %v5655_v40, 0  ;;  %v5675_v0 = vsel %vm701_vm10, %v5656_v11, 0  ;;  %v5678_v15 = vsel %vm701_vm10, %v5657_v58, 0  ;;  %v5416_v37 = vpop.f32.mrf.mxu3 }
 0x9ce   : > { %5717 = vmatpush.bf16.msrb.mxu3 %v5672_v36  ;;  %5730 = vmatpush.bf16.msra.mxu0 %v5675_v0 }
 0x9cf   : > { %5743 = vmatpush.bf16.msra.mxu1 %v5678_v15 }
 0x9d1   : > { %13002 = vmatmul.msk.bf16.vlgmr.msrb.gmra.mxu2 %vm697_vm11, %v13001_v48  ;;  %v15974_v62 = vpop.f32.mrf.mxu2 }
 0x9d2   : > { %13003 = vmatmul.msk.bf16.vlgmr.msrb.gmra.mxu3 %vm697_vm11, %v13001_v48 }
 0x9d3   : > { %v5647_v21 = vpop.permute.xlu1 %5646  ;;  %v5645_v51 = vpop.permute.xlu0 %5644 }
 0x9d4   : > { %v5660_v10 = vsel %vm1046_vm13, %v5647_v21, %v5649_v26  ;;  %v5658_v22 = vsel %vm1046_vm13, %v5643_v2, %v5645_v51  ;;  %v5659_v8 = vsel %vm1046_vm13, %v5645_v51, %v5647_v21  ;;  %13004 = vmatmul.msk.bf16.vlgmr.msra.gmra.mxu0 %vm697_vm11, %v13001_v48  ;;  %v5429_v41 = vpop.f32.mrf.mxu0  ;;  %v5442_v5 = vpop.f32.mrf.mxu1 }
 0x9d5   : > { %v5681_v14 = vsel %vm701_vm10, %v5658_v22, 0  ;;  %v5684_v63 = vsel %vm701_vm10, %v5659_v8, 0  ;;  %v5687_v16 = vsel %vm701_vm10, %v5660_v10, 0  ;;  %v15988_v18 = vpop.f32.mrf.mxu3 }
 0x9d6   : > { %5756 = vmatpush.bf16.msra.mxu2 %v5681_v14  ;;  %5769 = vmatpush.bf16.msra.mxu3 %v5684_v63 }
 0x9d7   : > { %5782 = vmatpush.bf16.msrb.mxu0 %v5687_v16 }
 0x9d9   : > { %13005 = vmatmul.msk.bf16.vlgmr.msra.gmra.mxu1 %vm697_vm11, %v13001_v48  ;;  %v5403_v60 = vpop.f32.mrf.mxu2 }
 0x9db   : > { %v5653_v7 = vpop.permute.xlu1 %5652  ;;  %v5651_v45 = vpop.permute.xlu0 %5650 }
 0x9dc   : > { %v5664_v38 = vsel %vm1046_vm13, %v5653_v7, 0  ;;  %v5661_v31 = vsel %vm1046_vm13, %v5649_v26, %v5651_v45  ;;  %v5662_v57 = vsel %vm1046_vm13, %v5651_v45, %v5653_v7  ;;  %v15994_v7 = vpop.permute.xlu2 %5841 }
 0x9dd   : > { %v5690_v29 = vsel %vm701_vm10, %v5661_v31, 0  ;;  %v5693_v32 = vsel %vm701_vm10, %v5662_v57, 0  ;;  %v5695_v20 = vsel %vm701_vm10, %v5664_v38, 0  ;;  %v5468_v3 = vpop.f32.mrf.mxu3 }
 0x9de   : > { %5795 = vmatpush.bf16.msrb.mxu1 %v5690_v29  ;;  %5808 = vmatpush.bf16.msrb.mxu2 %v5693_v32 }
 0x9df   : > { %5821 = vmatpush.bf16.msrb.mxu3 %v5695_v20 }
 0x9e1   : > { %13006 = vmatmul.msk.bf16.vlgmr.msra.gmra.mxu2 %vm697_vm11, %v13001_v48  ;;  %v15986_v17 = vpop.f32.mrf.mxu2 }
 0x9e2   : > { %13007 = vmatmul.msk.bf16.vlgmr.msra.gmra.mxu3 %vm697_vm11, %v13001_v48 }
 0x9e4   : > { %13008 = vmatmul.msk.bf16.vlgmr.msrb.gmra.mxu0 %vm697_vm11, %v13001_v48 }
 0x9e9   : > { %13009 = vmatmul.msk.bf16.vlgmr.msrb.gmra.mxu1 %vm697_vm11, %v13001_v48  ;;  %v5455_v23 = vpop.f32.mrf.mxu2 }
 0x9f1   : > { %13010 = vmatmul.msk.bf16.vlgmr.msrb.gmra.mxu2 %vm697_vm11, %v13001_v48 }
 0x9f2   : > { %13011 = vmatmul.msk.bf16.vlgmr.msrb.gmra.mxu3 %vm697_vm11, %v13001_v48 }
 0xa20   : > { %v5511_v34 = vpop.f32.mrf.mxu0 }
 0xa21   : > { %v5524_v42 = vpop.f32.mrf.mxu1  ;;  %v5512_v45 = vadd.f32 %v5511_v34, %v15952_v61 }
 0xa22   : > { %v5525_v38 = vadd.f32 %v5524_v42, %v15954_v6 }
 0xa26   : > { %v5537_v2 = vpop.f32.mrf.mxu2 }
 0xa27   : > { %v5538_v16 = vadd.f32 %v5537_v2, %v5375_v27 }
 0xa28   : > { %v5513_v25 = vpop.f32.mrf.mxu0 }
 0xa29   : > { %v5526_v24 = vpop.f32.mrf.mxu1 }
 0xa2e   : > { %v5539_v58 = vpop.f32.mrf.mxu2 }
 0xa31   : > { %v5563_v40 = vpop.f32.mrf.mxu0  ;;  %v5576_v11 = vpop.f32.mrf.mxu1 }
 0xa35   : > { %v5550_v36 = vpop.f32.mrf.mxu3 }
 0xa36   : > { %v5551_v19 = vadd.f32 %v5550_v36, %v15960_v59 }
 0xa39   : > { %v5565_v0 = vpop.f32.mrf.mxu0  ;;  %v5578_v15 = vpop.f32.mrf.mxu1 }
 0xa3d   : > { %v5552_v26 = vpop.f32.mrf.mxu3 }
 0xa41   : > { %v15990_v21 = vpop.f32.mrf.mxu0 }
 0xa44   : > { %v5589_v48 = vpop.f32.mrf.mxu2 }
 0xa45   : > { %v5602_v51 = vpop.f32.mrf.mxu3  ;;  %v5590_v0 = vadd.f32 %v5589_v48, %v15979_v39 }
 0xa46   : > { %v15992_v10 = vpop.f32.mrf.mxu1 }
 0xa49   : > { %v5617_v22 = vpop.f32.mrf.mxu0 }
 0xa4c   : > { %v5591_v8 = vpop.f32.mrf.mxu2 }
 0xa4d   : > { %v5604_v14 = vpop.f32.mrf.mxu3 }
 0xa4e   : > { %v5630_v63 = vpop.f32.mrf.mxu1 }
 0xa51   : > { %v5732_v56 = vpop.f32.mrf.mxu0 }
 0xa52   : > { %v5829_v33 = vadd.f32 %v5732_v56, %v5538_v16  ;;  %v5564_v56 = vadd.f32 %v5563_v40, %v15974_v62 }
 0xa54   : > { %v5846_v31 = vadd.f32 %v15994_v7, %v5829_v33  ;;  %v5706_v57 = vpop.f32.mrf.mxu2 }
 0xa55   : > { %v5827_v35 = vadd.f32 %v5706_v57, %v5512_v45  ;;  %v5719_v29 = vpop.f32.mrf.mxu3 }
 0xa56   : > { %v5856_v32 = vadd.f32 %v5846_v31, %v15529_v44  ;;  %v5828_v20 = vadd.f32 %v5719_v29, %v5525_v38  ;;  %v5745_v60 = vpop.f32.mrf.mxu1  ;;  %v5577_v38 = vadd.f32 %v5576_v11, %v15976_v12 }
 0xa57   : > { %v5844_v27 = vadd.f32 %v15994_v7, %v5827_v35  ;;  %v5830_v37 = vadd.f32 %v5745_v60, %v5551_v19  ;;  %v5603_v19 = vadd.f32 %v5602_v51, %v15981_v52 }
 0xa58   : > { %v5845_v41 = vadd.f32 %v15994_v7, %v5828_v20  ;;  %v16004_v61 = vmul.f32 %v5856_v32, %v14392_v9 }
 0xa59   : > { %v5854_v6 = vadd.f32 %v5844_v27, %v15535_v50  ;;  %v5847_v5 = vadd.f32 %v15994_v7, %v5830_v37  ;;  %v5734_v23 = vpop.f32.mrf.mxu0 }
 0xa5a   : > { %v5855_v59 = vadd.f32 %v5845_v41, %v15539_v55  ;;  %v5886_v2 = vmul.f32 0.1, %v16004_v61  ;;  %vm5876_vm1 = vcmp.ge.f32.partialorder %v16004_v61, 0.0 }
 0xa5b   : > { %v16010_v3 = vmul.f32 %v5854_v6, %v14345_v46  ;;  %v5857_v44 = vadd.f32 %v5847_v5, %v15542_v30  ;;  %v16062_v5 = vld [vmem:[%s18463_s2 + $0x64] sm:$0xf] }
 0xa5c   : > { %v16014_v34 = vmul.f32 %v5855_v59, %v14343_v43  ;;  %v5708_v42 = vpop.f32.mrf.mxu2  ;;  %v5896_v8 = vsel %vm5876_vm1, %v16004_v61, %v5886_v2 }
 0xa5d   : > { %v5884_v25 = vmul.f32 0.1, %v16010_v3  ;;  %v16019_v50 = vmul.f32 %v5857_v44, %v14394_v49  ;;  %v5721_v24 = vpop.f32.mrf.mxu3  ;;  %vm5874_vm7 = vcmp.ge.f32.partialorder %v16010_v3, 0.0 }
 0xa5e   : > { %v5885_v55 = vmul.f32 0.1, %v16014_v34  ;;  %v5747_v58 = vpop.f32.mrf.mxu1  ;;  %vm5875_vm8 = vcmp.ge.f32.partialorder %v16014_v34, 0.0 }
 0xa5f   : > { %v5887_v30 = vmul.f32 0.1, %v16019_v50  ;;  %v5894_v36 = vsel %vm5874_vm7, %v16010_v3, %v5884_v25  ;;  %vm5877_vm2 = vcmp.ge.f32.partialorder %v16019_v50, 0.0 }
 0xa60   : > { %v5895_v15 = vsel %vm5875_vm8, %v16014_v34, %v5885_v55 }
 0xa61   : > { %v5784_v26 = vpop.f32.mrf.mxu0  ;;  %v5904_v22 = vpack.c.bf16 %v5895_v15, %v5894_v36  ;;  %v5897_v14 = vsel %vm5877_vm2, %v16019_v50, %v5887_v30 }
 0xa62   : > { %v5833_v63 = vadd.f32 %v5784_v26, %v5590_v0  ;;  %v5905_v16 = vpack.c.bf16 %v5897_v14, %v5896_v8 }
 0xa63   : > { %v5917_v33 = vunpack.c.h.b16 %v5904_v22  ;;  %v5916_v45 = vunpack.c.l.b16 %v5904_v22 }
 0xa64   : > { %v5850_v31 = vadd.f32 %v15994_v7, %v5833_v63  ;;  %v5758_v57 = vpop.f32.mrf.mxu2  ;;  %v5918_v39 = vunpack.c.l.b16 %v5905_v16  ;;  %v5919_v48 = vunpack.c.h.b16 %v5905_v16 }
 0xa65   : > { %v5831_v35 = vadd.f32 %v5758_v57, %v5564_v56  ;;  %v5771_v29 = vpop.f32.mrf.mxu3  ;;  %v16036_v32 = vpack.c.b16 %v5917_v33, %v5917_v33  ;;  %v16038_v20 = vpack.c.b16 %v5916_v45, %v5916_v45  ;;  %v5616_v56 = vadd.f32 %v15990_v21, %v15986_v17 }
 0xa66   : > { %v5860_v60 = vadd.f32 %v5850_v31, %v15590_v47  ;;  %v5832_v62 = vadd.f32 %v5771_v29, %v5577_v38  ;;  %v5797_v40 = vpop.f32.mrf.mxu1  ;;  %v16041_v27 = vpack.c.b16 %v5918_v39, %v5918_v39  ;;  %v16043_v12 = vpack.c.b16 %v5919_v48, %v5919_v48 }
 0xa67   : > { %v5848_v11 = vadd.f32 %v15994_v7, %v5831_v35  ;;  %v5834_v37 = vadd.f32 %v5797_v40, %v5603_v19  ;;  %5938 = vrot.lane.b32.xlu1 %v16036_v32, %s13797_s14  ;;  %5936 = vrot.lane.b32.xlu0 %v16038_v20, %s13797_s14  ;;  %v5973_v52 = vsel %vm701_vm10, %v16038_v20, 0  ;;  %v5976_v47 = vsel %vm701_vm10, %v16036_v32, 0 }
 0xa68   : > { %v5849_v51 = vadd.f32 %v15994_v7, %v5832_v62  ;;  %6009 = vmatpush.bf16.msra.mxu0 %v5973_v52  ;;  %6022 = vmatpush.bf16.msra.mxu1 %v5976_v47  ;;  %v5979_v41 = vsel %vm701_vm10, %v16041_v27, 0  ;;  %v5982_v6 = vsel %vm701_vm10, %v16043_v12, 0  ;;  %v16065_v23 = vmul.f32 %v5860_v60, %v14343_v43 }
 0xa69   : > { %v5858_v59 = vadd.f32 %v5848_v11, %v15598_v4  ;;  %v5851_v44 = vadd.f32 %v15994_v7, %v5834_v37  ;;  %5940 = vrot.lane.b32.xlu2 %v16041_v27, %s13797_s14  ;;  %6035 = vmatpush.bf16.msra.mxu2 %v5979_v41  ;;  %v5786_v42 = vpop.f32.mrf.mxu0  ;;  %v5629_v38 = vadd.f32 %v15992_v10, %v15988_v18 }
 0xa6a   : > { %v5859_v2 = vadd.f32 %v5849_v51, %v15606_v1  ;;  %6048 = vmatpush.bf16.msra.mxu3 %v5982_v6  ;;  %v5890_v1 = vmul.f32 0.1, %v16065_v23  ;;  %vm5880_vm5 = vcmp.ge.f32.partialorder %v16065_v23, 0.0 }
 0xa6b   : > { %v16073_v25 = vmul.f32 %v5858_v59, %v14379_v28  ;;  %v5861_v24 = vadd.f32 %v5851_v44, %v15611_v53  ;;  %13015 = vmatmul.msk.bf16.vlgmr.msra.gmra.mxu0 %vm697_vm11, %v16062_v5  ;;  %13016 = vmatmul.msk.bf16.vlgmr.msra.gmra.mxu1 %vm697_vm11, %v16062_v5 }
 0xa6c   : > { %v16081_v4 = vmul.f32 %v5859_v2, %v14345_v46  ;;  %v5760_v55 = vpop.f32.mrf.mxu2  ;;  %13017 = vmatmul.msk.bf16.vlgmr.msra.gmra.mxu2 %vm697_vm11, %v16062_v5  ;;  %v5900_v14 = vsel %vm5880_vm5, %v16065_v23, %v5890_v1 }
 0xa6d   : > { %v5888_v58 = vmul.f32 0.1, %v16073_v25  ;;  %v16088_v30 = vmul.f32 %v5861_v24, %v14392_v9  ;;  %v5773_v53 = vpop.f32.mrf.mxu3  ;;  %vm5878_vm3 = vcmp.ge.f32.partialorder %v16073_v25, 0.0  ;;  %13018 = vmatmul.msk.bf16.vlgmr.msra.gmra.mxu3 %vm697_vm11, %v16062_v5 }
 0xa6e   : > { %v5889_v36 = vmul.f32 0.1, %v16081_v4  ;;  %v5799_v0 = vpop.f32.mrf.mxu1  ;;  %vm5879_vm4 = vcmp.ge.f32.partialorder %v16081_v4, 0.0 }
 0xa6f   : > { %v5891_v15 = vmul.f32 0.1, %v16088_v30  ;;  %5942 = vrot.lane.b32.xlu0 %v16043_v12, %s13797_s14  ;;  %v5898_v26 = vsel %vm5878_vm3, %v16073_v25, %v5888_v58  ;;  %vm5881_vm6 = vcmp.ge.f32.partialorder %v16088_v30, 0.0 }
 0xa70   : > { %v5899_v22 = vsel %vm5879_vm4, %v16081_v4, %v5889_v36 }
 0xa71   : > { %v5906_v8 = vpack.c.bf16 %v5899_v22, %v5898_v26  ;;  %v5901_v63 = vsel %vm5881_vm6, %v16088_v30, %v5891_v15 }
 0xa72   : > { %v5907_v16 = vpack.c.bf16 %v5901_v63, %v5900_v14 }
 0xa73   : > { %v5921_v33 = vunpack.c.h.b16 %v5906_v8  ;;  %v5920_v45 = vunpack.c.l.b16 %v5906_v8  ;;  %v13013_v8 = vld [vmem:[%s18463_s2 + $0x60] sm:$0xf] }
 0xa74   : > { %v5810_v31 = vpop.f32.mrf.mxu2  ;;  %v5922_v57 = vunpack.c.l.b16 %v5907_v16  ;;  %v5923_v39 = vunpack.c.h.b16 %v5907_v16 }
 0xa75   : > { %v5835_v48 = vadd.f32 %v5810_v31, %v5616_v56  ;;  %v5823_v19 = vpop.f32.mrf.mxu3  ;;  %v5931_v35 = vpack.c.b16 %v5921_v33, %v5921_v33  ;;  %v5930_v29 = vpack.c.b16 %v5920_v45, %v5920_v45 }
 0xa76   : > { %v5836_v60 = vadd.f32 %v5823_v19, %v5629_v38  ;;  %v5932_v62 = vpack.c.b16 %v5922_v57, %v5922_v57  ;;  %v5933_v40 = vpack.c.b16 %v5923_v39, %v5923_v39 }
 0xa77   : > { %v5852_v11 = vadd.f32 %v15994_v7, %v5835_v48  ;;  %5946 = vrot.lane.b32.xlu2 %v5931_v35, %s13797_s14  ;;  %5944 = vrot.lane.b32.xlu1 %v5930_v29, %s13797_s14  ;;  %v5985_v17 = vsel %vm701_vm10, %v5930_v29, 0  ;;  %v5988_v18 = vsel %vm701_vm10, %v5931_v35, 0 }
 0xa78   : > { %v5853_v21 = vadd.f32 %v15994_v7, %v5836_v60  ;;  %6061 = vmatpush.bf16.msrb.mxu0 %v5985_v17  ;;  %6074 = vmatpush.bf16.msrb.mxu1 %v5988_v18  ;;  %v5991_v10 = vsel %vm701_vm10, %v5932_v62, 0  ;;  %v5994_v37 = vsel %vm701_vm10, %v5933_v40, 0 }
 0xa79   : > { %v5862_v52 = vadd.f32 %v5852_v11, %v15645_v54  ;;  %5948 = vrot.lane.b32.xlu0 %v5932_v62, %s13797_s14  ;;  %6087 = vmatpush.bf16.msrb.mxu2 %v5991_v10 }
 0xa7a   : > { %v5863_v47 = vadd.f32 %v5853_v21, %v15652_v13  ;;  %6100 = vmatpush.bf16.msrb.mxu3 %v5994_v37 }
 0xa7b   : > { %v16120_v51 = vmul.f32 %v5862_v52, %v14394_v49  ;;  %13019 = vmatmul.msk.bf16.vlgmr.msrb.gmra.mxu0 %vm697_vm11, %v16062_v5  ;;  %13020 = vmatmul.msk.bf16.vlgmr.msrb.gmra.mxu1 %vm697_vm11, %v16062_v5 }
 0xa7c   : > { %v16127_v7 = vmul.f32 %v5863_v47, %v14379_v28  ;;  %v5812_v41 = vpop.f32.mrf.mxu2  ;;  %13021 = vmatmul.msk.bf16.vlgmr.msrb.gmra.mxu2 %vm697_vm11, %v16062_v5 }
 0xa7d   : > { %v5892_v54 = vmul.f32 0.1, %v16120_v51  ;;  %v5825_v13 = vpop.f32.mrf.mxu3  ;;  %vm5882_vm7 = vcmp.ge.f32.partialorder %v16120_v51, 0.0  ;;  %13022 = vmatmul.msk.bf16.vlgmr.msrb.gmra.mxu3 %vm697_vm11, %v16062_v5 }
 0xa7e   : > { %v5893_v6 = vmul.f32 0.1, %v16127_v7  ;;  %vm5883_vm8 = vcmp.ge.f32.partialorder %v16127_v7, 0.0 }
 0xa7f   : > { %5950 = vrot.lane.b32.xlu1 %v5933_v40, %s13797_s14  ;;  %v5902_v59 = vsel %vm5882_vm7, %v16120_v51, %v5892_v54  ;;  %v13035_v54 = vld [vmem:[%s18463_s2 + $0x68] sm:$0xf] }
 0xa80   : > { %v5903_v44 = vsel %vm5883_vm8, %v16127_v7, %v5893_v6 }
 0xa81   : > { %v5908_v42 = vpack.c.bf16 %v5903_v44, %v5902_v59 }
 0xa83   : > { %v5924_v2 = vunpack.c.l.b16 %v5908_v42  ;;  %v5925_v24 = vunpack.c.h.b16 %v5908_v42 }
 0xa85   : > { %v5934_v55 = vpack.c.b16 %v5924_v2, %v5924_v2  ;;  %v5935_v1 = vpack.c.b16 %v5925_v24, %v5925_v24 }
 0xa87   : > { %5952 = vrot.lane.b32.xlu2 %v5934_v55, %s13797_s14  ;;  %6296 = vrot.lane.b32.xlu1 %v16038_v20, %s13798_s27  ;;  %v5997_v58 = vsel %vm701_vm10, %v5934_v55, 0  ;;  %v6000_v53 = vsel %vm701_vm10, %v5935_v1, 0 }
 0xa88   : > { %5954 = vrot.lane.b32.xlu0 %v5935_v1, %s13797_s14  ;;  %6113 = vmatpush.bf16.msra.mxu0 %v5997_v58 }
 0xa89   : > { %6126 = vmatpush.bf16.msra.mxu1 %v6000_v53 }
 0xa8b   : > { %13023 = vmatmul.msk.bf16.vlgmr.msra.gmra.mxu0 %vm697_vm11, %v16062_v5 }
 0xa8c   : > { %13024 = vmatmul.msk.bf16.vlgmr.msra.gmra.mxu1 %vm697_vm11, %v16062_v5 }
 0xa8f   : > { %6298 = vrot.lane.b32.xlu2 %v16036_v32, %s13798_s27  ;;  %6302 = vrot.lane.b32.xlu1 %v16043_v12, %s13798_s27  ;;  %v13046_v32 = vld [vmem:[%s18464_s3 + $0x40] sm:$0xff] }
 0xa90   : > { %6300 = vrot.lane.b32.xlu0 %v16041_v27, %s13798_s27 }
 0xa97   : > { %6304 = vrot.lane.b32.xlu2 %v5930_v29, %s13798_s27  ;;  %6308 = vrot.lane.b32.xlu1 %v5932_v62, %s13798_s27 }
 0xa98   : > { %6306 = vrot.lane.b32.xlu0 %v5931_v35, %s13798_s27 }
 0xa9f   : > { %6310 = vrot.lane.b32.xlu2 %v5933_v40, %s13798_s27  ;;  %6314 = vrot.lane.b32.xlu1 %v5935_v1, %s13798_s27 }
 0xaa0   : > { %6312 = vrot.lane.b32.xlu0 %v5934_v55, %s13798_s27 }
 0xaa7   : > { %6503 = vperm.xlu2 %13571, %v13046_v32  }
 0xac3   : > { %v5941_v20 = vpop.permute.xlu2 %5940 }
 0xad1   : > { %v5947_v14 = vpop.permute.xlu2 %5946 }
 0xad9   : > { %v5939_v12 = vpop.permute.xlu1 %5938  ;;  %v5937_v27 = vpop.permute.xlu0 %5936 }
 0xada   : > { %v5957_v5 = vsel %vm2006_vm9, %v5939_v12, %v5941_v20  ;;  %v5956_v36 = vsel %vm2006_vm9, %v5937_v27, %v5939_v12  ;;  %v5966_v0 = vsel %vm2006_vm9, 0, %v5937_v27 }
 0xadb   : > { %v6135_v15 = vsel %vm701_vm10, %v5966_v0, 0  ;;  %v6138_v26 = vsel %vm701_vm10, %v5956_v36, 0  ;;  %v6141_v22 = vsel %vm701_vm10, %v5957_v5, 0 }
 0xadc   : > { %6171 = vmatpush.bf16.msra.mxu2 %v6135_v15  ;;  %6184 = vmatpush.bf16.msra.mxu3 %v6138_v26 }
 0xadd   : > { %6197 = vmatpush.bf16.msrb.mxu0 %v6141_v22 }
 0xadf   : > { %13025 = vmatmul.msk.bf16.vlgmr.msra.gmra.mxu2 %vm697_vm11, %v13013_v8  ;;  %13026 = vmatmul.msk.bf16.vlgmr.msra.gmra.mxu3 %vm697_vm11, %v13013_v8 }
 0xae0   : > { %13027 = vmatmul.msk.bf16.vlgmr.msrb.gmra.mxu0 %vm697_vm11, %v13013_v8 }
 0xae1   : > { %v5943_v63 = vpop.permute.xlu0 %5942  ;;  %v5953_v33 = vpop.permute.xlu2 %5952 }
 0xae2   : > { %v5958_v16 = vsel %vm2006_vm9, %v5941_v20, %v5943_v63 }
 0xae3   : > { %v6144_v56 = vsel %vm701_vm10, %v5958_v16, 0 }
 0xae4   : > { %6210 = vmatpush.bf16.msrb.mxu1 %v6144_v56 }
 0xae7   : > { %13028 = vmatmul.msk.bf16.vlgmr.msrb.gmra.mxu1 %vm697_vm11, %v13013_v8 }
 0xae8   : > { %v16211_v58 = vpop.f32.mrf.mxu0  ;;  %v16213_v53 = vpop.f32.mrf.mxu1 }
 0xae9   : > { %v5945_v45 = vpop.permute.xlu1 %5944  ;;  %v6299_v40 = vpop.permute.xlu2 %6298 }
 0xaea   : > { %v5959_v38 = vsel %vm2006_vm9, %v5943_v63, %v5945_v45  ;;  %v5960_v31 = vsel %vm2006_vm9, %v5945_v45, %v5947_v14 }
 0xaeb   : > { %v5949_v57 = vpop.permute.xlu0 %5948  ;;  %v6147_v39 = vsel %vm701_vm10, %v5959_v38, 0  ;;  %v6150_v48 = vsel %vm701_vm10, %v5960_v31, 0 }
 0xaec   : > { %v5961_v19 = vsel %vm2006_vm9, %v5947_v14, %v5949_v57  ;;  %6223 = vmatpush.bf16.msrb.mxu2 %v6147_v39  ;;  %6236 = vmatpush.bf16.msrb.mxu3 %v6150_v48 }
 0xaed   : > { %v6153_v35 = vsel %vm701_vm10, %v5961_v19, 0 }
 0xaee   : > { %6249 = vmatpush.bf16.msra.mxu0 %v6153_v35 }
 0xaef   : > { %13029 = vmatmul.msk.bf16.vlgmr.msrb.gmra.mxu2 %vm697_vm11, %v13013_v8  ;;  %13030 = vmatmul.msk.bf16.vlgmr.msrb.gmra.mxu3 %vm697_vm11, %v13013_v8  ;;  %v16215_v20 = vpop.f32.mrf.mxu2 }
 0xaf0   : > { %v16218_v5 = vpop.f32.mrf.mxu3  ;;  %v6026_v14 = vpop.f32.mrf.mxu1 }
 0xaf1   : > { %v5951_v29 = vpop.permute.xlu1 %5950  ;;  %13031 = vmatmul.msk.bf16.vlgmr.msra.gmra.mxu0 %vm697_vm11, %v13013_v8  ;;  %v6305_v41 = vpop.permute.xlu2 %6304 }
 0xaf2   : > { %v5962_v60 = vsel %vm2006_vm9, %v5949_v57, %v5951_v29  ;;  %v5963_v62 = vsel %vm2006_vm9, %v5951_v29, %v5953_v33 }
 0xaf3   : > { %v6156_v11 = vsel %vm701_vm10, %v5962_v60, 0  ;;  %v6159_v17 = vsel %vm701_vm10, %v5963_v62, 0 }
 0xaf4   : > { %6262 = vmatpush.bf16.msra.mxu1 %v6156_v11  ;;  %6275 = vmatpush.bf16.msra.mxu2 %v6159_v17 }
 0xaf7   : > { %13032 = vmatmul.msk.bf16.vlgmr.msra.gmra.mxu1 %vm697_vm11, %v13013_v8  ;;  %v6039_v16 = vpop.f32.mrf.mxu2 }
 0xaf8   : > { %v6052_v45 = vpop.f32.mrf.mxu3  ;;  %v16235_v35 = vpop.f32.mrf.mxu1 }
 0xaf9   : > { %v6297_v18 = vpop.permute.xlu1 %6296  ;;  %v6311_v1 = vpop.permute.xlu2 %6310 }
 0xafa   : > { %v6316_v21 = vsel %vm2368_vm14, %v6297_v18, %v6299_v40  ;;  %v5955_v10 = vpop.permute.xlu0 %5954 }
 0xafb   : > { %v6331_v37 = vsel %vm701_vm10, %v6316_v21, 0  ;;  %v5964_v52 = vsel %vm2006_vm9, %v5953_v33, %v5955_v10 }
 0xafc   : > { %v6162_v47 = vsel %vm701_vm10, %v5964_v52, 0  ;;  %6366 = vmatpush.bf16.msrb.mxu0 %v6331_v37 }
 0xafd   : > { %6288 = vmatpush.bf16.msra.mxu3 %v6162_v47 }
 0xaff   : > { %13033 = vmatmul.msk.bf16.vlgmr.msra.gmra.mxu2 %vm697_vm11, %v13013_v8  ;;  %v16237_v29 = vpop.f32.mrf.mxu2 }
 0xb00   : > { %13034 = vmatmul.msk.bf16.vlgmr.msra.gmra.mxu3 %vm697_vm11, %v13013_v8  ;;  %v6013_v8 = vpop.f32.mrf.mxu0  ;;  %v16239_v60 = vpop.f32.mrf.mxu3 }
 0xb01   : > { %v6303_v13 = vpop.permute.xlu1 %6302  ;;  %13036 = vmatmul.msk.bf16.vlgmr.msrb.gmra.mxu0 %vm697_vm11, %v13035_v54 }
 0xb02   : > { %v6319_v6 = vsel %vm2368_vm14, %v6303_v13, %v6305_v41  ;;  %v6301_v59 = vpop.permute.xlu0 %6300 }
 0xb03   : > { %v6317_v44 = vsel %vm2368_vm14, %v6299_v40, %v6301_v59  ;;  %v6318_v42 = vsel %vm2368_vm14, %v6301_v59, %v6303_v13  ;;  %v6340_v2 = vsel %vm701_vm10, %v6319_v6, 0  ;;  %v6078_v40 = vpop.f32.mrf.mxu1 }
 0xb04   : > { %v6334_v24 = vsel %vm701_vm10, %v6317_v44, 0  ;;  %v6337_v55 = vsel %vm701_vm10, %v6318_v42, 0  ;;  %6405 = vmatpush.bf16.msrb.mxu3 %v6340_v2 }
 0xb05   : > { %6379 = vmatpush.bf16.msrb.mxu1 %v6334_v24  ;;  %6392 = vmatpush.bf16.msrb.mxu2 %v6337_v55 }
 0xb07   : > { %v6091_v11 = vpop.f32.mrf.mxu2 }
 0xb08   : > { %13037 = vmatmul.msk.bf16.vlgmr.msrb.gmra.mxu1 %vm697_vm11, %v13035_v54  ;;  %v6063_v19 = vpop.f32.mrf.mxu0  ;;  %v6104_v17 = vpop.f32.mrf.mxu3 }
 0xb09   : > { %v6309_v32 = vpop.permute.xlu1 %6308 }
 0xb0a   : > { %v6322_v12 = vsel %vm2368_vm14, %v6309_v32, %v6311_v1  ;;  %v6307_v27 = vpop.permute.xlu0 %6306 }
 0xb0b   : > { %v6320_v36 = vsel %vm2368_vm14, %v6305_v41, %v6307_v27  ;;  %v6321_v0 = vsel %vm2368_vm14, %v6307_v27, %v6309_v32  ;;  %v6349_v15 = vsel %vm701_vm10, %v6322_v12, 0  ;;  %v16247_v21 = vpop.f32.mrf.mxu1 }
 0xb0c   : > { %v6343_v26 = vsel %vm701_vm10, %v6320_v36, 0  ;;  %v6346_v22 = vsel %vm701_vm10, %v6321_v0, 0  ;;  %6444 = vmatpush.bf16.msra.mxu2 %v6349_v15 }
 0xb0d   : > { %6418 = vmatpush.bf16.msra.mxu0 %v6343_v26  ;;  %6431 = vmatpush.bf16.msra.mxu1 %v6346_v22  ;;  %v16254_v26 = vpop.permute.xlu2 %6503 }
 0xb0f   : > { %13038 = vmatmul.msk.bf16.vlgmr.msrb.gmra.mxu2 %vm697_vm11, %v13035_v54 }
 0xb10   : > { %13039 = vmatmul.msk.bf16.vlgmr.msrb.gmra.mxu3 %vm697_vm11, %v13035_v54  ;;  %v6065_v62 = vpop.f32.mrf.mxu0 }
 0xb11   : > { %v6315_v63 = vpop.permute.xlu1 %6314  ;;  %13040 = vmatmul.msk.bf16.vlgmr.msra.gmra.mxu0 %vm697_vm11, %v13035_v54 }
 0xb12   : > { %v6326_v56 = vsel %vm2368_vm14, %v6315_v63, 0  ;;  %v6313_v33 = vpop.permute.xlu0 %6312 }
 0xb13   : > { %v6323_v38 = vsel %vm2368_vm14, %v6311_v1, %v6313_v33  ;;  %v6324_v31 = vsel %vm2368_vm14, %v6313_v33, %v6315_v63  ;;  %v6357_v57 = vsel %vm701_vm10, %v6326_v56, 0  ;;  %v6130_v37 = vpop.f32.mrf.mxu1 }
 0xb14   : > { %v6352_v39 = vsel %vm701_vm10, %v6323_v38, 0  ;;  %v6355_v48 = vsel %vm701_vm10, %v6324_v31, 0  ;;  %6483 = vmatpush.bf16.msrb.mxu1 %v6357_v57 }
 0xb15   : > { %6457 = vmatpush.bf16.msra.mxu3 %v6352_v39  ;;  %6470 = vmatpush.bf16.msrb.mxu0 %v6355_v48 }
 0xb18   : > { %13041 = vmatmul.msk.bf16.vlgmr.msra.gmra.mxu1 %vm697_vm11, %v13035_v54  ;;  %v16245_v18 = vpop.f32.mrf.mxu0 }
 0xb1f   : > { %13042 = vmatmul.msk.bf16.vlgmr.msra.gmra.mxu2 %vm697_vm11, %v13035_v54 }
 0xb20   : > { %13043 = vmatmul.msk.bf16.vlgmr.msra.gmra.mxu3 %vm697_vm11, %v13035_v54  ;;  %v6117_v10 = vpop.f32.mrf.mxu0 }
 0xb21   : > { %13044 = vmatmul.msk.bf16.vlgmr.msrb.gmra.mxu0 %vm697_vm11, %v13035_v54 }
 0xb28   : > { %13045 = vmatmul.msk.bf16.vlgmr.msrb.gmra.mxu1 %vm697_vm11, %v13035_v54 }
 0xb5d   : > { %v6199_v52 = vpop.f32.mrf.mxu0 }
 0xb62   : > { %v6173_v47 = vpop.f32.mrf.mxu2  ;;  %v6186_v41 = vpop.f32.mrf.mxu3 }
 0xb63   : > { %v6174_v36 = vadd.f32 %v6173_v47, %v16211_v58  ;;  %v6187_v63 = vadd.f32 %v6186_v41, %v16213_v53  ;;  %v6200_v47 = vadd.f32 %v6199_v52, %v16215_v20 }
 0xb64   : > { %v6212_v13 = vpop.f32.mrf.mxu1 }
 0xb65   : > { %v6201_v6 = vpop.f32.mrf.mxu0 }
 0xb6a   : > { %v6175_v59 = vpop.f32.mrf.mxu2  ;;  %v6188_v44 = vpop.f32.mrf.mxu3 }
 0xb6b   : > { %v6213_v44 = vadd.f32 %v6212_v13, %v16218_v5 }
 0xb6c   : > { %v6214_v42 = vpop.f32.mrf.mxu1 }
 0xb6e   : > { %v16249_v2 = vpop.f32.mrf.mxu0 }
 0xb72   : > { %v6225_v24 = vpop.f32.mrf.mxu2  ;;  %v6238_v55 = vpop.f32.mrf.mxu3 }
 0xb73   : > { %v6226_v62 = vadd.f32 %v6225_v24, %v6063_v19  ;;  %v6239_v24 = vadd.f32 %v6238_v55, %v16235_v35 }
 0xb74   : > { %v16251_v1 = vpop.f32.mrf.mxu1 }
 0xb76   : > { %v6253_v54 = vpop.f32.mrf.mxu0 }
 0xb7a   : > { %v6227_v32 = vpop.f32.mrf.mxu2  ;;  %v6240_v12 = vpop.f32.mrf.mxu3 }
 0xb7c   : > { %v6266_v27 = vpop.f32.mrf.mxu1 }
 0xb7e   : > { %v6368_v0 = vpop.f32.mrf.mxu0 }
 0xb7f   : > { %v6489_v15 = vadd.f32 %v6368_v0, %v6174_v36 }
 0xb81   : > { %v6506_v22 = vadd.f32 %v16254_v26, %v6489_v15  ;;  %v16286_v15 = vld [vmem:[%s18463_s2 + $0x70] sm:$0xf] }
 0xb82   : > { %v16257_v8 = vpop.f32.mrf.mxu2 }
 0xb83   : > { %v16259_v14 = vpop.f32.mrf.mxu3  ;;  %v6526_v56 = vmul.f32 0.1, %v6506_v22  ;;  %vm6516_vm1 = vcmp.ge.f32.partialorder %v6506_v22, 0.0 }
 0xb85   : > { %v6381_v16 = vpop.f32.mrf.mxu1  ;;  %v6536_v58 = vsel %vm6516_vm1, %v6506_v22, %v6526_v56 }
 0xb86   : > { %v6490_v33 = vadd.f32 %v6381_v16, %v6187_v63  ;;  %v6370_v45 = vpop.f32.mrf.mxu0  ;;  %v6546_v40 = vmul.f32 %v6536_v58, %v14345_v46 }
 0xb88   : > { %v6507_v38 = vadd.f32 %v16254_v26, %v6490_v33 }
 0xb8a   : > { %vm6517_vm2 = vcmp.ge.f32.partialorder %v6507_v38, 0.0  ;;  %v6527_v31 = vmul.f32 0.1, %v6507_v38  ;;  %v6279_v57 = vpop.f32.mrf.mxu2 }
 0xb8b   : > { %v6292_v39 = vpop.f32.mrf.mxu3 }
 0xb8c   : > { %v6537_v48 = vsel %vm6517_vm2, %v6507_v38, %v6527_v31 }
 0xb8d   : > { %v6547_v11 = vmul.f32 %v6537_v48, %v14343_v43  ;;  %v6383_v17 = vpop.f32.mrf.mxu1 }
 0xb8e   : > { %v6420_v53 = vpop.f32.mrf.mxu0 }
 0xb8f   : > { %v6493_v10 = vadd.f32 %v6420_v53, %v6226_v62  ;;  %v6556_v37 = vpack.c.bf16 %v6547_v11, %v6546_v40  ;;  %v6278_v62 = vadd.f32 %v16257_v8, %v16245_v18  ;;  %v6265_v8 = vadd.f32 %v16251_v1, %v16239_v60 }
 0xb91   : > { %v6510_v41 = vadd.f32 %v16254_v26, %v6493_v10  ;;  %v6569_v6 = vunpack.c.h.b16 %v6556_v37  ;;  %v6568_v59 = vunpack.c.l.b16 %v6556_v37 }
 0xb92   : > { %v6394_v42 = vpop.f32.mrf.mxu2 }
 0xb93   : > { %v6491_v54 = vadd.f32 %v6394_v42, %v6200_v47  ;;  %v6407_v32 = vpop.f32.mrf.mxu3  ;;  %v16268_v19 = vpack.c.b16 %v6569_v6, %v6569_v6  ;;  %v16271_v27 = vpack.c.b16 %v6568_v59, %v6568_v59  ;;  %v6530_v36 = vmul.f32 0.1, %v6510_v41 }
 0xb94   : > { %v6492_v12 = vadd.f32 %v6407_v32, %v6213_v44  ;;  %vm6520_vm3 = vcmp.ge.f32.partialorder %v6510_v41, 0.0  ;;  %v6252_v59 = vadd.f32 %v16249_v2, %v16237_v29 }
 0xb95   : > { %v6508_v0 = vadd.f32 %v16254_v26, %v6491_v54  ;;  %v6433_v20 = vpop.f32.mrf.mxu1  ;;  %6590 = vrot.lane.b32.xlu1 %v16268_v19, %s13793_s11  ;;  %v6628_v5 = vsel %vm701_vm10, %v16268_v19, 0  ;;  %6588 = vrot.lane.b32.xlu0 %v16271_v27, %s13793_s11  ;;  %v6625_v35 = vsel %vm701_vm10, %v16271_v27, 0  ;;  %v6540_v56 = vsel %vm6520_vm3, %v6510_v41, %v6530_v36 }
 0xb96   : > { %v6509_v52 = vadd.f32 %v16254_v26, %v6492_v12  ;;  %v6494_v13 = vadd.f32 %v6433_v20, %v6239_v24  ;;  %6674 = vmatpush.bf16.msrb.mxu3 %v6628_v5  ;;  %v6422_v55 = vpop.f32.mrf.mxu0  ;;  %6661 = vmatpush.bf16.msrb.mxu2 %v6625_v35  ;;  %v6550_v40 = vmul.f32 %v6540_v56, %v14379_v28 }
 0xb97   : > { %vm6518_vm4 = vcmp.ge.f32.partialorder %v6508_v0, 0.0  ;;  %v6528_v22 = vmul.f32 0.1, %v6508_v0  ;;  %v6291_v12 = vadd.f32 %v16259_v14, %v16247_v21 }
 0xb98   : > { %vm6519_vm5 = vcmp.ge.f32.partialorder %v6509_v52, 0.0  ;;  %v6529_v63 = vmul.f32 0.1, %v6509_v52  ;;  %v6511_v16 = vadd.f32 %v16254_v26, %v6494_v13 }
 0xb99   : > { %v6538_v33 = vsel %vm6518_vm4, %v6508_v0, %v6528_v22  ;;  %13050 = vmatmul.msk.bf16.vlgmr.msrb.gmra.mxu3 %vm697_vm11, %v16286_v15  ;;  %13049 = vmatmul.msk.bf16.vlgmr.msrb.gmra.mxu2 %vm697_vm11, %v16286_v15 }
 0xb9a   : > { %v6548_v45 = vmul.f32 %v6538_v33, %v14392_v9  ;;  %v6539_v38 = vsel %vm6519_vm5, %v6509_v52, %v6529_v63  ;;  %vm6521_vm6 = vcmp.ge.f32.partialorder %v6511_v16, 0.0  ;;  %v6531_v58 = vmul.f32 0.1, %v6511_v16  ;;  %v6396_v31 = vpop.f32.mrf.mxu2 }
 0xb9b   : > { %v6549_v57 = vmul.f32 %v6539_v38, %v14394_v49  ;;  %v6409_v39 = vpop.f32.mrf.mxu3 }
 0xb9c   : > { %v6541_v48 = vsel %vm6521_vm6, %v6511_v16, %v6531_v58 }
 0xb9d   : > { %v6551_v11 = vmul.f32 %v6541_v48, %v14345_v46  ;;  %v6435_v17 = vpop.f32.mrf.mxu1  ;;  %v6557_v53 = vpack.c.bf16 %v6549_v57, %v6548_v45 }
 0xb9e   : > { %v6472_v10 = vpop.f32.mrf.mxu0 }
 0xb9f   : > { %v6497_v37 = vadd.f32 %v6472_v10, %v6278_v62  ;;  %v6571_v47 = vunpack.c.h.b16 %v6557_v53  ;;  %v6570_v41 = vunpack.c.l.b16 %v6557_v53  ;;  %v6558_v6 = vpack.c.bf16 %v6551_v11, %v6550_v40 }
 0xba1   : > { %v6514_v44 = vadd.f32 %v16254_v26, %v6497_v37  ;;  %v16302_v42 = vpack.c.b16 %v6571_v47, %v6571_v47  ;;  %v16304_v54 = vpack.c.b16 %v6570_v41, %v6570_v41  ;;  %v6572_v18 = vunpack.c.l.b16 %v6558_v6 }
 0xba2   : > { %v6446_v32 = vpop.f32.mrf.mxu2  ;;  %v6573_v24 = vunpack.c.h.b16 %v6558_v6 }
 0xba3   : > { %v6495_v36 = vadd.f32 %v6446_v32, %v6252_v59  ;;  %v6459_v0 = vpop.f32.mrf.mxu3  ;;  %6594 = vrot.lane.b32.xlu0 %v16302_v42, %s13793_s11  ;;  %6592 = vrot.lane.b32.xlu2 %v16304_v54, %s13793_s11  ;;  %v6631_v29 = vsel %vm701_vm10, %v16304_v54, 0  ;;  %v6634_v60 = vsel %vm701_vm10, %v16302_v42, 0  ;;  %v16318_v1 = vpack.c.b16 %v6572_v18, %v6572_v18 }
 0xba4   : > { %v6496_v2 = vadd.f32 %v6459_v0, %v6265_v8  ;;  %6687 = vmatpush.bf16.msra.mxu0 %v6631_v29  ;;  %v16320_v20 = vpack.c.b16 %v6573_v24, %v6573_v24  ;;  %v6534_v21 = vmul.f32 0.1, %v6514_v44  ;;  %6700 = vmatpush.bf16.msra.mxu1 %v6634_v60  ;;  %vm6524_vm7 = vcmp.ge.f32.partialorder %v6514_v44, 0.0 }
 0xba5   : > { %v6512_v14 = vadd.f32 %v16254_v26, %v6495_v36  ;;  %v6485_v5 = vpop.f32.mrf.mxu1  ;;  %6596 = vrot.lane.b32.xlu1 %v16318_v1, %s13793_s11  ;;  %v6637_v35 = vsel %vm701_vm10, %v16318_v1, 0 }
 0xba6   : > { %v6513_v52 = vadd.f32 %v16254_v26, %v6496_v2  ;;  %v6498_v13 = vadd.f32 %v6485_v5, %v6291_v12  ;;  %v6474_v55 = vpop.f32.mrf.mxu0  ;;  %6713 = vmatpush.bf16.msra.mxu2 %v6637_v35  ;;  %v6640_v63 = vsel %vm701_vm10, %v16320_v20, 0  ;;  %v6544_v33 = vsel %vm6524_vm7, %v6514_v44, %v6534_v21 }
 0xba7   : > { %vm6522_vm8 = vcmp.ge.f32.partialorder %v6512_v14, 0.0  ;;  %v6532_v22 = vmul.f32 0.1, %v6512_v14  ;;  %13051 = vmatmul.msk.bf16.vlgmr.msra.gmra.mxu0 %vm697_vm11, %v16286_v15  ;;  %6726 = vmatpush.bf16.msra.mxu3 %v6640_v63  ;;  %v6554_v62 = vmul.f32 %v6544_v33, %v14394_v49 }
 0xba8   : > { %vm6523_vm1 = vcmp.ge.f32.partialorder %v6513_v52, 0.0  ;;  %v6533_v16 = vmul.f32 0.1, %v6513_v52  ;;  %v6515_v56 = vadd.f32 %v16254_v26, %v6498_v13  ;;  %13052 = vmatmul.msk.bf16.vlgmr.msra.gmra.mxu1 %vm697_vm11, %v16286_v15 }
 0xba9   : > { %v6542_v45 = vsel %vm6522_vm8, %v6512_v14, %v6532_v22  ;;  %13053 = vmatmul.msk.bf16.vlgmr.msra.gmra.mxu2 %vm697_vm11, %v16286_v15 }
 0xbaa   : > { %v6552_v38 = vmul.f32 %v6542_v45, %v14343_v43  ;;  %v6543_v58 = vsel %vm6523_vm1, %v6513_v52, %v6533_v16  ;;  %vm6525_vm2 = vcmp.ge.f32.partialorder %v6515_v56, 0.0  ;;  %v6535_v31 = vmul.f32 0.1, %v6515_v56  ;;  %v6448_v57 = vpop.f32.mrf.mxu2  ;;  %13054 = vmatmul.msk.bf16.vlgmr.msra.gmra.mxu3 %vm697_vm11, %v16286_v15 }
 0xbab   : > { %v6553_v39 = vmul.f32 %v6543_v58, %v14392_v9  ;;  %v6461_v48 = vpop.f32.mrf.mxu3  ;;  %6598 = vrot.lane.b32.xlu2 %v16320_v20, %s13793_s11 }
 0xbac   : > { %v6545_v26 = vsel %vm6525_vm2, %v6515_v56, %v6535_v31 }
 0xbad   : > { %v6555_v40 = vmul.f32 %v6545_v26, %v14379_v28  ;;  %v6487_v11 = vpop.f32.mrf.mxu1  ;;  %v6559_v17 = vpack.c.bf16 %v6553_v39, %v6552_v38 }
 0xbaf   : > { %v6575_v53 = vunpack.c.h.b16 %v6559_v17  ;;  %v6574_v10 = vunpack.c.l.b16 %v6559_v17  ;;  %v6560_v37 = vpack.c.bf16 %v6555_v40, %v6554_v62 }
 0xbb1   : > { %v6585_v47 = vpack.c.b16 %v6575_v53, %v6575_v53  ;;  %v6584_v41 = vpack.c.b16 %v6574_v10, %v6574_v10  ;;  %v6576_v6 = vunpack.c.l.b16 %v6560_v37  ;;  %v6577_v59 = vunpack.c.h.b16 %v6560_v37 }
 0xbb3   : > { %6602 = vrot.lane.b32.xlu1 %v6585_v47, %s13793_s11  ;;  %6600 = vrot.lane.b32.xlu0 %v6584_v41, %s13793_s11  ;;  %v6643_v44 = vsel %vm701_vm10, %v6584_v41, 0  ;;  %v6646_v18 = vsel %vm701_vm10, %v6585_v47, 0  ;;  %v6586_v8 = vpack.c.b16 %v6576_v6, %v6576_v6  ;;  %v6587_v32 = vpack.c.b16 %v6577_v59, %v6577_v59 }
 0xbb4   : > { %6739 = vmatpush.bf16.msrb.mxu0 %v6643_v44  ;;  %6752 = vmatpush.bf16.msrb.mxu1 %v6646_v18 }
 0xbb5   : > { %6604 = vrot.lane.b32.xlu2 %v6586_v8, %s13793_s11  ;;  %v6649_v24 = vsel %vm701_vm10, %v6586_v8, 0  ;;  %v6652_v12 = vsel %vm701_vm10, %v6587_v32, 0 }
 0xbb6   : > { %6765 = vmatpush.bf16.msrb.mxu2 %v6649_v24  ;;  %6778 = vmatpush.bf16.msrb.mxu3 %v6652_v12 }
 0xbb7   : > { %13055 = vmatmul.msk.bf16.vlgmr.msrb.gmra.mxu0 %vm697_vm11, %v16286_v15 }
 0xbb8   : > { %13056 = vmatmul.msk.bf16.vlgmr.msrb.gmra.mxu1 %vm697_vm11, %v16286_v15 }
 0xbb9   : > { %13057 = vmatmul.msk.bf16.vlgmr.msrb.gmra.mxu2 %vm697_vm11, %v16286_v15 }
 0xbba   : > { %13058 = vmatmul.msk.bf16.vlgmr.msrb.gmra.mxu3 %vm697_vm11, %v16286_v15 }
 0xbbb   : > { %6948 = vrot.lane.b32.xlu1 %v16271_v27, %s13794_s28  ;;  %6606 = vrot.lane.b32.xlu0 %v6587_v32, %s13793_s11 }
 0xbbd   : > { %6950 = vrot.lane.b32.xlu2 %v16268_v19, %s13794_s28  ;;  %v13080_v19 = vld [vmem:[%s18464_s3 + $0x48] sm:$0xff] }
 0xbc3   : > { %6954 = vrot.lane.b32.xlu1 %v16302_v42, %s13794_s28  ;;  %6952 = vrot.lane.b32.xlu0 %v16304_v54, %s13794_s28 }
 0xbc5   : > { %6956 = vrot.lane.b32.xlu2 %v16318_v1, %s13794_s28  ;;  %v13047_v1 = vld [vmem:[%s18463_s2 + $0x6c] sm:$0xf] }
 0xbcb   : > { %6960 = vrot.lane.b32.xlu1 %v6584_v41, %s13794_s28  ;;  %6958 = vrot.lane.b32.xlu0 %v16320_v20, %s13794_s28 }
 0xbcd   : > { %6962 = vrot.lane.b32.xlu2 %v6585_v47, %s13794_s28 }
 0xbd3   : > { %6966 = vrot.lane.b32.xlu1 %v6587_v32, %s13794_s28  ;;  %6964 = vrot.lane.b32.xlu0 %v6586_v8, %s13794_s28  ;;  %v13069_v8 = vld [vmem:[%s18463_s2 + $0x74] sm:$0xf] }
 0xbd5   : > { %7155 = vperm.xlu2 %13571, %v13080_v19  }
 0xbfd   : > { %v6593_v27 = vpop.permute.xlu2 %6592 }
 0xc05   : > { %v6599_v20 = vpop.permute.xlu2 %6598 }
 0xc07   : > { %v6591_v15 = vpop.permute.xlu1 %6590  ;;  %v6589_v54 = vpop.permute.xlu0 %6588 }
 0xc08   : > { %v6609_v42 = vsel %vm681_vm12, %v6591_v15, %v6593_v27  ;;  %v6608_v36 = vsel %vm681_vm12, %v6589_v54, %v6591_v15  ;;  %v6618_v0 = vsel %vm681_vm12, 0, %v6589_v54 }
 0xc09   : > { %v6793_v29 = vsel %vm701_vm10, %v6609_v42, 0  ;;  %v6787_v2 = vsel %vm701_vm10, %v6618_v0, 0  ;;  %v6790_v60 = vsel %vm701_vm10, %v6608_v36, 0 }
 0xc0a   : > { %6849 = vmatpush.bf16.msra.mxu2 %v6793_v29  ;;  %6823 = vmatpush.bf16.msra.mxu0 %v6787_v2 }
 0xc0b   : > { %6836 = vmatpush.bf16.msra.mxu1 %v6790_v60 }
 0xc0d   : > { %13061 = vmatmul.msk.bf16.vlgmr.msra.gmra.mxu2 %vm697_vm11, %v13047_v1  ;;  %13059 = vmatmul.msk.bf16.vlgmr.msra.gmra.mxu0 %vm697_vm11, %v13047_v1 }
 0xc0e   : > { %13060 = vmatmul.msk.bf16.vlgmr.msra.gmra.mxu1 %vm697_vm11, %v13047_v1 }
 0xc0f   : > { %v6605_v63 = vpop.permute.xlu2 %6604 }
 0xc15   : > { %v6595_v21 = vpop.permute.xlu0 %6594 }
 0xc16   : > { %v6610_v14 = vsel %vm681_vm12, %v6593_v27, %v6595_v21 }
 0xc17   : > { %v6796_v5 = vsel %vm701_vm10, %v6610_v14, 0  ;;  %v6597_v52 = vpop.permute.xlu1 %6596  ;;  %v6951_v58 = vpop.permute.xlu2 %6950 }
 0xc18   : > { %6862 = vmatpush.bf16.msra.mxu3 %v6796_v5  ;;  %v6611_v13 = vsel %vm681_vm12, %v6595_v21, %v6597_v52  ;;  %v6612_v35 = vsel %vm681_vm12, %v6597_v52, %v6599_v20 }
 0xc19   : > { %v6799_v55 = vsel %vm701_vm10, %v6611_v13, 0  ;;  %v6802_v22 = vsel %vm701_vm10, %v6612_v35, 0 }
 0xc1a   : > { %6875 = vmatpush.bf16.msrb.mxu0 %v6799_v55  ;;  %6888 = vmatpush.bf16.msrb.mxu1 %v6802_v22 }
 0xc1b   : > { %13062 = vmatmul.msk.bf16.vlgmr.msra.gmra.mxu3 %vm697_vm11, %v13047_v1 }
 0xc1c   : > { %v16427_v24 = vpop.f32.mrf.mxu2  ;;  %v16429_v12 = vpop.f32.mrf.mxu3 }
 0xc1d   : > { %13063 = vmatmul.msk.bf16.vlgmr.msrb.gmra.mxu0 %vm697_vm11, %v13047_v1 }
 0xc1e   : > { %13064 = vmatmul.msk.bf16.vlgmr.msrb.gmra.mxu1 %vm697_vm11, %v13047_v1 }
 0xc1f   : > { %v6957_v53 = vpop.permute.xlu2 %6956 }
 0xc24   : > { %v6689_v36 = vpop.f32.mrf.mxu0 }
 0xc25   : > { %v6603_v16 = vpop.permute.xlu1 %6602  ;;  %v6601_v56 = vpop.permute.xlu0 %6600 }
 0xc26   : > { %v6615_v33 = vsel %vm681_vm12, %v6603_v16, %v6605_v63  ;;  %v6613_v45 = vsel %vm681_vm12, %v6599_v20, %v6601_v56  ;;  %v6614_v38 = vsel %vm681_vm12, %v6601_v56, %v6603_v16  ;;  %v16435_v0 = vpop.f32.mrf.mxu1  ;;  %v6678_v20 = vpop.f32.mrf.mxu3 }
 0xc27   : > { %v6805_v31 = vsel %vm701_vm10, %v6613_v45, 0  ;;  %v6808_v57 = vsel %vm701_vm10, %v6614_v38, 0  ;;  %v6811_v39 = vsel %vm701_vm10, %v6615_v33, 0  ;;  %v6963_v32 = vpop.permute.xlu2 %6962 }
 0xc28   : > { %6901 = vmatpush.bf16.msrb.mxu2 %v6805_v31  ;;  %6914 = vmatpush.bf16.msrb.mxu3 %v6808_v57 }
 0xc29   : > { %6927 = vmatpush.bf16.msra.mxu0 %v6811_v39 }
 0xc2b   : > { %13065 = vmatmul.msk.bf16.vlgmr.msrb.gmra.mxu2 %vm697_vm11, %v13047_v1  ;;  %13066 = vmatmul.msk.bf16.vlgmr.msrb.gmra.mxu3 %vm697_vm11, %v13047_v1 }
 0xc2c   : > { %v6691_v35 = vpop.f32.mrf.mxu0 }
 0xc2d   : > { %v6949_v48 = vpop.permute.xlu1 %6948  ;;  %v6607_v26 = vpop.permute.xlu0 %6606  ;;  %13067 = vmatmul.msk.bf16.vlgmr.msra.gmra.mxu0 %vm697_vm11, %v13047_v1 }
 0xc2e   : > { %v6968_v62 = vsel %vm1046_vm13, %v6949_v48, %v6951_v58  ;;  %v6616_v40 = vsel %vm681_vm12, %v6605_v63, %v6607_v26  ;;  %v6704_v55 = vpop.f32.mrf.mxu1  ;;  %v16451_v33 = vpop.f32.mrf.mxu3 }
 0xc2f   : > { %v6983_v11 = vsel %vm701_vm10, %v6968_v62, 0  ;;  %v6814_v17 = vsel %vm701_vm10, %v6616_v40, 0 }
 0xc30   : > { %6940 = vmatpush.bf16.msra.mxu1 %v6814_v17  ;;  %7018 = vmatpush.bf16.msra.mxu2 %v6983_v11 }
 0xc33   : > { %13068 = vmatmul.msk.bf16.vlgmr.msra.gmra.mxu1 %vm697_vm11, %v13047_v1  ;;  %v6665_v1 = vpop.f32.mrf.mxu2 }
 0xc34   : > { %v16454_v45 = vpop.f32.mrf.mxu0 }
 0xc35   : > { %v6955_v10 = vpop.permute.xlu1 %6954  ;;  %v6953_v37 = vpop.permute.xlu0 %6952 }
 0xc36   : > { %v6971_v47 = vsel %vm1046_vm13, %v6955_v10, %v6957_v53  ;;  %v6969_v41 = vsel %vm1046_vm13, %v6951_v58, %v6953_v37  ;;  %v6970_v6 = vsel %vm1046_vm13, %v6953_v37, %v6955_v10  ;;  %v16456_v38 = vpop.f32.mrf.mxu1  ;;  %v6730_v31 = vpop.f32.mrf.mxu3 }
 0xc37   : > { %v6986_v59 = vsel %vm701_vm10, %v6969_v41, 0  ;;  %v6989_v44 = vsel %vm701_vm10, %v6970_v6, 0  ;;  %v6992_v18 = vsel %vm701_vm10, %v6971_v47, 0 }
 0xc38   : > { %7031 = vmatpush.bf16.msra.mxu3 %v6986_v59  ;;  %7044 = vmatpush.bf16.msrb.mxu0 %v6989_v44 }
 0xc39   : > { %7057 = vmatpush.bf16.msrb.mxu1 %v6992_v18 }
 0xc3b   : > { %13070 = vmatmul.msk.bf16.vlgmr.msra.gmra.mxu2 %vm697_vm11, %v13069_v8  ;;  %13071 = vmatmul.msk.bf16.vlgmr.msra.gmra.mxu3 %vm697_vm11, %v13069_v8  ;;  %v16449_v56 = vpop.f32.mrf.mxu2 }
 0xc3c   : > { %v6743_v57 = vpop.f32.mrf.mxu0 }
 0xc3d   : > { %v6961_v19 = vpop.permute.xlu1 %6960  ;;  %v6959_v27 = vpop.permute.xlu0 %6958  ;;  %13072 = vmatmul.msk.bf16.vlgmr.msrb.gmra.mxu0 %vm697_vm11, %v13069_v8 }
 0xc3e   : > { %v6974_v15 = vsel %vm1046_vm13, %v6961_v19, %v6963_v32  ;;  %v6972_v42 = vsel %vm1046_vm13, %v6957_v53, %v6959_v27  ;;  %v6973_v54 = vsel %vm1046_vm13, %v6959_v27, %v6961_v19  ;;  %v6756_v39 = vpop.f32.mrf.mxu1  ;;  %v16463_v26 = vpop.f32.mrf.mxu3 }
 0xc3f   : > { %v6995_v29 = vsel %vm701_vm10, %v6972_v42, 0  ;;  %v6998_v2 = vsel %vm701_vm10, %v6973_v54, 0  ;;  %v7001_v60 = vsel %vm701_vm10, %v6974_v15, 0 }
 0xc40   : > { %7070 = vmatpush.bf16.msrb.mxu2 %v6995_v29  ;;  %7083 = vmatpush.bf16.msrb.mxu3 %v6998_v2 }
 0xc41   : > { %7096 = vmatpush.bf16.msra.mxu0 %v7001_v60 }
 0xc43   : > { %13073 = vmatmul.msk.bf16.vlgmr.msrb.gmra.mxu1 %vm697_vm11, %v13069_v8  ;;  %v6717_v58 = vpop.f32.mrf.mxu2 }
 0xc45   : > { %v6967_v21 = vpop.permute.xlu1 %6966  ;;  %v6965_v14 = vpop.permute.xlu0 %6964 }
 0xc46   : > { %v6978_v5 = vsel %vm1046_vm13, %v6967_v21, 0  ;;  %v6975_v52 = vsel %vm1046_vm13, %v6963_v32, %v6965_v14  ;;  %v6976_v13 = vsel %vm1046_vm13, %v6965_v14, %v6967_v21  ;;  %v6782_v40 = vpop.f32.mrf.mxu3  ;;  %v16469_v21 = vpop.permute.xlu2 %7155 }
 0xc47   : > { %v7004_v22 = vsel %vm701_vm10, %v6975_v52, 0  ;;  %v7007_v63 = vsel %vm701_vm10, %v6976_v13, 0  ;;  %v7009_v16 = vsel %vm701_vm10, %v6978_v5, 0 }
 0xc48   : > { %7109 = vmatpush.bf16.msra.mxu1 %v7004_v22  ;;  %7122 = vmatpush.bf16.msra.mxu2 %v7007_v63 }
 0xc49   : > { %7135 = vmatpush.bf16.msra.mxu3 %v7009_v16 }
 0xc4b   : > { %13074 = vmatmul.msk.bf16.vlgmr.msrb.gmra.mxu2 %vm697_vm11, %v13069_v8  ;;  %13075 = vmatmul.msk.bf16.vlgmr.msrb.gmra.mxu3 %vm697_vm11, %v13069_v8  ;;  %v16461_v48 = vpop.f32.mrf.mxu2 }
 0xc4d   : > { %13076 = vmatmul.msk.bf16.vlgmr.msra.gmra.mxu0 %vm697_vm11, %v13069_v8 }
 0xc53   : > { %13077 = vmatmul.msk.bf16.vlgmr.msra.gmra.mxu1 %vm697_vm11, %v13069_v8  ;;  %v6769_v62 = vpop.f32.mrf.mxu2 }
 0xc5b   : > { %13078 = vmatmul.msk.bf16.vlgmr.msra.gmra.mxu2 %vm697_vm11, %v13069_v8  ;;  %13079 = vmatmul.msk.bf16.vlgmr.msra.gmra.mxu3 %vm697_vm11, %v13069_v8 }
 0xc8a   : > { %v6825_v11 = vpop.f32.mrf.mxu0 }
 0xc8b   : > { %v6838_v17 = vpop.f32.mrf.mxu1  ;;  %v6826_v14 = vadd.f32 %v6825_v11, %v16427_v24 }
 0xc8c   : > { %v6839_v5 = vadd.f32 %v6838_v17, %v16429_v12 }
 0xc90   : > { %v6851_v53 = vpop.f32.mrf.mxu2 }
 0xc91   : > { %v6852_v60 = vadd.f32 %v6851_v53, %v6689_v36 }
 0xc92   : > { %v6827_v10 = vpop.f32.mrf.mxu0 }
 0xc93   : > { %v6840_v37 = vpop.f32.mrf.mxu1 }
 0xc98   : > { %v6853_v47 = vpop.f32.mrf.mxu2 }
 0xc9a   : > { %v6877_v41 = vpop.f32.mrf.mxu0 }
 0xc9b   : > { %v6890_v6 = vpop.f32.mrf.mxu1 }
 0xc9e   : > { %v6864_v59 = vpop.f32.mrf.mxu3 }
 0xc9f   : > { %v6865_v35 = vadd.f32 %v6864_v59, %v16435_v0 }
 0xca2   : > { %v6879_v44 = vpop.f32.mrf.mxu0 }
 0xca3   : > { %v6892_v18 = vpop.f32.mrf.mxu1 }
 0xca6   : > { %v6866_v32 = vpop.f32.mrf.mxu3 }
 0xcaa   : > { %v16465_v19 = vpop.f32.mrf.mxu0 }
 0xcae   : > { %v6903_v8 = vpop.f32.mrf.mxu2  ;;  %v6916_v27 = vpop.f32.mrf.mxu3 }
 0xcaf   : > { %v6904_v44 = vadd.f32 %v6903_v8, %v16454_v45 }
 0xcb0   : > { %v16467_v15 = vpop.f32.mrf.mxu1 }
 0xcb2   : > { %v6931_v42 = vpop.f32.mrf.mxu0 }
 0xcb6   : > { %v6905_v54 = vpop.f32.mrf.mxu2  ;;  %v6918_v29 = vpop.f32.mrf.mxu3 }
 0xcb8   : > { %v6944_v2 = vpop.f32.mrf.mxu1 }
 0xcba   : > { %v7046_v1 = vpop.f32.mrf.mxu0 }
 0xcbb   : > { %v7143_v20 = vadd.f32 %v7046_v1, %v6852_v60  ;;  %v6878_v1 = vadd.f32 %v6877_v41, %v16449_v56 }
 0xcbd   : > { %v7160_v52 = vadd.f32 %v16469_v21, %v7143_v20 }
 0xcbe   : > { %v7020_v13 = vpop.f32.mrf.mxu2  ;;  %v7033_v22 = vpop.f32.mrf.mxu3 }
 0xcbf   : > { %v7141_v55 = vadd.f32 %v7020_v13, %v6826_v14  ;;  %v7170_v63 = vadd.f32 %v7160_v52, %v16004_v61  ;;  %v7142_v16 = vadd.f32 %v7033_v22, %v6839_v5  ;;  %v6891_v5 = vadd.f32 %v6890_v6, %v16451_v33 }
 0xcc0   : > { %v7059_v58 = vpop.f32.mrf.mxu1 }
 0xcc1   : > { %v7158_v36 = vadd.f32 %v16469_v21, %v7141_v55  ;;  %v7144_v31 = vadd.f32 %v7059_v58, %v6865_v35  ;;  %v7159_v57 = vadd.f32 %v16469_v21, %v7142_v16  ;;  %v16479_v24 = vmul.f32 %v7170_v63, %v14392_v9 }
 0xcc2   : > { %v7048_v62 = vpop.f32.mrf.mxu0  ;;  %v6917_v35 = vadd.f32 %v6916_v27, %v16456_v38 }
 0xcc3   : > { %v7168_v12 = vadd.f32 %v7158_v36, %v16010_v3  ;;  %v7161_v39 = vadd.f32 %v16469_v21, %v7144_v31  ;;  %v7169_v0 = vadd.f32 %v7159_v57, %v16014_v34  ;;  %v7200_v53 = vmul.f32 0.1, %v16479_v24 }
 0xcc4   : > { %vm7190_vm5 = vcmp.ge.f32.partialorder %v16479_v24, 0.0 }
 0xcc5   : > { %v16485_v40 = vmul.f32 %v7168_v12, %v14345_v46  ;;  %v7171_v61 = vadd.f32 %v7161_v39, %v16019_v50  ;;  %v16489_v11 = vmul.f32 %v7169_v0, %v14343_v43  ;;  %v7210_v54 = vsel %vm7190_vm5, %v16479_v24, %v7200_v53  ;;  %v16537_v39 = vld [vmem:[%s18463_s2 + $0x7c] sm:$0xf] }
 0xcc6   : > { %v7022_v17 = vpop.f32.mrf.mxu2  ;;  %v7035_v37 = vpop.f32.mrf.mxu3 }
 0xcc7   : > { %v7198_v10 = vmul.f32 0.1, %v16485_v40  ;;  %v16494_v3 = vmul.f32 %v7171_v61, %v14394_v49  ;;  %vm7188_vm3 = vcmp.ge.f32.partialorder %v16485_v40, 0.0  ;;  %v7199_v34 = vmul.f32 0.1, %v16489_v11 }
 0xcc8   : > { %v7061_v47 = vpop.f32.mrf.mxu1  ;;  %vm7189_vm4 = vcmp.ge.f32.partialorder %v16489_v11, 0.0 }
 0xcc9   : > { %v7201_v50 = vmul.f32 0.1, %v16494_v3  ;;  %v7208_v59 = vsel %vm7188_vm3, %v16485_v40, %v7198_v10  ;;  %vm7191_vm6 = vcmp.ge.f32.partialorder %v16494_v3, 0.0  ;;  %v7209_v18 = vsel %vm7189_vm4, %v16489_v11, %v7199_v34 }
 0xcca   : > { %v7098_v32 = vpop.f32.mrf.mxu0  ;;  %v7218_v42 = vpack.c.bf16 %v7209_v18, %v7208_v59 }
 0xccb   : > { %v7211_v29 = vsel %vm7191_vm6, %v16494_v3, %v7201_v50  ;;  %v7147_v2 = vadd.f32 %v7098_v32, %v6904_v44 }
 0xccc   : > { %v7219_v60 = vpack.c.bf16 %v7211_v29, %v7210_v54  ;;  %v7231_v20 = vunpack.c.h.b16 %v7218_v42  ;;  %v7230_v14 = vunpack.c.l.b16 %v7218_v42 }
 0xccd   : > { %v7164_v52 = vadd.f32 %v16469_v21, %v7147_v2 }
 0xcce   : > { %v7072_v13 = vpop.f32.mrf.mxu2  ;;  %v7232_v45 = vunpack.c.l.b16 %v7219_v60  ;;  %v7233_v8 = vunpack.c.h.b16 %v7219_v60  ;;  %v7085_v22 = vpop.f32.mrf.mxu3  ;;  %v16511_v63 = vpack.c.b16 %v7231_v20, %v7231_v20  ;;  %v16513_v16 = vpack.c.b16 %v7230_v14, %v7230_v14 }
 0xccf   : > { %v7145_v55 = vadd.f32 %v7072_v13, %v6878_v1  ;;  %v7174_v58 = vadd.f32 %v7164_v52, %v16065_v23  ;;  %v7146_v56 = vadd.f32 %v7085_v22, %v6891_v5  ;;  %v6930_v1 = vadd.f32 %v16465_v19, %v16461_v48 }
 0xcd0   : > { %v7111_v41 = vpop.f32.mrf.mxu1  ;;  %v16516_v36 = vpack.c.b16 %v7232_v45, %v7232_v45  ;;  %v16518_v33 = vpack.c.b16 %v7233_v8, %v7233_v8  ;;  %7252 = vrot.lane.b32.xlu1 %v16511_v63, %s13799_s10  ;;  %7250 = vrot.lane.b32.xlu0 %v16513_v16, %s13799_s10  ;;  %v7287_v38 = vsel %vm701_vm10, %v16513_v16, 0  ;;  %v7290_v23 = vsel %vm701_vm10, %v16511_v63, 0 }
 0xcd1   : > { %v7162_v6 = vadd.f32 %v16469_v21, %v7145_v55  ;;  %v7148_v31 = vadd.f32 %v7111_v41, %v6917_v35  ;;  %v7163_v27 = vadd.f32 %v16469_v21, %v7146_v56  ;;  %7323 = vmatpush.bf16.msrb.mxu0 %v7287_v38  ;;  %7336 = vmatpush.bf16.msrb.mxu1 %v7290_v23 }
 0xcd2   : > { %v7293_v57 = vsel %vm701_vm10, %v16516_v36, 0  ;;  %v7296_v12 = vsel %vm701_vm10, %v16518_v33, 0  ;;  %v16540_v62 = vmul.f32 %v7174_v58, %v14343_v43  ;;  %7254 = vrot.lane.b32.xlu2 %v16516_v36, %s13799_s10  ;;  %v7100_v17 = vpop.f32.mrf.mxu0  ;;  %v6943_v5 = vadd.f32 %v16467_v15, %v16463_v26 }
 0xcd3   : > { %v7172_v0 = vadd.f32 %v7162_v6, %v16073_v25  ;;  %v7165_v61 = vadd.f32 %v16469_v21, %v7148_v31  ;;  %7349 = vmatpush.bf16.msrb.mxu2 %v7293_v57  ;;  %v7173_v53 = vadd.f32 %v7163_v27, %v16081_v4  ;;  %7362 = vmatpush.bf16.msrb.mxu3 %v7296_v12 }
 0xcd4   : > { %13083 = vmatmul.msk.bf16.vlgmr.msrb.gmra.mxu0 %vm697_vm11, %v16537_v39  ;;  %13084 = vmatmul.msk.bf16.vlgmr.msrb.gmra.mxu1 %vm697_vm11, %v16537_v39  ;;  %v7204_v4 = vmul.f32 0.1, %v16540_v62  ;;  %vm7194_vm1 = vcmp.ge.f32.partialorder %v16540_v62, 0.0 }
 0xcd5   : > { %v16548_v10 = vmul.f32 %v7172_v0, %v14379_v28  ;;  %v7175_v37 = vadd.f32 %v7165_v61, %v16088_v30  ;;  %v16556_v25 = vmul.f32 %v7173_v53, %v14345_v46 }
 0xcd6   : > { %v7074_v34 = vpop.f32.mrf.mxu2  ;;  %13085 = vmatmul.msk.bf16.vlgmr.msrb.gmra.mxu2 %vm697_vm11, %v16537_v39  ;;  %v7087_v30 = vpop.f32.mrf.mxu3  ;;  %13086 = vmatmul.msk.bf16.vlgmr.msrb.gmra.mxu3 %vm697_vm11, %v16537_v39  ;;  %v7214_v29 = vsel %vm7194_vm1, %v16540_v62, %v7204_v4 }
 0xcd7   : > { %v7202_v47 = vmul.f32 0.1, %v16548_v10  ;;  %v16563_v50 = vmul.f32 %v7175_v37, %v14392_v9  ;;  %vm7192_vm7 = vcmp.ge.f32.partialorder %v16548_v10, 0.0  ;;  %v7203_v59 = vmul.f32 0.1, %v16556_v25 }
 0xcd8   : > { %v7113_v44 = vpop.f32.mrf.mxu1  ;;  %vm7193_vm8 = vcmp.ge.f32.partialorder %v16556_v25, 0.0  ;;  %7256 = vrot.lane.b32.xlu0 %v16518_v33, %s13799_s10 }
 0xcd9   : > { %v7205_v18 = vmul.f32 0.1, %v16563_v50  ;;  %v7212_v32 = vsel %vm7192_vm7, %v16548_v10, %v7202_v47  ;;  %vm7195_vm2 = vcmp.ge.f32.partialorder %v16563_v50, 0.0  ;;  %v7213_v42 = vsel %vm7193_vm8, %v16556_v25, %v7203_v59 }
 0xcda   : > { %v7220_v54 = vpack.c.bf16 %v7213_v42, %v7212_v32 }
 0xcdb   : > { %v7215_v2 = vsel %vm7195_vm2, %v16563_v50, %v7205_v18 }
 0xcdc   : > { %v7221_v60 = vpack.c.bf16 %v7215_v2, %v7214_v29  ;;  %v7235_v20 = vunpack.c.h.b16 %v7220_v54  ;;  %v7234_v14 = vunpack.c.l.b16 %v7220_v54  ;;  %v13081_v54 = vld [vmem:[%s18463_s2 + $0x78] sm:$0xf] }
 0xcde   : > { %v7124_v52 = vpop.f32.mrf.mxu2  ;;  %v7236_v13 = vunpack.c.l.b16 %v7221_v60  ;;  %v7237_v45 = vunpack.c.h.b16 %v7221_v60  ;;  %v7137_v35 = vpop.f32.mrf.mxu3  ;;  %v7245_v55 = vpack.c.b16 %v7235_v20, %v7235_v20  ;;  %v7244_v22 = vpack.c.b16 %v7234_v14, %v7234_v14 }
 0xcdf   : > { %v7149_v8 = vadd.f32 %v7124_v52, %v6930_v1  ;;  %v7150_v58 = vadd.f32 %v7137_v35, %v6943_v5 }
 0xce0   : > { %v7246_v56 = vpack.c.b16 %v7236_v13, %v7236_v13  ;;  %v7247_v41 = vpack.c.b16 %v7237_v45, %v7237_v45  ;;  %7260 = vrot.lane.b32.xlu2 %v7245_v55, %s13799_s10  ;;  %7258 = vrot.lane.b32.xlu1 %v7244_v22, %s13799_s10  ;;  %v7299_v48 = vsel %vm701_vm10, %v7244_v22, 0  ;;  %v7302_v26 = vsel %vm701_vm10, %v7245_v55, 0 }
 0xce1   : > { %v7166_v6 = vadd.f32 %v16469_v21, %v7149_v8  ;;  %v7167_v19 = vadd.f32 %v16469_v21, %v7150_v58  ;;  %7375 = vmatpush.bf16.msra.mxu0 %v7299_v48  ;;  %7388 = vmatpush.bf16.msra.mxu1 %v7302_v26 }
 0xce2   : > { %v7305_v15 = vsel %vm701_vm10, %v7246_v56, 0  ;;  %v7308_v31 = vsel %vm701_vm10, %v7247_v41, 0  ;;  %7262 = vrot.lane.b32.xlu0 %v7246_v56, %s13799_s10 }
 0xce3   : > { %v7176_v38 = vadd.f32 %v7166_v6, %v16120_v51  ;;  %7401 = vmatpush.bf16.msra.mxu2 %v7305_v15  ;;  %v7177_v23 = vadd.f32 %v7167_v19, %v16127_v7  ;;  %7414 = vmatpush.bf16.msra.mxu3 %v7308_v31 }
 0xce4   : > { %13087 = vmatmul.msk.bf16.vlgmr.msra.gmra.mxu0 %vm697_vm11, %v16537_v39  ;;  %13088 = vmatmul.msk.bf16.vlgmr.msra.gmra.mxu1 %vm697_vm11, %v16537_v39 }
 0xce5   : > { %v16595_v27 = vmul.f32 %v7176_v38, %v14394_v49  ;;  %v16602_v21 = vmul.f32 %v7177_v23, %v14379_v28 }
 0xce6   : > { %v7126_v57 = vpop.f32.mrf.mxu2  ;;  %13089 = vmatmul.msk.bf16.vlgmr.msra.gmra.mxu2 %vm697_vm11, %v16537_v39  ;;  %v7139_v7 = vpop.f32.mrf.mxu3  ;;  %13090 = vmatmul.msk.bf16.vlgmr.msra.gmra.mxu3 %vm697_vm11, %v16537_v39 }
 0xce7   : > { %v7206_v51 = vmul.f32 0.1, %v16595_v27  ;;  %vm7196_vm3 = vcmp.ge.f32.partialorder %v16595_v27, 0.0  ;;  %v7207_v12 = vmul.f32 0.1, %v16602_v21  ;;  %vm7197_vm4 = vcmp.ge.f32.partialorder %v16602_v21, 0.0 }
 0xce8   : > { %7264 = vrot.lane.b32.xlu1 %v7247_v41, %s13799_s10 }
 0xce9   : > { %v7216_v0 = vsel %vm7196_vm3, %v16595_v27, %v7206_v51  ;;  %v7217_v61 = vsel %vm7197_vm4, %v16602_v21, %v7207_v12  ;;  %v13103_v51 = vld [vmem:[%s18463_s2 + $0x80] sm:$0xf] }
 0xcea   : > { %v7222_v17 = vpack.c.bf16 %v7217_v61, %v7216_v0 }
 0xcec   : > { %v7238_v53 = vunpack.c.l.b16 %v7222_v17  ;;  %v7239_v37 = vunpack.c.h.b16 %v7222_v17 }
 0xcee   : > { %v7248_v34 = vpack.c.b16 %v7238_v53, %v7238_v53  ;;  %v7249_v4 = vpack.c.b16 %v7239_v37, %v7239_v37 }
 0xcf0   : > { %7266 = vrot.lane.b32.xlu2 %v7248_v34, %s13799_s10  ;;  %7610 = vrot.lane.b32.xlu1 %v16513_v16, %s13800_s12  ;;  %v7311_v47 = vsel %vm701_vm10, %v7248_v34, 0  ;;  %v7314_v30 = vsel %vm701_vm10, %v7249_v4, 0 }
 0xcf1   : > { %7268 = vrot.lane.b32.xlu0 %v7249_v4, %s13799_s10  ;;  %7427 = vmatpush.bf16.msrb.mxu0 %v7311_v47 }
 0xcf2   : > { %7440 = vmatpush.bf16.msrb.mxu1 %v7314_v30 }
 0xcf4   : > { %13091 = vmatmul.msk.bf16.vlgmr.msrb.gmra.mxu0 %vm697_vm11, %v16537_v39 }
 0xcf5   : > { %13092 = vmatmul.msk.bf16.vlgmr.msrb.gmra.mxu1 %vm697_vm11, %v16537_v39 }
 0xcf8   : > { %7612 = vrot.lane.b32.xlu2 %v16511_v63, %s13800_s12  ;;  %7616 = vrot.lane.b32.xlu1 %v16518_v33, %s13800_s12  ;;  %v13114_v63 = vld [vmem:[%s18464_s3 + $0x50] sm:$0xff] }
 0xcf9   : > { %7614 = vrot.lane.b32.xlu0 %v16516_v36, %s13800_s12 }
 0xd00   : > { %7618 = vrot.lane.b32.xlu2 %v7244_v22, %s13800_s12  ;;  %7622 = vrot.lane.b32.xlu1 %v7246_v56, %s13800_s12 }
 0xd01   : > { %7620 = vrot.lane.b32.xlu0 %v7245_v55, %s13800_s12 }
 0xd08   : > { %7624 = vrot.lane.b32.xlu2 %v7247_v41, %s13800_s12  ;;  %7628 = vrot.lane.b32.xlu1 %v7249_v4, %s13800_s12 }
 0xd09   : > { %7626 = vrot.lane.b32.xlu0 %v7248_v34, %s13800_s12 }
 0xd10   : > { %7817 = vperm.xlu2 %13571, %v13114_v63  }
 0xd2c   : > { %v7255_v16 = vpop.permute.xlu2 %7254 }
 0xd3a   : > { %v7261_v29 = vpop.permute.xlu2 %7260 }
 0xd42   : > { %v7253_v33 = vpop.permute.xlu1 %7252  ;;  %v7251_v36 = vpop.permute.xlu0 %7250 }
 0xd43   : > { %v7271_v39 = vsel %vm3324_vm15, %v7253_v33, %v7255_v16  ;;  %v7270_v59 = vsel %vm3324_vm15, %v7251_v36, %v7253_v33  ;;  %v7280_v44 = vsel %vm3324_vm15, 0, %v7251_v36 }
 0xd44   : > { %v7449_v18 = vsel %vm701_vm10, %v7280_v44, 0  ;;  %v7452_v32 = vsel %vm701_vm10, %v7270_v59, 0  ;;  %v7455_v42 = vsel %vm701_vm10, %v7271_v39, 0 }
 0xd45   : > { %7485 = vmatpush.bf16.msrb.mxu2 %v7449_v18  ;;  %7498 = vmatpush.bf16.msrb.mxu3 %v7452_v32 }
 0xd46   : > { %7511 = vmatpush.bf16.msra.mxu0 %v7455_v42 }
 0xd48   : > { %13093 = vmatmul.msk.bf16.vlgmr.msrb.gmra.mxu2 %vm697_vm11, %v13081_v54  ;;  %13094 = vmatmul.msk.bf16.vlgmr.msrb.gmra.mxu3 %vm697_vm11, %v13081_v54 }
 0xd49   : > { %13095 = vmatmul.msk.bf16.vlgmr.msra.gmra.mxu0 %vm697_vm11, %v13081_v54 }
 0xd4a   : > { %v7257_v2 = vpop.permute.xlu0 %7256  ;;  %v7267_v20 = vpop.permute.xlu2 %7266 }
 0xd4b   : > { %v7272_v60 = vsel %vm3324_vm15, %v7255_v16, %v7257_v2 }
 0xd4c   : > { %v7458_v1 = vsel %vm701_vm10, %v7272_v60, 0 }
 0xd4d   : > { %7524 = vmatpush.bf16.msra.mxu1 %v7458_v1 }
 0xd50   : > { %13096 = vmatmul.msk.bf16.vlgmr.msra.gmra.mxu1 %vm697_vm11, %v13081_v54 }
 0xd51   : > { %v16686_v47 = vpop.f32.mrf.mxu0  ;;  %v16688_v30 = vpop.f32.mrf.mxu1 }
 0xd52   : > { %v7259_v14 = vpop.permute.xlu1 %7258  ;;  %v7613_v41 = vpop.permute.xlu2 %7612 }
 0xd53   : > { %v7273_v5 = vsel %vm3324_vm15, %v7257_v2, %v7259_v14  ;;  %v7274_v52 = vsel %vm3324_vm15, %v7259_v14, %v7261_v29 }
 0xd54   : > { %v7263_v13 = vpop.permute.xlu0 %7262  ;;  %v7461_v45 = vsel %vm701_vm10, %v7273_v5, 0  ;;  %v7464_v8 = vsel %vm701_vm10, %v7274_v52, 0 }
 0xd55   : > { %v7275_v35 = vsel %vm3324_vm15, %v7261_v29, %v7263_v13  ;;  %7537 = vmatpush.bf16.msra.mxu2 %v7461_v45  ;;  %7550 = vmatpush.bf16.msra.mxu3 %v7464_v8 }
 0xd56   : > { %v7467_v55 = vsel %vm701_vm10, %v7275_v35, 0 }
 0xd57   : > { %7563 = vmatpush.bf16.msrb.mxu0 %v7467_v55 }
 0xd58   : > { %13097 = vmatmul.msk.bf16.vlgmr.msra.gmra.mxu2 %vm697_vm11, %v13081_v54  ;;  %13098 = vmatmul.msk.bf16.vlgmr.msra.gmra.mxu3 %vm697_vm11, %v13081_v54 }
 0xd59   : > { %v16690_v16 = vpop.f32.mrf.mxu2  ;;  %v16693_v39 = vpop.f32.mrf.mxu3 }
 0xd5a   : > { %v7265_v22 = vpop.permute.xlu1 %7264  ;;  %13099 = vmatmul.msk.bf16.vlgmr.msrb.gmra.mxu0 %vm697_vm11, %v13081_v54  ;;  %v7619_v57 = vpop.permute.xlu2 %7618 }
 0xd5b   : > { %v7276_v58 = vsel %vm3324_vm15, %v7263_v13, %v7265_v22  ;;  %v7277_v56 = vsel %vm3324_vm15, %v7265_v22, %v7267_v20  ;;  %v7340_v29 = vpop.f32.mrf.mxu1 }
 0xd5c   : > { %v7470_v6 = vsel %vm701_vm10, %v7276_v58, 0  ;;  %v7473_v48 = vsel %vm701_vm10, %v7277_v56, 0 }
 0xd5d   : > { %7576 = vmatpush.bf16.msrb.mxu1 %v7470_v6  ;;  %7589 = vmatpush.bf16.msrb.mxu2 %v7473_v48 }
 0xd60   : > { %13100 = vmatmul.msk.bf16.vlgmr.msrb.gmra.mxu1 %vm697_vm11, %v13081_v54 }
 0xd61   : > { %v7353_v60 = vpop.f32.mrf.mxu2  ;;  %v7366_v14 = vpop.f32.mrf.mxu3 }
 0xd62   : > { %v7611_v26 = vpop.permute.xlu1 %7610  ;;  %v7625_v4 = vpop.permute.xlu2 %7624 }
 0xd63   : > { %v7630_v19 = vsel %vm3686_vm0, %v7611_v26, %v7613_v41  ;;  %v7269_v15 = vpop.permute.xlu0 %7268  ;;  %v16710_v55 = vpop.f32.mrf.mxu1 }
 0xd64   : > { %v7645_v31 = vsel %vm701_vm10, %v7630_v19, 0  ;;  %v7278_v38 = vsel %vm3324_vm15, %v7267_v20, %v7269_v15 }
 0xd65   : > { %v7476_v23 = vsel %vm701_vm10, %v7278_v38, 0  ;;  %7680 = vmatpush.bf16.msra.mxu0 %v7645_v31 }
 0xd66   : > { %7602 = vmatpush.bf16.msrb.mxu3 %v7476_v23 }
 0xd68   : > { %13101 = vmatmul.msk.bf16.vlgmr.msrb.gmra.mxu2 %vm697_vm11, %v13081_v54 }
 0xd69   : > { %13102 = vmatmul.msk.bf16.vlgmr.msrb.gmra.mxu3 %vm697_vm11, %v13081_v54  ;;  %v7327_v54 = vpop.f32.mrf.mxu0  ;;  %v16712_v22 = vpop.f32.mrf.mxu2 }
 0xd6a   : > { %v7617_v7 = vpop.permute.xlu1 %7616  ;;  %13104 = vmatmul.msk.bf16.vlgmr.msra.gmra.mxu0 %vm697_vm11, %v13103_v51  ;;  %v16714_v58 = vpop.f32.mrf.mxu3 }
 0xd6b   : > { %v7633_v12 = vsel %vm3686_vm0, %v7617_v7, %v7619_v57  ;;  %v7615_v0 = vpop.permute.xlu0 %7614 }
 0xd6c   : > { %v7631_v61 = vsel %vm3686_vm0, %v7613_v41, %v7615_v0  ;;  %v7632_v17 = vsel %vm3686_vm0, %v7615_v0, %v7617_v7  ;;  %v7654_v53 = vsel %vm701_vm10, %v7633_v12, 0  ;;  %v7392_v41 = vpop.f32.mrf.mxu1 }
 0xd6d   : > { %v7648_v37 = vsel %vm701_vm10, %v7631_v61, 0  ;;  %v7651_v34 = vsel %vm701_vm10, %v7632_v17, 0  ;;  %7719 = vmatpush.bf16.msra.mxu3 %v7654_v53 }
 0xd6e   : > { %7693 = vmatpush.bf16.msra.mxu1 %v7648_v37  ;;  %7706 = vmatpush.bf16.msra.mxu2 %v7651_v34 }
 0xd71   : > { %13105 = vmatmul.msk.bf16.vlgmr.msra.gmra.mxu1 %vm697_vm11, %v13103_v51  ;;  %v7377_v35 = vpop.f32.mrf.mxu0  ;;  %v7405_v6 = vpop.f32.mrf.mxu2 }
 0xd72   : > { %v7623_v63 = vpop.permute.xlu1 %7622  ;;  %v7418_v48 = vpop.f32.mrf.mxu3 }
 0xd73   : > { %v7636_v33 = vsel %vm3686_vm0, %v7623_v63, %v7625_v4  ;;  %v7621_v36 = vpop.permute.xlu0 %7620 }
 0xd74   : > { %v7634_v59 = vsel %vm3686_vm0, %v7619_v57, %v7621_v36  ;;  %v7635_v44 = vsel %vm3686_vm0, %v7621_v36, %v7623_v63  ;;  %v7663_v18 = vsel %vm701_vm10, %v7636_v33, 0  ;;  %v16722_v19 = vpop.f32.mrf.mxu1 }
 0xd75   : > { %v7657_v32 = vsel %vm701_vm10, %v7634_v59, 0  ;;  %v7660_v42 = vsel %vm701_vm10, %v7635_v44, 0  ;;  %7758 = vmatpush.bf16.msrb.mxu2 %v7663_v18 }
 0xd76   : > { %7732 = vmatpush.bf16.msrb.mxu0 %v7657_v32  ;;  %7745 = vmatpush.bf16.msrb.mxu1 %v7660_v42  ;;  %v16729_v32 = vpop.permute.xlu2 %7817 }
 0xd78   : > { %13106 = vmatmul.msk.bf16.vlgmr.msra.gmra.mxu2 %vm697_vm11, %v13103_v51 }
 0xd79   : > { %13107 = vmatmul.msk.bf16.vlgmr.msra.gmra.mxu3 %vm697_vm11, %v13103_v51  ;;  %v7379_v56 = vpop.f32.mrf.mxu0 }
 0xd7a   : > { %v7629_v2 = vpop.permute.xlu1 %7628  ;;  %13108 = vmatmul.msk.bf16.vlgmr.msrb.gmra.mxu0 %vm697_vm11, %v13103_v51 }
 0xd7b   : > { %v7640_v1 = vsel %vm3686_vm0, %v7629_v2, 0  ;;  %v7627_v20 = vpop.permute.xlu0 %7626 }
 0xd7c   : > { %v7637_v5 = vsel %vm3686_vm0, %v7625_v4, %v7627_v20  ;;  %v7638_v52 = vsel %vm3686_vm0, %v7627_v20, %v7629_v2  ;;  %v7671_v13 = vsel %vm701_vm10, %v7640_v1, 0  ;;  %v7444_v31 = vpop.f32.mrf.mxu1 }
 0xd7d   : > { %v7666_v45 = vsel %vm701_vm10, %v7637_v5, 0  ;;  %v7669_v8 = vsel %vm701_vm10, %v7638_v52, 0  ;;  %7797 = vmatpush.bf16.msra.mxu1 %v7671_v13 }
 0xd7e   : > { %7771 = vmatpush.bf16.msrb.mxu3 %v7666_v45  ;;  %7784 = vmatpush.bf16.msra.mxu0 %v7669_v8 }
 0xd81   : > { %13109 = vmatmul.msk.bf16.vlgmr.msrb.gmra.mxu1 %vm697_vm11, %v13103_v51  ;;  %v16720_v26 = vpop.f32.mrf.mxu0 }
 0xd88   : > { %13110 = vmatmul.msk.bf16.vlgmr.msrb.gmra.mxu2 %vm697_vm11, %v13103_v51 }
 0xd89   : > { %13111 = vmatmul.msk.bf16.vlgmr.msrb.gmra.mxu3 %vm697_vm11, %v13103_v51  ;;  %v7431_v15 = vpop.f32.mrf.mxu0 }
 0xd8a   : > { %13112 = vmatmul.msk.bf16.vlgmr.msra.gmra.mxu0 %vm697_vm11, %v13103_v51 }
 0xd91   : > { %13113 = vmatmul.msk.bf16.vlgmr.msra.gmra.mxu1 %vm697_vm11, %v13103_v51 }
 0xdc6   : > { %v7513_v38 = vpop.f32.mrf.mxu0 }
 0xdcb   : > { %v7487_v23 = vpop.f32.mrf.mxu2  ;;  %v7500_v57 = vpop.f32.mrf.mxu3 }
 0xdcc   : > { %v7488_v59 = vadd.f32 %v7487_v23, %v16686_v47  ;;  %v7501_v2 = vadd.f32 %v7500_v57, %v16688_v30  ;;  %v7514_v23 = vadd.f32 %v7513_v38, %v16690_v16 }
 0xdcd   : > { %v7526_v7 = vpop.f32.mrf.mxu1 }
 0xdce   : > { %v7515_v12 = vpop.f32.mrf.mxu0 }
 0xdd3   : > { %v7489_v0 = vpop.f32.mrf.mxu2  ;;  %v7502_v61 = vpop.f32.mrf.mxu3 }
 0xdd4   : > { %v7527_v61 = vadd.f32 %v7526_v7, %v16693_v39 }
 0xdd5   : > { %v7528_v17 = vpop.f32.mrf.mxu1 }
 0xdd7   : > { %v16724_v53 = vpop.f32.mrf.mxu0 }
 0xddb   : > { %v7539_v37 = vpop.f32.mrf.mxu2  ;;  %v7552_v34 = vpop.f32.mrf.mxu3 }
 0xddc   : > { %v7540_v56 = vadd.f32 %v7539_v37, %v7377_v35  ;;  %v7553_v37 = vadd.f32 %v7552_v34, %v16710_v55 }
 0xddd   : > { %v16726_v4 = vpop.f32.mrf.mxu1 }
 0xddf   : > { %v7567_v51 = vpop.f32.mrf.mxu0 }
 0xde3   : > { %v7541_v63 = vpop.f32.mrf.mxu2  ;;  %v7554_v33 = vpop.f32.mrf.mxu3 }
 0xde5   : > { %v7580_v36 = vpop.f32.mrf.mxu1 }
 0xde7   : > { %v7682_v44 = vpop.f32.mrf.mxu0 }
 0xde8   : > { %v7803_v18 = vadd.f32 %v7682_v44, %v7488_v59 }
 0xdea   : > { %v7820_v42 = vadd.f32 %v16729_v32, %v7803_v18  ;;  %v16761_v18 = vld [vmem:[%s18463_s2 + $0x88] sm:$0xf] }
 0xdeb   : > { %v16732_v54 = vpop.f32.mrf.mxu2 }
 0xdec   : > { %v16734_v29 = vpop.f32.mrf.mxu3  ;;  %v7840_v1 = vmul.f32 0.1, %v7820_v42  ;;  %vm7830_vm5 = vcmp.ge.f32.partialorder %v7820_v42, 0.0 }
 0xdee   : > { %v7695_v60 = vpop.f32.mrf.mxu1  ;;  %v7850_v47 = vsel %vm7830_vm5, %v7820_v42, %v7840_v1 }
 0xdef   : > { %v7804_v20 = vadd.f32 %v7695_v60, %v7501_v2  ;;  %v7684_v14 = vpop.f32.mrf.mxu0  ;;  %v7860_v41 = vmul.f32 %v7850_v47, %v14345_v46 }
 0xdf1   : > { %v7821_v5 = vadd.f32 %v16729_v32, %v7804_v20 }
 0xdf3   : > { %vm7831_vm6 = vcmp.ge.f32.partialorder %v7821_v5, 0.0  ;;  %v7841_v52 = vmul.f32 0.1, %v7821_v5  ;;  %v7593_v13 = vpop.f32.mrf.mxu2 }
 0xdf4   : > { %v7606_v45 = vpop.f32.mrf.mxu3 }
 0xdf5   : > { %v7851_v8 = vsel %vm7831_vm6, %v7821_v5, %v7841_v52 }
 0xdf6   : > { %v7861_v6 = vmul.f32 %v7851_v8, %v14343_v43  ;;  %v7697_v48 = vpop.f32.mrf.mxu1 }
 0xdf7   : > { %v7734_v30 = vpop.f32.mrf.mxu0 }
 0xdf8   : > { %v7807_v15 = vadd.f32 %v7734_v30, %v7540_v56  ;;  %v7870_v31 = vpack.c.bf16 %v7861_v6, %v7860_v41  ;;  %v7592_v56 = vadd.f32 %v16732_v54, %v16720_v26  ;;  %v7579_v54 = vadd.f32 %v16726_v4, %v16714_v58 }
 0xdfa   : > { %v7824_v57 = vadd.f32 %v16729_v32, %v7807_v15  ;;  %v7883_v12 = vunpack.c.h.b16 %v7870_v31  ;;  %v7882_v0 = vunpack.c.l.b16 %v7870_v31 }
 0xdfb   : > { %v7708_v17 = vpop.f32.mrf.mxu2 }
 0xdfc   : > { %v7805_v51 = vadd.f32 %v7708_v17, %v7514_v23  ;;  %v7721_v63 = vpop.f32.mrf.mxu3  ;;  %v16743_v35 = vpack.c.b16 %v7883_v12, %v7883_v12  ;;  %v16746_v36 = vpack.c.b16 %v7882_v0, %v7882_v0  ;;  %v7844_v59 = vmul.f32 0.1, %v7824_v57 }
 0xdfd   : > { %v7806_v33 = vadd.f32 %v7721_v63, %v7527_v61  ;;  %vm7834_vm7 = vcmp.ge.f32.partialorder %v7824_v57, 0.0  ;;  %v7566_v0 = vadd.f32 %v16724_v53, %v16712_v22 }
 0xdfe   : > { %v7822_v44 = vadd.f32 %v16729_v32, %v7805_v51  ;;  %v7747_v16 = vpop.f32.mrf.mxu1  ;;  %7904 = vrot.lane.b32.xlu1 %v16743_v35, %s13793_s11  ;;  %v7942_v39 = vsel %vm701_vm10, %v16743_v35, 0  ;;  %7902 = vrot.lane.b32.xlu0 %v16746_v36, %s13793_s11  ;;  %v7939_v55 = vsel %vm701_vm10, %v16746_v36, 0  ;;  %v7854_v1 = vsel %vm7834_vm7, %v7824_v57, %v7844_v59 }
 0xdff   : > { %v7823_v38 = vadd.f32 %v16729_v32, %v7806_v33  ;;  %v7808_v7 = vadd.f32 %v7747_v16, %v7553_v37  ;;  %7988 = vmatpush.bf16.msra.mxu3 %v7942_v39  ;;  %v7736_v34 = vpop.f32.mrf.mxu0  ;;  %7975 = vmatpush.bf16.msra.mxu2 %v7939_v55  ;;  %v7864_v41 = vmul.f32 %v7854_v1, %v14379_v28 }
 0xe00   : > { %vm7832_vm8 = vcmp.ge.f32.partialorder %v7822_v44, 0.0  ;;  %v7842_v42 = vmul.f32 0.1, %v7822_v44  ;;  %v7605_v33 = vadd.f32 %v16734_v29, %v16722_v19 }
 0xe01   : > { %vm7833_vm1 = vcmp.ge.f32.partialorder %v7823_v38, 0.0  ;;  %v7843_v2 = vmul.f32 0.1, %v7823_v38  ;;  %v7825_v60 = vadd.f32 %v16729_v32, %v7808_v7 }
 0xe02   : > { %v7852_v20 = vsel %vm7832_vm8, %v7822_v44, %v7842_v42  ;;  %13118 = vmatmul.msk.bf16.vlgmr.msra.gmra.mxu3 %vm697_vm11, %v16761_v18  ;;  %13117 = vmatmul.msk.bf16.vlgmr.msra.gmra.mxu2 %vm697_vm11, %v16761_v18 }
 0xe03   : > { %v7862_v14 = vmul.f32 %v7852_v20, %v14392_v9  ;;  %v7853_v5 = vsel %vm7833_vm1, %v7823_v38, %v7843_v2  ;;  %vm7835_vm2 = vcmp.ge.f32.partialorder %v7825_v60, 0.0  ;;  %v7845_v47 = vmul.f32 0.1, %v7825_v60  ;;  %v7710_v52 = vpop.f32.mrf.mxu2 }
 0xe04   : > { %v7863_v13 = vmul.f32 %v7853_v5, %v14394_v49  ;;  %v7723_v45 = vpop.f32.mrf.mxu3 }
 0xe05   : > { %v7855_v8 = vsel %vm7835_vm2, %v7825_v60, %v7845_v47 }
 0xe06   : > { %v7865_v6 = vmul.f32 %v7855_v8, %v14345_v46  ;;  %v7749_v48 = vpop.f32.mrf.mxu1  ;;  %v7871_v30 = vpack.c.bf16 %v7863_v13, %v7862_v14 }
 0xe07   : > { %v7786_v15 = vpop.f32.mrf.mxu0 }
 0xe08   : > { %v7811_v31 = vadd.f32 %v7786_v15, %v7592_v56  ;;  %v7885_v23 = vunpack.c.h.b16 %v7871_v30  ;;  %v7884_v57 = vunpack.c.l.b16 %v7871_v30  ;;  %v7872_v12 = vpack.c.bf16 %v7865_v6, %v7864_v41 }
 0xe0a   : > { %v7828_v61 = vadd.f32 %v16729_v32, %v7811_v31  ;;  %v16777_v17 = vpack.c.b16 %v7885_v23, %v7885_v23  ;;  %v16779_v51 = vpack.c.b16 %v7884_v57, %v7884_v57  ;;  %v7886_v26 = vunpack.c.l.b16 %v7872_v12 }
 0xe0b   : > { %v7760_v63 = vpop.f32.mrf.mxu2  ;;  %v7887_v37 = vunpack.c.h.b16 %v7872_v12 }
 0xe0c   : > { %v7809_v59 = vadd.f32 %v7760_v63, %v7566_v0  ;;  %v7773_v44 = vpop.f32.mrf.mxu3  ;;  %7908 = vrot.lane.b32.xlu0 %v16777_v17, %s13793_s11  ;;  %7906 = vrot.lane.b32.xlu2 %v16779_v51, %s13793_s11  ;;  %v7945_v22 = vsel %vm701_vm10, %v16779_v51, 0  ;;  %v7948_v58 = vsel %vm701_vm10, %v16777_v17, 0  ;;  %v16793_v4 = vpack.c.b16 %v7886_v26, %v7886_v26 }
 0xe0d   : > { %v7810_v53 = vadd.f32 %v7773_v44, %v7579_v54  ;;  %8001 = vmatpush.bf16.msrb.mxu0 %v7945_v22  ;;  %v16795_v16 = vpack.c.b16 %v7887_v37, %v7887_v37  ;;  %v7848_v19 = vmul.f32 0.1, %v7828_v61  ;;  %8014 = vmatpush.bf16.msrb.mxu1 %v7948_v58  ;;  %vm7838_vm3 = vcmp.ge.f32.partialorder %v7828_v61, 0.0 }
 0xe0e   : > { %v7826_v29 = vadd.f32 %v16729_v32, %v7809_v59  ;;  %v7799_v39 = vpop.f32.mrf.mxu1  ;;  %7910 = vrot.lane.b32.xlu1 %v16793_v4, %s13793_s11  ;;  %v7951_v55 = vsel %vm701_vm10, %v16793_v4, 0 }
 0xe0f   : > { %v7827_v38 = vadd.f32 %v16729_v32, %v7810_v53  ;;  %v7812_v7 = vadd.f32 %v7799_v39, %v7605_v33  ;;  %v7788_v34 = vpop.f32.mrf.mxu0  ;;  %8027 = vmatpush.bf16.msrb.mxu2 %v7951_v55  ;;  %v7954_v2 = vsel %vm701_vm10, %v16795_v16, 0  ;;  %v7858_v20 = vsel %vm7838_vm3, %v7828_v61, %v7848_v19 }
 0xe10   : > { %vm7836_vm4 = vcmp.ge.f32.partialorder %v7826_v29, 0.0  ;;  %v7846_v42 = vmul.f32 0.1, %v7826_v29  ;;  %13119 = vmatmul.msk.bf16.vlgmr.msrb.gmra.mxu0 %vm697_vm11, %v16761_v18  ;;  %8040 = vmatpush.bf16.msrb.mxu3 %v7954_v2  ;;  %v7868_v56 = vmul.f32 %v7858_v20, %v14394_v49 }
 0xe11   : > { %vm7837_vm5 = vcmp.ge.f32.partialorder %v7827_v38, 0.0  ;;  %v7847_v60 = vmul.f32 0.1, %v7827_v38  ;;  %v7829_v1 = vadd.f32 %v16729_v32, %v7812_v7  ;;  %13120 = vmatmul.msk.bf16.vlgmr.msrb.gmra.mxu1 %vm697_vm11, %v16761_v18 }
 0xe12   : > { %v7856_v14 = vsel %vm7836_vm4, %v7826_v29, %v7846_v42  ;;  %13121 = vmatmul.msk.bf16.vlgmr.msrb.gmra.mxu2 %vm697_vm11, %v16761_v18 }
 0xe13   : > { %v7866_v5 = vmul.f32 %v7856_v14, %v14343_v43  ;;  %v7857_v47 = vsel %vm7837_vm5, %v7827_v38, %v7847_v60  ;;  %vm7839_vm6 = vcmp.ge.f32.partialorder %v7829_v1, 0.0  ;;  %v7849_v52 = vmul.f32 0.1, %v7829_v1  ;;  %v7762_v13 = vpop.f32.mrf.mxu2  ;;  %13122 = vmatmul.msk.bf16.vlgmr.msrb.gmra.mxu3 %vm697_vm11, %v16761_v18 }
 0xe14   : > { %v7867_v45 = vmul.f32 %v7857_v47, %v14392_v9  ;;  %v7775_v8 = vpop.f32.mrf.mxu3  ;;  %7912 = vrot.lane.b32.xlu2 %v16795_v16, %s13793_s11 }
 0xe15   : > { %v7859_v32 = vsel %vm7839_vm6, %v7829_v1, %v7849_v52 }
 0xe16   : > { %v7869_v41 = vmul.f32 %v7859_v32, %v14379_v28  ;;  %v7801_v6 = vpop.f32.mrf.mxu1  ;;  %v7873_v48 = vpack.c.bf16 %v7867_v45, %v7866_v5 }
 0xe18   : > { %v7889_v30 = vunpack.c.h.b16 %v7873_v48  ;;  %v7888_v15 = vunpack.c.l.b16 %v7873_v48  ;;  %v7874_v31 = vpack.c.bf16 %v7869_v41, %v7868_v56 }
 0xe1a   : > { %v7899_v23 = vpack.c.b16 %v7889_v30, %v7889_v30  ;;  %v7898_v57 = vpack.c.b16 %v7888_v15, %v7888_v15  ;;  %v7890_v12 = vunpack.c.l.b16 %v7874_v31  ;;  %v7891_v0 = vunpack.c.h.b16 %v7874_v31 }
 0xe1c   : > { %7916 = vrot.lane.b32.xlu1 %v7899_v23, %s13793_s11  ;;  %7914 = vrot.lane.b32.xlu0 %v7898_v57, %s13793_s11  ;;  %v7957_v61 = vsel %vm701_vm10, %v7898_v57, 0  ;;  %v7960_v26 = vsel %vm701_vm10, %v7899_v23, 0  ;;  %v7900_v54 = vpack.c.b16 %v7890_v12, %v7890_v12  ;;  %v7901_v63 = vpack.c.b16 %v7891_v0, %v7891_v0 }
 0xe1d   : > { %8053 = vmatpush.bf16.msra.mxu0 %v7957_v61  ;;  %8066 = vmatpush.bf16.msra.mxu1 %v7960_v26 }
 0xe1e   : > { %7918 = vrot.lane.b32.xlu2 %v7900_v54, %s13793_s11  ;;  %v7963_v37 = vsel %vm701_vm10, %v7900_v54, 0  ;;  %v7966_v33 = vsel %vm701_vm10, %v7901_v63, 0 }
 0xe1f   : > { %8079 = vmatpush.bf16.msra.mxu2 %v7963_v37  ;;  %8092 = vmatpush.bf16.msra.mxu3 %v7966_v33 }
 0xe20   : > { %13123 = vmatmul.msk.bf16.vlgmr.msra.gmra.mxu0 %vm697_vm11, %v16761_v18 }
 0xe21   : > { %13124 = vmatmul.msk.bf16.vlgmr.msra.gmra.mxu1 %vm697_vm11, %v16761_v18 }
 0xe22   : > { %13125 = vmatmul.msk.bf16.vlgmr.msra.gmra.mxu2 %vm697_vm11, %v16761_v18 }
 0xe23   : > { %13126 = vmatmul.msk.bf16.vlgmr.msra.gmra.mxu3 %vm697_vm11, %v16761_v18 }
 0xe24   : > { %8262 = vrot.lane.b32.xlu1 %v16746_v36, %s13794_s28  ;;  %7920 = vrot.lane.b32.xlu0 %v7901_v63, %s13793_s11 }
 0xe26   : > { %8264 = vrot.lane.b32.xlu2 %v16743_v35, %s13794_s28  ;;  %v13148_v35 = vld [vmem:[%s18464_s3 + $0x58] sm:$0xff] }
 0xe2c   : > { %8268 = vrot.lane.b32.xlu1 %v16777_v17, %s13794_s28  ;;  %8266 = vrot.lane.b32.xlu0 %v16779_v51, %s13794_s28 }
 0xe2e   : > { %8270 = vrot.lane.b32.xlu2 %v16793_v4, %s13794_s28  ;;  %v13115_v4 = vld [vmem:[%s18463_s2 + $0x84] sm:$0xf] }
 0xe34   : > { %8274 = vrot.lane.b32.xlu1 %v7898_v57, %s13794_s28  ;;  %8272 = vrot.lane.b32.xlu0 %v16795_v16, %s13794_s28 }
 0xe36   : > { %8276 = vrot.lane.b32.xlu2 %v7899_v23, %s13794_s28 }
 0xe3c   : > { %8280 = vrot.lane.b32.xlu1 %v7901_v63, %s13794_s28  ;;  %8278 = vrot.lane.b32.xlu0 %v7900_v54, %s13794_s28  ;;  %v13137_v54 = vld [vmem:[%s18463_s2 + $0x8c] sm:$0xf] }
 0xe3e   : > { %8469 = vperm.xlu2 %13571, %v13148_v35  }
 0xe66   : > { %v7907_v36 = vpop.permute.xlu2 %7906 }
 0xe6e   : > { %v7913_v16 = vpop.permute.xlu2 %7912 }
 0xe70   : > { %v7905_v18 = vpop.permute.xlu1 %7904  ;;  %v7903_v51 = vpop.permute.xlu0 %7902 }
 0xe71   : > { %v7923_v17 = vsel %vm681_vm12, %v7905_v18, %v7907_v36  ;;  %v7922_v59 = vsel %vm681_vm12, %v7903_v51, %v7905_v18  ;;  %v7932_v44 = vsel %vm681_vm12, 0, %v7903_v51 }
 0xe72   : > { %v8107_v22 = vsel %vm701_vm10, %v7923_v17, 0  ;;  %v8101_v53 = vsel %vm701_vm10, %v7932_v44, 0  ;;  %v8104_v58 = vsel %vm701_vm10, %v7922_v59, 0 }
 0xe73   : > { %8163 = vmatpush.bf16.msrb.mxu2 %v8107_v22  ;;  %8137 = vmatpush.bf16.msrb.mxu0 %v8101_v53 }
 0xe74   : > { %8150 = vmatpush.bf16.msrb.mxu1 %v8104_v58 }
 0xe76   : > { %13129 = vmatmul.msk.bf16.vlgmr.msrb.gmra.mxu2 %vm697_vm11, %v13115_v4  ;;  %13127 = vmatmul.msk.bf16.vlgmr.msrb.gmra.mxu0 %vm697_vm11, %v13115_v4 }
 0xe77   : > { %13128 = vmatmul.msk.bf16.vlgmr.msrb.gmra.mxu1 %vm697_vm11, %v13115_v4 }
 0xe78   : > { %v7919_v2 = vpop.permute.xlu2 %7918 }
 0xe7e   : > { %v7909_v19 = vpop.permute.xlu0 %7908 }
 0xe7f   : > { %v7924_v29 = vsel %vm681_vm12, %v7907_v36, %v7909_v19 }
 0xe80   : > { %v8110_v39 = vsel %vm701_vm10, %v7924_v29, 0  ;;  %v7911_v38 = vpop.permute.xlu1 %7910  ;;  %v8265_v47 = vpop.permute.xlu2 %8264 }
 0xe81   : > { %8176 = vmatpush.bf16.msrb.mxu3 %v8110_v39  ;;  %v7925_v7 = vsel %vm681_vm12, %v7909_v19, %v7911_v38  ;;  %v7926_v55 = vsel %vm681_vm12, %v7911_v38, %v7913_v16 }
 0xe82   : > { %v8113_v34 = vsel %vm701_vm10, %v7925_v7, 0  ;;  %v8116_v42 = vsel %vm701_vm10, %v7926_v55, 0 }
 0xe83   : > { %8189 = vmatpush.bf16.msra.mxu0 %v8113_v34  ;;  %8202 = vmatpush.bf16.msra.mxu1 %v8116_v42 }
 0xe84   : > { %13130 = vmatmul.msk.bf16.vlgmr.msrb.gmra.mxu3 %vm697_vm11, %v13115_v4 }
 0xe85   : > { %v16902_v37 = vpop.f32.mrf.mxu2  ;;  %v16904_v33 = vpop.f32.mrf.mxu3 }
 0xe86   : > { %13131 = vmatmul.msk.bf16.vlgmr.msra.gmra.mxu0 %vm697_vm11, %v13115_v4 }
 0xe87   : > { %13132 = vmatmul.msk.bf16.vlgmr.msra.gmra.mxu1 %vm697_vm11, %v13115_v4 }
 0xe88   : > { %v8271_v30 = vpop.permute.xlu2 %8270 }
 0xe8d   : > { %v8003_v59 = vpop.f32.mrf.mxu0 }
 0xe8e   : > { %v7917_v60 = vpop.permute.xlu1 %7916  ;;  %v7915_v1 = vpop.permute.xlu0 %7914 }
 0xe8f   : > { %v7929_v20 = vsel %vm681_vm12, %v7917_v60, %v7919_v2  ;;  %v7927_v14 = vsel %vm681_vm12, %v7913_v16, %v7915_v1  ;;  %v7928_v5 = vsel %vm681_vm12, %v7915_v1, %v7917_v60  ;;  %v16910_v44 = vpop.f32.mrf.mxu1  ;;  %v7992_v16 = vpop.f32.mrf.mxu3 }
 0xe90   : > { %v8119_v52 = vsel %vm701_vm10, %v7927_v14, 0  ;;  %v8122_v13 = vsel %vm701_vm10, %v7928_v5, 0  ;;  %v8125_v45 = vsel %vm701_vm10, %v7929_v20, 0  ;;  %v8277_v63 = vpop.permute.xlu2 %8276 }
 0xe91   : > { %8215 = vmatpush.bf16.msra.mxu2 %v8119_v52  ;;  %8228 = vmatpush.bf16.msra.mxu3 %v8122_v13 }
 0xe92   : > { %8241 = vmatpush.bf16.msrb.mxu0 %v8125_v45 }
 0xe94   : > { %13133 = vmatmul.msk.bf16.vlgmr.msra.gmra.mxu2 %vm697_vm11, %v13115_v4  ;;  %13134 = vmatmul.msk.bf16.vlgmr.msra.gmra.mxu3 %vm697_vm11, %v13115_v4 }
 0xe95   : > { %v8005_v55 = vpop.f32.mrf.mxu0 }
 0xe96   : > { %v8263_v8 = vpop.permute.xlu1 %8262  ;;  %v7921_v32 = vpop.permute.xlu0 %7920  ;;  %13135 = vmatmul.msk.bf16.vlgmr.msrb.gmra.mxu0 %vm697_vm11, %v13115_v4 }
 0xe97   : > { %v8282_v56 = vsel %vm1046_vm13, %v8263_v8, %v8265_v47  ;;  %v7930_v41 = vsel %vm681_vm12, %v7919_v2, %v7921_v32  ;;  %v8018_v34 = vpop.f32.mrf.mxu1  ;;  %v16926_v20 = vpop.f32.mrf.mxu3 }
 0xe98   : > { %v8297_v6 = vsel %vm701_vm10, %v8282_v56, 0  ;;  %v8128_v48 = vsel %vm701_vm10, %v7930_v41, 0 }
 0xe99   : > { %8254 = vmatpush.bf16.msrb.mxu1 %v8128_v48  ;;  %8332 = vmatpush.bf16.msrb.mxu2 %v8297_v6 }
 0xe9c   : > { %13136 = vmatmul.msk.bf16.vlgmr.msrb.gmra.mxu1 %vm697_vm11, %v13115_v4  ;;  %v7979_v4 = vpop.f32.mrf.mxu2 }
 0xe9d   : > { %v16929_v14 = vpop.f32.mrf.mxu0 }
 0xe9e   : > { %v8269_v15 = vpop.permute.xlu1 %8268  ;;  %v8267_v31 = vpop.permute.xlu0 %8266 }
 0xe9f   : > { %v8285_v23 = vsel %vm1046_vm13, %v8269_v15, %v8271_v30  ;;  %v8283_v57 = vsel %vm1046_vm13, %v8265_v47, %v8267_v31  ;;  %v8284_v12 = vsel %vm1046_vm13, %v8267_v31, %v8269_v15  ;;  %v16931_v5 = vpop.f32.mrf.mxu1  ;;  %v8044_v52 = vpop.f32.mrf.mxu3 }
 0xea0   : > { %v8306_v0 = vsel %vm701_vm10, %v8285_v23, 0  ;;  %v8300_v61 = vsel %vm701_vm10, %v8283_v57, 0  ;;  %v8303_v26 = vsel %vm701_vm10, %v8284_v12, 0 }
 0xea1   : > { %8345 = vmatpush.bf16.msrb.mxu3 %v8300_v61  ;;  %8358 = vmatpush.bf16.msra.mxu0 %v8303_v26 }
 0xea2   : > { %8371 = vmatpush.bf16.msra.mxu1 %v8306_v0 }
 0xea4   : > { %13138 = vmatmul.msk.bf16.vlgmr.msrb.gmra.mxu2 %vm697_vm11, %v13137_v54  ;;  %13139 = vmatmul.msk.bf16.vlgmr.msrb.gmra.mxu3 %vm697_vm11, %v13137_v54  ;;  %v16924_v1 = vpop.f32.mrf.mxu2 }
 0xea5   : > { %v8057_v13 = vpop.f32.mrf.mxu0 }
 0xea6   : > { %v8275_v35 = vpop.permute.xlu1 %8274  ;;  %v8273_v36 = vpop.permute.xlu0 %8272  ;;  %13140 = vmatmul.msk.bf16.vlgmr.msra.gmra.mxu0 %vm697_vm11, %v13137_v54 }
 0xea7   : > { %v8288_v18 = vsel %vm1046_vm13, %v8275_v35, %v8277_v63  ;;  %v8286_v17 = vsel %vm1046_vm13, %v8271_v30, %v8273_v36  ;;  %v8287_v51 = vsel %vm1046_vm13, %v8273_v36, %v8275_v35  ;;  %v8070_v45 = vpop.f32.mrf.mxu1  ;;  %v16938_v32 = vpop.f32.mrf.mxu3 }
 0xea8   : > { %v8315_v22 = vsel %vm701_vm10, %v8288_v18, 0  ;;  %v8309_v53 = vsel %vm701_vm10, %v8286_v17, 0  ;;  %v8312_v58 = vsel %vm701_vm10, %v8287_v51, 0 }
 0xea9   : > { %8384 = vmatpush.bf16.msra.mxu2 %v8309_v53  ;;  %8397 = vmatpush.bf16.msra.mxu3 %v8312_v58 }
 0xeaa   : > { %8410 = vmatpush.bf16.msrb.mxu0 %v8315_v22 }
 0xeac   : > { %13141 = vmatmul.msk.bf16.vlgmr.msra.gmra.mxu1 %vm697_vm11, %v13137_v54  ;;  %v8031_v47 = vpop.f32.mrf.mxu2 }
 0xeae   : > { %v8281_v19 = vpop.permute.xlu1 %8280  ;;  %v8279_v29 = vpop.permute.xlu0 %8278 }
 0xeaf   : > { %v8292_v39 = vsel %vm1046_vm13, %v8281_v19, 0  ;;  %v8289_v38 = vsel %vm1046_vm13, %v8277_v63, %v8279_v29  ;;  %v8290_v7 = vsel %vm1046_vm13, %v8279_v29, %v8281_v19  ;;  %v8096_v41 = vpop.f32.mrf.mxu3  ;;  %v16944_v19 = vpop.permute.xlu2 %8469 }
 0xeb0   : > { %v8323_v42 = vsel %vm701_vm10, %v8292_v39, 0  ;;  %v8318_v2 = vsel %vm701_vm10, %v8289_v38, 0  ;;  %v8321_v60 = vsel %vm701_vm10, %v8290_v7, 0 }
 0xeb1   : > { %8423 = vmatpush.bf16.msrb.mxu1 %v8318_v2  ;;  %8436 = vmatpush.bf16.msrb.mxu2 %v8321_v60 }
 0xeb2   : > { %8449 = vmatpush.bf16.msrb.mxu3 %v8323_v42 }
 0xeb4   : > { %13142 = vmatmul.msk.bf16.vlgmr.msra.gmra.mxu2 %vm697_vm11, %v13137_v54  ;;  %13143 = vmatmul.msk.bf16.vlgmr.msra.gmra.mxu3 %vm697_vm11, %v13137_v54  ;;  %v16936_v8 = vpop.f32.mrf.mxu2 }
 0xeb6   : > { %13144 = vmatmul.msk.bf16.vlgmr.msrb.gmra.mxu0 %vm697_vm11, %v13137_v54 }
 0xebc   : > { %13145 = vmatmul.msk.bf16.vlgmr.msrb.gmra.mxu1 %vm697_vm11, %v13137_v54  ;;  %v8083_v56 = vpop.f32.mrf.mxu2 }
 0xec4   : > { %13146 = vmatmul.msk.bf16.vlgmr.msrb.gmra.mxu2 %vm697_vm11, %v13137_v54  ;;  %13147 = vmatmul.msk.bf16.vlgmr.msrb.gmra.mxu3 %vm697_vm11, %v13137_v54 }
 0xef3   : > { %v8139_v6 = vpop.f32.mrf.mxu0 }
 0xef4   : > { %v8152_v48 = vpop.f32.mrf.mxu1  ;;  %v8140_v29 = vadd.f32 %v8139_v6, %v16902_v37 }
 0xef5   : > { %v8153_v39 = vadd.f32 %v8152_v48, %v16904_v33 }
 0xef9   : > { %v8165_v30 = vpop.f32.mrf.mxu2 }
 0xefa   : > { %v8166_v58 = vadd.f32 %v8165_v30, %v8003_v59 }
 0xefb   : > { %v8141_v15 = vpop.f32.mrf.mxu0 }
 0xefc   : > { %v8154_v31 = vpop.f32.mrf.mxu1 }
 0xf01   : > { %v8167_v23 = vpop.f32.mrf.mxu2 }
 0xf03   : > { %v8191_v57 = vpop.f32.mrf.mxu0 }
 0xf04   : > { %v8204_v12 = vpop.f32.mrf.mxu1 }
 0xf07   : > { %v8178_v0 = vpop.f32.mrf.mxu3 }
 0xf08   : > { %v8179_v55 = vadd.f32 %v8178_v0, %v16910_v44 }
 0xf0b   : > { %v8193_v61 = vpop.f32.mrf.mxu0 }
 0xf0c   : > { %v8206_v26 = vpop.f32.mrf.mxu1 }
 0xf0f   : > { %v8180_v63 = vpop.f32.mrf.mxu3 }
 0xf13   : > { %v16940_v35 = vpop.f32.mrf.mxu0 }
 0xf17   : > { %v8217_v54 = vpop.f32.mrf.mxu2  ;;  %v8230_v36 = vpop.f32.mrf.mxu3 }
 0xf18   : > { %v8218_v61 = vadd.f32 %v8217_v54, %v16929_v14 }
 0xf19   : > { %v16942_v18 = vpop.f32.mrf.mxu1 }
 0xf1b   : > { %v8245_v17 = vpop.f32.mrf.mxu0 }
 0xf1f   : > { %v8219_v51 = vpop.f32.mrf.mxu2  ;;  %v8232_v22 = vpop.f32.mrf.mxu3 }
 0xf21   : > { %v8258_v53 = vpop.f32.mrf.mxu1 }
 0xf23   : > { %v8360_v4 = vpop.f32.mrf.mxu0 }
 0xf24   : > { %v8457_v16 = vadd.f32 %v8360_v4, %v8166_v58  ;;  %v8192_v4 = vadd.f32 %v8191_v57, %v16924_v1 }
 0xf26   : > { %v8474_v38 = vadd.f32 %v16944_v19, %v8457_v16 }
 0xf27   : > { %v8334_v7 = vpop.f32.mrf.mxu2  ;;  %v8347_v42 = vpop.f32.mrf.mxu3 }
 0xf28   : > { %v8455_v34 = vadd.f32 %v8334_v7, %v8140_v29  ;;  %v8484_v2 = vadd.f32 %v8474_v38, %v16479_v24  ;;  %v8456_v60 = vadd.f32 %v8347_v42, %v8153_v39  ;;  %v8205_v39 = vadd.f32 %v8204_v12, %v16926_v20 }
 0xf29   : > { %v8373_v47 = vpop.f32.mrf.mxu1 }
 0xf2a   : > { %v8472_v59 = vadd.f32 %v16944_v19, %v8455_v34  ;;  %v8458_v52 = vadd.f32 %v8373_v47, %v8179_v55  ;;  %v8473_v13 = vadd.f32 %v16944_v19, %v8456_v60  ;;  %v16954_v37 = vmul.f32 %v8484_v2, %v14392_v9 }
 0xf2b   : > { %v8362_v56 = vpop.f32.mrf.mxu0  ;;  %v8231_v55 = vadd.f32 %v8230_v36, %v16931_v5 }
 0xf2c   : > { %v8482_v33 = vadd.f32 %v8472_v59, %v16485_v40  ;;  %v8475_v45 = vadd.f32 %v16944_v19, %v8458_v52  ;;  %v8483_v44 = vadd.f32 %v8473_v13, %v16489_v11  ;;  %v8514_v30 = vmul.f32 0.1, %v16954_v37 }
 0xf2d   : > { %vm8504_vm1 = vcmp.ge.f32.partialorder %v16954_v37, 0.0 }
 0xf2e   : > { %v16960_v41 = vmul.f32 %v8482_v33, %v14345_v46  ;;  %v8485_v24 = vadd.f32 %v8475_v45, %v16494_v3  ;;  %v16964_v6 = vmul.f32 %v8483_v44, %v14343_v43  ;;  %v8524_v51 = vsel %vm8504_vm1, %v16954_v37, %v8514_v30  ;;  %v17012_v45 = vld [vmem:[%s18463_s2 + $0x94] sm:$0xf] }
 0xf2f   : > { %v8336_v48 = vpop.f32.mrf.mxu2  ;;  %v8349_v31 = vpop.f32.mrf.mxu3 }
 0xf30   : > { %v8512_v15 = vmul.f32 0.1, %v16960_v41  ;;  %v16969_v40 = vmul.f32 %v8485_v24, %v14394_v49  ;;  %vm8502_vm7 = vcmp.ge.f32.partialorder %v16960_v41, 0.0  ;;  %v8513_v11 = vmul.f32 0.1, %v16964_v6 }
 0xf31   : > { %v8375_v23 = vpop.f32.mrf.mxu1  ;;  %vm8503_vm8 = vcmp.ge.f32.partialorder %v16964_v6, 0.0 }
 0xf32   : > { %v8515_v3 = vmul.f32 0.1, %v16969_v40  ;;  %v8522_v0 = vsel %vm8502_vm7, %v16960_v41, %v8512_v15  ;;  %vm8505_vm2 = vcmp.ge.f32.partialorder %v16969_v40, 0.0  ;;  %v8523_v26 = vsel %vm8503_vm8, %v16964_v6, %v8513_v11 }
 0xf33   : > { %v8412_v63 = vpop.f32.mrf.mxu0  ;;  %v8532_v17 = vpack.c.bf16 %v8523_v26, %v8522_v0 }
 0xf34   : > { %v8525_v22 = vsel %vm8505_vm2, %v16969_v40, %v8515_v3  ;;  %v8461_v53 = vadd.f32 %v8412_v63, %v8218_v61 }
 0xf35   : > { %v8533_v58 = vpack.c.bf16 %v8525_v22, %v8524_v51  ;;  %v8545_v16 = vunpack.c.h.b16 %v8532_v17  ;;  %v8544_v29 = vunpack.c.l.b16 %v8532_v17 }
 0xf36   : > { %v8478_v38 = vadd.f32 %v16944_v19, %v8461_v53 }
 0xf37   : > { %v8386_v7 = vpop.f32.mrf.mxu2  ;;  %v8546_v14 = vunpack.c.l.b16 %v8533_v58  ;;  %v8547_v54 = vunpack.c.h.b16 %v8533_v58  ;;  %v8399_v42 = vpop.f32.mrf.mxu3  ;;  %v16986_v2 = vpack.c.b16 %v8545_v16, %v8545_v16  ;;  %v16988_v60 = vpack.c.b16 %v8544_v29, %v8544_v29 }
 0xf38   : > { %v8459_v34 = vadd.f32 %v8386_v7, %v8192_v4  ;;  %v8488_v47 = vadd.f32 %v8478_v38, %v16540_v62  ;;  %v8460_v1 = vadd.f32 %v8399_v42, %v8205_v39  ;;  %v8244_v4 = vadd.f32 %v16940_v35, %v16936_v8 }
 0xf39   : > { %v8425_v57 = vpop.f32.mrf.mxu1  ;;  %v16991_v59 = vpack.c.b16 %v8546_v14, %v8546_v14  ;;  %v16993_v20 = vpack.c.b16 %v8547_v54, %v8547_v54  ;;  %8566 = vrot.lane.b32.xlu1 %v16986_v2, %s13793_s11  ;;  %8564 = vrot.lane.b32.xlu0 %v16988_v60, %s13793_s11  ;;  %v8601_v5 = vsel %vm701_vm10, %v16988_v60, 0  ;;  %v8604_v62 = vsel %vm701_vm10, %v16986_v2, 0 }
 0xf3a   : > { %v8476_v12 = vadd.f32 %v16944_v19, %v8459_v34  ;;  %v8462_v52 = vadd.f32 %v8425_v57, %v8231_v55  ;;  %v8477_v36 = vadd.f32 %v16944_v19, %v8460_v1  ;;  %8637 = vmatpush.bf16.msra.mxu0 %v8601_v5  ;;  %8650 = vmatpush.bf16.msra.mxu1 %v8604_v62 }
 0xf3b   : > { %v8607_v13 = vsel %vm701_vm10, %v16991_v59, 0  ;;  %v8610_v33 = vsel %vm701_vm10, %v16993_v20, 0  ;;  %v17015_v56 = vmul.f32 %v8488_v47, %v14343_v43  ;;  %8568 = vrot.lane.b32.xlu2 %v16991_v59, %s13793_s11  ;;  %v8414_v48 = vpop.f32.mrf.mxu0  ;;  %v8257_v39 = vadd.f32 %v16942_v18, %v16938_v32 }
 0xf3c   : > { %v8486_v44 = vadd.f32 %v8476_v12, %v16548_v10  ;;  %v8479_v24 = vadd.f32 %v16944_v19, %v8462_v52  ;;  %8663 = vmatpush.bf16.msra.mxu2 %v8607_v13  ;;  %v8487_v30 = vadd.f32 %v8477_v36, %v16556_v25  ;;  %8676 = vmatpush.bf16.msra.mxu3 %v8610_v33 }
 0xf3d   : > { %13151 = vmatmul.msk.bf16.vlgmr.msra.gmra.mxu0 %vm697_vm11, %v17012_v45  ;;  %13152 = vmatmul.msk.bf16.vlgmr.msra.gmra.mxu1 %vm697_vm11, %v17012_v45  ;;  %v8518_v25 = vmul.f32 0.1, %v17015_v56  ;;  %vm8508_vm5 = vcmp.ge.f32.partialorder %v17015_v56, 0.0 }
 0xf3e   : > { %v17023_v15 = vmul.f32 %v8486_v44, %v14379_v28  ;;  %v8489_v31 = vadd.f32 %v8479_v24, %v16563_v50  ;;  %v17031_v10 = vmul.f32 %v8487_v30, %v14345_v46 }
 0xf3f   : > { %v8388_v11 = vpop.f32.mrf.mxu2  ;;  %13153 = vmatmul.msk.bf16.vlgmr.msra.gmra.mxu2 %vm697_vm11, %v17012_v45  ;;  %v8401_v50 = vpop.f32.mrf.mxu3  ;;  %13154 = vmatmul.msk.bf16.vlgmr.msra.gmra.mxu3 %vm697_vm11, %v17012_v45  ;;  %v8528_v22 = vsel %vm8508_vm5, %v17015_v56, %v8518_v25 }
 0xf40   : > { %v8516_v23 = vmul.f32 0.1, %v17023_v15  ;;  %v17038_v3 = vmul.f32 %v8489_v31, %v14392_v9  ;;  %vm8506_vm3 = vcmp.ge.f32.partialorder %v17023_v15, 0.0  ;;  %v8517_v0 = vmul.f32 0.1, %v17031_v10 }
 0xf41   : > { %v8427_v61 = vpop.f32.mrf.mxu1  ;;  %vm8507_vm4 = vcmp.ge.f32.partialorder %v17031_v10, 0.0  ;;  %8570 = vrot.lane.b32.xlu0 %v16993_v20, %s13793_s11 }
 0xf42   : > { %v8519_v26 = vmul.f32 0.1, %v17038_v3  ;;  %v8526_v63 = vsel %vm8506_vm3, %v17023_v15, %v8516_v23  ;;  %vm8509_vm6 = vcmp.ge.f32.partialorder %v17038_v3, 0.0  ;;  %v8527_v17 = vsel %vm8507_vm4, %v17031_v10, %v8517_v0 }
 0xf43   : > { %v8534_v51 = vpack.c.bf16 %v8527_v17, %v8526_v63 }
 0xf44   : > { %v8529_v53 = vsel %vm8509_vm6, %v17038_v3, %v8519_v26 }
 0xf45   : > { %v8535_v58 = vpack.c.bf16 %v8529_v53, %v8528_v22  ;;  %v8549_v16 = vunpack.c.h.b16 %v8534_v51  ;;  %v8548_v29 = vunpack.c.l.b16 %v8534_v51  ;;  %v13149_v51 = vld [vmem:[%s18463_s2 + $0x90] sm:$0xf] }
 0xf47   : > { %v8438_v38 = vpop.f32.mrf.mxu2  ;;  %v8550_v7 = vunpack.c.l.b16 %v8535_v58  ;;  %v8551_v14 = vunpack.c.h.b16 %v8535_v58  ;;  %v8451_v55 = vpop.f32.mrf.mxu3  ;;  %v8559_v34 = vpack.c.b16 %v8549_v16, %v8549_v16  ;;  %v8558_v42 = vpack.c.b16 %v8548_v29, %v8548_v29 }
 0xf48   : > { %v8463_v54 = vadd.f32 %v8438_v38, %v8244_v4  ;;  %v8464_v47 = vadd.f32 %v8451_v55, %v8257_v39 }
 0xf49   : > { %v8560_v1 = vpack.c.b16 %v8550_v7, %v8550_v7  ;;  %v8561_v57 = vpack.c.b16 %v8551_v14, %v8551_v14  ;;  %8574 = vrot.lane.b32.xlu2 %v8559_v34, %s13793_s11  ;;  %8572 = vrot.lane.b32.xlu1 %v8558_v42, %s13793_s11  ;;  %v8613_v8 = vsel %vm701_vm10, %v8558_v42, 0  ;;  %v8616_v32 = vsel %vm701_vm10, %v8559_v34, 0 }
 0xf4a   : > { %v8480_v12 = vadd.f32 %v16944_v19, %v8463_v54  ;;  %v8481_v35 = vadd.f32 %v16944_v19, %v8464_v47  ;;  %8689 = vmatpush.bf16.msrb.mxu0 %v8613_v8  ;;  %8702 = vmatpush.bf16.msrb.mxu1 %v8616_v32 }
 0xf4b   : > { %v8619_v18 = vsel %vm701_vm10, %v8560_v1, 0  ;;  %v8622_v52 = vsel %vm701_vm10, %v8561_v57, 0  ;;  %8576 = vrot.lane.b32.xlu0 %v8560_v1, %s13793_s11 }
 0xf4c   : > { %v8490_v5 = vadd.f32 %v8480_v12, %v16595_v27  ;;  %8715 = vmatpush.bf16.msrb.mxu2 %v8619_v18  ;;  %v8491_v62 = vadd.f32 %v8481_v35, %v16602_v21  ;;  %8728 = vmatpush.bf16.msrb.mxu3 %v8622_v52 }
 0xf4d   : > { %13155 = vmatmul.msk.bf16.vlgmr.msrb.gmra.mxu0 %vm697_vm11, %v17012_v45  ;;  %13156 = vmatmul.msk.bf16.vlgmr.msrb.gmra.mxu1 %vm697_vm11, %v17012_v45 }
 0xf4e   : > { %v17070_v36 = vmul.f32 %v8490_v5, %v14394_v49  ;;  %v17077_v19 = vmul.f32 %v8491_v62, %v14379_v28 }
 0xf4f   : > { %v8440_v13 = vpop.f32.mrf.mxu2  ;;  %13157 = vmatmul.msk.bf16.vlgmr.msrb.gmra.mxu2 %vm697_vm11, %v17012_v45  ;;  %v8453_v21 = vpop.f32.mrf.mxu3  ;;  %13158 = vmatmul.msk.bf16.vlgmr.msrb.gmra.mxu3 %vm697_vm11, %v17012_v45 }
 0xf50   : > { %v8520_v27 = vmul.f32 0.1, %v17070_v36  ;;  %vm8510_vm7 = vcmp.ge.f32.partialorder %v17070_v36, 0.0  ;;  %v8521_v33 = vmul.f32 0.1, %v17077_v19  ;;  %vm8511_vm8 = vcmp.ge.f32.partialorder %v17077_v19, 0.0 }
 0xf51   : > { %8578 = vrot.lane.b32.xlu1 %v8561_v57, %s13793_s11 }
 0xf52   : > { %v8530_v44 = vsel %vm8510_vm7, %v17070_v36, %v8520_v27  ;;  %v8531_v24 = vsel %vm8511_vm8, %v17077_v19, %v8521_v33  ;;  %v13171_v27 = vld [vmem:[%s18463_s2 + $0x98] sm:$0xf] }
 0xf53   : > { %v8536_v48 = vpack.c.bf16 %v8531_v24, %v8530_v44 }
 0xf55   : > { %v8552_v30 = vunpack.c.l.b16 %v8536_v48  ;;  %v8553_v31 = vunpack.c.h.b16 %v8536_v48 }
 0xf57   : > { %v8562_v11 = vpack.c.b16 %v8552_v30, %v8552_v30  ;;  %v8563_v25 = vpack.c.b16 %v8553_v31, %v8553_v31 }
 0xf59   : > { %8580 = vrot.lane.b32.xlu2 %v8562_v11, %s13793_s11  ;;  %8924 = vrot.lane.b32.xlu1 %v16988_v60, %s13794_s28  ;;  %v8625_v23 = vsel %vm701_vm10, %v8562_v11, 0  ;;  %v8628_v50 = vsel %vm701_vm10, %v8563_v25, 0 }
 0xf5a   : > { %8582 = vrot.lane.b32.xlu0 %v8563_v25, %s13793_s11  ;;  %8741 = vmatpush.bf16.msra.mxu0 %v8625_v23 }
 0xf5b   : > { %8754 = vmatpush.bf16.msra.mxu1 %v8628_v50 }
 0xf5d   : > { %13159 = vmatmul.msk.bf16.vlgmr.msra.gmra.mxu0 %vm697_vm11, %v17012_v45 }
 0xf5e   : > { %13160 = vmatmul.msk.bf16.vlgmr.msra.gmra.mxu1 %vm697_vm11, %v17012_v45 }
 0xf61   : > { %8926 = vrot.lane.b32.xlu2 %v16986_v2, %s13794_s28  ;;  %8930 = vrot.lane.b32.xlu1 %v16993_v20, %s13794_s28  ;;  %v13182_v2 = vld [vmem:[%s18464_s3 + $0x60] sm:$0xff] }
 0xf62   : > { %8928 = vrot.lane.b32.xlu0 %v16991_v59, %s13794_s28 }
 0xf69   : > { %8932 = vrot.lane.b32.xlu2 %v8558_v42, %s13794_s28  ;;  %8936 = vrot.lane.b32.xlu1 %v8560_v1, %s13794_s28 }
 0xf6a   : > { %8934 = vrot.lane.b32.xlu0 %v8559_v34, %s13794_s28 }
 0xf71   : > { %8938 = vrot.lane.b32.xlu2 %v8561_v57, %s13794_s28  ;;  %8942 = vrot.lane.b32.xlu1 %v8563_v25, %s13794_s28 }
 0xf72   : > { %8940 = vrot.lane.b32.xlu0 %v8562_v11, %s13794_s28 }
 0xf79   : > { %9131 = vperm.xlu2 %13571, %v13182_v2  }
 0xf95   : > { %v8569_v60 = vpop.permute.xlu2 %8568 }
 0xfa3   : > { %v8575_v22 = vpop.permute.xlu2 %8574 }
 0xfab   : > { %v8567_v20 = vpop.permute.xlu1 %8566  ;;  %v8565_v59 = vpop.permute.xlu0 %8564 }
 0xfac   : > { %v8585_v45 = vsel %vm681_vm12, %v8567_v20, %v8569_v60  ;;  %v8584_v0 = vsel %vm681_vm12, %v8565_v59, %v8567_v20  ;;  %v8594_v61 = vsel %vm681_vm12, 0, %v8565_v59 }
 0xfad   : > { %v8769_v26 = vsel %vm701_vm10, %v8585_v45, 0  ;;  %v8763_v63 = vsel %vm701_vm10, %v8594_v61, 0  ;;  %v8766_v17 = vsel %vm701_vm10, %v8584_v0, 0 }
 0xfae   : > { %8799 = vmatpush.bf16.msra.mxu2 %v8763_v63  ;;  %8812 = vmatpush.bf16.msra.mxu3 %v8766_v17 }
 0xfaf   : > { %8825 = vmatpush.bf16.msrb.mxu0 %v8769_v26 }
 0xfb1   : > { %13161 = vmatmul.msk.bf16.vlgmr.msra.gmra.mxu2 %vm697_vm11, %v13149_v51  ;;  %13162 = vmatmul.msk.bf16.vlgmr.msra.gmra.mxu3 %vm697_vm11, %v13149_v51 }
 0xfb2   : > { %13163 = vmatmul.msk.bf16.vlgmr.msrb.gmra.mxu0 %vm697_vm11, %v13149_v51 }
 0xfb3   : > { %v8571_v53 = vpop.permute.xlu0 %8570  ;;  %v8581_v16 = vpop.permute.xlu2 %8580 }
 0xfb4   : > { %v8586_v58 = vsel %vm681_vm12, %v8569_v60, %v8571_v53 }
 0xfb5   : > { %v8772_v4 = vsel %vm701_vm10, %v8586_v58, 0 }
 0xfb6   : > { %8838 = vmatpush.bf16.msrb.mxu1 %v8772_v4 }
 0xfb9   : > { %13164 = vmatmul.msk.bf16.vlgmr.msrb.gmra.mxu1 %vm697_vm11, %v13149_v51 }
 0xfba   : > { %v17161_v23 = vpop.f32.mrf.mxu0  ;;  %v17163_v50 = vpop.f32.mrf.mxu1 }
 0xfbb   : > { %v8573_v29 = vpop.permute.xlu1 %8572  ;;  %v8927_v57 = vpop.permute.xlu2 %8926 }
 0xfbc   : > { %v8587_v39 = vsel %vm681_vm12, %v8571_v53, %v8573_v29  ;;  %v8588_v38 = vsel %vm681_vm12, %v8573_v29, %v8575_v22 }
 0xfbd   : > { %v8775_v7 = vsel %vm701_vm10, %v8587_v39, 0  ;;  %v8778_v14 = vsel %vm701_vm10, %v8588_v38, 0  ;;  %v8577_v54 = vpop.permute.xlu0 %8576 }
 0xfbe   : > { %v8589_v55 = vsel %vm681_vm12, %v8575_v22, %v8577_v54  ;;  %8851 = vmatpush.bf16.msrb.mxu2 %v8775_v7  ;;  %8864 = vmatpush.bf16.msrb.mxu3 %v8778_v14 }
 0xfbf   : > { %v8781_v34 = vsel %vm701_vm10, %v8589_v55, 0 }
 0xfc0   : > { %8877 = vmatpush.bf16.msra.mxu0 %v8781_v34 }
 0xfc1   : > { %13165 = vmatmul.msk.bf16.vlgmr.msrb.gmra.mxu2 %vm697_vm11, %v13149_v51  ;;  %13166 = vmatmul.msk.bf16.vlgmr.msrb.gmra.mxu3 %vm697_vm11, %v13149_v51 }
 0xfc2   : > { %v17165_v60 = vpop.f32.mrf.mxu2  ;;  %v17168_v45 = vpop.f32.mrf.mxu3 }
 0xfc3   : > { %v8579_v42 = vpop.permute.xlu1 %8578  ;;  %13167 = vmatmul.msk.bf16.vlgmr.msra.gmra.mxu0 %vm697_vm11, %v13149_v51  ;;  %v8933_v13 = vpop.permute.xlu2 %8932 }
 0xfc4   : > { %v8590_v47 = vsel %vm681_vm12, %v8577_v54, %v8579_v42  ;;  %v8591_v1 = vsel %vm681_vm12, %v8579_v42, %v8581_v16  ;;  %v8654_v22 = vpop.f32.mrf.mxu1 }
 0xfc5   : > { %v8784_v12 = vsel %vm701_vm10, %v8590_v47, 0  ;;  %v8787_v8 = vsel %vm701_vm10, %v8591_v1, 0 }
 0xfc6   : > { %8890 = vmatpush.bf16.msra.mxu1 %v8784_v12  ;;  %8903 = vmatpush.bf16.msra.mxu2 %v8787_v8 }
 0xfc9   : > { %13168 = vmatmul.msk.bf16.vlgmr.msra.gmra.mxu1 %vm697_vm11, %v13149_v51 }
 0xfca   : > { %v8667_v58 = vpop.f32.mrf.mxu2  ;;  %v8680_v29 = vpop.f32.mrf.mxu3 }
 0xfcb   : > { %v8925_v32 = vpop.permute.xlu1 %8924  ;;  %v8939_v25 = vpop.permute.xlu2 %8938 }
 0xfcc   : > { %v8944_v35 = vsel %vm1046_vm13, %v8925_v32, %v8927_v57  ;;  %v8583_v18 = vpop.permute.xlu0 %8582  ;;  %v17185_v34 = vpop.f32.mrf.mxu1 }
 0xfcd   : > { %v8959_v52 = vsel %vm701_vm10, %v8944_v35, 0  ;;  %v8592_v5 = vsel %vm681_vm12, %v8581_v16, %v8583_v18 }
 0xfce   : > { %v8790_v62 = vsel %vm701_vm10, %v8592_v5, 0  ;;  %8994 = vmatpush.bf16.msrb.mxu0 %v8959_v52 }
 0xfcf   : > { %8916 = vmatpush.bf16.msra.mxu3 %v8790_v62 }
 0xfd1   : > { %13169 = vmatmul.msk.bf16.vlgmr.msra.gmra.mxu2 %vm697_vm11, %v13149_v51 }
 0xfd2   : > { %13170 = vmatmul.msk.bf16.vlgmr.msra.gmra.mxu3 %vm697_vm11, %v13149_v51  ;;  %v8641_v51 = vpop.f32.mrf.mxu0  ;;  %v17187_v42 = vpop.f32.mrf.mxu2 }
 0xfd3   : > { %v8931_v21 = vpop.permute.xlu1 %8930  ;;  %13172 = vmatmul.msk.bf16.vlgmr.msrb.gmra.mxu0 %vm697_vm11, %v13171_v27  ;;  %v17189_v47 = vpop.f32.mrf.mxu3 }
 0xfd4   : > { %v8947_v33 = vsel %vm1046_vm13, %v8931_v21, %v8933_v13  ;;  %v8929_v44 = vpop.permute.xlu0 %8928 }
 0xfd5   : > { %v8968_v24 = vsel %vm701_vm10, %v8947_v33, 0  ;;  %v8945_v48 = vsel %vm1046_vm13, %v8927_v57, %v8929_v44  ;;  %v8946_v30 = vsel %vm1046_vm13, %v8929_v44, %v8931_v21  ;;  %v8706_v57 = vpop.f32.mrf.mxu1 }
 0xfd6   : > { %v8962_v31 = vsel %vm701_vm10, %v8945_v48, 0  ;;  %v8965_v11 = vsel %vm701_vm10, %v8946_v30, 0  ;;  %9033 = vmatpush.bf16.msrb.mxu3 %v8968_v24 }
 0xfd7   : > { %9007 = vmatpush.bf16.msrb.mxu1 %v8962_v31  ;;  %9020 = vmatpush.bf16.msrb.mxu2 %v8965_v11 }
 0xfda   : > { %13173 = vmatmul.msk.bf16.vlgmr.msrb.gmra.mxu1 %vm697_vm11, %v13171_v27  ;;  %v8691_v55 = vpop.f32.mrf.mxu0  ;;  %v8719_v12 = vpop.f32.mrf.mxu2 }
 0xfdb   : > { %v8937_v2 = vpop.permute.xlu1 %8936  ;;  %v8732_v8 = vpop.f32.mrf.mxu3 }
 0xfdc   : > { %v8950_v20 = vsel %vm1046_vm13, %v8937_v2, %v8939_v25  ;;  %v8935_v59 = vpop.permute.xlu0 %8934 }
 0xfdd   : > { %v8977_v0 = vsel %vm701_vm10, %v8950_v20, 0  ;;  %v8948_v61 = vsel %vm1046_vm13, %v8933_v13, %v8935_v59  ;;  %v8949_v26 = vsel %vm1046_vm13, %v8935_v59, %v8937_v2  ;;  %v17197_v35 = vpop.f32.mrf.mxu1 }
 0xfde   : > { %v8971_v63 = vsel %vm701_vm10, %v8948_v61, 0  ;;  %v8974_v17 = vsel %vm701_vm10, %v8949_v26, 0  ;;  %9072 = vmatpush.bf16.msra.mxu2 %v8977_v0 }
 0xfdf   : > { %9046 = vmatpush.bf16.msra.mxu0 %v8971_v63  ;;  %9059 = vmatpush.bf16.msra.mxu1 %v8974_v17  ;;  %v17204_v63 = vpop.permute.xlu2 %9131 }
 0xfe1   : > { %13174 = vmatmul.msk.bf16.vlgmr.msrb.gmra.mxu2 %vm697_vm11, %v13171_v27 }
 0xfe2   : > { %13175 = vmatmul.msk.bf16.vlgmr.msrb.gmra.mxu3 %vm697_vm11, %v13171_v27  ;;  %v8693_v1 = vpop.f32.mrf.mxu0 }
 0xfe3   : > { %v8943_v53 = vpop.permute.xlu1 %8942  ;;  %13176 = vmatmul.msk.bf16.vlgmr.msra.gmra.mxu0 %vm697_vm11, %v13171_v27 }
 0xfe4   : > { %v8954_v4 = vsel %vm1046_vm13, %v8943_v53, 0  ;;  %v8941_v16 = vpop.permute.xlu0 %8940 }
 0xfe5   : > { %v8985_v39 = vsel %vm701_vm10, %v8954_v4, 0  ;;  %v8951_v38 = vsel %vm1046_vm13, %v8939_v25, %v8941_v16  ;;  %v8952_v7 = vsel %vm1046_vm13, %v8941_v16, %v8943_v53  ;;  %v8758_v52 = vpop.f32.mrf.mxu1 }
 0xfe6   : > { %v8980_v14 = vsel %vm701_vm10, %v8951_v38, 0  ;;  %v8983_v54 = vsel %vm701_vm10, %v8952_v7, 0  ;;  %9111 = vmatpush.bf16.msrb.mxu1 %v8985_v39 }
 0xfe7   : > { %9085 = vmatpush.bf16.msra.mxu3 %v8980_v14  ;;  %9098 = vmatpush.bf16.msrb.mxu0 %v8983_v54 }
 0xfea   : > { %13177 = vmatmul.msk.bf16.vlgmr.msra.gmra.mxu1 %vm697_vm11, %v13171_v27  ;;  %v17195_v32 = vpop.f32.mrf.mxu0 }
 0xff1   : > { %13178 = vmatmul.msk.bf16.vlgmr.msra.gmra.mxu2 %vm697_vm11, %v13171_v27 }
 0xff2   : > { %13179 = vmatmul.msk.bf16.vlgmr.msra.gmra.mxu3 %vm697_vm11, %v13171_v27  ;;  %v8745_v18 = vpop.f32.mrf.mxu0 }
 0xff3   : > { %13180 = vmatmul.msk.bf16.vlgmr.msrb.gmra.mxu0 %vm697_vm11, %v13171_v27 }
 0xffa   : > { %13181 = vmatmul.msk.bf16.vlgmr.msrb.gmra.mxu1 %vm697_vm11, %v13171_v27 }
0x102f   : > { %v8827_v5 = vpop.f32.mrf.mxu0 }
0x1034   : > { %v8801_v62 = vpop.f32.mrf.mxu2  ;;  %v8814_v13 = vpop.f32.mrf.mxu3 }
0x1035   : > { %v8802_v0 = vadd.f32 %v8801_v62, %v17161_v23  ;;  %v8815_v53 = vadd.f32 %v8814_v13, %v17163_v50  ;;  %v8828_v62 = vadd.f32 %v8827_v5, %v17165_v60 }
0x1036   : > { %v8840_v21 = vpop.f32.mrf.mxu1 }
0x1037   : > { %v8829_v33 = vpop.f32.mrf.mxu0 }
0x103c   : > { %v8803_v44 = vpop.f32.mrf.mxu2  ;;  %v8816_v24 = vpop.f32.mrf.mxu3 }
0x103d   : > { %v8841_v24 = vadd.f32 %v8840_v21, %v17168_v45 }
0x103e   : > { %v8842_v48 = vpop.f32.mrf.mxu1 }
0x1040   : > { %v17199_v30 = vpop.f32.mrf.mxu0 }
0x1044   : > { %v8853_v31 = vpop.f32.mrf.mxu2  ;;  %v8866_v11 = vpop.f32.mrf.mxu3 }
0x1045   : > { %v8854_v1 = vadd.f32 %v8853_v31, %v8691_v55  ;;  %v8867_v31 = vadd.f32 %v8866_v11, %v17185_v34 }
0x1046   : > { %v17201_v25 = vpop.f32.mrf.mxu1 }
0x1048   : > { %v8881_v27 = vpop.f32.mrf.mxu0 }
0x104c   : > { %v8855_v2 = vpop.f32.mrf.mxu2  ;;  %v8868_v20 = vpop.f32.mrf.mxu3 }
0x104e   : > { %v8894_v59 = vpop.f32.mrf.mxu1 }
0x1050   : > { %v8996_v61 = vpop.f32.mrf.mxu0 }
0x1051   : > { %v9117_v26 = vadd.f32 %v8996_v61, %v8802_v0 }
0x1053   : > { %v9134_v17 = vadd.f32 %v17204_v63, %v9117_v26  ;;  %v17236_v26 = vld [vmem:[%s18463_s2 + $0xa0] sm:$0xf] }
0x1054   : > { %v17207_v51 = vpop.f32.mrf.mxu2 }
0x1055   : > { %v17209_v22 = vpop.f32.mrf.mxu3  ;;  %v9154_v4 = vmul.f32 0.1, %v9134_v17  ;;  %vm9144_vm1 = vcmp.ge.f32.partialorder %v9134_v17, 0.0 }
0x1057   : > { %v9009_v58 = vpop.f32.mrf.mxu1  ;;  %v9164_v23 = vsel %vm9144_vm1, %v9134_v17, %v9154_v4 }
0x1058   : > { %v9118_v16 = vadd.f32 %v9009_v58, %v8815_v53  ;;  %v8998_v29 = vpop.f32.mrf.mxu0  ;;  %v9174_v57 = vmul.f32 %v9164_v23, %v14345_v46 }
0x105a   : > { %v9135_v39 = vadd.f32 %v17204_v63, %v9118_v16 }
0x105c   : > { %vm9145_vm2 = vcmp.ge.f32.partialorder %v9135_v39, 0.0  ;;  %v9155_v38 = vmul.f32 0.1, %v9135_v39  ;;  %v8907_v7 = vpop.f32.mrf.mxu2 }
0x105d   : > { %v8920_v14 = vpop.f32.mrf.mxu3 }
0x105e   : > { %v9165_v54 = vsel %vm9145_vm2, %v9135_v39, %v9155_v38 }
0x105f   : > { %v9175_v12 = vmul.f32 %v9165_v54, %v14343_v43  ;;  %v9011_v8 = vpop.f32.mrf.mxu1 }
0x1060   : > { %v9048_v50 = vpop.f32.mrf.mxu0 }
0x1061   : > { %v9121_v18 = vadd.f32 %v9048_v50, %v8854_v1  ;;  %v9184_v52 = vpack.c.bf16 %v9175_v12, %v9174_v57  ;;  %v8906_v1 = vadd.f32 %v17207_v51, %v17195_v32  ;;  %v8893_v51 = vadd.f32 %v17201_v25, %v17189_v47 }
0x1063   : > { %v9138_v13 = vadd.f32 %v17204_v63, %v9121_v18  ;;  %v9197_v33 = vunpack.c.h.b16 %v9184_v52  ;;  %v9196_v44 = vunpack.c.l.b16 %v9184_v52 }
0x1064   : > { %v9022_v48 = vpop.f32.mrf.mxu2 }
0x1065   : > { %v9119_v27 = vadd.f32 %v9022_v48, %v8828_v62  ;;  %v9035_v2 = vpop.f32.mrf.mxu3  ;;  %v17218_v55 = vpack.c.b16 %v9197_v33, %v9197_v33  ;;  %v17221_v59 = vpack.c.b16 %v9196_v44, %v9196_v44  ;;  %v9158_v0 = vmul.f32 0.1, %v9138_v13 }
0x1066   : > { %v9120_v20 = vadd.f32 %v9035_v2, %v8841_v24  ;;  %vm9148_vm3 = vcmp.ge.f32.partialorder %v9138_v13, 0.0  ;;  %v8880_v44 = vadd.f32 %v17199_v30, %v17187_v42 }
0x1067   : > { %v9136_v61 = vadd.f32 %v17204_v63, %v9119_v27  ;;  %v9061_v60 = vpop.f32.mrf.mxu1  ;;  %9218 = vrot.lane.b32.xlu1 %v17218_v55, %s13793_s11  ;;  %v9256_v45 = vsel %vm701_vm10, %v17218_v55, 0  ;;  %9216 = vrot.lane.b32.xlu0 %v17221_v59, %s13793_s11  ;;  %v9253_v34 = vsel %vm701_vm10, %v17221_v59, 0  ;;  %v9168_v4 = vsel %vm9148_vm3, %v9138_v13, %v9158_v0 }
0x1068   : > { %v9137_v5 = vadd.f32 %v17204_v63, %v9120_v20  ;;  %v9122_v21 = vadd.f32 %v9061_v60, %v8867_v31  ;;  %9302 = vmatpush.bf16.msrb.mxu3 %v9256_v45  ;;  %v9050_v11 = vpop.f32.mrf.mxu0  ;;  %9289 = vmatpush.bf16.msrb.mxu2 %v9253_v34  ;;  %v9178_v57 = vmul.f32 %v9168_v4, %v14379_v28 }
0x1069   : > { %vm9146_vm4 = vcmp.ge.f32.partialorder %v9136_v61, 0.0  ;;  %v9156_v17 = vmul.f32 0.1, %v9136_v61  ;;  %v8919_v20 = vadd.f32 %v17209_v22, %v17197_v35 }
0x106a   : > { %vm9147_vm5 = vcmp.ge.f32.partialorder %v9137_v5, 0.0  ;;  %v9157_v53 = vmul.f32 0.1, %v9137_v5  ;;  %v9139_v58 = vadd.f32 %v17204_v63, %v9122_v21 }
0x106b   : > { %v9166_v16 = vsel %vm9146_vm4, %v9136_v61, %v9156_v17  ;;  %13186 = vmatmul.msk.bf16.vlgmr.msrb.gmra.mxu3 %vm697_vm11, %v17236_v26  ;;  %13185 = vmatmul.msk.bf16.vlgmr.msrb.gmra.mxu2 %vm697_vm11, %v17236_v26 }
0x106c   : > { %v9176_v29 = vmul.f32 %v9166_v16, %v14392_v9  ;;  %v9167_v39 = vsel %vm9147_vm5, %v9137_v5, %v9157_v53  ;;  %vm9149_vm6 = vcmp.ge.f32.partialorder %v9139_v58, 0.0  ;;  %v9159_v23 = vmul.f32 0.1, %v9139_v58  ;;  %v9024_v38 = vpop.f32.mrf.mxu2 }
0x106d   : > { %v9177_v7 = vmul.f32 %v9167_v39, %v14394_v49  ;;  %v9037_v14 = vpop.f32.mrf.mxu3 }
0x106e   : > { %v9169_v54 = vsel %vm9149_vm6, %v9139_v58, %v9159_v23 }
0x106f   : > { %v9179_v12 = vmul.f32 %v9169_v54, %v14345_v46  ;;  %v9063_v8 = vpop.f32.mrf.mxu1  ;;  %v9185_v50 = vpack.c.bf16 %v9177_v7, %v9176_v29 }
0x1070   : > { %v9100_v18 = vpop.f32.mrf.mxu0 }
0x1071   : > { %v9125_v52 = vadd.f32 %v9100_v18, %v8906_v1  ;;  %v9199_v62 = vunpack.c.h.b16 %v9185_v50  ;;  %v9198_v13 = vunpack.c.l.b16 %v9185_v50  ;;  %v9186_v33 = vpack.c.bf16 %v9179_v12, %v9178_v57 }
0x1073   : > { %v9142_v24 = vadd.f32 %v17204_v63, %v9125_v52  ;;  %v17252_v48 = vpack.c.b16 %v9199_v62, %v9199_v62  ;;  %v17254_v27 = vpack.c.b16 %v9198_v13, %v9198_v13  ;;  %v9200_v32 = vunpack.c.l.b16 %v9186_v33 }
0x1074   : > { %v9074_v2 = vpop.f32.mrf.mxu2  ;;  %v9201_v31 = vunpack.c.h.b16 %v9186_v33 }
0x1075   : > { %v9123_v0 = vadd.f32 %v9074_v2, %v8880_v44  ;;  %v9087_v61 = vpop.f32.mrf.mxu3  ;;  %9222 = vrot.lane.b32.xlu0 %v17252_v48, %s13793_s11  ;;  %9220 = vrot.lane.b32.xlu2 %v17254_v27, %s13793_s11  ;;  %v9259_v42 = vsel %vm701_vm10, %v17254_v27, 0  ;;  %v9262_v47 = vsel %vm701_vm10, %v17252_v48, 0  ;;  %v17268_v25 = vpack.c.b16 %v9200_v32, %v9200_v32 }
0x1076   : > { %v9124_v30 = vadd.f32 %v9087_v61, %v8893_v51  ;;  %9315 = vmatpush.bf16.msra.mxu0 %v9259_v42  ;;  %v17270_v60 = vpack.c.b16 %v9201_v31, %v9201_v31  ;;  %v9162_v35 = vmul.f32 0.1, %v9142_v24  ;;  %9328 = vmatpush.bf16.msra.mxu1 %v9262_v47  ;;  %vm9152_vm7 = vcmp.ge.f32.partialorder %v9142_v24, 0.0 }
0x1077   : > { %v9140_v22 = vadd.f32 %v17204_v63, %v9123_v0  ;;  %v9113_v45 = vpop.f32.mrf.mxu1  ;;  %9224 = vrot.lane.b32.xlu1 %v17268_v25, %s13793_s11  ;;  %v9265_v34 = vsel %vm701_vm10, %v17268_v25, 0 }
0x1078   : > { %v9141_v5 = vadd.f32 %v17204_v63, %v9124_v30  ;;  %v9126_v21 = vadd.f32 %v9113_v45, %v8919_v20  ;;  %v9102_v11 = vpop.f32.mrf.mxu0  ;;  %9341 = vmatpush.bf16.msra.mxu2 %v9265_v34  ;;  %v9268_v53 = vsel %vm701_vm10, %v17270_v60, 0  ;;  %v9172_v16 = vsel %vm9152_vm7, %v9142_v24, %v9162_v35 }
0x1079   : > { %vm9150_vm8 = vcmp.ge.f32.partialorder %v9140_v22, 0.0  ;;  %v9160_v17 = vmul.f32 0.1, %v9140_v22  ;;  %13187 = vmatmul.msk.bf16.vlgmr.msra.gmra.mxu0 %vm697_vm11, %v17236_v26  ;;  %9354 = vmatpush.bf16.msra.mxu3 %v9268_v53  ;;  %v9182_v1 = vmul.f32 %v9172_v16, %v14394_v49 }
0x107a   : > { %vm9151_vm1 = vcmp.ge.f32.partialorder %v9141_v5, 0.0  ;;  %v9161_v58 = vmul.f32 0.1, %v9141_v5  ;;  %v9143_v4 = vadd.f32 %v17204_v63, %v9126_v21  ;;  %13188 = vmatmul.msk.bf16.vlgmr.msra.gmra.mxu1 %vm697_vm11, %v17236_v26 }
0x107b   : > { %v9170_v29 = vsel %vm9150_vm8, %v9140_v22, %v9160_v17  ;;  %13189 = vmatmul.msk.bf16.vlgmr.msra.gmra.mxu2 %vm697_vm11, %v17236_v26 }
0x107c   : > { %v9180_v39 = vmul.f32 %v9170_v29, %v14343_v43  ;;  %v9171_v23 = vsel %vm9151_vm1, %v9141_v5, %v9161_v58  ;;  %vm9153_vm2 = vcmp.ge.f32.partialorder %v9143_v4, 0.0  ;;  %v9163_v38 = vmul.f32 0.1, %v9143_v4  ;;  %v9076_v7 = vpop.f32.mrf.mxu2  ;;  %13190 = vmatmul.msk.bf16.vlgmr.msra.gmra.mxu3 %vm697_vm11, %v17236_v26 }
0x107d   : > { %v9181_v14 = vmul.f32 %v9171_v23, %v14392_v9  ;;  %v9089_v54 = vpop.f32.mrf.mxu3  ;;  %9226 = vrot.lane.b32.xlu2 %v17270_v60, %s13793_s11 }
0x107e   : > { %v9173_v63 = vsel %vm9153_vm2, %v9143_v4, %v9163_v38 }
0x107f   : > { %v9183_v57 = vmul.f32 %v9173_v63, %v14379_v28  ;;  %v9115_v12 = vpop.f32.mrf.mxu1  ;;  %v9187_v8 = vpack.c.bf16 %v9181_v14, %v9180_v39 }
0x1081   : > { %v9203_v50 = vunpack.c.h.b16 %v9187_v8  ;;  %v9202_v18 = vunpack.c.l.b16 %v9187_v8  ;;  %v9188_v52 = vpack.c.bf16 %v9183_v57, %v9182_v1 }
0x1083   : > { %v9213_v62 = vpack.c.b16 %v9203_v50, %v9203_v50  ;;  %v9212_v13 = vpack.c.b16 %v9202_v18, %v9202_v18  ;;  %v9204_v33 = vunpack.c.l.b16 %v9188_v52  ;;  %v9205_v44 = vunpack.c.h.b16 %v9188_v52 }
0x1085   : > { %9230 = vrot.lane.b32.xlu1 %v9213_v62, %s13793_s11  ;;  %9228 = vrot.lane.b32.xlu0 %v9212_v13, %s13793_s11  ;;  %v9271_v24 = vsel %vm701_vm10, %v9212_v13, 0  ;;  %v9274_v32 = vsel %vm701_vm10, %v9213_v62, 0  ;;  %v9214_v51 = vpack.c.b16 %v9204_v33, %v9204_v33  ;;  %v9215_v2 = vpack.c.b16 %v9205_v44, %v9205_v44 }
0x1086   : > { %9367 = vmatpush.bf16.msrb.mxu0 %v9271_v24  ;;  %9380 = vmatpush.bf16.msrb.mxu1 %v9274_v32 }
0x1087   : > { %9232 = vrot.lane.b32.xlu2 %v9214_v51, %s13793_s11  ;;  %v9277_v31 = vsel %vm701_vm10, %v9214_v51, 0  ;;  %v9280_v20 = vsel %vm701_vm10, %v9215_v2, 0 }
0x1088   : > { %9393 = vmatpush.bf16.msrb.mxu2 %v9277_v31  ;;  %9406 = vmatpush.bf16.msrb.mxu3 %v9280_v20 }
0x1089   : > { %13191 = vmatmul.msk.bf16.vlgmr.msrb.gmra.mxu0 %vm697_vm11, %v17236_v26 }
0x108a   : > { %13192 = vmatmul.msk.bf16.vlgmr.msrb.gmra.mxu1 %vm697_vm11, %v17236_v26 }
0x108b   : > { %13193 = vmatmul.msk.bf16.vlgmr.msrb.gmra.mxu2 %vm697_vm11, %v17236_v26 }
0x108c   : > { %13194 = vmatmul.msk.bf16.vlgmr.msrb.gmra.mxu3 %vm697_vm11, %v17236_v26 }
0x108d   : > { %9576 = vrot.lane.b32.xlu1 %v17221_v59, %s13794_s28  ;;  %9234 = vrot.lane.b32.xlu0 %v9215_v2, %s13793_s11 }
0x108f   : > { %9578 = vrot.lane.b32.xlu2 %v17218_v55, %s13794_s28  ;;  %v13216_v55 = vld [vmem:[%s18464_s3 + $0x68] sm:$0xff] }
0x1095   : > { %9582 = vrot.lane.b32.xlu1 %v17252_v48, %s13794_s28  ;;  %9580 = vrot.lane.b32.xlu0 %v17254_v27, %s13794_s28 }
0x1097   : > { %9584 = vrot.lane.b32.xlu2 %v17268_v25, %s13794_s28  ;;  %v13183_v25 = vld [vmem:[%s18463_s2 + $0x9c] sm:$0xf] }
0x109d   : > { %9588 = vrot.lane.b32.xlu1 %v9212_v13, %s13794_s28  ;;  %9586 = vrot.lane.b32.xlu0 %v17270_v60, %s13794_s28 }
0x109f   : > { %9590 = vrot.lane.b32.xlu2 %v9213_v62, %s13794_s28 }
0x10a5   : > { %9594 = vrot.lane.b32.xlu1 %v9215_v2, %s13794_s28  ;;  %9592 = vrot.lane.b32.xlu0 %v9214_v51, %s13794_s28  ;;  %v13205_v51 = vld [vmem:[%s18463_s2 + $0xa4] sm:$0xf] }
0x10a7   : > { %9783 = vperm.xlu2 %13571, %v13216_v55  }
0x10cf   : > { %v9221_v59 = vpop.permute.xlu2 %9220 }
0x10d7   : > { %v9227_v60 = vpop.permute.xlu2 %9226 }
0x10d9   : > { %v9219_v26 = vpop.permute.xlu1 %9218  ;;  %v9217_v27 = vpop.permute.xlu0 %9216 }
0x10da   : > { %v9237_v48 = vsel %vm681_vm12, %v9219_v26, %v9221_v59  ;;  %v9236_v61 = vsel %vm681_vm12, %v9217_v27, %v9219_v26  ;;  %v9246_v42 = vsel %vm681_vm12, 0, %v9217_v27 }
0x10db   : > { %v9421_v0 = vsel %vm701_vm10, %v9237_v48, 0  ;;  %v9415_v30 = vsel %vm701_vm10, %v9246_v42, 0  ;;  %v9418_v47 = vsel %vm701_vm10, %v9236_v61, 0 }
0x10dc   : > { %9477 = vmatpush.bf16.msra.mxu2 %v9421_v0  ;;  %9451 = vmatpush.bf16.msra.mxu0 %v9415_v30 }
0x10dd   : > { %9464 = vmatpush.bf16.msra.mxu1 %v9418_v47 }
0x10df   : > { %13197 = vmatmul.msk.bf16.vlgmr.msra.gmra.mxu2 %vm697_vm11, %v13183_v25  ;;  %13195 = vmatmul.msk.bf16.vlgmr.msra.gmra.mxu0 %vm697_vm11, %v13183_v25 }
0x10e0   : > { %13196 = vmatmul.msk.bf16.vlgmr.msra.gmra.mxu1 %vm697_vm11, %v13183_v25 }
0x10e1   : > { %v9233_v53 = vpop.permute.xlu2 %9232 }
0x10e7   : > { %v9223_v35 = vpop.permute.xlu0 %9222 }
0x10e8   : > { %v9238_v22 = vsel %vm681_vm12, %v9221_v59, %v9223_v35 }
0x10e9   : > { %v9424_v45 = vsel %vm701_vm10, %v9238_v22, 0  ;;  %v9225_v5 = vpop.permute.xlu1 %9224  ;;  %v9579_v23 = vpop.permute.xlu2 %9578 }
0x10ea   : > { %9490 = vmatpush.bf16.msra.mxu3 %v9424_v45  ;;  %v9239_v21 = vsel %vm681_vm12, %v9223_v35, %v9225_v5  ;;  %v9240_v34 = vsel %vm681_vm12, %v9225_v5, %v9227_v60 }
0x10eb   : > { %v9427_v11 = vsel %vm701_vm10, %v9239_v21, 0  ;;  %v9430_v17 = vsel %vm701_vm10, %v9240_v34, 0 }
0x10ec   : > { %9503 = vmatpush.bf16.msrb.mxu0 %v9427_v11  ;;  %9516 = vmatpush.bf16.msrb.mxu1 %v9430_v17 }
0x10ed   : > { %13198 = vmatmul.msk.bf16.vlgmr.msra.gmra.mxu3 %vm697_vm11, %v13183_v25 }
0x10ee   : > { %v17377_v31 = vpop.f32.mrf.mxu2  ;;  %v17379_v20 = vpop.f32.mrf.mxu3 }
0x10ef   : > { %13199 = vmatmul.msk.bf16.vlgmr.msrb.gmra.mxu0 %vm697_vm11, %v13183_v25 }
0x10f0   : > { %13200 = vmatmul.msk.bf16.vlgmr.msrb.gmra.mxu1 %vm697_vm11, %v13183_v25 }
0x10f1   : > { %v9585_v50 = vpop.permute.xlu2 %9584 }
0x10f6   : > { %v9317_v0 = vpop.f32.mrf.mxu0 }
0x10f7   : > { %v9231_v58 = vpop.permute.xlu1 %9230  ;;  %v9229_v4 = vpop.permute.xlu0 %9228 }
0x10f8   : > { %v9243_v16 = vsel %vm681_vm12, %v9231_v58, %v9233_v53  ;;  %v9241_v29 = vsel %vm681_vm12, %v9227_v60, %v9229_v4  ;;  %v9242_v39 = vsel %vm681_vm12, %v9229_v4, %v9231_v58  ;;  %v17385_v61 = vpop.f32.mrf.mxu1  ;;  %v9306_v60 = vpop.f32.mrf.mxu3 }
0x10f9   : > { %v9439_v38 = vsel %vm701_vm10, %v9243_v16, 0  ;;  %v9433_v7 = vsel %vm701_vm10, %v9241_v29, 0  ;;  %v9436_v14 = vsel %vm701_vm10, %v9242_v39, 0  ;;  %v9591_v2 = vpop.permute.xlu2 %9590 }
0x10fa   : > { %9529 = vmatpush.bf16.msrb.mxu2 %v9433_v7  ;;  %9542 = vmatpush.bf16.msrb.mxu3 %v9436_v14 }
0x10fb   : > { %9555 = vmatpush.bf16.msra.mxu0 %v9439_v38 }
0x10fd   : > { %13201 = vmatmul.msk.bf16.vlgmr.msrb.gmra.mxu2 %vm697_vm11, %v13183_v25  ;;  %13202 = vmatmul.msk.bf16.vlgmr.msrb.gmra.mxu3 %vm697_vm11, %v13183_v25 }
0x10fe   : > { %v9319_v34 = vpop.f32.mrf.mxu0 }
0x10ff   : > { %v9577_v54 = vpop.permute.xlu1 %9576  ;;  %v9235_v63 = vpop.permute.xlu0 %9234  ;;  %13203 = vmatmul.msk.bf16.vlgmr.msra.gmra.mxu0 %vm697_vm11, %v13183_v25 }
0x1100   : > { %v9596_v1 = vsel %vm1046_vm13, %v9577_v54, %v9579_v23  ;;  %v9244_v57 = vsel %vm681_vm12, %v9233_v53, %v9235_v63  ;;  %v9332_v11 = vpop.f32.mrf.mxu1  ;;  %v17401_v16 = vpop.f32.mrf.mxu3 }
0x1101   : > { %v9611_v12 = vsel %vm701_vm10, %v9596_v1, 0  ;;  %v9442_v8 = vsel %vm701_vm10, %v9244_v57, 0 }
0x1102   : > { %9568 = vmatpush.bf16.msra.mxu1 %v9442_v8  ;;  %9646 = vmatpush.bf16.msra.mxu2 %v9611_v12 }
0x1105   : > { %13204 = vmatmul.msk.bf16.vlgmr.msra.gmra.mxu1 %vm697_vm11, %v13183_v25  ;;  %v9293_v25 = vpop.f32.mrf.mxu2 }
0x1106   : > { %v17404_v29 = vpop.f32.mrf.mxu0 }
0x1107   : > { %v9583_v18 = vpop.permute.xlu1 %9582  ;;  %v9581_v52 = vpop.permute.xlu0 %9580 }
0x1108   : > { %v9599_v62 = vsel %vm1046_vm13, %v9583_v18, %v9585_v50  ;;  %v9597_v13 = vsel %vm1046_vm13, %v9579_v23, %v9581_v52  ;;  %v9598_v33 = vsel %vm1046_vm13, %v9581_v52, %v9583_v18  ;;  %v17406_v39 = vpop.f32.mrf.mxu1  ;;  %v9358_v38 = vpop.f32.mrf.mxu3 }
0x1109   : > { %v9620_v44 = vsel %vm701_vm10, %v9599_v62, 0  ;;  %v9614_v24 = vsel %vm701_vm10, %v9597_v13, 0  ;;  %v9617_v32 = vsel %vm701_vm10, %v9598_v33, 0 }
0x110a   : > { %9659 = vmatpush.bf16.msra.mxu3 %v9614_v24  ;;  %9672 = vmatpush.bf16.msrb.mxu0 %v9617_v32 }
0x110b   : > { %9685 = vmatpush.bf16.msrb.mxu1 %v9620_v44 }
0x110d   : > { %13206 = vmatmul.msk.bf16.vlgmr.msra.gmra.mxu2 %vm697_vm11, %v13205_v51  ;;  %13207 = vmatmul.msk.bf16.vlgmr.msra.gmra.mxu3 %vm697_vm11, %v13205_v51  ;;  %v17399_v4 = vpop.f32.mrf.mxu2 }
0x110e   : > { %v9371_v7 = vpop.f32.mrf.mxu0 }
0x110f   : > { %v9589_v55 = vpop.permute.xlu1 %9588  ;;  %v9587_v59 = vpop.permute.xlu0 %9586  ;;  %13208 = vmatmul.msk.bf16.vlgmr.msrb.gmra.mxu0 %vm697_vm11, %v13205_v51 }
0x1110   : > { %v9602_v26 = vsel %vm1046_vm13, %v9589_v55, %v9591_v2  ;;  %v9600_v48 = vsel %vm1046_vm13, %v9585_v50, %v9587_v59  ;;  %v9601_v27 = vsel %vm1046_vm13, %v9587_v59, %v9589_v55  ;;  %v9384_v14 = vpop.f32.mrf.mxu1  ;;  %v17413_v63 = vpop.f32.mrf.mxu3 }
0x1111   : > { %v9629_v42 = vsel %vm701_vm10, %v9602_v26, 0  ;;  %v9623_v30 = vsel %vm701_vm10, %v9600_v48, 0  ;;  %v9626_v47 = vsel %vm701_vm10, %v9601_v27, 0 }
0x1112   : > { %9698 = vmatpush.bf16.msrb.mxu2 %v9623_v30  ;;  %9711 = vmatpush.bf16.msrb.mxu3 %v9626_v47 }
0x1113   : > { %9724 = vmatpush.bf16.msra.mxu0 %v9629_v42 }
0x1115   : > { %13209 = vmatmul.msk.bf16.vlgmr.msrb.gmra.mxu1 %vm697_vm11, %v13205_v51  ;;  %v9345_v23 = vpop.f32.mrf.mxu2 }
0x1117   : > { %v9595_v35 = vpop.permute.xlu1 %9594  ;;  %v9593_v22 = vpop.permute.xlu0 %9592 }
0x1118   : > { %v9606_v45 = vsel %vm1046_vm13, %v9595_v35, 0  ;;  %v9603_v5 = vsel %vm1046_vm13, %v9591_v2, %v9593_v22  ;;  %v9604_v21 = vsel %vm1046_vm13, %v9593_v22, %v9595_v35  ;;  %v9410_v57 = vpop.f32.mrf.mxu3  ;;  %v17419_v35 = vpop.permute.xlu2 %9783 }
0x1119   : > { %v9637_v17 = vsel %vm701_vm10, %v9606_v45, 0  ;;  %v9632_v53 = vsel %vm701_vm10, %v9603_v5, 0  ;;  %v9635_v58 = vsel %vm701_vm10, %v9604_v21, 0 }
0x111a   : > { %9737 = vmatpush.bf16.msra.mxu1 %v9632_v53  ;;  %9750 = vmatpush.bf16.msra.mxu2 %v9635_v58 }
0x111b   : > { %9763 = vmatpush.bf16.msra.mxu3 %v9637_v17 }
0x111d   : > { %13210 = vmatmul.msk.bf16.vlgmr.msrb.gmra.mxu2 %vm697_vm11, %v13205_v51  ;;  %13211 = vmatmul.msk.bf16.vlgmr.msrb.gmra.mxu3 %vm697_vm11, %v13205_v51  ;;  %v17411_v54 = vpop.f32.mrf.mxu2 }
0x111f   : > { %13212 = vmatmul.msk.bf16.vlgmr.msra.gmra.mxu0 %vm697_vm11, %v13205_v51 }
0x1125   : > { %13213 = vmatmul.msk.bf16.vlgmr.msra.gmra.mxu1 %vm697_vm11, %v13205_v51  ;;  %v9397_v1 = vpop.f32.mrf.mxu2 }
0x112d   : > { %13214 = vmatmul.msk.bf16.vlgmr.msra.gmra.mxu2 %vm697_vm11, %v13205_v51  ;;  %13215 = vmatmul.msk.bf16.vlgmr.msra.gmra.mxu3 %vm697_vm11, %v13205_v51 }
0x115c   : > { %v9453_v12 = vpop.f32.mrf.mxu0 }
0x115d   : > { %v9466_v8 = vpop.f32.mrf.mxu1  ;;  %v9454_v22 = vadd.f32 %v9453_v12, %v17377_v31 }
0x115e   : > { %v9467_v45 = vadd.f32 %v9466_v8, %v17379_v20 }
0x1162   : > { %v9479_v50 = vpop.f32.mrf.mxu2 }
0x1163   : > { %v9480_v47 = vadd.f32 %v9479_v50, %v9317_v0 }
0x1164   : > { %v9455_v18 = vpop.f32.mrf.mxu0 }
0x1165   : > { %v9468_v52 = vpop.f32.mrf.mxu1 }
0x116a   : > { %v9481_v62 = vpop.f32.mrf.mxu2 }
0x116c   : > { %v9505_v13 = vpop.f32.mrf.mxu0 }
0x116d   : > { %v9518_v33 = vpop.f32.mrf.mxu1 }
0x1170   : > { %v9492_v44 = vpop.f32.mrf.mxu3 }
0x1171   : > { %v9493_v34 = vadd.f32 %v9492_v44, %v17385_v61 }
0x1174   : > { %v9507_v24 = vpop.f32.mrf.mxu0 }
0x1175   : > { %v9520_v32 = vpop.f32.mrf.mxu1 }
0x1178   : > { %v9494_v2 = vpop.f32.mrf.mxu3 }
0x117c   : > { %v17415_v55 = vpop.f32.mrf.mxu0 }
0x1180   : > { %v9531_v51 = vpop.f32.mrf.mxu2  ;;  %v9544_v59 = vpop.f32.mrf.mxu3 }
0x1181   : > { %v9532_v24 = vadd.f32 %v9531_v51, %v17404_v29 }
0x1182   : > { %v17417_v26 = vpop.f32.mrf.mxu1 }
0x1184   : > { %v9559_v48 = vpop.f32.mrf.mxu0 }
0x1188   : > { %v9533_v27 = vpop.f32.mrf.mxu2  ;;  %v9546_v42 = vpop.f32.mrf.mxu3 }
0x118a   : > { %v9572_v30 = vpop.f32.mrf.mxu1 }
0x118c   : > { %v9674_v25 = vpop.f32.mrf.mxu0 }
0x118d   : > { %v9771_v60 = vadd.f32 %v9674_v25, %v9480_v47  ;;  %v9506_v25 = vadd.f32 %v9505_v13, %v17399_v4 }
0x118f   : > { %v9788_v5 = vadd.f32 %v17419_v35, %v9771_v60 }
0x1190   : > { %v9648_v21 = vpop.f32.mrf.mxu2  ;;  %v9661_v17 = vpop.f32.mrf.mxu3 }
0x1191   : > { %v9769_v11 = vadd.f32 %v9648_v21, %v9454_v22  ;;  %v9798_v53 = vadd.f32 %v9788_v5, %v16954_v37  ;;  %v9770_v58 = vadd.f32 %v9661_v17, %v9467_v45  ;;  %v9519_v45 = vadd.f32 %v9518_v33, %v17401_v16 }
0x1192   : > { %v9687_v23 = vpop.f32.mrf.mxu1 }
0x1193   : > { %v9786_v0 = vadd.f32 %v17419_v35, %v9769_v11  ;;  %v9772_v38 = vadd.f32 %v9687_v23, %v9493_v34  ;;  %v9787_v7 = vadd.f32 %v17419_v35, %v9770_v58  ;;  %v17429_v31 = vmul.f32 %v9798_v53, %v14392_v9 }
0x1194   : > { %v9676_v1 = vpop.f32.mrf.mxu0  ;;  %v9545_v34 = vadd.f32 %v9544_v59, %v17406_v39 }
0x1195   : > { %v9796_v20 = vadd.f32 %v9786_v0, %v16960_v41  ;;  %v9789_v14 = vadd.f32 %v17419_v35, %v9772_v38  ;;  %v9797_v61 = vadd.f32 %v9787_v7, %v16964_v6  ;;  %v9828_v50 = vmul.f32 0.1, %v17429_v31 }
0x1196   : > { %vm9818_vm5 = vcmp.ge.f32.partialorder %v17429_v31, 0.0 }
0x1197   : > { %v17435_v57 = vmul.f32 %v9796_v20, %v14345_v46  ;;  %v9799_v37 = vadd.f32 %v9789_v14, %v16969_v40  ;;  %v17439_v12 = vmul.f32 %v9797_v61, %v14343_v43  ;;  %v9838_v27 = vsel %vm9818_vm5, %v17429_v31, %v9828_v50  ;;  %v17487_v14 = vld [vmem:[%s18463_s2 + $0xac] sm:$0xf] }
0x1198   : > { %v9650_v8 = vpop.f32.mrf.mxu2  ;;  %v9663_v52 = vpop.f32.mrf.mxu3 }
0x1199   : > { %v9826_v18 = vmul.f32 0.1, %v17435_v57  ;;  %v17444_v41 = vmul.f32 %v9799_v37, %v14394_v49  ;;  %vm9816_vm3 = vcmp.ge.f32.partialorder %v17435_v57, 0.0  ;;  %v9827_v6 = vmul.f32 0.1, %v17439_v12 }
0x119a   : > { %v9689_v62 = vpop.f32.mrf.mxu1  ;;  %vm9817_vm4 = vcmp.ge.f32.partialorder %v17439_v12, 0.0 }
0x119b   : > { %v9829_v40 = vmul.f32 0.1, %v17444_v41  ;;  %v9836_v44 = vsel %vm9816_vm3, %v17435_v57, %v9826_v18  ;;  %vm9819_vm6 = vcmp.ge.f32.partialorder %v17444_v41, 0.0  ;;  %v9837_v32 = vsel %vm9817_vm4, %v17439_v12, %v9827_v6 }
0x119c   : > { %v9726_v2 = vpop.f32.mrf.mxu0  ;;  %v9846_v48 = vpack.c.bf16 %v9837_v32, %v9836_v44 }
0x119d   : > { %v9839_v42 = vsel %vm9819_vm6, %v17444_v41, %v9829_v40  ;;  %v9775_v30 = vadd.f32 %v9726_v2, %v9532_v24 }
0x119e   : > { %v9847_v47 = vpack.c.bf16 %v9839_v42, %v9838_v27  ;;  %v9859_v60 = vunpack.c.h.b16 %v9846_v48  ;;  %v9858_v22 = vunpack.c.l.b16 %v9846_v48 }
0x119f   : > { %v9792_v5 = vadd.f32 %v17419_v35, %v9775_v30 }
0x11a0   : > { %v9700_v21 = vpop.f32.mrf.mxu2  ;;  %v9860_v29 = vunpack.c.l.b16 %v9847_v47  ;;  %v9861_v51 = vunpack.c.h.b16 %v9847_v47  ;;  %v9713_v17 = vpop.f32.mrf.mxu3  ;;  %v17461_v53 = vpack.c.b16 %v9859_v60, %v9859_v60  ;;  %v17463_v58 = vpack.c.b16 %v9858_v22, %v9858_v22 }
0x11a1   : > { %v9773_v11 = vadd.f32 %v9700_v21, %v9506_v25  ;;  %v9802_v23 = vadd.f32 %v9792_v5, %v17015_v56  ;;  %v9774_v4 = vadd.f32 %v9713_v17, %v9519_v45  ;;  %v9558_v25 = vadd.f32 %v17415_v55, %v17411_v54 }
0x11a2   : > { %v9739_v13 = vpop.f32.mrf.mxu1  ;;  %v17466_v0 = vpack.c.b16 %v9860_v29, %v9860_v29  ;;  %v17468_v16 = vpack.c.b16 %v9861_v51, %v9861_v51  ;;  %9880 = vrot.lane.b32.xlu1 %v17461_v53, %s13797_s14  ;;  %9878 = vrot.lane.b32.xlu0 %v17463_v58, %s13797_s14  ;;  %v9915_v39 = vsel %vm701_vm10, %v17463_v58, 0  ;;  %v9918_v56 = vsel %vm701_vm10, %v17461_v53, 0 }
0x11a3   : > { %v9790_v33 = vadd.f32 %v17419_v35, %v9773_v11  ;;  %v9776_v38 = vadd.f32 %v9739_v13, %v9545_v34  ;;  %v9791_v59 = vadd.f32 %v17419_v35, %v9774_v4  ;;  %9951 = vmatpush.bf16.msrb.mxu0 %v9915_v39  ;;  %9964 = vmatpush.bf16.msrb.mxu1 %v9918_v56 }
0x11a4   : > { %v9921_v7 = vsel %vm701_vm10, %v17466_v0, 0  ;;  %v9924_v20 = vsel %vm701_vm10, %v17468_v16, 0  ;;  %v17490_v1 = vmul.f32 %v9802_v23, %v14343_v43  ;;  %9882 = vrot.lane.b32.xlu2 %v17466_v0, %s13797_s14  ;;  %v9728_v8 = vpop.f32.mrf.mxu0  ;;  %v9571_v45 = vadd.f32 %v17417_v26, %v17413_v63 }
0x11a5   : > { %v9800_v61 = vadd.f32 %v9790_v33, %v17023_v15  ;;  %v9793_v37 = vadd.f32 %v17419_v35, %v9776_v38  ;;  %9977 = vmatpush.bf16.msrb.mxu2 %v9921_v7  ;;  %v9801_v50 = vadd.f32 %v9791_v59, %v17031_v10  ;;  %9990 = vmatpush.bf16.msrb.mxu3 %v9924_v20 }
0x11a6   : > { %13219 = vmatmul.msk.bf16.vlgmr.msrb.gmra.mxu0 %vm697_vm11, %v17487_v14  ;;  %13220 = vmatmul.msk.bf16.vlgmr.msrb.gmra.mxu1 %vm697_vm11, %v17487_v14  ;;  %v9832_v10 = vmul.f32 0.1, %v17490_v1  ;;  %vm9822_vm1 = vcmp.ge.f32.partialorder %v17490_v1, 0.0 }
0x11a7   : > { %v17498_v18 = vmul.f32 %v9800_v61, %v14379_v28  ;;  %v9803_v52 = vadd.f32 %v9793_v37, %v17038_v3  ;;  %v17506_v15 = vmul.f32 %v9801_v50, %v14345_v46 }
0x11a8   : > { %v9702_v6 = vpop.f32.mrf.mxu2  ;;  %13221 = vmatmul.msk.bf16.vlgmr.msrb.gmra.mxu2 %vm697_vm11, %v17487_v14  ;;  %v9715_v3 = vpop.f32.mrf.mxu3  ;;  %13222 = vmatmul.msk.bf16.vlgmr.msrb.gmra.mxu3 %vm697_vm11, %v17487_v14  ;;  %v9842_v42 = vsel %vm9822_vm1, %v17490_v1, %v9832_v10 }
0x11a9   : > { %v9830_v62 = vmul.f32 0.1, %v17498_v18  ;;  %v17513_v40 = vmul.f32 %v9803_v52, %v14392_v9  ;;  %vm9820_vm7 = vcmp.ge.f32.partialorder %v17498_v18, 0.0  ;;  %v9831_v44 = vmul.f32 0.1, %v17506_v15 }
0x11aa   : > { %v9741_v24 = vpop.f32.mrf.mxu1  ;;  %vm9821_vm8 = vcmp.ge.f32.partialorder %v17506_v15, 0.0  ;;  %9884 = vrot.lane.b32.xlu0 %v17468_v16, %s13797_s14 }
0x11ab   : > { %v9833_v32 = vmul.f32 0.1, %v17513_v40  ;;  %v9840_v2 = vsel %vm9820_vm7, %v17498_v18, %v9830_v62  ;;  %vm9823_vm2 = vcmp.ge.f32.partialorder %v17513_v40, 0.0  ;;  %v9841_v48 = vsel %vm9821_vm8, %v17506_v15, %v9831_v44 }
0x11ac   : > { %v9848_v27 = vpack.c.bf16 %v9841_v48, %v9840_v2 }
0x11ad   : > { %v9843_v30 = vsel %vm9823_vm2, %v17513_v40, %v9833_v32 }
0x11ae   : > { %v9849_v47 = vpack.c.bf16 %v9843_v30, %v9842_v42  ;;  %v9863_v60 = vunpack.c.h.b16 %v9848_v27  ;;  %v9862_v22 = vunpack.c.l.b16 %v9848_v27  ;;  %v13217_v27 = vld [vmem:[%s18463_s2 + $0xa8] sm:$0xf] }
0x11b0   : > { %v9752_v5 = vpop.f32.mrf.mxu2  ;;  %v9864_v21 = vunpack.c.l.b16 %v9849_v47  ;;  %v9865_v29 = vunpack.c.h.b16 %v9849_v47  ;;  %v9765_v34 = vpop.f32.mrf.mxu3  ;;  %v9873_v11 = vpack.c.b16 %v9863_v60, %v9863_v60  ;;  %v9872_v17 = vpack.c.b16 %v9862_v22, %v9862_v22 }
0x11b1   : > { %v9777_v51 = vadd.f32 %v9752_v5, %v9558_v25  ;;  %v9778_v23 = vadd.f32 %v9765_v34, %v9571_v45 }
0x11b2   : > { %v9874_v4 = vpack.c.b16 %v9864_v21, %v9864_v21  ;;  %v9875_v13 = vpack.c.b16 %v9865_v29, %v9865_v29  ;;  %9888 = vrot.lane.b32.xlu2 %v9873_v11, %s13797_s14  ;;  %9886 = vrot.lane.b32.xlu1 %v9872_v17, %s13797_s14  ;;  %v9927_v54 = vsel %vm701_vm10, %v9872_v17, 0  ;;  %v9930_v63 = vsel %vm701_vm10, %v9873_v11, 0 }
0x11b3   : > { %v9794_v33 = vadd.f32 %v17419_v35, %v9777_v51  ;;  %v9795_v55 = vadd.f32 %v17419_v35, %v9778_v23  ;;  %10003 = vmatpush.bf16.msra.mxu0 %v9927_v54  ;;  %10016 = vmatpush.bf16.msra.mxu1 %v9930_v63 }
0x11b4   : > { %v9933_v26 = vsel %vm701_vm10, %v9874_v4, 0  ;;  %v9936_v38 = vsel %vm701_vm10, %v9875_v13, 0  ;;  %9890 = vrot.lane.b32.xlu0 %v9874_v4, %s13797_s14 }
0x11b5   : > { %v9804_v39 = vadd.f32 %v9794_v33, %v17070_v36  ;;  %10029 = vmatpush.bf16.msra.mxu2 %v9933_v26  ;;  %v9805_v56 = vadd.f32 %v9795_v55, %v17077_v19  ;;  %10042 = vmatpush.bf16.msra.mxu3 %v9936_v38 }
0x11b6   : > { %13223 = vmatmul.msk.bf16.vlgmr.msra.gmra.mxu0 %vm697_vm11, %v17487_v14  ;;  %13224 = vmatmul.msk.bf16.vlgmr.msra.gmra.mxu1 %vm697_vm11, %v17487_v14 }
0x11b7   : > { %v17545_v59 = vmul.f32 %v9804_v39, %v14394_v49  ;;  %v17552_v35 = vmul.f32 %v9805_v56, %v14379_v28 }
0x11b8   : > { %v9754_v7 = vpop.f32.mrf.mxu2  ;;  %13225 = vmatmul.msk.bf16.vlgmr.msra.gmra.mxu2 %vm697_vm11, %v17487_v14  ;;  %v9767_v19 = vpop.f32.mrf.mxu3  ;;  %13226 = vmatmul.msk.bf16.vlgmr.msra.gmra.mxu3 %vm697_vm11, %v17487_v14 }
0x11b9   : > { %v9834_v36 = vmul.f32 0.1, %v17545_v59  ;;  %vm9824_vm3 = vcmp.ge.f32.partialorder %v17545_v59, 0.0  ;;  %v9835_v20 = vmul.f32 0.1, %v17552_v35  ;;  %vm9825_vm4 = vcmp.ge.f32.partialorder %v17552_v35, 0.0 }
0x11ba   : > { %9892 = vrot.lane.b32.xlu1 %v9875_v13, %s13797_s14 }
0x11bb   : > { %v9844_v61 = vsel %vm9824_vm3, %v17545_v59, %v9834_v36  ;;  %v9845_v37 = vsel %vm9825_vm4, %v17552_v35, %v9835_v20  ;;  %v13239_v36 = vld [vmem:[%s18463_s2 + $0xb0] sm:$0xf] }
0x11bc   : > { %v9850_v8 = vpack.c.bf16 %v9845_v37, %v9844_v61 }
0x11be   : > { %v9866_v50 = vunpack.c.l.b16 %v9850_v8  ;;  %v9867_v52 = vunpack.c.h.b16 %v9850_v8 }
0x11c0   : > { %v9876_v6 = vpack.c.b16 %v9866_v50, %v9866_v50  ;;  %v9877_v10 = vpack.c.b16 %v9867_v52, %v9867_v52 }
0x11c2   : > { %9894 = vrot.lane.b32.xlu2 %v9876_v6, %s13797_s14  ;;  %10238 = vrot.lane.b32.xlu1 %v17463_v58, %s13798_s27  ;;  %v9939_v62 = vsel %vm701_vm10, %v9876_v6, 0  ;;  %v9942_v3 = vsel %vm701_vm10, %v9877_v10, 0 }
0x11c3   : > { %9896 = vrot.lane.b32.xlu0 %v9877_v10, %s13797_s14  ;;  %10055 = vmatpush.bf16.msrb.mxu0 %v9939_v62  ;;  %s12512_s14 = scalar_lea.hbm %s18465_s4, %s13371_s13 }
0x11c4   : > { %10068 = vmatpush.bf16.msrb.mxu1 %v9942_v3  ;;  %s12515_s29 = sshll.u32 %s12512_s14, 4  ;;  %s12516_s29 = int_to_ptr.hbm [resolvable:$true] %s12515_s29 }
0x11c6   : > { %13227 = vmatmul.msk.bf16.vlgmr.msrb.gmra.mxu0 %vm697_vm11, %v17487_v14 }
0x11c7   : > { %13228 = vmatmul.msk.bf16.vlgmr.msrb.gmra.mxu1 %vm697_vm11, %v17487_v14 }
0x11ca   : > { %10240 = vrot.lane.b32.xlu2 %v17461_v53, %s13798_s27  ;;  %10244 = vrot.lane.b32.xlu1 %v17468_v16, %s13798_s27  ;;  %v13250_v53 = vld [vmem:[%s18464_s3 + $0x70] sm:$0xff] }
0x11cb   : > { %10242 = vrot.lane.b32.xlu0 %v17466_v0, %s13798_s27 }
0x11d2   : > { %10246 = vrot.lane.b32.xlu2 %v9872_v17, %s13798_s27  ;;  %10250 = vrot.lane.b32.xlu1 %v9874_v4, %s13798_s27 }
0x11d3   : > { %10248 = vrot.lane.b32.xlu0 %v9873_v11, %s13798_s27 }
0x11da   : > { %10252 = vrot.lane.b32.xlu2 %v9875_v13, %s13798_s27  ;;  %10256 = vrot.lane.b32.xlu1 %v9877_v10, %s13798_s27 }
0x11db   : > { %10254 = vrot.lane.b32.xlu0 %v9876_v6, %s13798_s27 }
0x11e2   : > { %10445 = vperm.xlu2 %13571, %v13250_v53  }
0x11fe   : > { %v9883_v58 = vpop.permute.xlu2 %9882 }
0x120c   : > { %v9889_v42 = vpop.permute.xlu2 %9888 }
0x1214   : > { %v9881_v16 = vpop.permute.xlu1 %9880  ;;  %v9879_v0 = vpop.permute.xlu0 %9878 }
0x1215   : > { %v9899_v14 = vsel %vm2006_vm9, %v9881_v16, %v9883_v58  ;;  %v9898_v44 = vsel %vm2006_vm9, %v9879_v0, %v9881_v16  ;;  %v9908_v24 = vsel %vm2006_vm9, 0, %v9879_v0 }
0x1216   : > { %v10083_v32 = vsel %vm701_vm10, %v9899_v14, 0  ;;  %v10077_v2 = vsel %vm701_vm10, %v9908_v24, 0  ;;  %v10080_v48 = vsel %vm701_vm10, %v9898_v44, 0 }
0x1217   : > { %10113 = vmatpush.bf16.msrb.mxu2 %v10077_v2  ;;  %10126 = vmatpush.bf16.msrb.mxu3 %v10080_v48 }
0x1218   : > { %10139 = vmatpush.bf16.msra.mxu0 %v10083_v32 }
0x121a   : > { %13229 = vmatmul.msk.bf16.vlgmr.msrb.gmra.mxu2 %vm697_vm11, %v13217_v27  ;;  %13230 = vmatmul.msk.bf16.vlgmr.msrb.gmra.mxu3 %vm697_vm11, %v13217_v27 }
0x121b   : > { %13231 = vmatmul.msk.bf16.vlgmr.msra.gmra.mxu0 %vm697_vm11, %v13217_v27 }
0x121c   : > { %v9885_v30 = vpop.permute.xlu0 %9884  ;;  %v9895_v60 = vpop.permute.xlu2 %9894 }
0x121d   : > { %v9900_v47 = vsel %vm2006_vm9, %v9883_v58, %v9885_v30 }
0x121e   : > { %v10086_v25 = vsel %vm701_vm10, %v9900_v47, 0 }
0x121f   : > { %10152 = vmatpush.bf16.msra.mxu1 %v10086_v25 }
0x1222   : > { %13232 = vmatmul.msk.bf16.vlgmr.msra.gmra.mxu1 %vm697_vm11, %v13217_v27 }
0x1223   : > { %v17636_v62 = vpop.f32.mrf.mxu0  ;;  %v17638_v3 = vpop.f32.mrf.mxu1 }
0x1224   : > { %v9887_v22 = vpop.permute.xlu1 %9886  ;;  %v10241_v13 = vpop.permute.xlu2 %10240 }
0x1225   : > { %v9901_v45 = vsel %vm2006_vm9, %v9885_v30, %v9887_v22  ;;  %v9902_v5 = vsel %vm2006_vm9, %v9887_v22, %v9889_v42 }
0x1226   : > { %v10089_v21 = vsel %vm701_vm10, %v9901_v45, 0  ;;  %v10092_v29 = vsel %vm701_vm10, %v9902_v5, 0  ;;  %v9891_v51 = vpop.permute.xlu0 %9890 }
0x1227   : > { %v9903_v34 = vsel %vm2006_vm9, %v9889_v42, %v9891_v51  ;;  %10165 = vmatpush.bf16.msra.mxu2 %v10089_v21  ;;  %10178 = vmatpush.bf16.msra.mxu3 %v10092_v29 }
0x1228   : > { %v10095_v11 = vsel %vm701_vm10, %v9903_v34, 0 }
0x1229   : > { %10191 = vmatpush.bf16.msrb.mxu0 %v10095_v11 }
0x122a   : > { %13233 = vmatmul.msk.bf16.vlgmr.msra.gmra.mxu2 %vm697_vm11, %v13217_v27  ;;  %13234 = vmatmul.msk.bf16.vlgmr.msra.gmra.mxu3 %vm697_vm11, %v13217_v27 }
0x122b   : > { %v17640_v58 = vpop.f32.mrf.mxu2  ;;  %v17643_v14 = vpop.f32.mrf.mxu3 }
0x122c   : > { %v9893_v17 = vpop.permute.xlu1 %9892  ;;  %13235 = vmatmul.msk.bf16.vlgmr.msrb.gmra.mxu0 %vm697_vm11, %v13217_v27  ;;  %v10247_v7 = vpop.permute.xlu2 %10246 }
0x122d   : > { %v9904_v23 = vsel %vm2006_vm9, %v9891_v51, %v9893_v17  ;;  %v9905_v4 = vsel %vm2006_vm9, %v9893_v17, %v9895_v60  ;;  %v9968_v42 = vpop.f32.mrf.mxu1 }
0x122e   : > { %v10098_v33 = vsel %vm701_vm10, %v9904_v23, 0  ;;  %v10101_v54 = vsel %vm701_vm10, %v9905_v4, 0 }
0x122f   : > { %10204 = vmatpush.bf16.msrb.mxu1 %v10098_v33  ;;  %10217 = vmatpush.bf16.msrb.mxu2 %v10101_v54 }
0x1232   : > { %13236 = vmatmul.msk.bf16.vlgmr.msrb.gmra.mxu1 %vm697_vm11, %v13217_v27 }
0x1233   : > { %v9981_v47 = vpop.f32.mrf.mxu2  ;;  %v9994_v22 = vpop.f32.mrf.mxu3 }
0x1234   : > { %v10239_v63 = vpop.permute.xlu1 %10238  ;;  %v10253_v10 = vpop.permute.xlu2 %10252 }
0x1235   : > { %v10258_v55 = vsel %vm2368_vm14, %v10239_v63, %v10241_v13  ;;  %v9897_v26 = vpop.permute.xlu0 %9896  ;;  %v17660_v11 = vpop.f32.mrf.mxu1 }
0x1236   : > { %v10273_v38 = vsel %vm701_vm10, %v10258_v55, 0  ;;  %v9906_v39 = vsel %vm2006_vm9, %v9895_v60, %v9897_v26 }
0x1237   : > { %v10104_v56 = vsel %vm701_vm10, %v9906_v39, 0  ;;  %10308 = vmatpush.bf16.msra.mxu0 %v10273_v38 }
0x1238   : > { %10230 = vmatpush.bf16.msrb.mxu3 %v10104_v56 }
0x123a   : > { %13237 = vmatmul.msk.bf16.vlgmr.msrb.gmra.mxu2 %vm697_vm11, %v13217_v27 }
0x123b   : > { %13238 = vmatmul.msk.bf16.vlgmr.msrb.gmra.mxu3 %vm697_vm11, %v13217_v27  ;;  %v9955_v27 = vpop.f32.mrf.mxu0  ;;  %v17662_v17 = vpop.f32.mrf.mxu2 }
0x123c   : > { %v10245_v19 = vpop.permute.xlu1 %10244  ;;  %13240 = vmatmul.msk.bf16.vlgmr.msra.gmra.mxu0 %vm697_vm11, %v13239_v36  ;;  %v17664_v23 = vpop.f32.mrf.mxu3 }
0x123d   : > { %v10261_v20 = vsel %vm2368_vm14, %v10245_v19, %v10247_v7  ;;  %v10243_v61 = vpop.permute.xlu0 %10242 }
0x123e   : > { %v10282_v37 = vsel %vm701_vm10, %v10261_v20, 0  ;;  %v10259_v8 = vsel %vm2368_vm14, %v10241_v13, %v10243_v61  ;;  %v10260_v50 = vsel %vm2368_vm14, %v10243_v61, %v10245_v19  ;;  %v10020_v13 = vpop.f32.mrf.mxu1 }
0x123f   : > { %v10276_v52 = vsel %vm701_vm10, %v10259_v8, 0  ;;  %v10279_v6 = vsel %vm701_vm10, %v10260_v50, 0  ;;  %10347 = vmatpush.bf16.msra.mxu3 %v10282_v37 }
0x1240   : > { %10321 = vmatpush.bf16.msra.mxu1 %v10276_v52  ;;  %10334 = vmatpush.bf16.msra.mxu2 %v10279_v6 }
0x1243   : > { %13241 = vmatmul.msk.bf16.vlgmr.msra.gmra.mxu1 %vm697_vm11, %v13239_v36  ;;  %v10005_v34 = vpop.f32.mrf.mxu0  ;;  %v10033_v33 = vpop.f32.mrf.mxu2 }
0x1244   : > { %v10251_v53 = vpop.permute.xlu1 %10250  ;;  %v10046_v54 = vpop.f32.mrf.mxu3 }
0x1245   : > { %v10264_v16 = vsel %vm2368_vm14, %v10251_v53, %v10253_v10  ;;  %v10249_v0 = vpop.permute.xlu0 %10248 }
0x1246   : > { %v10291_v44 = vsel %vm701_vm10, %v10264_v16, 0  ;;  %v10262_v24 = vsel %vm2368_vm14, %v10247_v7, %v10249_v0  ;;  %v10263_v32 = vsel %vm2368_vm14, %v10249_v0, %v10251_v53  ;;  %v17672_v55 = vpop.f32.mrf.mxu1 }
0x1247   : > { %v10285_v2 = vsel %vm701_vm10, %v10262_v24, 0  ;;  %v10288_v48 = vsel %vm701_vm10, %v10263_v32, 0  ;;  %10386 = vmatpush.bf16.msrb.mxu2 %v10291_v44 }
0x1248   : > { %10360 = vmatpush.bf16.msrb.mxu0 %v10285_v2  ;;  %10373 = vmatpush.bf16.msrb.mxu1 %v10288_v48  ;;  %v17679_v2 = vpop.permute.xlu2 %10445 }
0x124a   : > { %13242 = vmatmul.msk.bf16.vlgmr.msra.gmra.mxu2 %vm697_vm11, %v13239_v36 }
0x124b   : > { %13243 = vmatmul.msk.bf16.vlgmr.msra.gmra.mxu3 %vm697_vm11, %v13239_v36  ;;  %v10007_v4 = vpop.f32.mrf.mxu0 }
0x124c   : > { %v10257_v30 = vpop.permute.xlu1 %10256  ;;  %13244 = vmatmul.msk.bf16.vlgmr.msrb.gmra.mxu0 %vm697_vm11, %v13239_v36 }
0x124d   : > { %v10268_v25 = vsel %vm2368_vm14, %v10257_v30, 0  ;;  %v10255_v60 = vpop.permute.xlu0 %10254 }
0x124e   : > { %v10299_v45 = vsel %vm701_vm10, %v10268_v25, 0  ;;  %v10265_v5 = vsel %vm2368_vm14, %v10253_v10, %v10255_v60  ;;  %v10266_v21 = vsel %vm2368_vm14, %v10255_v60, %v10257_v30  ;;  %v10072_v38 = vpop.f32.mrf.mxu1 }
0x124f   : > { %v10294_v29 = vsel %vm701_vm10, %v10265_v5, 0  ;;  %v10297_v51 = vsel %vm701_vm10, %v10266_v21, 0  ;;  %10425 = vmatpush.bf16.msra.mxu1 %v10299_v45 }
0x1250   : > { %10399 = vmatpush.bf16.msrb.mxu3 %v10294_v29  ;;  %10412 = vmatpush.bf16.msra.mxu0 %v10297_v51 }
0x1253   : > { %13245 = vmatmul.msk.bf16.vlgmr.msrb.gmra.mxu1 %vm697_vm11, %v13239_v36  ;;  %v17670_v63 = vpop.f32.mrf.mxu0 }
0x125a   : > { %13246 = vmatmul.msk.bf16.vlgmr.msrb.gmra.mxu2 %vm697_vm11, %v13239_v36 }
0x125b   : > { %13247 = vmatmul.msk.bf16.vlgmr.msrb.gmra.mxu3 %vm697_vm11, %v13239_v36  ;;  %v10059_v26 = vpop.f32.mrf.mxu0 }
0x125c   : > { %13248 = vmatmul.msk.bf16.vlgmr.msra.gmra.mxu0 %vm697_vm11, %v13239_v36 }
0x1263   : > { %13249 = vmatmul.msk.bf16.vlgmr.msra.gmra.mxu1 %vm697_vm11, %v13239_v36 }
0x1298   : > { %v10141_v39 = vpop.f32.mrf.mxu0 }
0x129d   : > { %v10115_v56 = vpop.f32.mrf.mxu2  ;;  %v10128_v7 = vpop.f32.mrf.mxu3 }
0x129e   : > { %v10116_v44 = vadd.f32 %v10115_v56, %v17636_v62  ;;  %v10129_v30 = vadd.f32 %v10128_v7, %v17638_v3  ;;  %v10142_v56 = vadd.f32 %v10141_v39, %v17640_v58 }
0x129f   : > { %v10154_v19 = vpop.f32.mrf.mxu1 }
0x12a0   : > { %v10143_v20 = vpop.f32.mrf.mxu0 }
0x12a5   : > { %v10117_v61 = vpop.f32.mrf.mxu2  ;;  %v10130_v37 = vpop.f32.mrf.mxu3 }
0x12a6   : > { %v10155_v37 = vadd.f32 %v10154_v19, %v17643_v14 }
0x12a7   : > { %v10156_v8 = vpop.f32.mrf.mxu1 }
0x12a9   : > { %v17674_v50 = vpop.f32.mrf.mxu0 }
0x12ad   : > { %v10167_v52 = vpop.f32.mrf.mxu2  ;;  %v10180_v6 = vpop.f32.mrf.mxu3 }
0x12ae   : > { %v10168_v4 = vadd.f32 %v10167_v52, %v10005_v34  ;;  %v10181_v52 = vadd.f32 %v10180_v6, %v17660_v11 }
0x12af   : > { %v17676_v10 = vpop.f32.mrf.mxu1 }
0x12b1   : > { %v10195_v36 = vpop.f32.mrf.mxu0 }
0x12b5   : > { %v10169_v53 = vpop.f32.mrf.mxu2  ;;  %v10182_v16 = vpop.f32.mrf.mxu3 }
0x12b7   : > { %v10208_v0 = vpop.f32.mrf.mxu1 }
0x12b9   : > { %v10310_v24 = vpop.f32.mrf.mxu0 }
0x12ba   : > { %v10431_v32 = vadd.f32 %v10310_v24, %v10116_v44 }
0x12bc   : > { %v10448_v48 = vadd.f32 %v17679_v2, %v10431_v32  ;;  %v17711_v32 = vld [vmem:[%s18463_s2 + $0xb8] sm:$0xf] }
0x12bd   : > { %v17682_v27 = vpop.f32.mrf.mxu2 }
0x12be   : > { %v17684_v42 = vpop.f32.mrf.mxu3  ;;  %v10468_v25 = vmul.f32 0.1, %v10448_v48  ;;  %vm10458_vm9 = vcmp.ge.f32.partialorder %v10448_v48, 0.0 }
0x12c0   : > { %v10323_v47 = vpop.f32.mrf.mxu1  ;;  %v10478_v62 = vsel %vm10458_vm9, %v10448_v48, %v10468_v25 }
0x12c1   : > { %v10432_v60 = vadd.f32 %v10323_v47, %v10129_v30  ;;  %v10312_v22 = vpop.f32.mrf.mxu0  ;;  %v10488_v13 = vmul.f32 %v10478_v62, %v14345_v46 }
0x12c3   : > { %v10449_v45 = vadd.f32 %v17679_v2, %v10432_v60 }
0x12c5   : > { %vm10459_vm14 = vcmp.ge.f32.partialorder %v10449_v45, 0.0  ;;  %v10469_v5 = vmul.f32 0.1, %v10449_v45  ;;  %v10221_v21 = vpop.f32.mrf.mxu2 }
0x12c6   : > { %v10234_v29 = vpop.f32.mrf.mxu3 }
0x12c7   : > { %v10479_v51 = vsel %vm10459_vm14, %v10449_v45, %v10469_v5 }
0x12c8   : > { %v10489_v33 = vmul.f32 %v10479_v51, %v14343_v43  ;;  %v10325_v54 = vpop.f32.mrf.mxu1 }
0x12c9   : > { %v10362_v3 = vpop.f32.mrf.mxu0 }
0x12ca   : > { %v10435_v26 = vadd.f32 %v10362_v3, %v10168_v4  ;;  %v10498_v38 = vpack.c.bf16 %v10489_v33, %v10488_v13  ;;  %v10220_v4 = vadd.f32 %v17682_v27, %v17670_v63  ;;  %v10207_v27 = vadd.f32 %v17676_v10, %v17664_v23 }
0x12cc   : > { %v10452_v7 = vadd.f32 %v17679_v2, %v10435_v26  ;;  %v10511_v20 = vunpack.c.h.b16 %v10498_v38  ;;  %v10510_v61 = vunpack.c.l.b16 %v10498_v38 }
0x12cd   : > { %v10336_v8 = vpop.f32.mrf.mxu2 }
0x12ce   : > { %v10433_v36 = vadd.f32 %v10336_v8, %v10142_v56  ;;  %v10349_v53 = vpop.f32.mrf.mxu3  ;;  %v17693_v34 = vpack.c.b16 %v10511_v20, %v10511_v20  ;;  %v17696_v0 = vpack.c.b16 %v10510_v61, %v10510_v61  ;;  %v10472_v44 = vmul.f32 0.1, %v10452_v7 }
0x12cf   : > { %v10434_v16 = vadd.f32 %v10349_v53, %v10155_v37  ;;  %vm10462_vm5 = vcmp.ge.f32.partialorder %v10452_v7, 0.0  ;;  %v10194_v61 = vadd.f32 %v17674_v50, %v17662_v17 }
0x12d0   : > { %v10450_v24 = vadd.f32 %v17679_v2, %v10433_v36  ;;  %v10375_v58 = vpop.f32.mrf.mxu1  ;;  %10532 = vrot.lane.b32.xlu1 %v17693_v34, %s13793_s11  ;;  %v10570_v14 = vsel %vm701_vm10, %v17693_v34, 0  ;;  %10530 = vrot.lane.b32.xlu0 %v17696_v0, %s13793_s11  ;;  %v10567_v11 = vsel %vm701_vm10, %v17696_v0, 0  ;;  %v10482_v25 = vsel %vm10462_vm5, %v10452_v7, %v10472_v44 }
0x12d1   : > { %v10451_v39 = vadd.f32 %v17679_v2, %v10434_v16  ;;  %v10436_v19 = vadd.f32 %v10375_v58, %v10181_v52  ;;  %10616 = vmatpush.bf16.msra.mxu3 %v10570_v14  ;;  %v10364_v6 = vpop.f32.mrf.mxu0  ;;  %10603 = vmatpush.bf16.msra.mxu2 %v10567_v11  ;;  %v10492_v13 = vmul.f32 %v10482_v25, %v14379_v28 }
0x12d2   : > { %vm10460_vm6 = vcmp.ge.f32.partialorder %v10450_v24, 0.0  ;;  %v10470_v48 = vmul.f32 0.1, %v10450_v24  ;;  %v10233_v16 = vadd.f32 %v17684_v42, %v17672_v55 }
0x12d3   : > { %vm10461_vm7 = vcmp.ge.f32.partialorder %v10451_v39, 0.0  ;;  %v10471_v30 = vmul.f32 0.1, %v10451_v39  ;;  %v10453_v47 = vadd.f32 %v17679_v2, %v10436_v19 }
0x12d4   : > { %v10480_v60 = vsel %vm10460_vm6, %v10450_v24, %v10470_v48  ;;  %13254 = vmatmul.msk.bf16.vlgmr.msra.gmra.mxu3 %vm697_vm11, %v17711_v32  ;;  %13253 = vmatmul.msk.bf16.vlgmr.msra.gmra.mxu2 %vm697_vm11, %v17711_v32 }
0x12d5   : > { %v10490_v22 = vmul.f32 %v10480_v60, %v14392_v9  ;;  %v10481_v45 = vsel %vm10461_vm7, %v10451_v39, %v10471_v30  ;;  %vm10463_vm8 = vcmp.ge.f32.partialorder %v10453_v47, 0.0  ;;  %v10473_v62 = vmul.f32 0.1, %v10453_v47  ;;  %v10338_v5 = vpop.f32.mrf.mxu2 }
0x12d6   : > { %v10491_v21 = vmul.f32 %v10481_v45, %v14394_v49  ;;  %v10351_v29 = vpop.f32.mrf.mxu3 }
0x12d7   : > { %v10483_v51 = vsel %vm10463_vm8, %v10453_v47, %v10473_v62 }
0x12d8   : > { %v10493_v33 = vmul.f32 %v10483_v51, %v14345_v46  ;;  %v10377_v54 = vpop.f32.mrf.mxu1  ;;  %v10499_v3 = vpack.c.bf16 %v10491_v21, %v10490_v22 }
0x12d9   : > { %v10414_v26 = vpop.f32.mrf.mxu0 }
0x12da   : > { %v10439_v38 = vadd.f32 %v10414_v26, %v10220_v4  ;;  %v10513_v56 = vunpack.c.h.b16 %v10499_v3  ;;  %v10512_v7 = vunpack.c.l.b16 %v10499_v3  ;;  %v10500_v20 = vpack.c.bf16 %v10493_v33, %v10492_v13 }
0x12dc   : > { %v10456_v37 = vadd.f32 %v17679_v2, %v10439_v38  ;;  %v17727_v8 = vpack.c.b16 %v10513_v56, %v10513_v56  ;;  %v17729_v36 = vpack.c.b16 %v10512_v7, %v10512_v7  ;;  %v10514_v63 = vunpack.c.l.b16 %v10500_v20 }
0x12dd   : > { %v10388_v53 = vpop.f32.mrf.mxu2  ;;  %v10515_v52 = vunpack.c.h.b16 %v10500_v20 }
0x12de   : > { %v10437_v44 = vadd.f32 %v10388_v53, %v10194_v61  ;;  %v10401_v24 = vpop.f32.mrf.mxu3  ;;  %10536 = vrot.lane.b32.xlu0 %v17727_v8, %s13793_s11  ;;  %10534 = vrot.lane.b32.xlu2 %v17729_v36, %s13793_s11  ;;  %v10573_v17 = vsel %vm701_vm10, %v17729_v36, 0  ;;  %v10576_v23 = vsel %vm701_vm10, %v17727_v8, 0  ;;  %v17743_v10 = vpack.c.b16 %v10514_v63, %v10514_v63 }
0x12df   : > { %v10438_v50 = vadd.f32 %v10401_v24, %v10207_v27  ;;  %10629 = vmatpush.bf16.msrb.mxu0 %v10573_v17  ;;  %v17745_v58 = vpack.c.b16 %v10515_v52, %v10515_v52  ;;  %v10476_v55 = vmul.f32 0.1, %v10456_v37  ;;  %10642 = vmatpush.bf16.msrb.mxu1 %v10576_v23  ;;  %vm10466_vm1 = vcmp.ge.f32.partialorder %v10456_v37, 0.0 }
0x12e0   : > { %v10454_v42 = vadd.f32 %v17679_v2, %v10437_v44  ;;  %v10427_v14 = vpop.f32.mrf.mxu1  ;;  %10538 = vrot.lane.b32.xlu1 %v17743_v10, %s13793_s11  ;;  %v10579_v11 = vsel %vm701_vm10, %v17743_v10, 0 }
0x12e1   : > { %v10455_v39 = vadd.f32 %v17679_v2, %v10438_v50  ;;  %v10440_v19 = vadd.f32 %v10427_v14, %v10233_v16  ;;  %v10416_v6 = vpop.f32.mrf.mxu0  ;;  %10655 = vmatpush.bf16.msrb.mxu2 %v10579_v11  ;;  %v10582_v30 = vsel %vm701_vm10, %v17745_v58, 0  ;;  %v10486_v60 = vsel %vm10466_vm1, %v10456_v37, %v10476_v55 }
0x12e2   : > { %vm10464_vm2 = vcmp.ge.f32.partialorder %v10454_v42, 0.0  ;;  %v10474_v48 = vmul.f32 0.1, %v10454_v42  ;;  %13255 = vmatmul.msk.bf16.vlgmr.msrb.gmra.mxu0 %vm697_vm11, %v17711_v32  ;;  %10668 = vmatpush.bf16.msrb.mxu3 %v10582_v30  ;;  %v10496_v4 = vmul.f32 %v10486_v60, %v14394_v49 }
0x12e3   : > { %vm10465_vm3 = vcmp.ge.f32.partialorder %v10455_v39, 0.0  ;;  %v10475_v47 = vmul.f32 0.1, %v10455_v39  ;;  %v10457_v25 = vadd.f32 %v17679_v2, %v10440_v19  ;;  %13256 = vmatmul.msk.bf16.vlgmr.msrb.gmra.mxu1 %vm697_vm11, %v17711_v32 }
0x12e4   : > { %v10484_v22 = vsel %vm10464_vm2, %v10454_v42, %v10474_v48  ;;  %13257 = vmatmul.msk.bf16.vlgmr.msrb.gmra.mxu2 %vm697_vm11, %v17711_v32 }
0x12e5   : > { %v10494_v45 = vmul.f32 %v10484_v22, %v14343_v43  ;;  %v10485_v62 = vsel %vm10465_vm3, %v10455_v39, %v10475_v47  ;;  %vm10467_vm4 = vcmp.ge.f32.partialorder %v10457_v25, 0.0  ;;  %v10477_v5 = vmul.f32 0.1, %v10457_v25  ;;  %v10390_v21 = vpop.f32.mrf.mxu2  ;;  %13258 = vmatmul.msk.bf16.vlgmr.msrb.gmra.mxu3 %vm697_vm11, %v17711_v32 }
0x12e6   : > { %v10495_v29 = vmul.f32 %v10485_v62, %v14392_v9  ;;  %v10403_v51 = vpop.f32.mrf.mxu3  ;;  %10540 = vrot.lane.b32.xlu2 %v17745_v58, %s13793_s11 }
0x12e7   : > { %v10487_v2 = vsel %vm10467_vm4, %v10457_v25, %v10477_v5 }
0x12e8   : > { %v10497_v13 = vmul.f32 %v10487_v2, %v14379_v28  ;;  %v10429_v33 = vpop.f32.mrf.mxu1  ;;  %v10501_v54 = vpack.c.bf16 %v10495_v29, %v10494_v45 }
0x12ea   : > { %v10517_v3 = vunpack.c.h.b16 %v10501_v54  ;;  %v10516_v26 = vunpack.c.l.b16 %v10501_v54  ;;  %v10502_v38 = vpack.c.bf16 %v10497_v13, %v10496_v4 }
0x12ec   : > { %v10527_v56 = vpack.c.b16 %v10517_v3, %v10517_v3  ;;  %v10526_v7 = vpack.c.b16 %v10516_v26, %v10516_v26  ;;  %v10518_v20 = vunpack.c.l.b16 %v10502_v38  ;;  %v10519_v61 = vunpack.c.h.b16 %v10502_v38 }
0x12ee   : > { %10544 = vrot.lane.b32.xlu1 %v10527_v56, %s13793_s11  ;;  %10542 = vrot.lane.b32.xlu0 %v10526_v7, %s13793_s11  ;;  %v10585_v37 = vsel %vm701_vm10, %v10526_v7, 0  ;;  %v10588_v63 = vsel %vm701_vm10, %v10527_v56, 0  ;;  %v10528_v27 = vpack.c.b16 %v10518_v20, %v10518_v20  ;;  %v10529_v53 = vpack.c.b16 %v10519_v61, %v10519_v61 }
0x12ef   : > { %10681 = vmatpush.bf16.msra.mxu0 %v10585_v37  ;;  %10694 = vmatpush.bf16.msra.mxu1 %v10588_v63 }
0x12f0   : > { %10546 = vrot.lane.b32.xlu2 %v10528_v27, %s13793_s11  ;;  %v10591_v52 = vsel %vm701_vm10, %v10528_v27, 0  ;;  %v10594_v16 = vsel %vm701_vm10, %v10529_v53, 0 }
0x12f1   : > { %10707 = vmatpush.bf16.msra.mxu2 %v10591_v52  ;;  %10720 = vmatpush.bf16.msra.mxu3 %v10594_v16 }
0x12f2   : > { %13259 = vmatmul.msk.bf16.vlgmr.msra.gmra.mxu0 %vm697_vm11, %v17711_v32 }
0x12f3   : > { %13260 = vmatmul.msk.bf16.vlgmr.msra.gmra.mxu1 %vm697_vm11, %v17711_v32 }
0x12f4   : > { %13261 = vmatmul.msk.bf16.vlgmr.msra.gmra.mxu2 %vm697_vm11, %v17711_v32 }
0x12f5   : > { %13262 = vmatmul.msk.bf16.vlgmr.msra.gmra.mxu3 %vm697_vm11, %v17711_v32 }
0x12f6   : > { %10890 = vrot.lane.b32.xlu1 %v17696_v0, %s13794_s28  ;;  %10548 = vrot.lane.b32.xlu0 %v10529_v53, %s13793_s11 }
0x12f8   : > { %10892 = vrot.lane.b32.xlu2 %v17693_v34, %s13794_s28  ;;  %v13284_v34 = vld [vmem:[%s18464_s3 + $0x78] sm:$0xff] }
0x12fe   : > { %10896 = vrot.lane.b32.xlu1 %v17727_v8, %s13794_s28  ;;  %10894 = vrot.lane.b32.xlu0 %v17729_v36, %s13794_s28 }
0x1300   : > { %10898 = vrot.lane.b32.xlu2 %v17743_v10, %s13794_s28  ;;  %v13251_v10 = vld [vmem:[%s18463_s2 + $0xb4] sm:$0xf] }
0x1306   : > { %10902 = vrot.lane.b32.xlu1 %v10526_v7, %s13794_s28  ;;  %10900 = vrot.lane.b32.xlu0 %v17745_v58, %s13794_s28 }
0x1308   : > { %10904 = vrot.lane.b32.xlu2 %v10527_v56, %s13794_s28 }
0x130e   : > { %10908 = vrot.lane.b32.xlu1 %v10529_v53, %s13794_s28  ;;  %10906 = vrot.lane.b32.xlu0 %v10528_v27, %s13794_s28  ;;  %v13273_v27 = vld [vmem:[%s18463_s2 + $0xbc] sm:$0xf] }
0x1310   : > { %11097 = vperm.xlu2 %13571, %v13284_v34  }
0x1338   : > { %v10535_v0 = vpop.permute.xlu2 %10534 }
0x1340   : > { %v10541_v58 = vpop.permute.xlu2 %10540 }
0x1342   : > { %v10533_v32 = vpop.permute.xlu1 %10532  ;;  %v10531_v36 = vpop.permute.xlu0 %10530 }
0x1343   : > { %v10551_v8 = vsel %vm681_vm12, %v10533_v32, %v10535_v0  ;;  %v10550_v24 = vsel %vm681_vm12, %v10531_v36, %v10533_v32  ;;  %v10560_v17 = vsel %vm681_vm12, 0, %v10531_v36 }
0x1344   : > { %v10735_v44 = vsel %vm701_vm10, %v10551_v8, 0  ;;  %v10729_v50 = vsel %vm701_vm10, %v10560_v17, 0  ;;  %v10732_v23 = vsel %vm701_vm10, %v10550_v24, 0 }
0x1345   : > { %10791 = vmatpush.bf16.msrb.mxu2 %v10735_v44  ;;  %10765 = vmatpush.bf16.msrb.mxu0 %v10729_v50 }
0x1346   : > { %10778 = vmatpush.bf16.msrb.mxu1 %v10732_v23 }
0x1348   : > { %13265 = vmatmul.msk.bf16.vlgmr.msrb.gmra.mxu2 %vm697_vm11, %v13251_v10  ;;  %13263 = vmatmul.msk.bf16.vlgmr.msrb.gmra.mxu0 %vm697_vm11, %v13251_v10 }
0x1349   : > { %13264 = vmatmul.msk.bf16.vlgmr.msrb.gmra.mxu1 %vm697_vm11, %v13251_v10 }
0x134a   : > { %v10547_v30 = vpop.permute.xlu2 %10546 }
0x1350   : > { %v10537_v55 = vpop.permute.xlu0 %10536 }
0x1351   : > { %v10552_v42 = vsel %vm681_vm12, %v10535_v0, %v10537_v55 }
0x1352   : > { %v10738_v14 = vsel %vm701_vm10, %v10552_v42, 0  ;;  %v10539_v39 = vpop.permute.xlu1 %10538  ;;  %v10893_v62 = vpop.permute.xlu2 %10892 }
0x1353   : > { %10804 = vmatpush.bf16.msrb.mxu3 %v10738_v14  ;;  %v10553_v19 = vsel %vm681_vm12, %v10537_v55, %v10539_v39  ;;  %v10554_v11 = vsel %vm681_vm12, %v10539_v39, %v10541_v58 }
0x1354   : > { %v10741_v6 = vsel %vm701_vm10, %v10553_v19, 0  ;;  %v10744_v48 = vsel %vm701_vm10, %v10554_v11, 0 }
0x1355   : > { %10817 = vmatpush.bf16.msra.mxu0 %v10741_v6  ;;  %10830 = vmatpush.bf16.msra.mxu1 %v10744_v48 }
0x1356   : > { %13266 = vmatmul.msk.bf16.vlgmr.msrb.gmra.mxu3 %vm697_vm11, %v13251_v10 }
0x1357   : > { %v17852_v52 = vpop.f32.mrf.mxu2  ;;  %v17854_v16 = vpop.f32.mrf.mxu3 }
0x1358   : > { %13267 = vmatmul.msk.bf16.vlgmr.msra.gmra.mxu0 %vm697_vm11, %v13251_v10 }
0x1359   : > { %13268 = vmatmul.msk.bf16.vlgmr.msra.gmra.mxu1 %vm697_vm11, %v13251_v10 }
0x135a   : > { %v10899_v3 = vpop.permute.xlu2 %10898 }
0x135f   : > { %v10631_v44 = vpop.f32.mrf.mxu0 }
0x1360   : > { %v10545_v47 = vpop.permute.xlu1 %10544  ;;  %v10543_v25 = vpop.permute.xlu0 %10542 }
0x1361   : > { %v10557_v60 = vsel %vm681_vm12, %v10545_v47, %v10547_v30  ;;  %v10555_v22 = vsel %vm681_vm12, %v10541_v58, %v10543_v25  ;;  %v10556_v45 = vsel %vm681_vm12, %v10543_v25, %v10545_v47  ;;  %v17860_v24 = vpop.f32.mrf.mxu1  ;;  %v10620_v58 = vpop.f32.mrf.mxu3 }
0x1362   : > { %v10753_v5 = vsel %vm701_vm10, %v10557_v60, 0  ;;  %v10747_v21 = vsel %vm701_vm10, %v10555_v22, 0  ;;  %v10750_v29 = vsel %vm701_vm10, %v10556_v45, 0  ;;  %v10905_v53 = vpop.permute.xlu2 %10904 }
0x1363   : > { %10843 = vmatpush.bf16.msra.mxu2 %v10747_v21  ;;  %10856 = vmatpush.bf16.msra.mxu3 %v10750_v29 }
0x1364   : > { %10869 = vmatpush.bf16.msrb.mxu0 %v10753_v5 }
0x1366   : > { %13269 = vmatmul.msk.bf16.vlgmr.msra.gmra.mxu2 %vm697_vm11, %v13251_v10  ;;  %13270 = vmatmul.msk.bf16.vlgmr.msra.gmra.mxu3 %vm697_vm11, %v13251_v10 }
0x1367   : > { %v10633_v11 = vpop.f32.mrf.mxu0 }
0x1368   : > { %v10891_v51 = vpop.permute.xlu1 %10890  ;;  %v10549_v2 = vpop.permute.xlu0 %10548  ;;  %13271 = vmatmul.msk.bf16.vlgmr.msrb.gmra.mxu0 %vm697_vm11, %v13251_v10 }
0x1369   : > { %v10910_v4 = vsel %vm1046_vm13, %v10891_v51, %v10893_v62  ;;  %v10558_v13 = vsel %vm681_vm12, %v10547_v30, %v10549_v2  ;;  %v10646_v6 = vpop.f32.mrf.mxu1  ;;  %v17876_v60 = vpop.f32.mrf.mxu3 }
0x136a   : > { %v10925_v33 = vsel %vm701_vm10, %v10910_v4, 0  ;;  %v10756_v54 = vsel %vm701_vm10, %v10558_v13, 0 }
0x136b   : > { %10882 = vmatpush.bf16.msrb.mxu1 %v10756_v54  ;;  %10960 = vmatpush.bf16.msrb.mxu2 %v10925_v33 }
0x136e   : > { %13272 = vmatmul.msk.bf16.vlgmr.msrb.gmra.mxu1 %vm697_vm11, %v13251_v10  ;;  %v10607_v10 = vpop.f32.mrf.mxu2 }
0x136f   : > { %v17879_v22 = vpop.f32.mrf.mxu0 }
0x1370   : > { %v10897_v26 = vpop.permute.xlu1 %10896  ;;  %v10895_v38 = vpop.permute.xlu0 %10894 }
0x1371   : > { %v10913_v56 = vsel %vm1046_vm13, %v10897_v26, %v10899_v3  ;;  %v10911_v7 = vsel %vm1046_vm13, %v10893_v62, %v10895_v38  ;;  %v10912_v20 = vsel %vm1046_vm13, %v10895_v38, %v10897_v26  ;;  %v17881_v45 = vpop.f32.mrf.mxu1  ;;  %v10672_v5 = vpop.f32.mrf.mxu3 }
0x1372   : > { %v10934_v61 = vsel %vm701_vm10, %v10913_v56, 0  ;;  %v10928_v37 = vsel %vm701_vm10, %v10911_v7, 0  ;;  %v10931_v63 = vsel %vm701_vm10, %v10912_v20, 0 }
0x1373   : > { %10973 = vmatpush.bf16.msrb.mxu3 %v10928_v37  ;;  %10986 = vmatpush.bf16.msra.mxu0 %v10931_v63 }
0x1374   : > { %10999 = vmatpush.bf16.msra.mxu1 %v10934_v61 }
0x1376   : > { %13274 = vmatmul.msk.bf16.vlgmr.msrb.gmra.mxu2 %vm697_vm11, %v13273_v27  ;;  %13275 = vmatmul.msk.bf16.vlgmr.msrb.gmra.mxu3 %vm697_vm11, %v13273_v27  ;;  %v17874_v25 = vpop.f32.mrf.mxu2 }
0x1377   : > { %v10685_v21 = vpop.f32.mrf.mxu0 }
0x1378   : > { %v10903_v34 = vpop.permute.xlu1 %10902  ;;  %v10901_v0 = vpop.permute.xlu0 %10900  ;;  %13276 = vmatmul.msk.bf16.vlgmr.msra.gmra.mxu0 %vm697_vm11, %v13273_v27 }
0x1379   : > { %v10916_v32 = vsel %vm1046_vm13, %v10903_v34, %v10905_v53  ;;  %v10914_v8 = vsel %vm1046_vm13, %v10899_v3, %v10901_v0  ;;  %v10915_v36 = vsel %vm1046_vm13, %v10901_v0, %v10903_v34  ;;  %v10698_v29 = vpop.f32.mrf.mxu1  ;;  %v17888_v2 = vpop.f32.mrf.mxu3 }
0x137a   : > { %v10943_v17 = vsel %vm701_vm10, %v10916_v32, 0  ;;  %v10937_v50 = vsel %vm701_vm10, %v10914_v8, 0  ;;  %v10940_v23 = vsel %vm701_vm10, %v10915_v36, 0 }
0x137b   : > { %11012 = vmatpush.bf16.msra.mxu2 %v10937_v50  ;;  %11025 = vmatpush.bf16.msra.mxu3 %v10940_v23 }
0x137c   : > { %11038 = vmatpush.bf16.msrb.mxu0 %v10943_v17 }
0x137e   : > { %13277 = vmatmul.msk.bf16.vlgmr.msra.gmra.mxu1 %vm697_vm11, %v13273_v27  ;;  %v10659_v62 = vpop.f32.mrf.mxu2 }
0x1380   : > { %v10909_v55 = vpop.permute.xlu1 %10908  ;;  %v10907_v42 = vpop.permute.xlu0 %10906 }
0x1381   : > { %v10920_v14 = vsel %vm1046_vm13, %v10909_v55, 0  ;;  %v10917_v39 = vsel %vm1046_vm13, %v10905_v53, %v10907_v42  ;;  %v10918_v19 = vsel %vm1046_vm13, %v10907_v42, %v10909_v55  ;;  %v10724_v13 = vpop.f32.mrf.mxu3  ;;  %v17894_v55 = vpop.permute.xlu2 %11097 }
0x1382   : > { %v10951_v48 = vsel %vm701_vm10, %v10920_v14, 0  ;;  %v10946_v30 = vsel %vm701_vm10, %v10917_v39, 0  ;;  %v10949_v47 = vsel %vm701_vm10, %v10918_v19, 0 }
0x1383   : > { %11051 = vmatpush.bf16.msrb.mxu1 %v10946_v30  ;;  %11064 = vmatpush.bf16.msrb.mxu2 %v10949_v47 }
0x1384   : > { %11077 = vmatpush.bf16.msrb.mxu3 %v10951_v48 }
0x1386   : > { %13278 = vmatmul.msk.bf16.vlgmr.msra.gmra.mxu2 %vm697_vm11, %v13273_v27  ;;  %13279 = vmatmul.msk.bf16.vlgmr.msra.gmra.mxu3 %vm697_vm11, %v13273_v27  ;;  %v17886_v51 = vpop.f32.mrf.mxu2 }
0x1388   : > { %13280 = vmatmul.msk.bf16.vlgmr.msrb.gmra.mxu0 %vm697_vm11, %v13273_v27 }
0x138e   : > { %13281 = vmatmul.msk.bf16.vlgmr.msrb.gmra.mxu1 %vm697_vm11, %v13273_v27  ;;  %v10711_v4 = vpop.f32.mrf.mxu2 }
0x1396   : > { %13282 = vmatmul.msk.bf16.vlgmr.msrb.gmra.mxu2 %vm697_vm11, %v13273_v27  ;;  %13283 = vmatmul.msk.bf16.vlgmr.msrb.gmra.mxu3 %vm697_vm11, %v13273_v27 }
0x13c5   : > { %v10767_v33 = vpop.f32.mrf.mxu0 }
0x13c6   : > { %v10780_v54 = vpop.f32.mrf.mxu1  ;;  %v10768_v42 = vadd.f32 %v10767_v33, %v17852_v52 }
0x13c7   : > { %v10781_v14 = vadd.f32 %v10780_v54, %v17854_v16 }
0x13cb   : > { %v10793_v3 = vpop.f32.mrf.mxu2 }
0x13cc   : > { %v10794_v23 = vadd.f32 %v10793_v3, %v10631_v44 }
0x13cd   : > { %v10769_v26 = vpop.f32.mrf.mxu0 }
0x13ce   : > { %v10782_v38 = vpop.f32.mrf.mxu1 }
0x13d3   : > { %v10795_v56 = vpop.f32.mrf.mxu2 }
0x13d5   : > { %v10819_v7 = vpop.f32.mrf.mxu0 }
0x13d6   : > { %v10832_v20 = vpop.f32.mrf.mxu1 }
0x13d9   : > { %v10806_v61 = vpop.f32.mrf.mxu3 }
0x13da   : > { %v10807_v11 = vadd.f32 %v10806_v61, %v17860_v24 }
0x13dd   : > { %v10821_v37 = vpop.f32.mrf.mxu0 }
0x13de   : > { %v10834_v63 = vpop.f32.mrf.mxu1 }
0x13e1   : > { %v10808_v53 = vpop.f32.mrf.mxu3 }
0x13e5   : > { %v17890_v34 = vpop.f32.mrf.mxu0 }
0x13e9   : > { %v10845_v27 = vpop.f32.mrf.mxu2  ;;  %v10858_v0 = vpop.f32.mrf.mxu3 }
0x13ea   : > { %v10846_v37 = vadd.f32 %v10845_v27, %v17879_v22 }
0x13eb   : > { %v17892_v32 = vpop.f32.mrf.mxu1 }
0x13ed   : > { %v10873_v8 = vpop.f32.mrf.mxu0 }
0x13f1   : > { %v10847_v36 = vpop.f32.mrf.mxu2  ;;  %v10860_v17 = vpop.f32.mrf.mxu3 }
0x13f3   : > { %v10886_v50 = vpop.f32.mrf.mxu1 }
0x13f5   : > { %v10988_v10 = vpop.f32.mrf.mxu0 }
0x13f6   : > { %v11085_v58 = vadd.f32 %v10988_v10, %v10794_v23  ;;  %v10820_v10 = vadd.f32 %v10819_v7, %v17874_v25 }
0x13f8   : > { %v11102_v39 = vadd.f32 %v17894_v55, %v11085_v58 }
0x13f9   : > { %v10962_v19 = vpop.f32.mrf.mxu2  ;;  %v10975_v48 = vpop.f32.mrf.mxu3 }
0x13fa   : > { %v11083_v6 = vadd.f32 %v10962_v19, %v10768_v42  ;;  %v11112_v30 = vadd.f32 %v11102_v39, %v17429_v31  ;;  %v11084_v47 = vadd.f32 %v10975_v48, %v10781_v14  ;;  %v10833_v14 = vadd.f32 %v10832_v20, %v17876_v60 }
0x13fb   : > { %v11001_v62 = vpop.f32.mrf.mxu1 }
0x13fc   : > { %v11100_v44 = vadd.f32 %v17894_v55, %v11083_v6  ;;  %v11086_v5 = vadd.f32 %v11001_v62, %v10807_v11  ;;  %v11101_v21 = vadd.f32 %v17894_v55, %v11084_v47  ;;  %v17904_v52 = vmul.f32 %v11112_v30, %v14392_v9 }
0x13fd   : > { %v10990_v4 = vpop.f32.mrf.mxu0  ;;  %v10859_v11 = vadd.f32 %v10858_v0, %v17881_v45 }
0x13fe   : > { %v11110_v16 = vadd.f32 %v11100_v44, %v17435_v57  ;;  %v11103_v29 = vadd.f32 %v17894_v55, %v11086_v5  ;;  %v11111_v24 = vadd.f32 %v11101_v21, %v17439_v12  ;;  %v11142_v3 = vmul.f32 0.1, %v17904_v52 }
0x13ff   : > { %vm11132_vm5 = vcmp.ge.f32.partialorder %v17904_v52, 0.0 }
0x1400   : > { %v17910_v13 = vmul.f32 %v11110_v16, %v14345_v46  ;;  %v11113_v31 = vadd.f32 %v11103_v29, %v17444_v41  ;;  %v17914_v33 = vmul.f32 %v11111_v24, %v14343_v43  ;;  %v11152_v36 = vsel %vm11132_vm5, %v17904_v52, %v11142_v3  ;;  %v17962_v29 = vld [vmem:[%s18463_s2 + $0xc4] sm:$0xf] }
0x1401   : > { %v10964_v54 = vpop.f32.mrf.mxu2  ;;  %v10977_v38 = vpop.f32.mrf.mxu3 }
0x1402   : > { %v11140_v26 = vmul.f32 0.1, %v17910_v13  ;;  %v17919_v57 = vmul.f32 %v11113_v31, %v14394_v49  ;;  %vm11130_vm9 = vcmp.ge.f32.partialorder %v17910_v13, 0.0  ;;  %v11141_v12 = vmul.f32 0.1, %v17914_v33 }
0x1403   : > { %v11003_v56 = vpop.f32.mrf.mxu1  ;;  %vm11131_vm14 = vcmp.ge.f32.partialorder %v17914_v33, 0.0 }
0x1404   : > { %v11143_v41 = vmul.f32 0.1, %v17919_v57  ;;  %v11150_v61 = vsel %vm11130_vm9, %v17910_v13, %v11140_v26  ;;  %vm11133_vm6 = vcmp.ge.f32.partialorder %v17919_v57, 0.0  ;;  %v11151_v63 = vsel %vm11131_vm14, %v17914_v33, %v11141_v12 }
0x1405   : > { %v11040_v53 = vpop.f32.mrf.mxu0  ;;  %v11160_v8 = vpack.c.bf16 %v11151_v63, %v11150_v61 }
0x1406   : > { %v11153_v17 = vsel %vm11133_vm6, %v17919_v57, %v11143_v41  ;;  %v11089_v50 = vadd.f32 %v11040_v53, %v10846_v37 }
0x1407   : > { %v11161_v23 = vpack.c.bf16 %v11153_v17, %v11152_v36  ;;  %v11173_v58 = vunpack.c.h.b16 %v11160_v8  ;;  %v11172_v42 = vunpack.c.l.b16 %v11160_v8 }
0x1408   : > { %v11106_v39 = vadd.f32 %v17894_v55, %v11089_v50 }
0x1409   : > { %v11014_v19 = vpop.f32.mrf.mxu2  ;;  %v11174_v22 = vunpack.c.l.b16 %v11161_v23  ;;  %v11175_v27 = vunpack.c.h.b16 %v11161_v23  ;;  %v11027_v48 = vpop.f32.mrf.mxu3  ;;  %v17936_v30 = vpack.c.b16 %v11173_v58, %v11173_v58  ;;  %v17938_v47 = vpack.c.b16 %v11172_v42, %v11172_v42 }
0x140a   : > { %v11087_v6 = vadd.f32 %v11014_v19, %v10820_v10  ;;  %v11116_v62 = vadd.f32 %v11106_v39, %v17490_v1  ;;  %v11088_v25 = vadd.f32 %v11027_v48, %v10833_v14  ;;  %v10872_v10 = vadd.f32 %v17890_v34, %v17886_v51 }
0x140b   : > { %v11053_v7 = vpop.f32.mrf.mxu1  ;;  %v17941_v44 = vpack.c.b16 %v11174_v22, %v11174_v22  ;;  %v17943_v60 = vpack.c.b16 %v11175_v27, %v11175_v27  ;;  %11194 = vrot.lane.b32.xlu1 %v17936_v30, %s13799_s10  ;;  %11192 = vrot.lane.b32.xlu0 %v17938_v47, %s13799_s10  ;;  %v11229_v45 = vsel %vm701_vm10, %v17938_v47, 0  ;;  %v11232_v1 = vsel %vm701_vm10, %v17936_v30, 0 }
0x140c   : > { %v11104_v20 = vadd.f32 %v17894_v55, %v11087_v6  ;;  %v11090_v5 = vadd.f32 %v11053_v7, %v10859_v11  ;;  %v11105_v0 = vadd.f32 %v17894_v55, %v11088_v25  ;;  %11265 = vmatpush.bf16.msra.mxu0 %v11229_v45  ;;  %11278 = vmatpush.bf16.msra.mxu1 %v11232_v1 }
0x140d   : > { %v11235_v21 = vsel %vm701_vm10, %v17941_v44, 0  ;;  %v11238_v16 = vsel %vm701_vm10, %v17943_v60, 0  ;;  %v17965_v4 = vmul.f32 %v11116_v62, %v14343_v43  ;;  %11196 = vrot.lane.b32.xlu2 %v17941_v44, %s13799_s10  ;;  %v11042_v54 = vpop.f32.mrf.mxu0  ;;  %v10885_v14 = vadd.f32 %v17892_v32, %v17888_v2 }
0x140e   : > { %v11114_v24 = vadd.f32 %v11104_v20, %v17498_v18  ;;  %v11107_v31 = vadd.f32 %v17894_v55, %v11090_v5  ;;  %11291 = vmatpush.bf16.msra.mxu2 %v11235_v21  ;;  %v11115_v3 = vadd.f32 %v11105_v0, %v17506_v15  ;;  %11304 = vmatpush.bf16.msra.mxu3 %v11238_v16 }
0x140f   : > { %13287 = vmatmul.msk.bf16.vlgmr.msra.gmra.mxu0 %vm697_vm11, %v17962_v29  ;;  %13288 = vmatmul.msk.bf16.vlgmr.msra.gmra.mxu1 %vm697_vm11, %v17962_v29  ;;  %v11146_v15 = vmul.f32 0.1, %v17965_v4  ;;  %vm11136_vm1 = vcmp.ge.f32.partialorder %v17965_v4, 0.0 }
0x1410   : > { %v17973_v26 = vmul.f32 %v11114_v24, %v14379_v28  ;;  %v11117_v38 = vadd.f32 %v11107_v31, %v17513_v40  ;;  %v17981_v18 = vmul.f32 %v11115_v3, %v14345_v46 }
0x1411   : > { %v11016_v12 = vpop.f32.mrf.mxu2  ;;  %13289 = vmatmul.msk.bf16.vlgmr.msra.gmra.mxu2 %vm697_vm11, %v17962_v29  ;;  %v11029_v40 = vpop.f32.mrf.mxu3  ;;  %13290 = vmatmul.msk.bf16.vlgmr.msra.gmra.mxu3 %vm697_vm11, %v17962_v29  ;;  %v11156_v17 = vsel %vm11136_vm1, %v17965_v4, %v11146_v15 }
0x1412   : > { %v11144_v56 = vmul.f32 0.1, %v17973_v26  ;;  %v17988_v41 = vmul.f32 %v11117_v38, %v14392_v9  ;;  %vm11134_vm7 = vcmp.ge.f32.partialorder %v17973_v26, 0.0  ;;  %v11145_v61 = vmul.f32 0.1, %v17981_v18 }
0x1413   : > { %v11055_v37 = vpop.f32.mrf.mxu1  ;;  %vm11135_vm8 = vcmp.ge.f32.partialorder %v17981_v18, 0.0  ;;  %11198 = vrot.lane.b32.xlu0 %v17943_v60, %s13799_s10 }
0x1414   : > { %v11147_v63 = vmul.f32 0.1, %v17988_v41  ;;  %v11154_v53 = vsel %vm11134_vm7, %v17973_v26, %v11144_v56  ;;  %vm11137_vm2 = vcmp.ge.f32.partialorder %v17988_v41, 0.0  ;;  %v11155_v8 = vsel %vm11135_vm8, %v17981_v18, %v11145_v61 }
0x1415   : > { %v11162_v36 = vpack.c.bf16 %v11155_v8, %v11154_v53 }
0x1416   : > { %v11157_v50 = vsel %vm11137_vm2, %v17988_v41, %v11147_v63 }
0x1417   : > { %v11163_v23 = vpack.c.bf16 %v11157_v50, %v11156_v17  ;;  %v11177_v58 = vunpack.c.h.b16 %v11162_v36  ;;  %v11176_v42 = vunpack.c.l.b16 %v11162_v36  ;;  %v13285_v36 = vld [vmem:[%s18463_s2 + $0xc0] sm:$0xf] }
0x1419   : > { %v11066_v39 = vpop.f32.mrf.mxu2  ;;  %v11178_v19 = vunpack.c.l.b16 %v11163_v23  ;;  %v11179_v22 = vunpack.c.h.b16 %v11163_v23  ;;  %v11079_v11 = vpop.f32.mrf.mxu3  ;;  %v11187_v6 = vpack.c.b16 %v11177_v58, %v11177_v58  ;;  %v11186_v48 = vpack.c.b16 %v11176_v42, %v11176_v42 }
0x141a   : > { %v11091_v27 = vadd.f32 %v11066_v39, %v10872_v10  ;;  %v11092_v62 = vadd.f32 %v11079_v11, %v10885_v14 }
0x141b   : > { %v11188_v25 = vpack.c.b16 %v11178_v19, %v11178_v19  ;;  %v11189_v7 = vpack.c.b16 %v11179_v22, %v11179_v22  ;;  %11202 = vrot.lane.b32.xlu2 %v11187_v6, %s13799_s10  ;;  %11200 = vrot.lane.b32.xlu1 %v11186_v48, %s13799_s10  ;;  %v11241_v51 = vsel %vm701_vm10, %v11186_v48, 0  ;;  %v11244_v2 = vsel %vm701_vm10, %v11187_v6, 0 }
0x141c   : > { %v11108_v20 = vadd.f32 %v17894_v55, %v11091_v27  ;;  %v11109_v34 = vadd.f32 %v17894_v55, %v11092_v62  ;;  %11317 = vmatpush.bf16.msrb.mxu0 %v11241_v51  ;;  %11330 = vmatpush.bf16.msrb.mxu1 %v11244_v2 }
0x141d   : > { %v11247_v32 = vsel %vm701_vm10, %v11188_v25, 0  ;;  %v11250_v5 = vsel %vm701_vm10, %v11189_v7, 0  ;;  %11204 = vrot.lane.b32.xlu0 %v11188_v25, %s13799_s10 }
0x141e   : > { %v11118_v45 = vadd.f32 %v11108_v20, %v17545_v59  ;;  %11343 = vmatpush.bf16.msrb.mxu2 %v11247_v32  ;;  %v11119_v1 = vadd.f32 %v11109_v34, %v17552_v35  ;;  %11356 = vmatpush.bf16.msrb.mxu3 %v11250_v5 }
0x141f   : > { %13291 = vmatmul.msk.bf16.vlgmr.msrb.gmra.mxu0 %vm697_vm11, %v17962_v29  ;;  %13292 = vmatmul.msk.bf16.vlgmr.msrb.gmra.mxu1 %vm697_vm11, %v17962_v29 }
0x1420   : > { %v18020_v0 = vmul.f32 %v11118_v45, %v14394_v49  ;;  %v18027_v55 = vmul.f32 %v11119_v1, %v14379_v28 }
0x1421   : > { %v11068_v21 = vpop.f32.mrf.mxu2  ;;  %13293 = vmatmul.msk.bf16.vlgmr.msrb.gmra.mxu2 %vm697_vm11, %v17962_v29  ;;  %v11081_v35 = vpop.f32.mrf.mxu3  ;;  %13294 = vmatmul.msk.bf16.vlgmr.msrb.gmra.mxu3 %vm697_vm11, %v17962_v29 }
0x1422   : > { %v11148_v59 = vmul.f32 0.1, %v18020_v0  ;;  %vm11138_vm3 = vcmp.ge.f32.partialorder %v18020_v0, 0.0  ;;  %v11149_v16 = vmul.f32 0.1, %v18027_v55  ;;  %vm11139_vm4 = vcmp.ge.f32.partialorder %v18027_v55, 0.0 }
0x1423   : > { %11206 = vrot.lane.b32.xlu1 %v11189_v7, %s13799_s10 }
0x1424   : > { %v11158_v24 = vsel %vm11138_vm3, %v18020_v0, %v11148_v59  ;;  %v11159_v31 = vsel %vm11139_vm4, %v18027_v55, %v11149_v16  ;;  %v13307_v59 = vld [vmem:[%s18463_s2 + $0xc8] sm:$0xf] }
0x1425   : > { %v11164_v54 = vpack.c.bf16 %v11159_v31, %v11158_v24 }
0x1427   : > { %v11180_v3 = vunpack.c.l.b16 %v11164_v54  ;;  %v11181_v38 = vunpack.c.h.b16 %v11164_v54 }
0x1429   : > { %v11190_v12 = vpack.c.b16 %v11180_v3, %v11180_v3  ;;  %v11191_v15 = vpack.c.b16 %v11181_v38, %v11181_v38 }
0x142b   : > { %11208 = vrot.lane.b32.xlu2 %v11190_v12, %s13799_s10  ;;  %11552 = vrot.lane.b32.xlu1 %v17938_v47, %s13800_s12  ;;  %v11253_v56 = vsel %vm701_vm10, %v11190_v12, 0  ;;  %v11256_v40 = vsel %vm701_vm10, %v11191_v15, 0 }
0x142c   : > { %11210 = vrot.lane.b32.xlu0 %v11191_v15, %s13799_s10  ;;  %11369 = vmatpush.bf16.msra.mxu0 %v11253_v56  ;;  %s12513_s10 = sshll.u32 %s539_s26, 4  ;;  %s12514_s10 = int_to_ptr.vmem [resolvable:$true] %s12513_s10 }
0x142d   : > { %11382 = vmatpush.bf16.msra.mxu1 %v11256_v40 }
0x142f   : > { %13295 = vmatmul.msk.bf16.vlgmr.msra.gmra.mxu0 %vm697_vm11, %v17962_v29 }
0x1430   : > { %13296 = vmatmul.msk.bf16.vlgmr.msra.gmra.mxu1 %vm697_vm11, %v17962_v29 }
0x1433   : > { %11554 = vrot.lane.b32.xlu2 %v17936_v30, %s13800_s12  ;;  %11558 = vrot.lane.b32.xlu1 %v17943_v60, %s13800_s12  ;;  %v13318_v30 = vld [vmem:[%s18464_s3 + $0x80] sm:$0xff] }
0x1434   : > { %11556 = vrot.lane.b32.xlu0 %v17941_v44, %s13800_s12 }
0x143b   : > { %11560 = vrot.lane.b32.xlu2 %v11186_v48, %s13800_s12  ;;  %11564 = vrot.lane.b32.xlu1 %v11188_v25, %s13800_s12 }
0x143c   : > { %11562 = vrot.lane.b32.xlu0 %v11187_v6, %s13800_s12 }
0x1443   : > { %11566 = vrot.lane.b32.xlu2 %v11189_v7, %s13800_s12  ;;  %11570 = vrot.lane.b32.xlu1 %v11191_v15, %s13800_s12 }
0x1444   : > { %11568 = vrot.lane.b32.xlu0 %v11190_v12, %s13800_s12  ;;  %s13597_s12 = sshra.s32 %s12516_s29, 4  ;;  %s13598_s12 = int_to_ptr.hbm [resolvable:$true] %s13597_s12 }
0x1445   : > { %s13599_s27 = scalar_lea.hbm %s13598_s12, 64  ;;  %p13604_p2 = scmp.lt.s32.totalorder %s13598_s12, %s18465_s4 }
0x1446   : > { %p13600_p13 = scmp.ne.s32.totalorder %s13598_s12, %s13599_s27  ;;  %p13605_p3 = scmp.lt.s32.totalorder %s13603_s22, %s13599_s27 }
0x1448   : > { %p13601_p0 = pnand %p13600_p13, %p13895_p8  ;;  %p13606_p4 = por %p13605_p3, %p13604_p2 }
0x144a   : > { %p13602_p1 = pneg %p13601_p0 }
0x144b   : > { %11759 = vperm.xlu2 %13571, %v13318_v30  }
0x144c   : > { %p13607_p5 = pnand %p13606_p4, %p13602_p1 }
0x1467   : > { %v11197_v47 = vpop.permute.xlu2 %11196 }
0x1475   : > { %v11203_v17 = vpop.permute.xlu2 %11202 }
0x147d   : > { %v11195_v60 = vpop.permute.xlu1 %11194  ;;  %v11193_v44 = vpop.permute.xlu0 %11192 }
0x147e   : > { %v11213_v29 = vsel %vm3324_vm15, %v11195_v60, %v11197_v47  ;;  %v11212_v61 = vsel %vm3324_vm15, %v11193_v44, %v11195_v60  ;;  %v11222_v37 = vsel %vm3324_vm15, 0, %v11193_v44 }
0x147f   : > { %v11397_v63 = vsel %vm701_vm10, %v11213_v29, 0  ;;  %v11391_v53 = vsel %vm701_vm10, %v11222_v37, 0  ;;  %v11394_v8 = vsel %vm701_vm10, %v11212_v61, 0 }
0x1480   : > { %11427 = vmatpush.bf16.msra.mxu2 %v11391_v53  ;;  %11440 = vmatpush.bf16.msra.mxu3 %v11394_v8 }
0x1481   : > { %11453 = vmatpush.bf16.msrb.mxu0 %v11397_v63 }
0x1483   : > { %13297 = vmatmul.msk.bf16.vlgmr.msra.gmra.mxu2 %vm697_vm11, %v13285_v36  ;;  %13298 = vmatmul.msk.bf16.vlgmr.msra.gmra.mxu3 %vm697_vm11, %v13285_v36 }
0x1484   : > { %13299 = vmatmul.msk.bf16.vlgmr.msrb.gmra.mxu0 %vm697_vm11, %v13285_v36 }
0x1485   : > { %v11199_v50 = vpop.permute.xlu0 %11198  ;;  %v11209_v58 = vpop.permute.xlu2 %11208 }
0x1486   : > { %v11214_v23 = vsel %vm3324_vm15, %v11197_v47, %v11199_v50 }
0x1487   : > { %v11400_v10 = vsel %vm701_vm10, %v11214_v23, 0 }
0x1488   : > { %11466 = vmatpush.bf16.msrb.mxu1 %v11400_v10 }
0x148b   : > { %13300 = vmatmul.msk.bf16.vlgmr.msrb.gmra.mxu1 %vm697_vm11, %v13285_v36 }
0x148c   : > { %v18111_v56 = vpop.f32.mrf.mxu0  ;;  %v18113_v40 = vpop.f32.mrf.mxu1 }
0x148d   : > { %v11201_v42 = vpop.permute.xlu1 %11200  ;;  %v11555_v7 = vpop.permute.xlu2 %11554 }
0x148e   : > { %v11215_v14 = vsel %vm3324_vm15, %v11199_v50, %v11201_v42  ;;  %v11216_v39 = vsel %vm3324_vm15, %v11201_v42, %v11203_v17 }
0x148f   : > { %v11403_v19 = vsel %vm701_vm10, %v11215_v14, 0  ;;  %v11406_v22 = vsel %vm701_vm10, %v11216_v39, 0  ;;  %v11205_v27 = vpop.permute.xlu0 %11204 }
0x1490   : > { %v11217_v11 = vsel %vm3324_vm15, %v11203_v17, %v11205_v27  ;;  %11479 = vmatpush.bf16.msrb.mxu2 %v11403_v19  ;;  %11492 = vmatpush.bf16.msrb.mxu3 %v11406_v22 }
0x1491   : > { %v11409_v6 = vsel %vm701_vm10, %v11217_v11, 0 }
0x1492   : > { %11505 = vmatpush.bf16.msra.mxu0 %v11409_v6 }
0x1493   : > { %13301 = vmatmul.msk.bf16.vlgmr.msrb.gmra.mxu2 %vm697_vm11, %v13285_v36  ;;  %13302 = vmatmul.msk.bf16.vlgmr.msrb.gmra.mxu3 %vm697_vm11, %v13285_v36 }
0x1494   : > { %v18115_v47 = vpop.f32.mrf.mxu2  ;;  %v18118_v29 = vpop.f32.mrf.mxu3 }
0x1495   : > { %v11207_v48 = vpop.permute.xlu1 %11206  ;;  %13303 = vmatmul.msk.bf16.vlgmr.msra.gmra.mxu0 %vm697_vm11, %v13285_v36  ;;  %v11561_v21 = vpop.permute.xlu2 %11560 }
0x1496   : > { %v11218_v62 = vsel %vm3324_vm15, %v11205_v27, %v11207_v48  ;;  %v11219_v25 = vsel %vm3324_vm15, %v11207_v48, %v11209_v58  ;;  %v11282_v17 = vpop.f32.mrf.mxu1 }
0x1497   : > { %v11412_v20 = vsel %vm701_vm10, %v11218_v62, 0  ;;  %v11415_v51 = vsel %vm701_vm10, %v11219_v25, 0 }
0x1498   : > { %11518 = vmatpush.bf16.msra.mxu1 %v11412_v20  ;;  %11531 = vmatpush.bf16.msra.mxu2 %v11415_v51 }
0x149b   : > { %13304 = vmatmul.msk.bf16.vlgmr.msra.gmra.mxu1 %vm697_vm11, %v13285_v36 }
0x149c   : > { %v11295_v23 = vpop.f32.mrf.mxu2  ;;  %v11308_v42 = vpop.f32.mrf.mxu3 }
0x149d   : > { %v11553_v2 = vpop.permute.xlu1 %11552  ;;  %v11567_v15 = vpop.permute.xlu2 %11566 }
0x149e   : > { %v11572_v34 = vsel %vm3686_vm0, %v11553_v2, %v11555_v7  ;;  %v11211_v32 = vpop.permute.xlu0 %11210  ;;  %v18135_v6 = vpop.f32.mrf.mxu1 }
0x149f   : > { %v11587_v5 = vsel %vm701_vm10, %v11572_v34, 0  ;;  %v11220_v45 = vsel %vm3324_vm15, %v11209_v58, %v11211_v32 }
0x14a0   : > { %v11418_v1 = vsel %vm701_vm10, %v11220_v45, 0  ;;  %11622 = vmatpush.bf16.msrb.mxu0 %v11587_v5 }
0x14a1   : > { %11544 = vmatpush.bf16.msra.mxu3 %v11418_v1 }
0x14a3   : > { %13305 = vmatmul.msk.bf16.vlgmr.msra.gmra.mxu2 %vm697_vm11, %v13285_v36 }
0x14a4   : > { %13306 = vmatmul.msk.bf16.vlgmr.msra.gmra.mxu3 %vm697_vm11, %v13285_v36  ;;  %v11269_v36 = vpop.f32.mrf.mxu0  ;;  %v18137_v48 = vpop.f32.mrf.mxu2 }
0x14a5   : > { %v11559_v35 = vpop.permute.xlu1 %11558  ;;  %13308 = vmatmul.msk.bf16.vlgmr.msrb.gmra.mxu0 %vm697_vm11, %v13307_v59  ;;  %v18139_v62 = vpop.f32.mrf.mxu3 }
0x14a6   : > { %v11575_v16 = vsel %vm3686_vm0, %v11559_v35, %v11561_v21  ;;  %v11557_v24 = vpop.permute.xlu0 %11556 }
0x14a7   : > { %v11596_v31 = vsel %vm701_vm10, %v11575_v16, 0  ;;  %v11573_v54 = vsel %vm3686_vm0, %v11555_v7, %v11557_v24  ;;  %v11574_v3 = vsel %vm3686_vm0, %v11557_v24, %v11559_v35  ;;  %v11334_v7 = vpop.f32.mrf.mxu1 }
0x14a8   : > { %v11590_v38 = vsel %vm701_vm10, %v11573_v54, 0  ;;  %v11593_v12 = vsel %vm701_vm10, %v11574_v3, 0  ;;  %11661 = vmatpush.bf16.msrb.mxu3 %v11596_v31 }
0x14a9   : > { %11635 = vmatpush.bf16.msrb.mxu1 %v11590_v38  ;;  %11648 = vmatpush.bf16.msrb.mxu2 %v11593_v12 }
0x14ac   : > { %13309 = vmatmul.msk.bf16.vlgmr.msrb.gmra.mxu1 %vm697_vm11, %v13307_v59  ;;  %v11319_v11 = vpop.f32.mrf.mxu0  ;;  %v11347_v20 = vpop.f32.mrf.mxu2 }
0x14ad   : > { %v11565_v30 = vpop.permute.xlu1 %11564  ;;  %v11360_v51 = vpop.f32.mrf.mxu3 }
0x14ae   : > { %v11578_v60 = vsel %vm3686_vm0, %v11565_v30, %v11567_v15  ;;  %v11563_v44 = vpop.permute.xlu0 %11562 }
0x14af   : > { %v11605_v61 = vsel %vm701_vm10, %v11578_v60, 0  ;;  %v11576_v37 = vsel %vm3686_vm0, %v11561_v21, %v11563_v44  ;;  %v11577_v63 = vsel %vm3686_vm0, %v11563_v44, %v11565_v30  ;;  %v18147_v34 = vpop.f32.mrf.mxu1 }
0x14b0   : > { %v11599_v53 = vsel %vm701_vm10, %v11576_v37, 0  ;;  %v11602_v8 = vsel %vm701_vm10, %v11577_v63, 0  ;;  %11700 = vmatpush.bf16.msra.mxu2 %v11605_v61 }
0x14b1   : > { %11674 = vmatpush.bf16.msra.mxu0 %v11599_v53  ;;  %11687 = vmatpush.bf16.msra.mxu1 %v11602_v8  ;;  %v18154_v53 = vpop.permute.xlu2 %11759 }
0x14b3   : > { %13310 = vmatmul.msk.bf16.vlgmr.msrb.gmra.mxu2 %vm697_vm11, %v13307_v59 }
0x14b4   : > { %13311 = vmatmul.msk.bf16.vlgmr.msrb.gmra.mxu3 %vm697_vm11, %v13307_v59  ;;  %v11321_v25 = vpop.f32.mrf.mxu0 }
0x14b5   : > { %v11571_v50 = vpop.permute.xlu1 %11570  ;;  %13312 = vmatmul.msk.bf16.vlgmr.msra.gmra.mxu0 %vm697_vm11, %v13307_v59 }
0x14b6   : > { %v11582_v10 = vsel %vm3686_vm0, %v11571_v50, 0  ;;  %v11569_v58 = vpop.permute.xlu0 %11568 }
0x14b7   : > { %v11613_v14 = vsel %vm701_vm10, %v11582_v10, 0  ;;  %v11579_v39 = vsel %vm3686_vm0, %v11567_v15, %v11569_v58  ;;  %v11580_v19 = vsel %vm3686_vm0, %v11569_v58, %v11571_v50  ;;  %v11386_v5 = vpop.f32.mrf.mxu1 }
0x14b8   : > { %v11608_v22 = vsel %vm701_vm10, %v11579_v39, 0  ;;  %v11611_v27 = vsel %vm701_vm10, %v11580_v19, 0  ;;  %11739 = vmatpush.bf16.msrb.mxu1 %v11613_v14 }
0x14b9   : > { %11713 = vmatpush.bf16.msra.mxu3 %v11608_v22  ;;  %11726 = vmatpush.bf16.msrb.mxu0 %v11611_v27 }
0x14bc   : > { %13313 = vmatmul.msk.bf16.vlgmr.msra.gmra.mxu1 %vm697_vm11, %v13307_v59  ;;  %v18145_v2 = vpop.f32.mrf.mxu0 }
0x14c3   : > { %13314 = vmatmul.msk.bf16.vlgmr.msra.gmra.mxu2 %vm697_vm11, %v13307_v59 }
0x14c4   : > { %13315 = vmatmul.msk.bf16.vlgmr.msra.gmra.mxu3 %vm697_vm11, %v13307_v59  ;;  %v11373_v32 = vpop.f32.mrf.mxu0 }
0x14c5   : > { %13316 = vmatmul.msk.bf16.vlgmr.msrb.gmra.mxu0 %vm697_vm11, %v13307_v59 }
0x14cc   : > { %13317 = vmatmul.msk.bf16.vlgmr.msrb.gmra.mxu1 %vm697_vm11, %v13307_v59 }
0x1501   : > { %v11455_v45 = vpop.f32.mrf.mxu0 }
0x1506   : > { %v11429_v1 = vpop.f32.mrf.mxu2  ;;  %v11442_v21 = vpop.f32.mrf.mxu3 }
0x1507   : > { %v11430_v61 = vadd.f32 %v11429_v1, %v18111_v56  ;;  %v11443_v50 = vadd.f32 %v11442_v21, %v18113_v40  ;;  %v11456_v1 = vadd.f32 %v11455_v45, %v18115_v47 }
0x1508   : > { %v11468_v35 = vpop.f32.mrf.mxu1 }
0x1509   : > { %v11457_v16 = vpop.f32.mrf.mxu0 }
0x150e   : > { %v11431_v24 = vpop.f32.mrf.mxu2  ;;  %v11444_v31 = vpop.f32.mrf.mxu3 }
0x150f   : > { %v11469_v31 = vadd.f32 %v11468_v35, %v18118_v29 }
0x1510   : > { %v11470_v54 = vpop.f32.mrf.mxu1 }
0x1512   : > { %v18149_v3 = vpop.f32.mrf.mxu0 }
0x1516   : > { %v11481_v38 = vpop.f32.mrf.mxu2  ;;  %v11494_v12 = vpop.f32.mrf.mxu3 }
0x1517   : > { %v11482_v25 = vadd.f32 %v11481_v38, %v11319_v11  ;;  %v11495_v38 = vadd.f32 %v11494_v12, %v18135_v6 }
0x1518   : > { %v18151_v15 = vpop.f32.mrf.mxu1 }
0x151a   : > { %v11509_v59 = vpop.f32.mrf.mxu0 }
0x151e   : > { %v11483_v30 = vpop.f32.mrf.mxu2  ;;  %v11496_v60 = vpop.f32.mrf.mxu3 }
0x1520   : > { %v11522_v44 = vpop.f32.mrf.mxu1 }
0x1522   : > { %v11624_v37 = vpop.f32.mrf.mxu0 }
0x1523   : > { %v11745_v63 = vadd.f32 %v11624_v37, %v11430_v61 }
0x1525   : > { %v11762_v8 = vadd.f32 %v18154_v53, %v11745_v63  ;;  %v18184_v63 = vld [vmem:[%s18463_s2 + $0xd0] sm:$0xf] }
0x1526   : > { %v18157_v36 = vpop.f32.mrf.mxu2 }
0x1527   : > { %v18159_v17 = vpop.f32.mrf.mxu3  ;;  %v11782_v10 = vmul.f32 0.1, %v11762_v8  ;;  %vm11772_vm15 = vcmp.ge.f32.partialorder %v11762_v8, 0.0 }
0x1529   : > { %v11637_v23 = vpop.f32.mrf.mxu1  ;;  %v11792_v56 = vsel %vm11772_vm15, %v11762_v8, %v11782_v10 }
0x152a   : > { %v11746_v58 = vadd.f32 %v11637_v23, %v11443_v50  ;;  %v11626_v42 = vpop.f32.mrf.mxu0  ;;  %v11802_v7 = vmul.f32 %v11792_v56, %v14345_v46 }
0x152c   : > { %v11763_v14 = vadd.f32 %v18154_v53, %v11746_v58 }
0x152e   : > { %vm11773_vm0 = vcmp.ge.f32.partialorder %v11763_v14, 0.0  ;;  %v11783_v39 = vmul.f32 0.1, %v11763_v14  ;;  %v11535_v19 = vpop.f32.mrf.mxu2 }
0x152f   : > { %v11548_v22 = vpop.f32.mrf.mxu3 }
0x1530   : > { %v11793_v27 = vsel %vm11773_vm0, %v11763_v14, %v11783_v39 }
0x1531   : > { %v11803_v20 = vmul.f32 %v11793_v27, %v14343_v43  ;;  %v11639_v51 = vpop.f32.mrf.mxu1 }
0x1532   : > { %v11676_v40 = vpop.f32.mrf.mxu0 }
0x1533   : > { %v11749_v32 = vadd.f32 %v11676_v40, %v11482_v25  ;;  %v11812_v5 = vpack.c.bf16 %v11803_v20, %v11802_v7  ;;  %v11534_v25 = vadd.f32 %v18157_v36, %v18145_v2 }
0x1535   : > { %v11766_v21 = vadd.f32 %v18154_v53, %v11749_v32  ;;  %v11825_v16 = vunpack.c.h.b16 %v11812_v5  ;;  %v11824_v24 = vunpack.c.l.b16 %v11812_v5 }
0x1536   : > { %v11650_v54 = vpop.f32.mrf.mxu2 }
0x1537   : > { %v11747_v59 = vadd.f32 %v11650_v54, %v11456_v1  ;;  %v11663_v30 = vpop.f32.mrf.mxu3  ;;  %v18168_v11 = vpack.c.b16 %v11825_v16, %v11825_v16  ;;  %v18171_v44 = vpack.c.b16 %v11824_v24, %v11824_v24  ;;  %v11786_v61 = vmul.f32 0.1, %v11766_v21 }
0x1538   : > { %v11748_v60 = vadd.f32 %v11663_v30, %v11469_v31  ;;  %vm11776_vm9 = vcmp.ge.f32.partialorder %v11766_v21, 0.0  ;;  %v11508_v24 = vadd.f32 %v18149_v3, %v18137_v48 }
0x1539   : > { %v11764_v37 = vadd.f32 %v18154_v53, %v11747_v59  ;;  %v11689_v47 = vpop.f32.mrf.mxu1  ;;  %11846 = vrot.lane.b32.xlu0 %v18168_v11, %s13793_s11  ;;  %v11884_v29 = vsel %vm701_vm10, %v18168_v11, 0  ;;  %v11881_v6 = vsel %vm701_vm10, %v18171_v44, 0  ;;  %v11796_v10 = vsel %vm11776_vm9, %v11766_v21, %v11786_v61 }
0x153a   : > { %v11765_v45 = vadd.f32 %v18154_v53, %v11748_v60  ;;  %v11750_v35 = vadd.f32 %v11689_v47, %v11495_v38  ;;  %11930 = vmatpush.bf16.msrb.mxu3 %v11884_v29  ;;  %v11678_v12 = vpop.f32.mrf.mxu0  ;;  %11917 = vmatpush.bf16.msrb.mxu2 %v11881_v6  ;;  %v11806_v7 = vmul.f32 %v11796_v10, %v14379_v28 }
0x153b   : > { %vm11774_vm14 = vcmp.ge.f32.partialorder %v11764_v37, 0.0  ;;  %v11784_v8 = vmul.f32 0.1, %v11764_v37  ;;  %v11521_v59 = vadd.f32 %v18151_v15, %v18139_v62  ;;  %v11547_v60 = vadd.f32 %v18159_v17, %v18147_v34 }
0x153c   : > { %vm11775_vm5 = vcmp.ge.f32.partialorder %v11765_v45, 0.0  ;;  %v11785_v50 = vmul.f32 0.1, %v11765_v45  ;;  %v11767_v23 = vadd.f32 %v18154_v53, %v11750_v35 }
0x153d   : > { %v11794_v58 = vsel %vm11774_vm14, %v11764_v37, %v11784_v8  ;;  %13322 = vmatmul.msk.bf16.vlgmr.msrb.gmra.mxu3 %vm697_vm11, %v18184_v63  ;;  %13321 = vmatmul.msk.bf16.vlgmr.msrb.gmra.mxu2 %vm697_vm11, %v18184_v63 }
0x153e   : > { %v11804_v42 = vmul.f32 %v11794_v58, %v14392_v9  ;;  %v11795_v14 = vsel %vm11775_vm5, %v11765_v45, %v11785_v50  ;;  %vm11777_vm6 = vcmp.ge.f32.partialorder %v11767_v23, 0.0  ;;  %v11787_v56 = vmul.f32 0.1, %v11767_v23  ;;  %v11652_v39 = vpop.f32.mrf.mxu2 }
0x153f   : > { %v11805_v19 = vmul.f32 %v11795_v14, %v14394_v49  ;;  %v11665_v22 = vpop.f32.mrf.mxu3 }
0x1540   : > { %v11797_v27 = vsel %vm11777_vm6, %v11767_v23, %v11787_v56 }
0x1541   : > { %v11807_v20 = vmul.f32 %v11797_v27, %v14345_v46  ;;  %v11691_v51 = vpop.f32.mrf.mxu1  ;;  %11844 = vrot.lane.b32.xlu0 %v18171_v44, %s13793_s11  ;;  %v11813_v40 = vpack.c.bf16 %v11805_v19, %v11804_v42 }
0x1542   : > { %v11728_v32 = vpop.f32.mrf.mxu0 }
0x1543   : > { %v11814_v5 = vpack.c.bf16 %v11807_v20, %v11806_v7  ;;  %v11753_v1 = vadd.f32 %v11728_v32, %v11534_v25  ;;  %v11827_v21 = vunpack.c.h.b16 %v11813_v40  ;;  %v11826_v16 = vunpack.c.l.b16 %v11813_v40 }
0x1545   : > { %v11770_v31 = vadd.f32 %v18154_v53, %v11753_v1  ;;  %v18202_v2 = vpack.c.b16 %v11827_v21, %v11827_v21  ;;  %v18204_v36 = vpack.c.b16 %v11826_v16, %v11826_v16  ;;  %v11828_v54 = vunpack.c.l.b16 %v11814_v5 }
0x1546   : > { %v11702_v30 = vpop.f32.mrf.mxu2  ;;  %v11829_v38 = vunpack.c.h.b16 %v11814_v5 }
0x1547   : > { %v11751_v61 = vadd.f32 %v11702_v30, %v11508_v24  ;;  %v11715_v37 = vpop.f32.mrf.mxu3  ;;  %11850 = vrot.lane.b32.xlu2 %v18202_v2, %s13793_s11  ;;  %11848 = vrot.lane.b32.xlu1 %v18204_v36, %s13793_s11  ;;  %v11887_v48 = vsel %vm701_vm10, %v18204_v36, 0  ;;  %v11890_v62 = vsel %vm701_vm10, %v18202_v2, 0  ;;  %v18218_v15 = vpack.c.b16 %v11828_v54, %v11828_v54 }
0x1548   : > { %v11752_v3 = vadd.f32 %v11715_v37, %v11521_v59  ;;  %11943 = vmatpush.bf16.msra.mxu0 %v11887_v48  ;;  %v18220_v47 = vpack.c.b16 %v11829_v38, %v11829_v38  ;;  %v11790_v34 = vmul.f32 0.1, %v11770_v31  ;;  %11956 = vmatpush.bf16.msra.mxu1 %v11890_v62  ;;  %vm11780_vm7 = vcmp.ge.f32.partialorder %v11770_v31, 0.0  ;;  %v13319_v62 = vld [vmem:[%s18463_s2 + $0xcc] sm:$0xf] }
0x1549   : > { %v11768_v17 = vadd.f32 %v18154_v53, %v11751_v61  ;;  %v11741_v29 = vpop.f32.mrf.mxu1  ;;  %v11893_v6 = vsel %vm701_vm10, %v18218_v15, 0 }
0x154a   : > { %v11769_v45 = vadd.f32 %v18154_v53, %v11752_v3  ;;  %v11754_v35 = vadd.f32 %v11741_v29, %v11547_v60  ;;  %v11730_v12 = vpop.f32.mrf.mxu0  ;;  %11969 = vmatpush.bf16.msra.mxu2 %v11893_v6  ;;  %v11896_v50 = vsel %vm701_vm10, %v18220_v47, 0  ;;  %v11800_v58 = vsel %vm11780_vm7, %v11770_v31, %v11790_v34 }
0x154b   : > { %vm11778_vm8 = vcmp.ge.f32.partialorder %v11768_v17, 0.0  ;;  %v11788_v8 = vmul.f32 0.1, %v11768_v17  ;;  %13323 = vmatmul.msk.bf16.vlgmr.msra.gmra.mxu0 %vm697_vm11, %v18184_v63  ;;  %11982 = vmatpush.bf16.msra.mxu3 %v11896_v50  ;;  %v11810_v25 = vmul.f32 %v11800_v58, %v14394_v49 }
0x154c   : > { %vm11779_vm1 = vcmp.ge.f32.partialorder %v11769_v45, 0.0  ;;  %v11789_v23 = vmul.f32 0.1, %v11769_v45  ;;  %v11771_v10 = vadd.f32 %v18154_v53, %v11754_v35  ;;  %13324 = vmatmul.msk.bf16.vlgmr.msra.gmra.mxu1 %vm697_vm11, %v18184_v63 }
0x154d   : > { %v11798_v42 = vsel %vm11778_vm8, %v11768_v17, %v11788_v8  ;;  %13325 = vmatmul.msk.bf16.vlgmr.msra.gmra.mxu2 %vm697_vm11, %v18184_v63 }
0x154e   : > { %v11808_v14 = vmul.f32 %v11798_v42, %v14343_v43  ;;  %v11799_v56 = vsel %vm11779_vm1, %v11769_v45, %v11789_v23  ;;  %vm11781_vm2 = vcmp.ge.f32.partialorder %v11771_v10, 0.0  ;;  %v11791_v39 = vmul.f32 0.1, %v11771_v10  ;;  %v11704_v19 = vpop.f32.mrf.mxu2  ;;  %13326 = vmatmul.msk.bf16.vlgmr.msra.gmra.mxu3 %vm697_vm11, %v18184_v63 }
0x154f   : > { %v11809_v22 = vmul.f32 %v11799_v56, %v14392_v9  ;;  %v11717_v27 = vpop.f32.mrf.mxu3  ;;  %11854 = vrot.lane.b32.xlu1 %v18220_v47, %s13793_s11 }
0x1550   : > { %v11801_v53 = vsel %vm11781_vm2, %v11771_v10, %v11791_v39 }
0x1551   : > { %v11811_v7 = vmul.f32 %v11801_v53, %v14379_v28  ;;  %v11743_v20 = vpop.f32.mrf.mxu1  ;;  %v11815_v51 = vpack.c.bf16 %v11809_v22, %v11808_v14 }
0x1553   : > { %v11816_v40 = vpack.c.bf16 %v11811_v7, %v11810_v25  ;;  %v11831_v32 = vunpack.c.h.b16 %v11815_v51  ;;  %v11830_v5 = vunpack.c.l.b16 %v11815_v51 }
0x1555   : > { %v11841_v1 = vpack.c.b16 %v11831_v32, %v11831_v32  ;;  %v11840_v21 = vpack.c.b16 %v11830_v5, %v11830_v5  ;;  %v11832_v16 = vunpack.c.l.b16 %v11816_v40  ;;  %v11833_v24 = vunpack.c.h.b16 %v11816_v40 }
0x1557   : > { %11858 = vrot.lane.b32.xlu0 %v11841_v1, %s13793_s11  ;;  %11856 = vrot.lane.b32.xlu2 %v11840_v21, %s13793_s11  ;;  %v11899_v31 = vsel %vm701_vm10, %v11840_v21, 0  ;;  %v11902_v54 = vsel %vm701_vm10, %v11841_v1, 0  ;;  %v11842_v59 = vpack.c.b16 %v11832_v16, %v11832_v16  ;;  %v11843_v30 = vpack.c.b16 %v11833_v24, %v11833_v24 }
0x1558   : > { %11852 = vrot.lane.b32.xlu1 %v18218_v15, %s13793_s11  ;;  %11995 = vmatpush.bf16.msrb.mxu0 %v11899_v31  ;;  %v13341_v31 = vld [vmem:[%s18463_s2 + $0xd4] sm:$0xf] }
0x1559   : > { %12008 = vmatpush.bf16.msrb.mxu1 %v11902_v54  ;;  %v11905_v38 = vsel %vm701_vm10, %v11842_v59, 0  ;;  %v11908_v60 = vsel %vm701_vm10, %v11843_v30, 0 }
0x155a   : > { %12021 = vmatpush.bf16.msrb.mxu2 %v11905_v38  ;;  %12034 = vmatpush.bf16.msrb.mxu3 %v11908_v60 }
0x155b   : > { %13327 = vmatmul.msk.bf16.vlgmr.msrb.gmra.mxu0 %vm697_vm11, %v18184_v63 }
0x155c   : > { %13328 = vmatmul.msk.bf16.vlgmr.msrb.gmra.mxu1 %vm697_vm11, %v18184_v63 }
0x155d   : > { %13329 = vmatmul.msk.bf16.vlgmr.msrb.gmra.mxu2 %vm697_vm11, %v18184_v63 }
0x155e   : > { %13330 = vmatmul.msk.bf16.vlgmr.msrb.gmra.mxu3 %vm697_vm11, %v18184_v63 }
0x155f   : > { %12206 = vrot.lane.b32.xlu0 %v18168_v11, %s13794_s28  ;;  %12204 = vrot.lane.b32.xlu2 %v18171_v44, %s13794_s28  ;;  %v13352_v11 = vld [vmem:[%s18464_s3 + $0x88] sm:$0xff] }
0x1560   : > { %12208 = vrot.lane.b32.xlu1 %v18204_v36, %s13794_s28 }
0x1567   : > { %11862 = vrot.lane.b32.xlu0 %v11843_v30, %s13793_s11  ;;  %11860 = vrot.lane.b32.xlu2 %v11842_v59, %s13793_s11 }
0x1568   : > { %12212 = vrot.lane.b32.xlu1 %v18218_v15, %s13794_s28 }
0x156f   : > { %12216 = vrot.lane.b32.xlu0 %v11840_v21, %s13794_s28  ;;  %12214 = vrot.lane.b32.xlu2 %v18220_v47, %s13794_s28 }
0x1570   : > { %12210 = vrot.lane.b32.xlu1 %v18202_v2, %s13794_s28 }
0x1577   : > { %12222 = vrot.lane.b32.xlu0 %v11843_v30, %s13794_s28  ;;  %12220 = vrot.lane.b32.xlu2 %v11842_v59, %s13794_s28 }
0x1578   : > { %12218 = vrot.lane.b32.xlu1 %v11841_v1, %s13794_s28 }
0x157f   : > { %12411 = vperm.xlu2 %13571, %v13352_v11  }
0x15a1   : > { %v11851_v63 = vpop.permute.xlu2 %11850 }
0x15ab   : > { %v11847_v44 = vpop.permute.xlu0 %11846 }
0x15b1   : > { %v11857_v48 = vpop.permute.xlu2 %11856 }
0x15b3   : > { %v11845_v36 = vpop.permute.xlu0 %11844 }
0x15b4   : > { %v11864_v61 = vsel %vm681_vm12, %v11845_v36, %v11847_v44  ;;  %v11874_v37 = vsel %vm681_vm12, 0, %v11845_v36 }
0x15b5   : > { %v12043_v2 = vsel %vm701_vm10, %v11874_v37, 0  ;;  %v12046_v3 = vsel %vm701_vm10, %v11864_v61, 0 }
0x15b6   : > { %12079 = vmatpush.bf16.msra.mxu0 %v12043_v2  ;;  %12092 = vmatpush.bf16.msra.mxu1 %v12046_v3 }
0x15b9   : > { %13332 = vmatmul.msk.bf16.vlgmr.msra.gmra.mxu1 %vm697_vm11, %v13319_v62  ;;  %v11849_v15 = vpop.permute.xlu1 %11848  ;;  %13331 = vmatmul.msk.bf16.vlgmr.msra.gmra.mxu0 %vm697_vm11, %v13319_v62  ;;  %v12205_v45 = vpop.permute.xlu2 %12204 }
0x15ba   : > { %v11865_v47 = vsel %vm681_vm12, %v11847_v44, %v11849_v15  ;;  %v11866_v34 = vsel %vm681_vm12, %v11849_v15, %v11851_v63 }
0x15bb   : > { %v12049_v17 = vsel %vm701_vm10, %v11865_v47, 0  ;;  %v12052_v29 = vsel %vm701_vm10, %v11866_v34, 0 }
0x15bc   : > { %12105 = vmatpush.bf16.msra.mxu2 %v12049_v17  ;;  %12118 = vmatpush.bf16.msra.mxu3 %v12052_v29 }
0x15bf   : > { %13333 = vmatmul.msk.bf16.vlgmr.msra.gmra.mxu2 %vm697_vm11, %v13319_v62  ;;  %13334 = vmatmul.msk.bf16.vlgmr.msra.gmra.mxu3 %vm697_vm11, %v13319_v62 }
0x15c0   : > { %v18324_v54 = vpop.f32.mrf.mxu2  ;;  %v18326_v59 = vpop.f32.mrf.mxu3 }
0x15c1   : > { %v11855_v35 = vpop.permute.xlu1 %11854  ;;  %v11861_v8 = vpop.permute.xlu2 %11860 }
0x15c2   : > { %v11869_v6 = vsel %vm681_vm12, %v11855_v35, %v11857_v48 }
0x15c3   : > { %v12061_v12 = vsel %vm701_vm10, %v11869_v6, 0 }
0x15c4   : > { %12157 = vmatpush.bf16.msrb.mxu2 %v12061_v12 }
0x15c8   : > { %v18328_v38 = vpop.f32.mrf.mxu0  ;;  %v11921_v3 = vpop.f32.mrf.mxu2 }
0x15c9   : > { %v11859_v50 = vpop.permute.xlu0 %11858  ;;  %v12215_v32 = vpop.permute.xlu2 %12214 }
0x15ca   : > { %v11870_v23 = vsel %vm681_vm12, %v11857_v48, %v11859_v50  ;;  %v11871_v10 = vsel %vm681_vm12, %v11859_v50, %v11861_v8  ;;  %v11853_v58 = vpop.permute.xlu1 %11852  ;;  %v18331_v44 = vpop.f32.mrf.mxu1 }
0x15cb   : > { %v12064_v42 = vsel %vm701_vm10, %v11870_v23, 0  ;;  %v12067_v14 = vsel %vm701_vm10, %v11871_v10, 0  ;;  %v11867_v56 = vsel %vm681_vm12, %v11851_v63, %v11853_v58  ;;  %v11868_v39 = vsel %vm681_vm12, %v11853_v58, %v11855_v35 }
0x15cc   : > { %v12055_v19 = vsel %vm701_vm10, %v11867_v56, 0  ;;  %v12058_v22 = vsel %vm701_vm10, %v11868_v39, 0  ;;  %12170 = vmatpush.bf16.msrb.mxu3 %v12064_v42 }
0x15cd   : > { %12131 = vmatpush.bf16.msrb.mxu0 %v12055_v19  ;;  %12144 = vmatpush.bf16.msrb.mxu1 %v12058_v22 }
0x15cf   : > { %13337 = vmatmul.msk.bf16.vlgmr.msrb.gmra.mxu2 %vm697_vm11, %v13319_v62  ;;  %13338 = vmatmul.msk.bf16.vlgmr.msrb.gmra.mxu3 %vm697_vm11, %v13319_v62 }
0x15d0   : > { %13335 = vmatmul.msk.bf16.vlgmr.msrb.gmra.mxu0 %vm697_vm11, %v13319_v62  ;;  %13336 = vmatmul.msk.bf16.vlgmr.msrb.gmra.mxu1 %vm697_vm11, %v13319_v62  ;;  %v11947_v47 = vpop.f32.mrf.mxu0  ;;  %v11971_v10 = vpop.f32.mrf.mxu2 }
0x15d1   : > { %12183 = vmatpush.bf16.msra.mxu0 %v12067_v14  ;;  %v12207_v27 = vpop.permute.xlu0 %12206  ;;  %v12221_v2 = vpop.permute.xlu2 %12220 }
0x15d2   : > { %v12224_v53 = vsel %vm1046_vm13, %v12205_v45, %v12207_v27  ;;  %v12209_v25 = vpop.permute.xlu1 %12208  ;;  %v11960_v45 = vpop.f32.mrf.mxu1 }
0x15d3   : > { %v12239_v7 = vsel %vm701_vm10, %v12224_v53, 0  ;;  %v12225_v20 = vsel %vm1046_vm13, %v12207_v27, %v12209_v25 }
0x15d4   : > { %v12242_v51 = vsel %vm701_vm10, %v12225_v20, 0  ;;  %12274 = vmatpush.bf16.msra.mxu2 %v12239_v7 }
0x15d5   : > { %12287 = vmatpush.bf16.msra.mxu3 %v12242_v51 }
0x15d8   : > { %v18350_v42 = vpop.f32.mrf.mxu0  ;;  %v11973_v56 = vpop.f32.mrf.mxu2 }
0x15d9   : > { %v11863_v40 = vpop.permute.xlu0 %11862  ;;  %v18363_v47 = vpop.permute.xlu2 %12411 }
0x15da   : > { %v11872_v5 = vsel %vm681_vm12, %v11861_v8, %v11863_v40  ;;  %v12213_v1 = vpop.permute.xlu1 %12212  ;;  %v18352_v14 = vpop.f32.mrf.mxu1 }
0x15db   : > { %v12070_v21 = vsel %vm701_vm10, %v11872_v5, 0  ;;  %v12228_v16 = vsel %vm1046_vm13, %v12213_v1, %v12215_v32 }
0x15dc   : > { %v12251_v24 = vsel %vm701_vm10, %v12228_v16, 0  ;;  %12196 = vmatpush.bf16.msra.mxu1 %v12070_v21 }
0x15dd   : > { %12326 = vmatpush.bf16.msrb.mxu2 %v12251_v24 }
0x15df   : > { %13342 = vmatmul.msk.bf16.vlgmr.msra.gmra.mxu2 %vm697_vm11, %v13341_v31  ;;  %13343 = vmatmul.msk.bf16.vlgmr.msra.gmra.mxu3 %vm697_vm11, %v13341_v31 }
0x15e0   : > { %13339 = vmatmul.msk.bf16.vlgmr.msra.gmra.mxu0 %vm697_vm11, %v13319_v62  ;;  %13340 = vmatmul.msk.bf16.vlgmr.msra.gmra.mxu1 %vm697_vm11, %v13319_v62  ;;  %v11934_v62 = vpop.f32.mrf.mxu3  ;;  %v11999_v19 = vpop.f32.mrf.mxu0 }
0x15e1   : > { %v12217_v30 = vpop.permute.xlu0 %12216  ;;  %v18358_v27 = vpop.f32.mrf.mxu2 }
0x15e2   : > { %v12229_v60 = vsel %vm1046_vm13, %v12215_v32, %v12217_v30  ;;  %v12211_v11 = vpop.permute.xlu1 %12210  ;;  %v12012_v22 = vpop.f32.mrf.mxu1 }
0x15e3   : > { %v12254_v63 = vsel %vm701_vm10, %v12229_v60, 0  ;;  %v12226_v36 = vsel %vm1046_vm13, %v12209_v25, %v12211_v11  ;;  %v12227_v61 = vsel %vm1046_vm13, %v12211_v11, %v12213_v1 }
0x15e4   : > { %v12245_v37 = vsel %vm701_vm10, %v12226_v36, 0  ;;  %v12248_v48 = vsel %vm701_vm10, %v12227_v61, 0  ;;  %12339 = vmatpush.bf16.msrb.mxu3 %v12254_v63 }
0x15e5   : > { %12300 = vmatpush.bf16.msrb.mxu0 %v12245_v37  ;;  %12313 = vmatpush.bf16.msrb.mxu1 %v12248_v48 }
0x15e8   : > { %v11984_v58 = vpop.f32.mrf.mxu3 }
0x15e9   : > { %v12223_v15 = vpop.permute.xlu0 %12222  ;;  %v12025_v25 = vpop.f32.mrf.mxu2 }
0x15ea   : > { %v12232_v34 = vsel %vm1046_vm13, %v12221_v2, %v12223_v15  ;;  %v12234_v17 = vsel %vm1046_vm13, %v12223_v15, 0  ;;  %v12219_v29 = vpop.permute.xlu1 %12218 }
0x15eb   : > { %v12263_v35 = vsel %vm701_vm10, %v12232_v34, 0  ;;  %v12265_v6 = vsel %vm701_vm10, %v12234_v17, 0  ;;  %v12230_v12 = vsel %vm1046_vm13, %v12217_v30, %v12219_v29  ;;  %v12231_v8 = vsel %vm1046_vm13, %v12219_v29, %v12221_v2 }
0x15ec   : > { %v12257_v50 = vsel %vm701_vm10, %v12230_v12, 0  ;;  %v12260_v23 = vsel %vm701_vm10, %v12231_v8, 0  ;;  %12378 = vmatpush.bf16.msra.mxu2 %v12263_v35  ;;  %12391 = vmatpush.bf16.msra.mxu3 %v12265_v6  ;;  %vm12459_vm10 = vcmask 752640  }
0x15ed   : > { %12352 = vmatpush.bf16.msra.mxu0 %v12257_v50  ;;  %12365 = vmatpush.bf16.msra.mxu1 %v12260_v23 }
0x15ef   : > { %13346 = vmatmul.msk.bf16.vlgmr.msrb.gmra.mxu2 %vm697_vm11, %v13341_v31  ;;  %13347 = vmatmul.msk.bf16.vlgmr.msrb.gmra.mxu3 %vm697_vm11, %v13341_v31 }
0x15f0   : > { %13344 = vmatmul.msk.bf16.vlgmr.msrb.gmra.mxu0 %vm697_vm11, %v13341_v31  ;;  %13345 = vmatmul.msk.bf16.vlgmr.msrb.gmra.mxu1 %vm697_vm11, %v13341_v31  ;;  %v11986_v39 = vpop.f32.mrf.mxu3 }
0x15f8   : > { %v18360_v53 = vpop.f32.mrf.mxu3 }
0x15ff   : > { %13350 = vmatmul.msk.bf16.vlgmr.msra.gmra.mxu2 %vm697_vm11, %v13341_v31  ;;  %13351 = vmatmul.msk.bf16.vlgmr.msra.gmra.mxu3 %vm697_vm11, %v13341_v31 }
0x1600   : > { %13348 = vmatmul.msk.bf16.vlgmr.msra.gmra.mxu0 %vm697_vm11, %v13341_v31  ;;  %13349 = vmatmul.msk.bf16.vlgmr.msra.gmra.mxu1 %vm697_vm11, %v13341_v31  ;;  %v12038_v7 = vpop.f32.mrf.mxu3 }
0x1636   : > { %v12081_v20 = vpop.f32.mrf.mxu0  ;;  %v12094_v51 = vpop.f32.mrf.mxu1 }
0x1637   : > { %v12095_v2 = vadd.f32 %v12094_v51, %v18326_v59  ;;  %v12082_v56 = vadd.f32 %v12081_v20, %v18324_v54 }
0x163e   : > { %v12083_v40 = vpop.f32.mrf.mxu0  ;;  %v12096_v32 = vpop.f32.mrf.mxu1 }
0x1642   : > { %v12107_v5 = vpop.f32.mrf.mxu2  ;;  %v12120_v1 = vpop.f32.mrf.mxu3 }
0x1643   : > { %v12108_v59 = vadd.f32 %v12107_v5, %v18328_v38  ;;  %v12121_v8 = vadd.f32 %v12120_v1, %v18331_v44 }
0x164a   : > { %v12109_v21 = vpop.f32.mrf.mxu2  ;;  %v12122_v16 = vpop.f32.mrf.mxu3 }
0x164d   : > { %v12133_v24 = vpop.f32.mrf.mxu0  ;;  %v12146_v30 = vpop.f32.mrf.mxu1 }
0x164e   : > { %v12134_v7 = vadd.f32 %v12133_v24, %v11971_v10  ;;  %v12147_v51 = vadd.f32 %v12146_v30, %v11984_v58 }
0x1652   : > { %v12159_v60 = vpop.f32.mrf.mxu2  ;;  %v12172_v11 = vpop.f32.mrf.mxu3 }
0x1655   : > { %v12135_v63 = vpop.f32.mrf.mxu0  ;;  %v12148_v31 = vpop.f32.mrf.mxu1 }
0x165a   : > { %v12161_v36 = vpop.f32.mrf.mxu2  ;;  %v12174_v61 = vpop.f32.mrf.mxu3 }
0x165b   : > { %v12160_v61 = vadd.f32 %v12159_v60, %v18350_v42 }
0x165d   : > { %v12185_v37 = vpop.f32.mrf.mxu0  ;;  %v12198_v48 = vpop.f32.mrf.mxu1 }
0x165e   : > { %v12186_v42 = vadd.f32 %v12185_v37, %v18358_v27 }
0x1662   : > { %v12276_v3 = vpop.f32.mrf.mxu2  ;;  %v12289_v62 = vpop.f32.mrf.mxu3 }
0x1663   : > { %v12398_v15 = vadd.f32 %v12289_v62, %v12095_v2  ;;  %v12397_v22 = vadd.f32 %v12276_v3, %v12082_v56  ;;  %v12173_v2 = vadd.f32 %v12172_v11, %v18352_v14  ;;  %v12199_v14 = vadd.f32 %v12198_v48, %v18360_v53 }
0x1665   : > { %v12415_v34 = vadd.f32 %v18363_v47, %v12398_v15  ;;  %v12187_v17 = vpop.f32.mrf.mxu0  ;;  %v12200_v29 = vpop.f32.mrf.mxu1  ;;  %v12414_v21 = vadd.f32 %v18363_v47, %v12397_v22 }
0x1667   : > { %v12425_v45 = vadd.f32 %v12415_v34, %v17914_v33 }
0x1669   : > { %v12435_v35 = vmul.f32 %v12425_v45, %v14343_v43 }
0x166a   : > { %v12278_v6 = vpop.f32.mrf.mxu2  ;;  %v12291_v12 = vpop.f32.mrf.mxu3 }
0x166b   : > { %12451 = vrot.lane.b32.xlu1 %v12435_v35, %s13801_s16 }
0x166d   : > { %v12302_v50 = vpop.f32.mrf.mxu0  ;;  %v12315_v23 = vpop.f32.mrf.mxu1 }
0x166e   : > { %v12399_v39 = vadd.f32 %v12302_v50, %v12108_v59  ;;  %v12400_v19 = vadd.f32 %v12315_v23, %v12121_v8 }
0x1670   : > { %v12416_v33 = vadd.f32 %v18363_v47, %v12399_v39  ;;  %v12417_v25 = vadd.f32 %v18363_v47, %v12400_v19 }
0x1672   : > { %v12426_v40 = vadd.f32 %v12416_v33, %v17904_v52  ;;  %v12427_v32 = vadd.f32 %v12417_v25, %v17919_v57  ;;  %v12328_v38 = vpop.f32.mrf.mxu2  ;;  %v12341_v5 = vpop.f32.mrf.mxu3  ;;  %v12424_v57 = vadd.f32 %v12414_v21, %v17910_v13 }
0x1673   : > { %v12401_v44 = vadd.f32 %v12328_v38, %v12134_v7  ;;  %v12402_v1 = vadd.f32 %v12341_v5, %v12147_v51 }
0x1674   : > { %v12436_v54 = vmul.f32 %v12426_v40, %v14392_v9  ;;  %v12437_v20 = vmul.f32 %v12427_v32, %v14394_v49  ;;  %v12434_v3 = vmul.f32 %v12424_v57, %v14345_v46 }
0x1675   : > { %v12418_v16 = vadd.f32 %v18363_v47, %v12401_v44  ;;  %v12419_v63 = vadd.f32 %v18363_v47, %v12402_v1  ;;  %v12304_v10 = vpop.f32.mrf.mxu0  ;;  %v12317_v58 = vpop.f32.mrf.mxu1 }
0x1676   : > { %12455 = vrot.lane.b32.xlu0 %v12437_v20, %s13801_s16  ;;  %12453 = vrot.lane.b32.xlu2 %v12436_v54, %s13801_s16 }
0x1677   : > { %v12428_v52 = vadd.f32 %v12418_v16, %v17973_v26  ;;  %v12429_v24 = vadd.f32 %v12419_v63, %v17981_v18 }
0x1679   : > { %v12438_v30 = vmul.f32 %v12428_v52, %v14379_v28  ;;  %v12439_v62 = vmul.f32 %v12429_v24, %v14345_v46 }
0x167a   : > { %v12330_v31 = vpop.f32.mrf.mxu2  ;;  %v12343_v36 = vpop.f32.mrf.mxu3 }
0x167b   : > { %12457 = vrot.lane.b32.xlu1 %v12438_v30, %s13801_s16 }
0x167d   : > { %v12354_v15 = vpop.f32.mrf.mxu0  ;;  %v12367_v26 = vpop.f32.mrf.mxu1 }
0x167e   : > { %v12403_v34 = vadd.f32 %v12354_v15, %v12160_v61  ;;  %v12404_v13 = vadd.f32 %v12367_v26, %v12173_v2  ;;  %12477 = vrot.lane.b32.xlu2 %v12439_v62, %s13801_s16  ;;  %12449 = vrot.lane.b32.xlu0 %v12434_v3, %s13801_s16 }
0x1680   : > { %v12420_v18 = vadd.f32 %v18363_v47, %v12403_v34  ;;  %v12421_v17 = vadd.f32 %v18363_v47, %v12404_v13 }
0x1682   : > { %v12430_v60 = vadd.f32 %v12420_v18, %v17965_v4  ;;  %v12431_v46 = vadd.f32 %v12421_v17, %v17988_v41  ;;  %v12380_v11 = vpop.f32.mrf.mxu2  ;;  %v12393_v29 = vpop.f32.mrf.mxu3 }
0x1683   : > { %v12405_v45 = vadd.f32 %v12380_v11, %v12186_v42  ;;  %v12406_v35 = vadd.f32 %v12393_v29, %v12199_v14 }
0x1684   : > { %v12440_v6 = vmul.f32 %v12430_v60, %v14343_v43  ;;  %v12441_v12 = vmul.f32 %v12431_v46, %v14392_v9 }
0x1685   : > { %v12422_v59 = vadd.f32 %v18363_v47, %v12405_v45  ;;  %v12423_v8 = vadd.f32 %v18363_v47, %v12406_v35  ;;  %v12356_v50 = vpop.f32.mrf.mxu0  ;;  %v12369_v27 = vpop.f32.mrf.mxu1 }
0x1686   : > { %12481 = vrot.lane.b32.xlu1 %v12441_v12, %s13801_s16  ;;  %12479 = vrot.lane.b32.xlu0 %v12440_v6, %s13801_s16 }
0x1687   : > { %v12432_v4 = vadd.f32 %v12422_v59, %v18020_v0  ;;  %v12433_v41 = vadd.f32 %v12423_v8, %v18027_v55 }
0x1689   : > { %v12442_v53 = vmul.f32 %v12432_v4, %v14394_v49  ;;  %v12443_v9 = vmul.f32 %v12433_v41, %v14379_v28 }
0x168a   : > { %v12395_v43 = vpop.f32.mrf.mxu3  ;;  %v12382_v37 = vpop.f32.mrf.mxu2 }
0x168b   : > { %12483 = vrot.lane.b32.xlu2 %v12442_v53, %s13801_s16 }
0x168e   : > { %12485 = vrot.lane.b32.xlu0 %v12443_v9, %s13801_s16 }
0x16d0   : > { %v12454_v48 = vpop.permute.xlu2 %12453 }
0x16d8   : > { %v12478_v39 = vpop.permute.xlu2 %12477 }
0x16dd   : > { %v12452_v47 = vpop.permute.xlu1 %12451 }
0x16de   : > { %v12461_v23 = vsel %vm12459_vm10, %v12452_v47, %v12454_v48 }
0x16df   : > { %12469 = vst [vmem:[%s539_s26 + $0x8] sm:$0xff] %v12461_v23 }
0x16e5   : > { %v12484_v22 = vpop.permute.xlu2 %12483 }
0x16e8   : > { %v12456_v0 = vpop.permute.xlu0 %12455 }
0x16e9   : > { %v12462_v55 = vsel %vm12459_vm10, %v12454_v48, %v12456_v0 }
0x16ea   : > { %12470 = vst [vmem:[%s539_s26 + $0x10] sm:$0xff] %v12462_v55 }
0x16ed   : > { %v12458_v49 = vpop.permute.xlu1 %12457 }
0x16ee   : > { %v12463_v56 = vsel %vm12459_vm10, %v12456_v0, %v12458_v49 }
0x16ef   : > { %12471 = vst [vmem:[%s539_s26 + $0x18] sm:$0xff] %v12463_v56 }
0x16f0   : > { %v12450_v28 = vpop.permute.xlu0 %12449 }
0x16f1   : > { %v12460_v19 = vsel %vm12459_vm10, %v12450_v28, %v12452_v47 }
0x16f2   : > { %12468 = vst [vmem:[%s539_s26] sm:$0xff] %v12460_v19 }
0x16f8   : > { %v12482_v33 = vpop.permute.xlu1 %12481  ;;  %v12480_v25 = vpop.permute.xlu0 %12479 }
0x16f9   : > { %v12489_v7 = vsel %vm12459_vm10, %v12482_v33, %v12484_v22  ;;  %v12487_v51 = vsel %vm12459_vm10, %v12478_v39, %v12480_v25  ;;  %v12488_v40 = vsel %vm12459_vm10, %v12480_v25, %v12482_v33 }
0x16fa   : > { %13355 = vst [vmem:[%s539_s26 + $0x30] sm:$0xff] %v12489_v7 }
0x16fb   : > { %13353 = vst [vmem:[%s539_s26 + $0x20] sm:$0xff] %v12487_v51 }
0x16fc   : > { %13354 = vst [vmem:[%s539_s26 + $0x28] sm:$0xff] %v12488_v40 }
0x1700   : > { %v12486_v32 = vpop.permute.xlu0 %12485 }
0x1701   : > { %v12490_v38 = vsel %vm12459_vm10, %v12484_v22, %v12486_v32 }
0x1702   : > { %13356 = vst [vmem:[%s539_s26 + $0x38] sm:$0xff] %v12490_v38 }
0x1703   : > { %13610 = shalt.err (!%p13607_p5)
}
0x1704   : > { %s13802_s7 = smov 512   ;;  %s13803_s19 = smov 1024  }
0x1705   : > { %s13804_s11 = smov 32  }
0x1706   : > { %13374 = dma.vmem_to_hbm [thread:$0]  (%p13895_p8), %s12514_s10, 1024, %s12516_s29, %s12501_s21, %s13802_s7, %s13803_s19, %s13804_s11  }
0x1707 PF: > { %s12530_s24 = sand.u32 1, %s13705_s15   ;;  %p13377_p6 = pnand %p12693_p12, %p13904_p11 }
0x1708   : > { %s12531_s23 = scalar_lea.sflag [#allocation5], %s12530_s24 }
0x1709   : > { %p13378_p9 = pneg %p13377_p6 }
0x170b   : > { %13700 = dma.done.wait (%p13378_p9), %s12531_s23, 1024  }
0x170c   : > { %13702 = vsyncadd (%p13378_p9), %s12531_s23, 4294966272  ;;  %s18492_s20 = sld [smem:[#allocation8_spill]]  ;;  %s18496_s15 = smov %s13717_s18 }
0x170d   : > { %s18493_s26 = sld [smem:[#allocation10_spill]]  ;;  %s18497_s16 = smov %s13713_s17 }
0x170e   : > { %s18494_s13 = sld [smem:[#allocation7_spill]] }
0x170f   : > { %s18495_s19 = sld [smem:[#allocation9_spill]] }
0x1712   : > { %p14_p8 = scmp.ge.s32.totalorder %s18492_s20, 4  }
0x1713   : > { %s18498_s17 = smov %s18493_s26 }
0x1714   : > { %s18499_s18 = smov %s18494_s13  ;;  %16 = sbr.rel (!%p14_p8) target bundleno = 6 (0x6), region = 323 }
0x1719   :  { %12537 = vsyncpa [#allocation5], 1 }
0x171a   :  { %12539 = vsyncpa [#allocation5 + $0x1], 1 }

</bundles_post_ra>
